<compile_context>
chip_gen: v7x
topology: tpu7x:2x2x1
jax: 0.10.0
libtpu: 0.0.40
codegen_flags: <defaults>
</compile_context>

<pallas_src>
import functools

import jax
import jax.numpy as jnp
from jax.experimental import pallas as pl

BATCH_SIZE = 2


def same_padding(input_size, stride, kernel):
    padding = ((input_size - 1) * stride + kernel - input_size) / 2
    return int(padding + 0.5)


def _round_up(x, m):
    return ((x + m - 1) // m) * m


# Architecture constants (the module hard-codes 64x64 spatial inputs).
CONV1_OUT = 65        # 64 + 2*2 - 4 + 1
CONV2_OUT = 65        # 64 + 2*1 - 2 + 1
POOL1_K, POOL1_N, POOL1_OFF = 8, 9, 28    # live pool1 windows: [28, 37) of 64
POOL2_K, POOL2_N, POOL2_OFF = 4, 17, 24   # live pool2 windows: [24, 41) of 64
GROUP1 = 128 // 8     # 16 conv1 patches per 128-lane matmul row (8 out ch)
GROUP2 = 128 // 16    # 8 conv2 patches per 128-lane matmul row (16 out ch)


# ---------------------------------------------------------------------------
# Pallas kernels
# ---------------------------------------------------------------------------

def _conv_pool(p_ref, w_ref, n_t, n_g):
    """relu(patches @ blockdiag(w_aug)) followed by a max over the n_t
    within-window offsets.

    Patch rows are ordered (t, window-group), so slab t is rows
    [t*n_g, (t+1)*n_g) of the matmul result and the max-pool is an unrolled
    elementwise VPU max over aligned slabs (no cross-sublane/XLU reduce).
    Bias is carried by the ones-column of the patches, so padded (all-zero)
    patch rows yield exactly 0 -- identical to F.pad(value=0) + MaxPool.
    """
    res = jnp.dot(p_ref[...], w_ref[...], preferred_element_type=jnp.float32)
    res = jnp.maximum(res, 0.0)                      # (n_t*n_g, 128) f32
    pooled = res[0:n_g]
    for t in range(1, n_t):
        pooled = jnp.maximum(pooled, res[t * n_g:(t + 1) * n_g])
    return pooled                                    # (n_g, 128) f32


def _conv1_pool1_kernel(p_ref, w_ref, o_ref, *, n_t, n_g):
    o_ref[...] = _conv_pool(p_ref, w_ref, n_t, n_g)


def _conv2_pool2_fc_kernel(p_ref, w_ref, wfc_ref, bfc_ref, o_ref, *,
                           n_t, n_g, n_out):
    pooled = _conv_pool(p_ref, w_ref, n_t, n_g)      # (n_g, 128) f32
    # FC over the statically-live columns only.  One lane-partial row per
    # output neuron: bf16 weight slab -> f32, multiply, sublane-sum.  The
    # per-n loop keeps the working set to a handful of vregs (no (12,K,128)
    # product is ever materialized).
    rows = []
    for n in range(n_out):
        w_n = wfc_ref[n].astype(jnp.float32)          # (n_g, 128)
        rows.append(jnp.sum(w_n * pooled, axis=0, keepdims=True))  # (1, 128)
    lane_partials = jnp.concatenate(rows, axis=0)     # (n_out, 128)
    o_ref[...] = (jnp.sum(lane_partials, axis=1, keepdims=True)
                  + bfc_ref[...])                     # (n_out, 1)


def conv1_pool1(patches, w_big, n_t, n_g):
    return pl.pallas_call(
        functools.partial(_conv1_pool1_kernel, n_t=n_t, n_g=n_g),
        out_shape=jax.ShapeDtypeStruct((n_g, 128), jnp.float32),
    )(patches, w_big)


def conv2_pool2_fc(patches, w_big, wfc_packed, bfc2d, n_t, n_g):
    n_out = bfc2d.shape[0]
    return pl.pallas_call(
        functools.partial(_conv2_pool2_fc_kernel, n_t=n_t, n_g=n_g,
                          n_out=n_out),
        out_shape=jax.ShapeDtypeStruct((n_out, 1), jnp.float32),
    )(patches, w_big, wfc_packed, bfc2d)


# ---------------------------------------------------------------------------
# XLA-side glue: pool-major im2col packing
# ---------------------------------------------------------------------------

def _pool_major_patches(x, kh, kw, conv_out, pool_k, pool_n, group):
    """im2col + ones-column (bias), emitted in (within-window-offset, window)
    order and packed `group` windows per 128-lane row for the block-diagonal
    conv matmul.  Spatial positions beyond `conv_out` (the F.pad region of the
    pool) become all-zero rows (ones-column = 0 too) -> conv output exactly 0.

    x: (B, Hp, Wp, C) zero-padded conv input.
    Returns the bf16 patch matrix (n_t*n_g, group*(kh*kw*C+1)) and the padded
    window count.
    """
    B = x.shape[0]
    C = x.shape[-1]
    k_aug = kh * kw * C + 1
    cols = [x[:, di:di + conv_out, dj:dj + conv_out, :]
            for di in range(kh) for dj in range(kw)]
    ones = jnp.ones((B, conv_out, conv_out, 1), x.dtype)
    p = jnp.concatenate(cols + [ones], axis=-1)          # (B, co, co, K+1)
    pad_hw = pool_n * pool_k
    p = jnp.pad(p, ((0, 0), (0, pad_hw - conv_out),
                    (0, pad_hw - conv_out), (0, 0)))
    p = p.reshape(B, pool_n, pool_k, pool_n, pool_k, k_aug)
    p = p.transpose(2, 4, 0, 1, 3, 5)                    # (pk, pk, B, pn, pn, K+1)
    n_win = B * pool_n * pool_n
    p = p.reshape(pool_k * pool_k, n_win, k_aug)
    n_win_pad = _round_up(n_win, group * 8)              # sublane-aligned slabs
    p = jnp.pad(p, ((0, 0), (0, n_win_pad - n_win), (0, 0)))
    p = p.reshape((pool_k * pool_k * n_win_pad) // group, group * k_aug)
    return p.astype(jnp.bfloat16), n_win_pad


# ---------------------------------------------------------------------------
# Parameters (PyTorch layouts -> kernel layouts)
# ---------------------------------------------------------------------------

def init_params(batch_size):
    key = jax.random.PRNGKey(0)
    k1, k2, k3, k4, k5, k6 = jax.random.split(key, 6)
    # PyTorch layouts: conv weight (O, Cin, KH, KW), fc weight (out, in)
    w1 = jax.random.normal(k1, (8, 3, 4, 4), jnp.float32) * 0.1
    b1 = jax.random.normal(k2, (8,), jnp.float32) * 0.1
    w2 = jax.random.normal(k3, (16, 8, 2, 2), jnp.float32) * 0.1
    b2 = jax.random.normal(k4, (16,), jnp.float32) * 0.1
    fc_in = 64 * 64 * 16 * batch_size
    fc_out = batch_size * 6
    wfc = jax.random.normal(k5, (fc_out, fc_in), jnp.float32) * 0.01
    bfc = jax.random.normal(k6, (fc_out,), jnp.float32) * 0.1

    # conv weights -> im2col layout (KH*KW*Cin, Cout) + a bias row (matching
    # the patches' ones-column), then block-diagonal replication so `group`
    # patches share one lane-dense 128-wide MXU matmul.
    w1_aug = jnp.concatenate(
        [jnp.transpose(w1, (2, 3, 1, 0)).reshape(48, 8), b1.reshape(1, 8)], 0)
    w2_aug = jnp.concatenate(
        [jnp.transpose(w2, (2, 3, 1, 0)).reshape(32, 16), b2.reshape(1, 16)], 0)
    w1_big = jnp.kron(jnp.eye(GROUP1, dtype=jnp.float32), w1_aug)  # (784,128)
    w2_big = jnp.kron(jnp.eye(GROUP2, dtype=jnp.float32), w2_aug)  # (264,128)

    # FC weight restricted to the statically-live pool2 columns (exact: every
    # other pool2 output is 0), permuted from PyTorch's NCHW flatten order to
    # the kernel's packed (window-group, window-in-group, channel) layout.
    nw2 = batch_size * POOL2_N * POOL2_N
    nw2p = _round_up(nw2, GROUP2 * 8)
    wl = wfc.reshape(fc_out, batch_size, 16, 64, 64)[
        :, :, :, POOL2_OFF:POOL2_OFF + POOL2_N, POOL2_OFF:POOL2_OFF + POOL2_N]
    wl = jnp.transpose(wl, (0, 1, 3, 4, 2)).reshape(fc_out, nw2, 16)
    wl = jnp.pad(wl, ((0, 0), (0, nw2p - nw2), (0, 0)))
    wl = wl.reshape(fc_out, nw2p // GROUP2, 128)

    return {
        "w1_big": w1_big.astype(jnp.bfloat16),
        "w2_big": w2_big.astype(jnp.bfloat16),
        "wfc_packed": wl.astype(jnp.bfloat16),
        "bfc2d": bfc.reshape(fc_out, 1),
    }


# ---------------------------------------------------------------------------
# Forward pass (mirrors the PyTorch module)
# ---------------------------------------------------------------------------

def forward(x_nchw, params):
    B = x_nchw.shape[0]
    assert x_nchw.shape[1:] == (3, 64, 64)
    x = jnp.transpose(x_nchw, (0, 2, 3, 1))                 # NCHW -> NHWC

    # conv1 (k=4, s=1, pad=2) + ReLU + F.pad(224) + MaxPool(8/8).
    # Only pool windows 28..36 can be non-zero; they align with conv-out row 0
    # (224 % 8 == 0), so the pool is a top-left-aligned 8x8 max over the 65x65
    # conv output zero-padded to 72x72.
    p1 = same_padding(64, 1, 4)                              # 2
    xp = jnp.pad(x, ((0, 0), (p1, p1), (p1, p1), (0, 0)))    # (B,68,68,3)
    pat1, nw1p = _pool_major_patches(xp, 4, 4, CONV1_OUT,
                                     POOL1_K, POOL1_N, GROUP1)
    ng1 = nw1p // GROUP1
    pool1 = conv1_pool1(pat1, params["w1_big"],
                        POOL1_K * POOL1_K, ng1)              # (ng1, 128) f32

    # Unpack the packed live block -> (B,9,9,8) and place it at output offset
    # 28 of the otherwise all-zero 64x64 pool1 map (input of conv2).
    nw1 = B * POOL1_N * POOL1_N
    live1 = pool1.reshape(ng1 * GROUP1, 8)[:nw1]
    live1 = live1.reshape(B, POOL1_N, POOL1_N, 8)
    y = jnp.zeros((B, 64, 64, 8), jnp.float32)
    y = y.at[:, POOL1_OFF:POOL1_OFF + POOL1_N,
             POOL1_OFF:POOL1_OFF + POOL1_N, :].set(live1)

    # conv2 (k=2, s=1, pad=1) + ReLU + F.pad(96) + MaxPool(4/4) + flatten + FC
    # (live pool2 windows 24..40, aligned since 96 % 4 == 0; the FC only uses
    # those columns because all other pool2 outputs are exactly zero).
    p2 = same_padding(64, 1, 2)                              # 1
    yp = jnp.pad(y, ((0, 0), (p2, p2), (p2, p2), (0, 0)))    # (B,66,66,8)
    pat2, nw2p = _pool_major_patches(yp, 2, 2, CONV2_OUT,
                                     POOL2_K, POOL2_N, GROUP2)
    ng2 = nw2p // GROUP2
    out = conv2_pool2_fc(pat2, params["w2_big"], params["wfc_packed"],
                         params["bfc2d"], POOL2_K * POOL2_K, ng2)
    return out.reshape(-1)                                   # (B*6,)


if __name__ == "__main__":
    B = BATCH_SIZE
    params = init_params(B)
    kx = jax.random.PRNGKey(0)
    # the module hard-codes 64x64 spatial (fc in_features = 64*64*16*B)
    x = jax.random.normal(kx, (B, 3, 64, 64), jnp.float32)

    out = jax.jit(forward)(x, params)
    out = jax.block_until_ready(out)
    assert out.shape == (B * 6,), out.shape
    print("KERNEL_OK")
</pallas_src>

<mosaic_0001>
module attributes {stable_mosaic.version = 11 : i64} {
  func.func @_conv1_pool1_kernel(%arg0: memref<1024x784xbf16, #tpu.memory_space<vmem>>, %arg1: memref<784x128xbf16, #tpu.memory_space<vmem>>, %arg2: memref<16x128xf32, #tpu.memory_space<vmem>>) attributes {dimension_semantics = [], scalar_prefetch = 0 : i64, scratch_operands = 0 : i64, tpu.core_type = #tpu.core_type<tc>} {
    %c0 = arith.constant 0 : index
    %c0_0 = arith.constant 0 : index
    %0 = vector.load %arg0[%c0, %c0_0] : memref<1024x784xbf16, #tpu.memory_space<vmem>>, vector<1024x784xbf16>
    %c0_1 = arith.constant 0 : index
    %c0_2 = arith.constant 0 : index
    %1 = vector.load %arg1[%c0_1, %c0_2] : memref<784x128xbf16, #tpu.memory_space<vmem>>, vector<784x128xbf16>
    %cst = arith.constant dense<0.000000e+00> : vector<1024x128xf32>
    %2 = tpu.matmul %0, %1, %cst {dimension_numbers = #tpu.dot_dimension_numbers<[1], [0], [0], [1], [0, 0, 1, 1], [], []>} : vector<1024x784xbf16>, vector<784x128xbf16>, vector<1024x128xf32> -> vector<1024x128xf32>
    %cst_3 = arith.constant 0.000000e+00 : f32
    %3 = vector.broadcast %cst_3 : f32 to vector<1024x128xf32>
    %4 = arith.maximumf %2, %3 : vector<1024x128xf32>
    %5 = vector.extract_strided_slice %4 {offsets = [0, 0], sizes = [16, 128], strides = [1, 1]} : vector<1024x128xf32> to vector<16x128xf32>
    %6 = vector.extract_strided_slice %4 {offsets = [16, 0], sizes = [16, 128], strides = [1, 1]} : vector<1024x128xf32> to vector<16x128xf32>
    %7 = arith.maximumf %5, %6 : vector<16x128xf32>
    %8 = vector.extract_strided_slice %4 {offsets = [32, 0], sizes = [16, 128], strides = [1, 1]} : vector<1024x128xf32> to vector<16x128xf32>
    %9 = arith.maximumf %7, %8 : vector<16x128xf32>
    %10 = vector.extract_strided_slice %4 {offsets = [48, 0], sizes = [16, 128], strides = [1, 1]} : vector<1024x128xf32> to vector<16x128xf32>
    %11 = arith.maximumf %9, %10 : vector<16x128xf32>
    %12 = vector.extract_strided_slice %4 {offsets = [64, 0], sizes = [16, 128], strides = [1, 1]} : vector<1024x128xf32> to vector<16x128xf32>
    %13 = arith.maximumf %11, %12 : vector<16x128xf32>
    %14 = vector.extract_strided_slice %4 {offsets = [80, 0], sizes = [16, 128], strides = [1, 1]} : vector<1024x128xf32> to vector<16x128xf32>
    %15 = arith.maximumf %13, %14 : vector<16x128xf32>
    %16 = vector.extract_strided_slice %4 {offsets = [96, 0], sizes = [16, 128], strides = [1, 1]} : vector<1024x128xf32> to vector<16x128xf32>
    %17 = arith.maximumf %15, %16 : vector<16x128xf32>
    %18 = vector.extract_strided_slice %4 {offsets = [112, 0], sizes = [16, 128], strides = [1, 1]} : vector<1024x128xf32> to vector<16x128xf32>
    %19 = arith.maximumf %17, %18 : vector<16x128xf32>
    %20 = vector.extract_strided_slice %4 {offsets = [128, 0], sizes = [16, 128], strides = [1, 1]} : vector<1024x128xf32> to vector<16x128xf32>
    %21 = arith.maximumf %19, %20 : vector<16x128xf32>
    %22 = vector.extract_strided_slice %4 {offsets = [144, 0], sizes = [16, 128], strides = [1, 1]} : vector<1024x128xf32> to vector<16x128xf32>
    %23 = arith.maximumf %21, %22 : vector<16x128xf32>
    %24 = vector.extract_strided_slice %4 {offsets = [160, 0], sizes = [16, 128], strides = [1, 1]} : vector<1024x128xf32> to vector<16x128xf32>
    %25 = arith.maximumf %23, %24 : vector<16x128xf32>
    %26 = vector.extract_strided_slice %4 {offsets = [176, 0], sizes = [16, 128], strides = [1, 1]} : vector<1024x128xf32> to vector<16x128xf32>
    %27 = arith.maximumf %25, %26 : vector<16x128xf32>
    %28 = vector.extract_strided_slice %4 {offsets = [192, 0], sizes = [16, 128], strides = [1, 1]} : vector<1024x128xf32> to vector<16x128xf32>
    %29 = arith.maximumf %27, %28 : vector<16x128xf32>
    %30 = vector.extract_strided_slice %4 {offsets = [208, 0], sizes = [16, 128], strides = [1, 1]} : vector<1024x128xf32> to vector<16x128xf32>
    %31 = arith.maximumf %29, %30 : vector<16x128xf32>
    %32 = vector.extract_strided_slice %4 {offsets = [224, 0], sizes = [16, 128], strides = [1, 1]} : vector<1024x128xf32> to vector<16x128xf32>
    %33 = arith.maximumf %31, %32 : vector<16x128xf32>
    %34 = vector.extract_strided_slice %4 {offsets = [240, 0], sizes = [16, 128], strides = [1, 1]} : vector<1024x128xf32> to vector<16x128xf32>
    %35 = arith.maximumf %33, %34 : vector<16x128xf32>
    %36 = vector.extract_strided_slice %4 {offsets = [256, 0], sizes = [16, 128], strides = [1, 1]} : vector<1024x128xf32> to vector<16x128xf32>
    %37 = arith.maximumf %35, %36 : vector<16x128xf32>
    %38 = vector.extract_strided_slice %4 {offsets = [272, 0], sizes = [16, 128], strides = [1, 1]} : vector<1024x128xf32> to vector<16x128xf32>
    %39 = arith.maximumf %37, %38 : vector<16x128xf32>
    %40 = vector.extract_strided_slice %4 {offsets = [288, 0], sizes = [16, 128], strides = [1, 1]} : vector<1024x128xf32> to vector<16x128xf32>
    %41 = arith.maximumf %39, %40 : vector<16x128xf32>
    %42 = vector.extract_strided_slice %4 {offsets = [304, 0], sizes = [16, 128], strides = [1, 1]} : vector<1024x128xf32> to vector<16x128xf32>
    %43 = arith.maximumf %41, %42 : vector<16x128xf32>
    %44 = vector.extract_strided_slice %4 {offsets = [320, 0], sizes = [16, 128], strides = [1, 1]} : vector<1024x128xf32> to vector<16x128xf32>
    %45 = arith.maximumf %43, %44 : vector<16x128xf32>
    %46 = vector.extract_strided_slice %4 {offsets = [336, 0], sizes = [16, 128], strides = [1, 1]} : vector<1024x128xf32> to vector<16x128xf32>
    %47 = arith.maximumf %45, %46 : vector<16x128xf32>
    %48 = vector.extract_strided_slice %4 {offsets = [352, 0], sizes = [16, 128], strides = [1, 1]} : vector<1024x128xf32> to vector<16x128xf32>
    %49 = arith.maximumf %47, %48 : vector<16x128xf32>
    %50 = vector.extract_strided_slice %4 {offsets = [368, 0], sizes = [16, 128], strides = [1, 1]} : vector<1024x128xf32> to vector<16x128xf32>
    %51 = arith.maximumf %49, %50 : vector<16x128xf32>
    %52 = vector.extract_strided_slice %4 {offsets = [384, 0], sizes = [16, 128], strides = [1, 1]} : vector<1024x128xf32> to vector<16x128xf32>
    %53 = arith.maximumf %51, %52 : vector<16x128xf32>
    %54 = vector.extract_strided_slice %4 {offsets = [400, 0], sizes = [16, 128], strides = [1, 1]} : vector<1024x128xf32> to vector<16x128xf32>
    %55 = arith.maximumf %53, %54 : vector<16x128xf32>
    %56 = vector.extract_strided_slice %4 {offsets = [416, 0], sizes = [16, 128], strides = [1, 1]} : vector<1024x128xf32> to vector<16x128xf32>
    %57 = arith.maximumf %55, %56 : vector<16x128xf32>
    %58 = vector.extract_strided_slice %4 {offsets = [432, 0], sizes = [16, 128], strides = [1, 1]} : vector<1024x128xf32> to vector<16x128xf32>
    %59 = arith.maximumf %57, %58 : vector<16x128xf32>
    %60 = vector.extract_strided_slice %4 {offsets = [448, 0], sizes = [16, 128], strides = [1, 1]} : vector<1024x128xf32> to vector<16x128xf32>
    %61 = arith.maximumf %59, %60 : vector<16x128xf32>
    %62 = vector.extract_strided_slice %4 {offsets = [464, 0], sizes = [16, 128], strides = [1, 1]} : vector<1024x128xf32> to vector<16x128xf32>
    %63 = arith.maximumf %61, %62 : vector<16x128xf32>
    %64 = vector.extract_strided_slice %4 {offsets = [480, 0], sizes = [16, 128], strides = [1, 1]} : vector<1024x128xf32> to vector<16x128xf32>
    %65 = arith.maximumf %63, %64 : vector<16x128xf32>
    %66 = vector.extract_strided_slice %4 {offsets = [496, 0], sizes = [16, 128], strides = [1, 1]} : vector<1024x128xf32> to vector<16x128xf32>
    %67 = arith.maximumf %65, %66 : vector<16x128xf32>
    %68 = vector.extract_strided_slice %4 {offsets = [512, 0], sizes = [16, 128], strides = [1, 1]} : vector<1024x128xf32> to vector<16x128xf32>
    %69 = arith.maximumf %67, %68 : vector<16x128xf32>
    %70 = vector.extract_strided_slice %4 {offsets = [528, 0], sizes = [16, 128], strides = [1, 1]} : vector<1024x128xf32> to vector<16x128xf32>
    %71 = arith.maximumf %69, %70 : vector<16x128xf32>
    %72 = vector.extract_strided_slice %4 {offsets = [544, 0], sizes = [16, 128], strides = [1, 1]} : vector<1024x128xf32> to vector<16x128xf32>
    %73 = arith.maximumf %71, %72 : vector<16x128xf32>
    %74 = vector.extract_strided_slice %4 {offsets = [560, 0], sizes = [16, 128], strides = [1, 1]} : vector<1024x128xf32> to vector<16x128xf32>
    %75 = arith.maximumf %73, %74 : vector<16x128xf32>
    %76 = vector.extract_strided_slice %4 {offsets = [576, 0], sizes = [16, 128], strides = [1, 1]} : vector<1024x128xf32> to vector<16x128xf32>
    %77 = arith.maximumf %75, %76 : vector<16x128xf32>
    %78 = vector.extract_strided_slice %4 {offsets = [592, 0], sizes = [16, 128], strides = [1, 1]} : vector<1024x128xf32> to vector<16x128xf32>
    %79 = arith.maximumf %77, %78 : vector<16x128xf32>
    %80 = vector.extract_strided_slice %4 {offsets = [608, 0], sizes = [16, 128], strides = [1, 1]} : vector<1024x128xf32> to vector<16x128xf32>
    %81 = arith.maximumf %79, %80 : vector<16x128xf32>
    %82 = vector.extract_strided_slice %4 {offsets = [624, 0], sizes = [16, 128], strides = [1, 1]} : vector<1024x128xf32> to vector<16x128xf32>
    %83 = arith.maximumf %81, %82 : vector<16x128xf32>
    %84 = vector.extract_strided_slice %4 {offsets = [640, 0], sizes = [16, 128], strides = [1, 1]} : vector<1024x128xf32> to vector<16x128xf32>
    %85 = arith.maximumf %83, %84 : vector<16x128xf32>
    %86 = vector.extract_strided_slice %4 {offsets = [656, 0], sizes = [16, 128], strides = [1, 1]} : vector<1024x128xf32> to vector<16x128xf32>
    %87 = arith.maximumf %85, %86 : vector<16x128xf32>
    %88 = vector.extract_strided_slice %4 {offsets = [672, 0], sizes = [16, 128], strides = [1, 1]} : vector<1024x128xf32> to vector<16x128xf32>
    %89 = arith.maximumf %87, %88 : vector<16x128xf32>
    %90 = vector.extract_strided_slice %4 {offsets = [688, 0], sizes = [16, 128], strides = [1, 1]} : vector<1024x128xf32> to vector<16x128xf32>
    %91 = arith.maximumf %89, %90 : vector<16x128xf32>
    %92 = vector.extract_strided_slice %4 {offsets = [704, 0], sizes = [16, 128], strides = [1, 1]} : vector<1024x128xf32> to vector<16x128xf32>
    %93 = arith.maximumf %91, %92 : vector<16x128xf32>
    %94 = vector.extract_strided_slice %4 {offsets = [720, 0], sizes = [16, 128], strides = [1, 1]} : vector<1024x128xf32> to vector<16x128xf32>
    %95 = arith.maximumf %93, %94 : vector<16x128xf32>
    %96 = vector.extract_strided_slice %4 {offsets = [736, 0], sizes = [16, 128], strides = [1, 1]} : vector<1024x128xf32> to vector<16x128xf32>
    %97 = arith.maximumf %95, %96 : vector<16x128xf32>
    %98 = vector.extract_strided_slice %4 {offsets = [752, 0], sizes = [16, 128], strides = [1, 1]} : vector<1024x128xf32> to vector<16x128xf32>
    %99 = arith.maximumf %97, %98 : vector<16x128xf32>
    %100 = vector.extract_strided_slice %4 {offsets = [768, 0], sizes = [16, 128], strides = [1, 1]} : vector<1024x128xf32> to vector<16x128xf32>
    %101 = arith.maximumf %99, %100 : vector<16x128xf32>
    %102 = vector.extract_strided_slice %4 {offsets = [784, 0], sizes = [16, 128], strides = [1, 1]} : vector<1024x128xf32> to vector<16x128xf32>
    %103 = arith.maximumf %101, %102 : vector<16x128xf32>
    %104 = vector.extract_strided_slice %4 {offsets = [800, 0], sizes = [16, 128], strides = [1, 1]} : vector<1024x128xf32> to vector<16x128xf32>
    %105 = arith.maximumf %103, %104 : vector<16x128xf32>
    %106 = vector.extract_strided_slice %4 {offsets = [816, 0], sizes = [16, 128], strides = [1, 1]} : vector<1024x128xf32> to vector<16x128xf32>
    %107 = arith.maximumf %105, %106 : vector<16x128xf32>
    %108 = vector.extract_strided_slice %4 {offsets = [832, 0], sizes = [16, 128], strides = [1, 1]} : vector<1024x128xf32> to vector<16x128xf32>
    %109 = arith.maximumf %107, %108 : vector<16x128xf32>
    %110 = vector.extract_strided_slice %4 {offsets = [848, 0], sizes = [16, 128], strides = [1, 1]} : vector<1024x128xf32> to vector<16x128xf32>
    %111 = arith.maximumf %109, %110 : vector<16x128xf32>
    %112 = vector.extract_strided_slice %4 {offsets = [864, 0], sizes = [16, 128], strides = [1, 1]} : vector<1024x128xf32> to vector<16x128xf32>
    %113 = arith.maximumf %111, %112 : vector<16x128xf32>
    %114 = vector.extract_strided_slice %4 {offsets = [880, 0], sizes = [16, 128], strides = [1, 1]} : vector<1024x128xf32> to vector<16x128xf32>
    %115 = arith.maximumf %113, %114 : vector<16x128xf32>
    %116 = vector.extract_strided_slice %4 {offsets = [896, 0], sizes = [16, 128], strides = [1, 1]} : vector<1024x128xf32> to vector<16x128xf32>
    %117 = arith.maximumf %115, %116 : vector<16x128xf32>
    %118 = vector.extract_strided_slice %4 {offsets = [912, 0], sizes = [16, 128], strides = [1, 1]} : vector<1024x128xf32> to vector<16x128xf32>
    %119 = arith.maximumf %117, %118 : vector<16x128xf32>
    %120 = vector.extract_strided_slice %4 {offsets = [928, 0], sizes = [16, 128], strides = [1, 1]} : vector<1024x128xf32> to vector<16x128xf32>
    %121 = arith.maximumf %119, %120 : vector<16x128xf32>
    %122 = vector.extract_strided_slice %4 {offsets = [944, 0], sizes = [16, 128], strides = [1, 1]} : vector<1024x128xf32> to vector<16x128xf32>
    %123 = arith.maximumf %121, %122 : vector<16x128xf32>
    %124 = vector.extract_strided_slice %4 {offsets = [960, 0], sizes = [16, 128], strides = [1, 1]} : vector<1024x128xf32> to vector<16x128xf32>
    %125 = arith.maximumf %123, %124 : vector<16x128xf32>
    %126 = vector.extract_strided_slice %4 {offsets = [976, 0], sizes = [16, 128], strides = [1, 1]} : vector<1024x128xf32> to vector<16x128xf32>
    %127 = arith.maximumf %125, %126 : vector<16x128xf32>
    %128 = vector.extract_strided_slice %4 {offsets = [992, 0], sizes = [16, 128], strides = [1, 1]} : vector<1024x128xf32> to vector<16x128xf32>
    %129 = arith.maximumf %127, %128 : vector<16x128xf32>
    %130 = vector.extract_strided_slice %4 {offsets = [1008, 0], sizes = [16, 128], strides = [1, 1]} : vector<1024x128xf32> to vector<16x128xf32>
    %131 = arith.maximumf %129, %130 : vector<16x128xf32>
    %c0_4 = arith.constant 0 : index
    %c0_5 = arith.constant 0 : index
    %132 = vector.load %arg2[%c0_4, %c0_5] : memref<16x128xf32, #tpu.memory_space<vmem>>, vector<16x128xf32>
    tpu.vector_store %arg2[%c0_4, %c0_5], %131 {strides = array<i32>} : memref<16x128xf32, #tpu.memory_space<vmem>>, vector<16x128xf32>,
    return
  }
}

module attributes {stable_mosaic.version = 11 : i64} {
  func.func @_conv2_pool2_fc_kernel(%arg0: memref<1280x264xbf16, #tpu.memory_space<vmem>>, %arg1: memref<264x128xbf16, #tpu.memory_space<vmem>>, %arg2: memref<12x80x128xbf16, #tpu.memory_space<vmem>>, %arg3: memref<12x1xf32, #tpu.memory_space<vmem>>, %arg4: memref<12x1xf32, #tpu.memory_space<vmem>>) attributes {dimension_semantics = [], scalar_prefetch = 0 : i64, scratch_operands = 0 : i64, tpu.core_type = #tpu.core_type<tc>} {
    %c0 = arith.constant 0 : index
    %c0_0 = arith.constant 0 : index
    %0 = vector.load %arg0[%c0, %c0_0] : memref<1280x264xbf16, #tpu.memory_space<vmem>>, vector<1280x264xbf16>
    %c0_1 = arith.constant 0 : index
    %c0_2 = arith.constant 0 : index
    %1 = vector.load %arg1[%c0_1, %c0_2] : memref<264x128xbf16, #tpu.memory_space<vmem>>, vector<264x128xbf16>
    %cst = arith.constant dense<0.000000e+00> : vector<1280x128xf32>
    %2 = tpu.matmul %0, %1, %cst {dimension_numbers = #tpu.dot_dimension_numbers<[1], [0], [0], [1], [0, 0, 1, 1], [], []>} : vector<1280x264xbf16>, vector<264x128xbf16>, vector<1280x128xf32> -> vector<1280x128xf32>
    %cst_3 = arith.constant 0.000000e+00 : f32
    %3 = vector.broadcast %cst_3 : f32 to vector<1280x128xf32>
    %4 = arith.maximumf %2, %3 : vector<1280x128xf32>
    %5 = vector.extract_strided_slice %4 {offsets = [0, 0], sizes = [80, 128], strides = [1, 1]} : vector<1280x128xf32> to vector<80x128xf32>
    %6 = vector.extract_strided_slice %4 {offsets = [80, 0], sizes = [80, 128], strides = [1, 1]} : vector<1280x128xf32> to vector<80x128xf32>
    %7 = arith.maximumf %5, %6 : vector<80x128xf32>
    %8 = vector.extract_strided_slice %4 {offsets = [160, 0], sizes = [80, 128], strides = [1, 1]} : vector<1280x128xf32> to vector<80x128xf32>
    %9 = arith.maximumf %7, %8 : vector<80x128xf32>
    %10 = vector.extract_strided_slice %4 {offsets = [240, 0], sizes = [80, 128], strides = [1, 1]} : vector<1280x128xf32> to vector<80x128xf32>
    %11 = arith.maximumf %9, %10 : vector<80x128xf32>
    %12 = vector.extract_strided_slice %4 {offsets = [320, 0], sizes = [80, 128], strides = [1, 1]} : vector<1280x128xf32> to vector<80x128xf32>
    %13 = arith.maximumf %11, %12 : vector<80x128xf32>
    %14 = vector.extract_strided_slice %4 {offsets = [400, 0], sizes = [80, 128], strides = [1, 1]} : vector<1280x128xf32> to vector<80x128xf32>
    %15 = arith.maximumf %13, %14 : vector<80x128xf32>
    %16 = vector.extract_strided_slice %4 {offsets = [480, 0], sizes = [80, 128], strides = [1, 1]} : vector<1280x128xf32> to vector<80x128xf32>
    %17 = arith.maximumf %15, %16 : vector<80x128xf32>
    %18 = vector.extract_strided_slice %4 {offsets = [560, 0], sizes = [80, 128], strides = [1, 1]} : vector<1280x128xf32> to vector<80x128xf32>
    %19 = arith.maximumf %17, %18 : vector<80x128xf32>
    %20 = vector.extract_strided_slice %4 {offsets = [640, 0], sizes = [80, 128], strides = [1, 1]} : vector<1280x128xf32> to vector<80x128xf32>
    %21 = arith.maximumf %19, %20 : vector<80x128xf32>
    %22 = vector.extract_strided_slice %4 {offsets = [720, 0], sizes = [80, 128], strides = [1, 1]} : vector<1280x128xf32> to vector<80x128xf32>
    %23 = arith.maximumf %21, %22 : vector<80x128xf32>
    %24 = vector.extract_strided_slice %4 {offsets = [800, 0], sizes = [80, 128], strides = [1, 1]} : vector<1280x128xf32> to vector<80x128xf32>
    %25 = arith.maximumf %23, %24 : vector<80x128xf32>
    %26 = vector.extract_strided_slice %4 {offsets = [880, 0], sizes = [80, 128], strides = [1, 1]} : vector<1280x128xf32> to vector<80x128xf32>
    %27 = arith.maximumf %25, %26 : vector<80x128xf32>
    %28 = vector.extract_strided_slice %4 {offsets = [960, 0], sizes = [80, 128], strides = [1, 1]} : vector<1280x128xf32> to vector<80x128xf32>
    %29 = arith.maximumf %27, %28 : vector<80x128xf32>
    %30 = vector.extract_strided_slice %4 {offsets = [1040, 0], sizes = [80, 128], strides = [1, 1]} : vector<1280x128xf32> to vector<80x128xf32>
    %31 = arith.maximumf %29, %30 : vector<80x128xf32>
    %32 = vector.extract_strided_slice %4 {offsets = [1120, 0], sizes = [80, 128], strides = [1, 1]} : vector<1280x128xf32> to vector<80x128xf32>
    %33 = arith.maximumf %31, %32 : vector<80x128xf32>
    %34 = vector.extract_strided_slice %4 {offsets = [1200, 0], sizes = [80, 128], strides = [1, 1]} : vector<1280x128xf32> to vector<80x128xf32>
    %35 = arith.maximumf %33, %34 : vector<80x128xf32>
    %c0_4 = arith.constant 0 : index
    %c0_5 = arith.constant 0 : index
    %c0_6 = arith.constant 0 : index
    %36 = vector.load %arg2[%c0_4, %c0_5, %c0_6] : memref<12x80x128xbf16, #tpu.memory_space<vmem>>, vector<1x80x128xbf16>
    %37 = vector.shape_cast %36 : vector<1x80x128xbf16> to vector<80x128xbf16>
    %38 = arith.extf %37 : vector<80x128xbf16> to vector<80x128xf32>
    %39 = arith.mulf %38, %35 : vector<80x128xf32>
    %cst_7 = arith.constant dense<0.000000e+00> : vector<128xf32>
    %40 = vector.multi_reduction <add>, %39, %cst_7 [0] : vector<80x128xf32> to vector<128xf32>
    %41 = vector.shape_cast %40 : vector<128xf32> to vector<1x128xf32>
    %c1 = arith.constant 1 : index
    %c0_8 = arith.constant 0 : index
    %c0_9 = arith.constant 0 : index
    %42 = vector.load %arg2[%c1, %c0_8, %c0_9] : memref<12x80x128xbf16, #tpu.memory_space<vmem>>, vector<1x80x128xbf16>
    %43 = vector.shape_cast %42 : vector<1x80x128xbf16> to vector<80x128xbf16>
    %44 = arith.extf %43 : vector<80x128xbf16> to vector<80x128xf32>
    %45 = arith.mulf %44, %35 : vector<80x128xf32>
    %cst_10 = arith.constant dense<0.000000e+00> : vector<128xf32>
    %46 = vector.multi_reduction <add>, %45, %cst_10 [0] : vector<80x128xf32> to vector<128xf32>
    %47 = vector.shape_cast %46 : vector<128xf32> to vector<1x128xf32>
    %c2 = arith.constant 2 : index
    %c0_11 = arith.constant 0 : index
    %c0_12 = arith.constant 0 : index
    %48 = vector.load %arg2[%c2, %c0_11, %c0_12] : memref<12x80x128xbf16, #tpu.memory_space<vmem>>, vector<1x80x128xbf16>
    %49 = vector.shape_cast %48 : vector<1x80x128xbf16> to vector<80x128xbf16>
    %50 = arith.extf %49 : vector<80x128xbf16> to vector<80x128xf32>
    %51 = arith.mulf %50, %35 : vector<80x128xf32>
    %cst_13 = arith.constant dense<0.000000e+00> : vector<128xf32>
    %52 = vector.multi_reduction <add>, %51, %cst_13 [0] : vector<80x128xf32> to vector<128xf32>
    %53 = vector.shape_cast %52 : vector<128xf32> to vector<1x128xf32>
    %c3 = arith.constant 3 : index
    %c0_14 = arith.constant 0 : index
    %c0_15 = arith.constant 0 : index
    %54 = vector.load %arg2[%c3, %c0_14, %c0_15] : memref<12x80x128xbf16, #tpu.memory_space<vmem>>, vector<1x80x128xbf16>
    %55 = vector.shape_cast %54 : vector<1x80x128xbf16> to vector<80x128xbf16>
    %56 = arith.extf %55 : vector<80x128xbf16> to vector<80x128xf32>
    %57 = arith.mulf %56, %35 : vector<80x128xf32>
    %cst_16 = arith.constant dense<0.000000e+00> : vector<128xf32>
    %58 = vector.multi_reduction <add>, %57, %cst_16 [0] : vector<80x128xf32> to vector<128xf32>
    %59 = vector.shape_cast %58 : vector<128xf32> to vector<1x128xf32>
    %c4 = arith.constant 4 : index
    %c0_17 = arith.constant 0 : index
    %c0_18 = arith.constant 0 : index
    %60 = vector.load %arg2[%c4, %c0_17, %c0_18] : memref<12x80x128xbf16, #tpu.memory_space<vmem>>, vector<1x80x128xbf16>
    %61 = vector.shape_cast %60 : vector<1x80x128xbf16> to vector<80x128xbf16>
    %62 = arith.extf %61 : vector<80x128xbf16> to vector<80x128xf32>
    %63 = arith.mulf %62, %35 : vector<80x128xf32>
    %cst_19 = arith.constant dense<0.000000e+00> : vector<128xf32>
    %64 = vector.multi_reduction <add>, %63, %cst_19 [0] : vector<80x128xf32> to vector<128xf32>
    %65 = vector.shape_cast %64 : vector<128xf32> to vector<1x128xf32>
    %c5 = arith.constant 5 : index
    %c0_20 = arith.constant 0 : index
    %c0_21 = arith.constant 0 : index
    %66 = vector.load %arg2[%c5, %c0_20, %c0_21] : memref<12x80x128xbf16, #tpu.memory_space<vmem>>, vector<1x80x128xbf16>
    %67 = vector.shape_cast %66 : vector<1x80x128xbf16> to vector<80x128xbf16>
    %68 = arith.extf %67 : vector<80x128xbf16> to vector<80x128xf32>
    %69 = arith.mulf %68, %35 : vector<80x128xf32>
    %cst_22 = arith.constant dense<0.000000e+00> : vector<128xf32>
    %70 = vector.multi_reduction <add>, %69, %cst_22 [0] : vector<80x128xf32> to vector<128xf32>
    %71 = vector.shape_cast %70 : vector<128xf32> to vector<1x128xf32>
    %c6 = arith.constant 6 : index
    %c0_23 = arith.constant 0 : index
    %c0_24 = arith.constant 0 : index
    %72 = vector.load %arg2[%c6, %c0_23, %c0_24] : memref<12x80x128xbf16, #tpu.memory_space<vmem>>, vector<1x80x128xbf16>
    %73 = vector.shape_cast %72 : vector<1x80x128xbf16> to vector<80x128xbf16>
    %74 = arith.extf %73 : vector<80x128xbf16> to vector<80x128xf32>
    %75 = arith.mulf %74, %35 : vector<80x128xf32>
    %cst_25 = arith.constant dense<0.000000e+00> : vector<128xf32>
    %76 = vector.multi_reduction <add>, %75, %cst_25 [0] : vector<80x128xf32> to vector<128xf32>
    %77 = vector.shape_cast %76 : vector<128xf32> to vector<1x128xf32>
    %c7 = arith.constant 7 : index
    %c0_26 = arith.constant 0 : index
    %c0_27 = arith.constant 0 : index
    %78 = vector.load %arg2[%c7, %c0_26, %c0_27] : memref<12x80x128xbf16, #tpu.memory_space<vmem>>, vector<1x80x128xbf16>
    %79 = vector.shape_cast %78 : vector<1x80x128xbf16> to vector<80x128xbf16>
    %80 = arith.extf %79 : vector<80x128xbf16> to vector<80x128xf32>
    %81 = arith.mulf %80, %35 : vector<80x128xf32>
    %cst_28 = arith.constant dense<0.000000e+00> : vector<128xf32>
    %82 = vector.multi_reduction <add>, %81, %cst_28 [0] : vector<80x128xf32> to vector<128xf32>
    %83 = vector.shape_cast %82 : vector<128xf32> to vector<1x128xf32>
    %c8 = arith.constant 8 : index
    %c0_29 = arith.constant 0 : index
    %c0_30 = arith.constant 0 : index
    %84 = vector.load %arg2[%c8, %c0_29, %c0_30] : memref<12x80x128xbf16, #tpu.memory_space<vmem>>, vector<1x80x128xbf16>
    %85 = vector.shape_cast %84 : vector<1x80x128xbf16> to vector<80x128xbf16>
    %86 = arith.extf %85 : vector<80x128xbf16> to vector<80x128xf32>
    %87 = arith.mulf %86, %35 : vector<80x128xf32>
    %cst_31 = arith.constant dense<0.000000e+00> : vector<128xf32>
    %88 = vector.multi_reduction <add>, %87, %cst_31 [0] : vector<80x128xf32> to vector<128xf32>
    %89 = vector.shape_cast %88 : vector<128xf32> to vector<1x128xf32>
    %c9 = arith.constant 9 : index
    %c0_32 = arith.constant 0 : index
    %c0_33 = arith.constant 0 : index
    %90 = vector.load %arg2[%c9, %c0_32, %c0_33] : memref<12x80x128xbf16, #tpu.memory_space<vmem>>, vector<1x80x128xbf16>
    %91 = vector.shape_cast %90 : vector<1x80x128xbf16> to vector<80x128xbf16>
    %92 = arith.extf %91 : vector<80x128xbf16> to vector<80x128xf32>
    %93 = arith.mulf %92, %35 : vector<80x128xf32>
    %cst_34 = arith.constant dense<0.000000e+00> : vector<128xf32>
    %94 = vector.multi_reduction <add>, %93, %cst_34 [0] : vector<80x128xf32> to vector<128xf32>
    %95 = vector.shape_cast %94 : vector<128xf32> to vector<1x128xf32>
    %c10 = arith.constant 10 : index
    %c0_35 = arith.constant 0 : index
    %c0_36 = arith.constant 0 : index
    %96 = vector.load %arg2[%c10, %c0_35, %c0_36] : memref<12x80x128xbf16, #tpu.memory_space<vmem>>, vector<1x80x128xbf16>
    %97 = vector.shape_cast %96 : vector<1x80x128xbf16> to vector<80x128xbf16>
    %98 = arith.extf %97 : vector<80x128xbf16> to vector<80x128xf32>
    %99 = arith.mulf %98, %35 : vector<80x128xf32>
    %cst_37 = arith.constant dense<0.000000e+00> : vector<128xf32>
    %100 = vector.multi_reduction <add>, %99, %cst_37 [0] : vector<80x128xf32> to vector<128xf32>
    %101 = vector.shape_cast %100 : vector<128xf32> to vector<1x128xf32>
    %c11 = arith.constant 11 : index
    %c0_38 = arith.constant 0 : index
    %c0_39 = arith.constant 0 : index
    %102 = vector.load %arg2[%c11, %c0_38, %c0_39] : memref<12x80x128xbf16, #tpu.memory_space<vmem>>, vector<1x80x128xbf16>
    %103 = vector.shape_cast %102 : vector<1x80x128xbf16> to vector<80x128xbf16>
    %104 = arith.extf %103 : vector<80x128xbf16> to vector<80x128xf32>
    %105 = arith.mulf %104, %35 : vector<80x128xf32>
    %cst_40 = arith.constant dense<0.000000e+00> : vector<128xf32>
    %106 = vector.multi_reduction <add>, %105, %cst_40 [0] : vector<80x128xf32> to vector<128xf32>
    %107 = vector.shape_cast %106 : vector<128xf32> to vector<1x128xf32>
    %108 = tpu.concatenate %41, %47, %53, %59, %65, %71, %77, %83, %89, %95, %101, %107 in 0 : vector<1x128xf32>, vector<1x128xf32>, vector<1x128xf32>, vector<1x128xf32>, vector<1x128xf32>, vector<1x128xf32>, vector<1x128xf32>, vector<1x128xf32>, vector<1x128xf32>, vector<1x128xf32>, vector<1x128xf32>, vector<1x128xf32> -> vector<12x128xf32>
    %cst_41 = arith.constant dense<0.000000e+00> : vector<12xf32>
    %109 = vector.multi_reduction <add>, %108, %cst_41 [1] : vector<12x128xf32> to vector<12xf32>
    %110 = vector.shape_cast %109 : vector<12xf32> to vector<12x1xf32>
    %c0_42 = arith.constant 0 : index
    %c0_43 = arith.constant 0 : index
    %111 = vector.load %arg3[%c0_42, %c0_43] : memref<12x1xf32, #tpu.memory_space<vmem>>, vector<12x1xf32>
    %112 = arith.addf %110, %111 : vector<12x1xf32>
    %c0_44 = arith.constant 0 : index
    %c0_45 = arith.constant 0 : index
    %113 = vector.load %arg4[%c0_44, %c0_45] : memref<12x1xf32, #tpu.memory_space<vmem>>, vector<12x1xf32>
    tpu.vector_store %arg4[%c0_44, %c0_45], %112 {strides = array<i32>} : memref<12x1xf32, #tpu.memory_space<vmem>>, vector<12x1xf32>,
    return
  }
}

</mosaic_0001>

<bundles_post_ra>
// kernel: forward.2
= control target key start
LH: loop header
LB: loop body
LE: loop exit
PB: predicated region body
PF: predicated region fallthrough
CT: control target
= control target key end

     0   :  { %v7651_v0 = vmov 0   ;;  %vm3156_vm0 = vcmask 130048   ;;  %s10098_s1 = inlined_call_operand.vmem [shape: bf16[784,128], index: 1, kind: input, shape index: {}]   ;;  %s10099_s0 = inlined_call_operand.vmem [shape: bf16[1024,784], index: 0, kind: input, shape index: {}]   ;;  %s10100_s2 = inlined_call_operand.vmem [shape: f32[16,128], index: 2, kind: output, shape index: {}]  }
   0x1   :  { %3349 = vmatprep.subr.bf16.mxu1 %v7651_v0  ;;  %3894 = vmatprep.subr.bf16.mxu0 %v7651_v0  ;;  %v6962_v1 = vld [vmem:[%s10098_s1] sm:$0xff]   ;;  %v6964_v3 = vld [vmem:[%s10098_s1 + $0x8] sm:$0xff]   ;;  %v6966_v5 = vld [vmem:[%s10098_s1 + $0x10] sm:$0xff]  }
   0x2   :  { %v7675_v2 = vld [vmem:[%s10098_s1 + $0x80] sm:$0xff]   ;;  %3350 = vmatpush1.bf16.msra.mxu1 %v6962_v1  ;;  %v7685_v4 = vld [vmem:[%s10098_s1 + $0x88] sm:$0xff]   ;;  %v7696_v6 = vld [vmem:[%s10098_s1 + $0x90] sm:$0xff]  }
   0x3   :  { %3895 = vmatpush1.bf16.msra.mxu0 %v7675_v2  ;;  %3351 = vmatprep.subr.bf16.mxu1 %v7651_v0  ;;  %v6968_v7 = vld [vmem:[%s10098_s1 + $0x18] sm:$0xff]   ;;  %v6970_v9 = vld [vmem:[%s10098_s1 + $0x20] sm:$0xff]   ;;  %v6972_v11 = vld [vmem:[%s10098_s1 + $0x28] sm:$0xff]  }
   0x4   :  { %3896 = vmatprep.subr.bf16.mxu0 %v7651_v0  ;;  %v7707_v8 = vld [vmem:[%s10098_s1 + $0x98] sm:$0xff]   ;;  %v7718_v10 = vld [vmem:[%s10098_s1 + $0xa0] sm:$0xff]   ;;  %v7729_v12 = vld [vmem:[%s10098_s1 + $0xa8] sm:$0xff]  }
   0x5   :  { %v6974_v13 = vld [vmem:[%s10098_s1 + $0x30] sm:$0xff]   ;;  %v6976_v15 = vld [vmem:[%s10098_s1 + $0x38] sm:$0xff]   ;;  %v6978_v17 = vld [vmem:[%s10098_s1 + $0x40] sm:$0xff]  }
   0x6   :  { %3352 = vmatpush1.bf16.msra.mxu1 %v6964_v3  ;;  %v7740_v14 = vld [vmem:[%s10098_s1 + $0xb0] sm:$0xff]   ;;  %v7751_v16 = vld [vmem:[%s10098_s1 + $0xb8] sm:$0xff]   ;;  %v7762_v18 = vld [vmem:[%s10098_s1 + $0xc0] sm:$0xff]  }
   0x7   :  { %3897 = vmatpush1.bf16.msra.mxu0 %v7685_v4  ;;  %3353 = vmatprep.subr.bf16.mxu1 %v7651_v0  ;;  %v6996_v19 = vld [vmem:[%s10099_s0 + $0x4] ss:$28 sps:$4 sm:$0xff]   ;;  %v6980_v20 = vld [vmem:[%s10098_s1 + $0x48] sm:$0xff]   ;;  %v6982_v23 = vld [vmem:[%s10098_s1 + $0x50] sm:$0xff]  }
   0x8   :  { %3898 = vmatprep.subr.bf16.mxu0 %v7651_v0  ;;  %v6999_v21 = vld [vmem:[%s10099_s0 + $0xc] ss:$28 sps:$4 sm:$0xff]   ;;  %3381 = vmatprep.mubr.bf16.mxu1 %v6996_v19  ;;  %v7790_v24 = vld [vmem:[%s10098_s1 + $0xd0] sm:$0xff]   ;;  %v6984_v25 = vld [vmem:[%s10098_s1 + $0x58] sm:$0xff]  }
   0x9   :  { %v7779_v22 = vld [vmem:[%s10098_s1 + $0xc8] sm:$0xff]   ;;  %3926 = vmatprep.mubr.bf16.mxu0 %v6999_v21  ;;  %v7801_v26 = vld [vmem:[%s10098_s1 + $0xd8] sm:$0xff]   ;;  %v6986_v27 = vld [vmem:[%s10098_s1 + $0x60] sm:$0xff]  }
   0xa   :  { %3354 = vmatpush1.bf16.msra.mxu1 %v6966_v5  ;;  %v7812_v28 = vld [vmem:[%s10098_s1 + $0xe0] sm:$0xff]   ;;  %v6988_v29 = vld [vmem:[%s10098_s1 + $0x68] sm:$0xff]   ;;  %v6990_v31 = vld [vmem:[%s10098_s1 + $0x70] sm:$0xff]  }
   0xb   :  { %3899 = vmatpush1.bf16.msra.mxu0 %v7696_v6  ;;  %3355 = vmatprep.subr.bf16.mxu1 %v7651_v0  ;;  %v7823_v30 = vld [vmem:[%s10098_s1 + $0xe8] sm:$0xff]   ;;  %v7834_v32 = vld [vmem:[%s10098_s1 + $0xf0] sm:$0xff]   ;;  %v6992_v33 = vld [vmem:[%s10098_s1 + $0x78] sm:$0xff]  }
   0xc   :  { %3900 = vmatprep.subr.bf16.mxu0 %v7651_v0  ;;  %v7845_v34 = vld [vmem:[%s10098_s1 + $0xf8] sm:$0xff]   ;;  %v6997_v36 = vld [vmem:[%s10099_s0 + $0x8] ss:$28 sps:$4 sm:$0xff]   ;;  %v7007_v43 = vld [vmem:[%s10099_s0 + $0x74] ss:$28 sps:$4 sm:$0xff]  }
   0xd   :  { %v6994_v35 = vld [vmem:[%s10099_s0] ss:$28 sps:$4 sm:$0xff]   ;;  %v7019_v40 = vld [vmem:[%s10098_s1 + $0x108] sm:$0xff]   ;;  %v7005_v41 = vld [vmem:[%s10099_s0 + $0x38] ss:$28 sps:$4 sm:$0xff]  }
   0xe   :  { %3356 = vmatpush1.bf16.msra.mxu1 %v6968_v7  ;;  %v7000_v37 = vld [vmem:[%s10098_s1 + $0x100] sm:$0xff]   ;;  %v7001_v38 = vld [vmem:[%s10099_s0 + $0x3c] ss:$28 sps:$4 sm:$0xff]   ;;  %v7038_v45 = vld [vmem:[%s10098_s1 + $0x110] sm:$0xff]  }
   0xf   :  { %3901 = vmatpush1.bf16.msra.mxu0 %v7707_v8  ;;  %3357 = vmatprep.subr.bf16.mxu1 %v7651_v0  ;;  %v7003_v39 = vld [vmem:[%s10099_s0 + $0x44] ss:$28 sps:$4 sm:$0xff]   ;;  %v7009_v44 = vld [vmem:[%s10099_s0 + $0x7c] ss:$28 sps:$4 sm:$0xff]   ;;  %v7011_v47 = vld [vmem:[%s10099_s0 + $0x70] ss:$28 sps:$4 sm:$0xff]  }
  0x10   :  { %3902 = vmatprep.subr.bf16.mxu0 %v7651_v0  ;;  %v7006_v42 = vld [vmem:[%s10099_s0 + $0x40] ss:$28 sps:$4 sm:$0xff]   ;;  %v7012_v48 = vld [vmem:[%s10099_s0 + $0x78] ss:$28 sps:$4 sm:$0xff]   ;;  %v7013_v49 = vld [vmem:[%s10099_s0 + $0xac] ss:$28 sps:$4 sm:$0xff]  }
  0x11   :  { %v7057_v46 = vld [vmem:[%s10098_s1 + $0x118] sm:$0xff]   ;;  %v7015_v50 = vld [vmem:[%s10099_s0 + $0xb4] ss:$28 sps:$4 sm:$0xff]   ;;  %v7076_v51 = vld [vmem:[%s10098_s1 + $0x120] sm:$0xff]  }
  0x12   :  { %3358 = vmatpush1.bf16.msra.mxu1 %v6970_v9  ;;  %v7095_v52 = vld [vmem:[%s10098_s1 + $0x128] sm:$0xff]   ;;  %v7020_v55 = vld [vmem:[%s10099_s0 + $0xe4] ss:$28 sps:$4 sm:$0xff]   ;;  %v7114_v57 = vld [vmem:[%s10098_s1 + $0x130] sm:$0xff]  }
  0x13   :  { %3903 = vmatpush1.bf16.msra.mxu0 %v7718_v10  ;;  %3359 = vmatprep.subr.bf16.mxu1 %v7651_v0  ;;  %v7017_v53 = vld [vmem:[%s10099_s0 + $0xa8] ss:$28 sps:$4 sm:$0xff]   ;;  %v7018_v54 = vld [vmem:[%s10099_s0 + $0xb0] ss:$28 sps:$4 sm:$0xff]   ;;  %v7024_v58 = vld [vmem:[%s10099_s0 + $0xe0] ss:$28 sps:$4 sm:$0xff]  }
  0x14   :  { %3904 = vmatprep.subr.bf16.mxu0 %v7651_v0  ;;  %v7022_v56 = vld [vmem:[%s10099_s0 + $0xec] ss:$28 sps:$4 sm:$0xff]   ;;  %v7026_v60 = vld [vmem:[%s10099_s0 + $0x11c] ss:$28 sps:$4 sm:$0xff]   ;;  %v7028_v61 = vld [vmem:[%s10099_s0 + $0x124] ss:$28 sps:$4 sm:$0xff]  }
  0x15   :  { %v7025_v59 = vld [vmem:[%s10099_s0 + $0xe8] ss:$28 sps:$4 sm:$0xff]   ;;  %v7030_v62 = vld [vmem:[%s10099_s0 + $0x118] ss:$28 sps:$4 sm:$0xff]   ;;  %v7031_v63 = vld [vmem:[%s10099_s0 + $0x120] ss:$28 sps:$4 sm:$0xff]  }
  0x16   :  { %3360 = vmatpush1.bf16.msra.mxu1 %v6972_v11  ;;  %v7032_v1 = vld [vmem:[%s10099_s0 + $0x154] ss:$28 sps:$4 sm:$0xff]   ;;  %v7133_v3 = vld [vmem:[%s10098_s1 + $0x138] sm:$0xff]   ;;  %v7047_v11 = vld [vmem:[%s10099_s0 + $0x1cc] ss:$28 sps:$4 sm:$0xff]  }
  0x17   :  { %3905 = vmatpush1.bf16.msra.mxu0 %v7729_v12  ;;  %3361 = vmatprep.subr.bf16.mxu1 %v7651_v0  ;;  %v7037_v5 = vld [vmem:[%s10099_s0 + $0x158] ss:$28 sps:$4 sm:$0xff]   ;;  %v7044_v9 = vld [vmem:[%s10099_s0 + $0x190] ss:$28 sps:$4 sm:$0xff]  }
  0x18   :  { %3906 = vmatprep.subr.bf16.mxu0 %v7651_v0  ;;  %v7041_v7 = vld [vmem:[%s10099_s0 + $0x194] ss:$28 sps:$4 sm:$0xff]  }
  0x19   :  { %v7058_v19 = vld [vmem:[%s10099_s0 + $0x234] ss:$28 sps:$4 sm:$0xff]  }
  0x1a   :  { %3362 = vmatpush1.bf16.msra.mxu1 %v6974_v13  ;;  %v7050_v13 = vld [vmem:[%s10099_s0 + $0x1c8] ss:$28 sps:$4 sm:$0xff]   ;;  %v7062_v21 = vld [vmem:[%s10099_s0 + $0x230] ss:$28 sps:$4 sm:$0xff]  }
  0x1b   :  { %3907 = vmatpush1.bf16.msra.mxu0 %v7740_v14  ;;  %3363 = vmatprep.subr.bf16.mxu1 %v7651_v0 }
  0x1c   :  { %3908 = vmatprep.subr.bf16.mxu0 %v7651_v0 }
  0x1e   :  { %3364 = vmatpush1.bf16.msra.mxu1 %v6976_v15  ;;  %v7053_v15 = vld [vmem:[%s10099_s0 + $0x204] ss:$28 sps:$4 sm:$0xff]  }
  0x1f   :  { %3909 = vmatpush1.bf16.msra.mxu0 %v7751_v16  ;;  %3365 = vmatprep.subr.bf16.mxu1 %v7651_v0 }
  0x20   :  { %3910 = vmatprep.subr.bf16.mxu0 %v7651_v0 }
  0x22   :  { %3366 = vmatpush1.bf16.msra.mxu1 %v6978_v17  ;;  %v7055_v17 = vld [vmem:[%s10099_s0 + $0x1f8] ss:$28 sps:$4 sm:$0xff]  }
  0x23   :  { %3911 = vmatpush1.bf16.msra.mxu0 %v7762_v18  ;;  %3367 = vmatprep.subr.bf16.mxu1 %v7651_v0 }
  0x24   :  { %3912 = vmatprep.subr.bf16.mxu0 %v7651_v0 }
  0x26   :  { %3368 = vmatpush1.bf16.msra.mxu1 %v6980_v20  ;;  %v7060_v20 = vld [vmem:[%s10099_s0 + $0x23c] ss:$28 sps:$4 sm:$0xff]  }
  0x27   :  { %3913 = vmatpush1.bf16.msra.mxu0 %v7779_v22  ;;  %3369 = vmatprep.subr.bf16.mxu1 %v7651_v0 }
  0x28   :  { %3914 = vmatprep.subr.bf16.mxu0 %v7651_v0 }
  0x2a   :  { %3370 = vmatpush1.bf16.msra.mxu1 %v6982_v23  ;;  %v7064_v23 = vld [vmem:[%s10099_s0 + $0x26c] ss:$28 sps:$4 sm:$0xff]  }
  0x2b   :  { %3915 = vmatpush1.bf16.msra.mxu0 %v7790_v24  ;;  %3371 = vmatprep.subr.bf16.mxu1 %v7651_v0 }
  0x2c   :  { %3916 = vmatprep.subr.bf16.mxu0 %v7651_v0 }
  0x2e   :  { %3372 = vmatpush1.bf16.msra.mxu1 %v6984_v25  ;;  %v7068_v25 = vld [vmem:[%s10099_s0 + $0x268] ss:$28 sps:$4 sm:$0xff]  }
  0x2f   :  { %3917 = vmatpush1.bf16.msra.mxu0 %v7801_v26  ;;  %3373 = vmatprep.subr.bf16.mxu1 %v7651_v0 }
  0x30   :  { %3918 = vmatprep.subr.bf16.mxu0 %v7651_v0 }
  0x32   :  { %3374 = vmatpush1.bf16.msra.mxu1 %v6986_v27  ;;  %v7070_v27 = vld [vmem:[%s10099_s0 + $0x2a4] ss:$28 sps:$4 sm:$0xff]  }
  0x33   :  { %3919 = vmatpush1.bf16.msra.mxu0 %v7812_v28  ;;  %3375 = vmatprep.subr.bf16.mxu1 %v7651_v0 }
  0x34   :  { %3920 = vmatprep.subr.bf16.mxu0 %v7651_v0 }
  0x36   :  { %3376 = vmatpush1.bf16.msra.mxu1 %v6988_v29  ;;  %v7171_v29 = vld [vmem:[%s10098_s1 + $0x148] sm:$0xff]  }
  0x37   :  { %3921 = vmatpush1.bf16.msra.mxu0 %v7823_v30  ;;  %3377 = vmatprep.subr.bf16.mxu1 %v7651_v0 }
  0x38   :  { %3922 = vmatprep.subr.bf16.mxu0 %v7651_v0 }
  0x3a   :  { %3378 = vmatpush1.bf16.msra.mxu1 %v6990_v31  ;;  %v7075_v31 = vld [vmem:[%s10099_s0 + $0x2a8] ss:$28 sps:$4 sm:$0xff]  }
  0x3b   :  { %3923 = vmatpush1.bf16.msra.mxu0 %v7834_v32  ;;  %3379 = vmatprep.subr.bf16.mxu1 %v7651_v0 }
  0x3c   :  { %3924 = vmatprep.subr.bf16.mxu0 %v7651_v0 }
  0x3e   :  { %3380 = vmatpush1.bf16.msra.mxu1 %v6992_v33  ;;  %v7079_v33 = vld [vmem:[%s10099_s0 + $0x2e4] ss:$28 sps:$4 sm:$0xff]  }
  0x3f   :  { %3925 = vmatpush1.bf16.msra.mxu0 %v7845_v34  ;;  %6545 = vmatprep.subr.bf16.mxu1 %v7651_v0 }
  0x40   :  { %4439 = vmatprep.subr.bf16.mxu0 %v7651_v0 }
  0x41   :  { %3382 = vmatmul.mubr.bf16.vlgmr.msra.gmra.mrb[0].mxu1 %v6994_v35  ;;  %v7082_v35 = vld [vmem:[%s10099_s0 + $0x2e0] ss:$28 sps:$4 sm:$0xff]  }
  0x42   :  { %3927 = vmatmul.mubr.bf16.vlgmr.msra.gmra.mrb[0].mxu0 %v6997_v36  ;;  %6561 = vmatpush1.bf16.msra.mxu1 %v7675_v2  ;;  %v7034_v2 = vld [vmem:[%s10099_s0 + $0x15c] ss:$28 sps:$4 sm:$0xff]   ;;  %v7083_v36 = vld [vmem:[%s10099_s0 + $0x314] ss:$28 sps:$4 sm:$0xff]  }
  0x43   :  { %4440 = vmatpush1.bf16.msra.mxu0 %v7000_v37  ;;  %3389 = vmatprep.mubr.bf16.mxu1 %v7001_v38  ;;  %v7085_v37 = vld [vmem:[%s10099_s0 + $0x31c] ss:$28 sps:$4 sm:$0xff]   ;;  %v7087_v38 = vld [vmem:[%s10099_s0 + $0x310] ss:$28 sps:$4 sm:$0xff]  }
  0x44   :  { %3934 = vmatprep.mubr.bf16.mxu0 %v7003_v39  ;;  %4441 = vmatprep.subr.bf16.mxu0 %v7651_v0  ;;  %v7088_v39 = vld [vmem:[%s10099_s0 + $0x318] ss:$28 sps:$4 sm:$0xff]  }
  0x45   :  { %6546 = vmatprep.subr.bf16.mxu1 %v7651_v0 }
  0x46   :  { %6562 = vmatpush1.bf16.msra.mxu1 %v7685_v4  ;;  %v7036_v4 = vld [vmem:[%s10099_s0 + $0x150] ss:$28 sps:$4 sm:$0xff]  }
  0x47   :  { %4442 = vmatpush1.bf16.msra.mxu0 %v7019_v40  ;;  %6547 = vmatprep.subr.bf16.mxu1 %v7651_v0  ;;  %v7089_v40 = vld [vmem:[%s10099_s0 + $0x34c] ss:$28 sps:$4 sm:$0xff]  }
  0x48   :  { %4443 = vmatprep.subr.bf16.mxu0 %v7651_v0 }
  0x49   :  { %3390 = vmatmul.mubr.bf16.gmra.mrb[4].mxu1 %v7005_v41  ;;  %v7091_v41 = vld [vmem:[%s10099_s0 + $0x354] ss:$28 sps:$4 sm:$0xff]  }
  0x4a   :  { %3935 = vmatmul.mubr.bf16.gmra.mrb[4].mxu0 %v7006_v42  ;;  %3397 = vmatprep.mubr.bf16.mxu1 %v7007_v43  ;;  %v7190_v42 = vld [vmem:[%s10098_s1 + $0x150] sm:$0xff]   ;;  %v7093_v43 = vld [vmem:[%s10099_s0 + $0x348] ss:$28 sps:$4 sm:$0xff]  }
  0x4b   :  { %3942 = vmatprep.mubr.bf16.mxu0 %v7009_v44  ;;  %4444 = vmatpush1.bf16.msra.mxu0 %v7038_v45  ;;  %v7094_v44 = vld [vmem:[%s10099_s0 + $0x350] ss:$28 sps:$4 sm:$0xff]   ;;  %v7096_v45 = vld [vmem:[%s10099_s0 + $0x384] ss:$28 sps:$4 sm:$0xff]  }
  0x4c   :  { %6563 = vmatpush1.bf16.msra.mxu1 %v7696_v6  ;;  %4445 = vmatprep.subr.bf16.mxu0 %v7651_v0  ;;  %v7039_v6 = vld [vmem:[%s10099_s0 + $0x18c] ss:$28 sps:$4 sm:$0xff]  }
  0x4d   :  { %6548 = vmatprep.subr.bf16.mxu1 %v7651_v0 }
  0x4f   :  { %4446 = vmatpush1.bf16.msra.mxu0 %v7057_v46  ;;  %v7098_v46 = vld [vmem:[%s10099_s0 + $0x38c] ss:$28 sps:$4 sm:$0xff]  }
  0x50   :  { %6564 = vmatpush1.bf16.msra.mxu1 %v7707_v8  ;;  %4447 = vmatprep.subr.bf16.mxu0 %v7651_v0  ;;  %v7043_v8 = vld [vmem:[%s10099_s0 + $0x188] ss:$28 sps:$4 sm:$0xff]  }
  0x51   :  { %3398 = vmatmul.mubr.bf16.gmra.mrb[8].mxu1 %v7011_v47  ;;  %6549 = vmatprep.subr.bf16.mxu1 %v7651_v0  ;;  %v7100_v47 = vld [vmem:[%s10099_s0 + $0x380] ss:$28 sps:$4 sm:$0xff]  }
  0x52   :  { %3943 = vmatmul.mubr.bf16.gmra.mrb[8].mxu0 %v7012_v48  ;;  %3405 = vmatprep.mubr.bf16.mxu1 %v7013_v49  ;;  %v7101_v48 = vld [vmem:[%s10099_s0 + $0x388] ss:$28 sps:$4 sm:$0xff]   ;;  %v7102_v49 = vld [vmem:[%s10099_s0 + $0x3bc] ss:$28 sps:$4 sm:$0xff]  }
  0x53   :  { %3950 = vmatprep.mubr.bf16.mxu0 %v7015_v50  ;;  %4448 = vmatpush1.bf16.msra.mxu0 %v7076_v51  ;;  %v7104_v50 = vld [vmem:[%s10099_s0 + $0x3c4] ss:$28 sps:$4 sm:$0xff]   ;;  %v7106_v51 = vld [vmem:[%s10099_s0 + $0x3b8] ss:$28 sps:$4 sm:$0xff]  }
  0x54   :  { %4449 = vmatprep.subr.bf16.mxu0 %v7651_v0  ;;  %6565 = vmatpush1.bf16.msra.mxu1 %v7718_v10  ;;  %v7045_v10 = vld [vmem:[%s10099_s0 + $0x1c4] ss:$28 sps:$4 sm:$0xff]  }
  0x55   :  { %6550 = vmatprep.subr.bf16.mxu1 %v7651_v0 }
  0x57   :  { %4450 = vmatpush1.bf16.msra.mxu0 %v7095_v52  ;;  %v7107_v52 = vld [vmem:[%s10099_s0 + $0x3c0] ss:$28 sps:$4 sm:$0xff]  }
  0x58   :  { %4451 = vmatprep.subr.bf16.mxu0 %v7651_v0  ;;  %6566 = vmatpush1.bf16.msra.mxu1 %v7729_v12  ;;  %v7049_v12 = vld [vmem:[%s10099_s0 + $0x1c0] ss:$28 sps:$4 sm:$0xff]  }
  0x59   :  { %3406 = vmatmul.mubr.bf16.gmra.mrb[12].mxu1 %v7017_v53  ;;  %6551 = vmatprep.subr.bf16.mxu1 %v7651_v0  ;;  %v7108_v53 = vld [vmem:[%s10099_s0 + $0x3f4] ss:$28 sps:$4 sm:$0xff]  }
  0x5a   :  { %3951 = vmatmul.mubr.bf16.gmra.mrb[12].mxu0 %v7018_v54  ;;  %3413 = vmatprep.mubr.bf16.mxu1 %v7020_v55  ;;  %v7110_v54 = vld [vmem:[%s10099_s0 + $0x3fc] ss:$28 sps:$4 sm:$0xff]  }
  0x5b   :  { %3958 = vmatprep.mubr.bf16.mxu0 %v7022_v56  ;;  %4452 = vmatpush1.bf16.msra.mxu0 %v7114_v57  ;;  %v7209_v55 = vld [vmem:[%s10098_s1 + $0x158] sm:$0xff]   ;;  %v7112_v56 = vld [vmem:[%s10099_s0 + $0x3f0] ss:$28 sps:$4 sm:$0xff]  }
  0x5c   :  { %4453 = vmatprep.subr.bf16.mxu0 %v7651_v0  ;;  %6567 = vmatpush1.bf16.msra.mxu1 %v7740_v14  ;;  %v7051_v14 = vld [vmem:[%s10099_s0 + $0x1fc] ss:$28 sps:$4 sm:$0xff]  }
  0x5d   :  { %6552 = vmatprep.subr.bf16.mxu1 %v7651_v0  ;;  %v7113_v57 = vld [vmem:[%s10099_s0 + $0x3f8] ss:$28 sps:$4 sm:$0xff]  }
  0x5f   :  { %4454 = vmatpush1.bf16.msra.mxu0 %v7133_v3  ;;  %v7127_v3 = vld [vmem:[%s10099_s0 + $0x49c] ss:$28 sps:$4 sm:$0xff]  }
  0x60   :  { %6568 = vmatpush1.bf16.msra.mxu1 %v7751_v16  ;;  %4455 = vmatprep.subr.bf16.mxu0 %v7651_v0  ;;  %v7152_v16 = vld [vmem:[%s10098_s1 + $0x140] sm:$0xff]  }
  0x61   :  { %3414 = vmatmul.mubr.bf16.gmra.mrb[16].mxu1 %v7024_v58  ;;  %6553 = vmatprep.subr.bf16.mxu1 %v7651_v0  ;;  %v7115_v58 = vld [vmem:[%s10099_s0 + $0x42c] ss:$28 sps:$4 sm:$0xff]  }
  0x62   :  { %3959 = vmatmul.mubr.bf16.gmra.mrb[16].mxu0 %v7025_v59  ;;  %3421 = vmatprep.mubr.bf16.mxu1 %v7026_v60  ;;  %v7117_v59 = vld [vmem:[%s10099_s0 + $0x434] ss:$28 sps:$4 sm:$0xff]   ;;  %v7119_v60 = vld [vmem:[%s10099_s0 + $0x428] ss:$28 sps:$4 sm:$0xff]  }
  0x63   :  { %3966 = vmatprep.mubr.bf16.mxu0 %v7028_v61  ;;  %4456 = vmatpush1.bf16.msra.mxu0 %v7152_v16  ;;  %v7120_v61 = vld [vmem:[%s10099_s0 + $0x430] ss:$28 sps:$4 sm:$0xff]   ;;  %v7146_v16 = vld [vmem:[%s10099_s0 + $0x544] ss:$28 sps:$4 sm:$0xff]  }
  0x64   :  { %6569 = vmatpush1.bf16.msra.mxu1 %v7762_v18  ;;  %v7056_v18 = vld [vmem:[%s10099_s0 + $0x200] ss:$28 sps:$4 sm:$0xff]   ;;  %4457 = vmatprep.subr.bf16.mxu0 %v7651_v0 }
  0x65   :  { %6554 = vmatprep.subr.bf16.mxu1 %v7651_v0 }
  0x67   :  { %4458 = vmatpush1.bf16.msra.mxu0 %v7171_v29  ;;  %v7165_v29 = vld [vmem:[%s10099_s0 + $0x5ec] ss:$28 sps:$4 sm:$0xff]  }
  0x68   :  { %6570 = vmatpush1.bf16.msra.mxu1 %v7779_v22  ;;  %v7063_v22 = vld [vmem:[%s10099_s0 + $0x238] ss:$28 sps:$4 sm:$0xff]   ;;  %4459 = vmatprep.subr.bf16.mxu0 %v7651_v0 }
  0x69   :  { %3422 = vmatmul.mubr.bf16.gmra.mrb[20].mxu1 %v7030_v62  ;;  %6555 = vmatprep.subr.bf16.mxu1 %v7651_v0  ;;  %v7121_v62 = vld [vmem:[%s10099_s0 + $0x464] ss:$28 sps:$4 sm:$0xff]  }
  0x6a   :  { %3967 = vmatmul.mubr.bf16.gmra.mrb[20].mxu0 %v7031_v63  ;;  %3429 = vmatprep.mubr.bf16.mxu1 %v7032_v1  ;;  %v7123_v63 = vld [vmem:[%s10099_s0 + $0x46c] ss:$28 sps:$4 sm:$0xff]   ;;  %v7125_v1 = vld [vmem:[%s10099_s0 + $0x460] ss:$28 sps:$4 sm:$0xff]  }
  0x6b   :  { %3974 = vmatprep.mubr.bf16.mxu0 %v7034_v2  ;;  %4460 = vmatpush1.bf16.msra.mxu0 %v7190_v42  ;;  %v7126_v2 = vld [vmem:[%s10099_s0 + $0x468] ss:$28 sps:$4 sm:$0xff]  }
  0x6c   :  { %6571 = vmatpush1.bf16.msra.mxu1 %v7790_v24  ;;  %v7066_v24 = vld [vmem:[%s10099_s0 + $0x274] ss:$28 sps:$4 sm:$0xff]   ;;  %4461 = vmatprep.subr.bf16.mxu0 %v7651_v0 }
  0x6d   :  { %6556 = vmatprep.subr.bf16.mxu1 %v7651_v0 }
  0x6f   :  { %4462 = vmatpush1.bf16.msra.mxu0 %v7209_v55  ;;  %v7285_v55 = vld [vmem:[%s10098_s1 + $0x178] sm:$0xff]  }
  0x70   :  { %6572 = vmatpush1.bf16.msra.mxu1 %v7801_v26  ;;  %v7069_v26 = vld [vmem:[%s10099_s0 + $0x270] ss:$28 sps:$4 sm:$0xff]   ;;  %4463 = vmatprep.subr.bf16.mxu0 %v7651_v0 }
  0x71   :  { %3430 = vmatmul.mubr.bf16.gmra.mrb[24].mxu1 %v7036_v4  ;;  %6557 = vmatprep.subr.bf16.mxu1 %v7651_v0  ;;  %v7129_v4 = vld [vmem:[%s10099_s0 + $0x4a4] ss:$28 sps:$4 sm:$0xff]  }
  0x72   :  { %3975 = vmatmul.mubr.bf16.gmra.mrb[24].mxu0 %v7037_v5  ;;  %3437 = vmatprep.mubr.bf16.mxu1 %v7039_v6  ;;  %v7228_v5 = vld [vmem:[%s10098_s1 + $0x160] sm:$0xff]   ;;  %v7131_v6 = vld [vmem:[%s10099_s0 + $0x498] ss:$28 sps:$4 sm:$0xff]  }
  0x73   :  { %3982 = vmatprep.mubr.bf16.mxu0 %v7041_v7  ;;  %v7132_v7 = vld [vmem:[%s10099_s0 + $0x4a0] ss:$28 sps:$4 sm:$0xff]   ;;  %4464 = vmatpush1.bf16.msra.mxu0 %v7228_v5  ;;  %v7196_v5 = vld [vmem:[%s10099_s0 + $0x6d0] ss:$28 sps:$4 sm:$0xff]  }
  0x74   :  { %6573 = vmatpush1.bf16.msra.mxu1 %v7812_v28  ;;  %v7072_v28 = vld [vmem:[%s10099_s0 + $0x2ac] ss:$28 sps:$4 sm:$0xff]   ;;  %4465 = vmatprep.subr.bf16.mxu0 %v7651_v0 }
  0x75   :  { %6558 = vmatprep.subr.bf16.mxu1 %v7651_v0 }
  0x78   :  { %6574 = vmatpush1.bf16.msra.mxu1 %v7823_v30  ;;  %v7074_v30 = vld [vmem:[%s10099_s0 + $0x2a0] ss:$28 sps:$4 sm:$0xff]  }
  0x79   :  { %3438 = vmatmul.mubr.bf16.gmra.mrb[28].mxu1 %v7043_v8  ;;  %6559 = vmatprep.subr.bf16.mxu1 %v7651_v0  ;;  %v7134_v8 = vld [vmem:[%s10099_s0 + $0x4d4] ss:$28 sps:$4 sm:$0xff]  }
  0x7a   :  { %3983 = vmatmul.mubr.bf16.gmra.mrb[28].mxu0 %v7044_v9  ;;  %3445 = vmatprep.mubr.bf16.mxu1 %v7045_v10  ;;  %v7136_v9 = vld [vmem:[%s10099_s0 + $0x4dc] ss:$28 sps:$4 sm:$0xff]   ;;  %v7138_v10 = vld [vmem:[%s10099_s0 + $0x4d0] ss:$28 sps:$4 sm:$0xff]  }
  0x7b   :  { %3990 = vmatprep.mubr.bf16.mxu0 %v7047_v11  ;;  %v7139_v11 = vld [vmem:[%s10099_s0 + $0x4d8] ss:$28 sps:$4 sm:$0xff]  }
  0x7c   :  { %6575 = vmatpush1.bf16.msra.mxu1 %v7834_v32  ;;  %v7077_v32 = vld [vmem:[%s10099_s0 + $0x2dc] ss:$28 sps:$4 sm:$0xff]  }
  0x7d   :  { %6560 = vmatprep.subr.bf16.mxu1 %v7651_v0 }
  0x80   :  { %6576 = vmatpush1.bf16.msra.mxu1 %v7845_v34  ;;  %v7081_v34 = vld [vmem:[%s10099_s0 + $0x2d8] ss:$28 sps:$4 sm:$0xff]  }
  0x81   :  { %3446 = vmatmul.mubr.bf16.gmra.mrb[32].mxu1 %v7049_v12  ;;  %v7140_v12 = vld [vmem:[%s10099_s0 + $0x50c] ss:$28 sps:$4 sm:$0xff]  }
  0x82   :  { %3991 = vmatmul.mubr.bf16.gmra.mrb[32].mxu0 %v7050_v13  ;;  %3453 = vmatprep.mubr.bf16.mxu1 %v7051_v14  ;;  %v7142_v13 = vld [vmem:[%s10099_s0 + $0x514] ss:$28 sps:$4 sm:$0xff]   ;;  %v7144_v14 = vld [vmem:[%s10099_s0 + $0x508] ss:$28 sps:$4 sm:$0xff]  }
  0x83   :  { %3998 = vmatprep.mubr.bf16.mxu0 %v7053_v15  ;;  %v7145_v15 = vld [vmem:[%s10099_s0 + $0x510] ss:$28 sps:$4 sm:$0xff]  }
  0x89   :  { %3454 = vmatmul.mubr.bf16.gmra.mrb[36].mxu1 %v7055_v17  ;;  %v7148_v17 = vld [vmem:[%s10099_s0 + $0x54c] ss:$28 sps:$4 sm:$0xff]  }
  0x8a   :  { %3999 = vmatmul.mubr.bf16.gmra.mrb[36].mxu0 %v7056_v18  ;;  %3461 = vmatprep.mubr.bf16.mxu1 %v7058_v19  ;;  %v7247_v18 = vld [vmem:[%s10098_s1 + $0x168] sm:$0xff]   ;;  %v7150_v19 = vld [vmem:[%s10099_s0 + $0x540] ss:$28 sps:$4 sm:$0xff]  }
  0x8b   :  { %4006 = vmatprep.mubr.bf16.mxu0 %v7060_v20  ;;  %v7151_v20 = vld [vmem:[%s10099_s0 + $0x548] ss:$28 sps:$4 sm:$0xff]   ;;  %4466 = vmatpush1.bf16.msra.mxu0 %v7247_v18 }
  0x8c   :  { %4467 = vmatprep.subr.bf16.mxu0 %v7651_v0 }
  0x91   :  { %3462 = vmatmul.mubr.bf16.gmra.mrb[40].mxu1 %v7062_v21  ;;  %v7153_v21 = vld [vmem:[%s10099_s0 + $0x57c] ss:$28 sps:$4 sm:$0xff]  }
  0x92   :  { %4007 = vmatmul.mubr.bf16.gmra.mrb[40].mxu0 %v7063_v22  ;;  %3469 = vmatprep.mubr.bf16.mxu1 %v7064_v23  ;;  %v7155_v22 = vld [vmem:[%s10099_s0 + $0x584] ss:$28 sps:$4 sm:$0xff]   ;;  %v7157_v23 = vld [vmem:[%s10099_s0 + $0x578] ss:$28 sps:$4 sm:$0xff]  }
  0x93   :  { %4014 = vmatprep.mubr.bf16.mxu0 %v7066_v24  ;;  %v7158_v24 = vld [vmem:[%s10099_s0 + $0x580] ss:$28 sps:$4 sm:$0xff]  }
  0x99   :  { %3470 = vmatmul.mubr.bf16.gmra.mrb[44].mxu1 %v7068_v25  ;;  %v7159_v25 = vld [vmem:[%s10099_s0 + $0x5b4] ss:$28 sps:$4 sm:$0xff]  }
  0x9a   :  { %4015 = vmatmul.mubr.bf16.gmra.mrb[44].mxu0 %v7069_v26  ;;  %3477 = vmatprep.mubr.bf16.mxu1 %v7070_v27  ;;  %v7161_v26 = vld [vmem:[%s10099_s0 + $0x5bc] ss:$28 sps:$4 sm:$0xff]   ;;  %v7163_v27 = vld [vmem:[%s10099_s0 + $0x5b0] ss:$28 sps:$4 sm:$0xff]  }
  0x9b   :  { %4022 = vmatprep.mubr.bf16.mxu0 %v7072_v28  ;;  %v7164_v28 = vld [vmem:[%s10099_s0 + $0x5b8] ss:$28 sps:$4 sm:$0xff]  }
  0xa1   :  { %3478 = vmatmul.mubr.bf16.gmra.mrb[48].mxu1 %v7074_v30  ;;  %v7167_v30 = vld [vmem:[%s10099_s0 + $0x5f4] ss:$28 sps:$4 sm:$0xff]  }
  0xa2   :  { %4023 = vmatmul.mubr.bf16.gmra.mrb[48].mxu0 %v7075_v31  ;;  %3485 = vmatprep.mubr.bf16.mxu1 %v7077_v32  ;;  %v7266_v31 = vld [vmem:[%s10098_s1 + $0x170] sm:$0xff]  }
  0xa3   :  { %4030 = vmatprep.mubr.bf16.mxu0 %v7079_v33  ;;  %4468 = vmatpush1.bf16.msra.mxu0 %v7266_v31 }
  0xa4   :  { %4469 = vmatprep.subr.bf16.mxu0 %v7651_v0 }
  0xa7   :  { %4470 = vmatpush1.bf16.msra.mxu0 %v7285_v55 }
  0xa9   :  { %3486 = vmatmul.mubr.bf16.gmra.mrb[52].mxu1 %v7081_v34  ;;  %v7169_v34 = vld [vmem:[%s10099_s0 + $0x5e8] ss:$28 sps:$4 sm:$0xff]  }
  0xaa   :  { %4031 = vmatmul.mubr.bf16.gmra.mrb[52].mxu0 %v7082_v35  ;;  %3493 = vmatprep.mubr.bf16.mxu1 %v7083_v36  ;;  %v7170_v36 = vld [vmem:[%s10099_s0 + $0x5f0] ss:$28 sps:$4 sm:$0xff]  }
  0xab   :  { %4038 = vmatprep.mubr.bf16.mxu0 %v7085_v37  ;;  %v7172_v37 = vld [vmem:[%s10099_s0 + $0x624] ss:$28 sps:$4 sm:$0xff]  }
  0xb1   :  { %3494 = vmatmul.mubr.bf16.gmra.mrb[56].mxu1 %v7087_v38 }
  0xb2   :  { %4039 = vmatmul.mubr.bf16.gmra.mrb[56].mxu0 %v7088_v39  ;;  %3501 = vmatprep.mubr.bf16.mxu1 %v7089_v40  ;;  %v7174_v39 = vld [vmem:[%s10099_s0 + $0x62c] ss:$28 sps:$4 sm:$0xff]  }
  0xb3   :  { %4046 = vmatprep.mubr.bf16.mxu0 %v7091_v41  ;;  %v7176_v41 = vld [vmem:[%s10099_s0 + $0x620] ss:$28 sps:$4 sm:$0xff]  }
  0xb9   :  { %3502 = vmatmul.mubr.bf16.gmra.mrb[60].mxu1 %v7093_v43  ;;  %v7177_v43 = vld [vmem:[%s10099_s0 + $0x628] ss:$28 sps:$4 sm:$0xff]  }
  0xba   :  { %4047 = vmatmul.mubr.bf16.gmra.mrb[60].mxu0 %v7094_v44  ;;  %3509 = vmatprep.mubr.bf16.mxu1 %v7096_v45  ;;  %v7178_v44 = vld [vmem:[%s10099_s0 + $0x65c] ss:$28 sps:$4 sm:$0xff]  }
  0xbb   :  { %4054 = vmatprep.mubr.bf16.mxu0 %v7098_v46  ;;  %v7180_v46 = vld [vmem:[%s10099_s0 + $0x664] ss:$28 sps:$4 sm:$0xff]  }
  0xc1   :  { %3510 = vmatmul.mubr.bf16.gmra.mrb[64].mxu1 %v7100_v47 }
  0xc2   :  { %4055 = vmatmul.mubr.bf16.gmra.mrb[64].mxu0 %v7101_v48  ;;  %3517 = vmatprep.mubr.bf16.mxu1 %v7102_v49  ;;  %v7182_v49 = vld [vmem:[%s10099_s0 + $0x658] ss:$28 sps:$4 sm:$0xff]  }
  0xc3   :  { %4062 = vmatprep.mubr.bf16.mxu0 %v7104_v50 }
  0xc9   :  { %3518 = vmatmul.mubr.bf16.gmra.mrb[68].mxu1 %v7106_v51  ;;  %v7183_v51 = vld [vmem:[%s10099_s0 + $0x660] ss:$28 sps:$4 sm:$0xff]  }
  0xca   :  { %4063 = vmatmul.mubr.bf16.gmra.mrb[68].mxu0 %v7107_v52  ;;  %3525 = vmatprep.mubr.bf16.mxu1 %v7108_v53  ;;  %v7184_v52 = vld [vmem:[%s10099_s0 + $0x694] ss:$28 sps:$4 sm:$0xff]  }
  0xcb   :  { %4070 = vmatprep.mubr.bf16.mxu0 %v7110_v54  ;;  %v7186_v54 = vld [vmem:[%s10099_s0 + $0x69c] ss:$28 sps:$4 sm:$0xff]  }
  0xd1   :  { %3526 = vmatmul.mubr.bf16.gmra.mrb[72].mxu1 %v7112_v56 }
  0xd2   :  { %4071 = vmatmul.mubr.bf16.gmra.mrb[72].mxu0 %v7113_v57  ;;  %3533 = vmatprep.mubr.bf16.mxu1 %v7115_v58  ;;  %v7188_v58 = vld [vmem:[%s10099_s0 + $0x690] ss:$28 sps:$4 sm:$0xff]  }
  0xd3   :  { %4078 = vmatprep.mubr.bf16.mxu0 %v7117_v59 }
  0xd9   :  { %3534 = vmatmul.mubr.bf16.gmra.mrb[76].mxu1 %v7119_v60  ;;  %v7189_v60 = vld [vmem:[%s10099_s0 + $0x698] ss:$28 sps:$4 sm:$0xff]  }
  0xda   :  { %4079 = vmatmul.mubr.bf16.gmra.mrb[76].mxu0 %v7120_v61  ;;  %3541 = vmatprep.mubr.bf16.mxu1 %v7121_v62  ;;  %v7191_v61 = vld [vmem:[%s10099_s0 + $0x6cc] ss:$28 sps:$4 sm:$0xff]  }
  0xdb   :  { %4086 = vmatprep.mubr.bf16.mxu0 %v7123_v63  ;;  %v7193_v63 = vld [vmem:[%s10099_s0 + $0x6d4] ss:$28 sps:$4 sm:$0xff]  }
  0xe1   :  { %3542 = vmatmul.mubr.bf16.gmra.mrb[80].mxu1 %v7125_v1 }
  0xe2   :  { %4087 = vmatmul.mubr.bf16.gmra.mrb[80].mxu0 %v7126_v2  ;;  %3549 = vmatprep.mubr.bf16.mxu1 %v7127_v3  ;;  %v7195_v3 = vld [vmem:[%s10099_s0 + $0x6c8] ss:$28 sps:$4 sm:$0xff]  }
  0xe3   :  { %4094 = vmatprep.mubr.bf16.mxu0 %v7129_v4 }
  0xe9   :  { %3550 = vmatmul.mubr.bf16.gmra.mrb[84].mxu1 %v7131_v6  ;;  %v7197_v6 = vld [vmem:[%s10099_s0 + $0x704] ss:$28 sps:$4 sm:$0xff]  }
  0xea   :  { %4095 = vmatmul.mubr.bf16.gmra.mrb[84].mxu0 %v7132_v7  ;;  %3557 = vmatprep.mubr.bf16.mxu1 %v7134_v8  ;;  %v7199_v8 = vld [vmem:[%s10099_s0 + $0x70c] ss:$28 sps:$4 sm:$0xff]  }
  0xeb   :  { %4102 = vmatprep.mubr.bf16.mxu0 %v7136_v9 }
  0xf1   :  { %3558 = vmatmul.mubr.bf16.gmra.mrb[88].mxu1 %v7138_v10 }
  0xf2   :  { %4103 = vmatmul.mubr.bf16.gmra.mrb[88].mxu0 %v7139_v11  ;;  %3565 = vmatprep.mubr.bf16.mxu1 %v7140_v12  ;;  %v7201_v11 = vld [vmem:[%s10099_s0 + $0x700] ss:$28 sps:$4 sm:$0xff]  }
  0xf3   :  { %4110 = vmatprep.mubr.bf16.mxu0 %v7142_v13  ;;  %v7202_v13 = vld [vmem:[%s10099_s0 + $0x708] ss:$28 sps:$4 sm:$0xff]  }
  0xf9   :  { %3566 = vmatmul.mubr.bf16.gmra.mrb[92].mxu1 %v7144_v14  ;;  %v7203_v14 = vld [vmem:[%s10099_s0 + $0x73c] ss:$28 sps:$4 sm:$0xff]  }
  0xfa   :  { %4111 = vmatmul.mubr.bf16.gmra.mrb[92].mxu0 %v7145_v15  ;;  %3573 = vmatprep.mubr.bf16.mxu1 %v7146_v16  ;;  %v7205_v16 = vld [vmem:[%s10099_s0 + $0x744] ss:$28 sps:$4 sm:$0xff]  }
  0xfb   :  { %4118 = vmatprep.mubr.bf16.mxu0 %v7148_v17 }
 0x101   :  { %3574 = vmatmul.mubr.bf16.gmra.mrb[96].mxu1 %v7150_v19  ;;  %v7207_v19 = vld [vmem:[%s10099_s0 + $0x738] ss:$28 sps:$4 sm:$0xff]  }
 0x102   :  { %4119 = vmatmul.mubr.bf16.gmra.mrb[96].mxu0 %v7151_v20  ;;  %3581 = vmatprep.mubr.bf16.mxu1 %v7153_v21  ;;  %v7208_v21 = vld [vmem:[%s10099_s0 + $0x740] ss:$28 sps:$4 sm:$0xff]  }
 0x103   :  { %4126 = vmatprep.mubr.bf16.mxu0 %v7155_v22  ;;  %v7210_v22 = vld [vmem:[%s10099_s0 + $0x774] ss:$28 sps:$4 sm:$0xff]  }
 0x109   :  { %3582 = vmatmul.mubr.bf16.gmra.mrb[100].mxu1 %v7157_v23 }
 0x10a   :  { %4127 = vmatmul.mubr.bf16.gmra.mrb[100].mxu0 %v7158_v24  ;;  %3589 = vmatprep.mubr.bf16.mxu1 %v7159_v25  ;;  %v7212_v24 = vld [vmem:[%s10099_s0 + $0x77c] ss:$28 sps:$4 sm:$0xff]  }
 0x10b   :  { %4134 = vmatprep.mubr.bf16.mxu0 %v7161_v26 }
 0x111   :  { %3590 = vmatmul.mubr.bf16.gmra.mrb[104].mxu1 %v7163_v27  ;;  %v7214_v27 = vld [vmem:[%s10099_s0 + $0x770] ss:$28 sps:$4 sm:$0xff]  }
 0x112   :  { %4135 = vmatmul.mubr.bf16.gmra.mrb[104].mxu0 %v7164_v28  ;;  %3597 = vmatprep.mubr.bf16.mxu1 %v7165_v29  ;;  %v7215_v29 = vld [vmem:[%s10099_s0 + $0x778] ss:$28 sps:$4 sm:$0xff]  }
 0x113   :  { %4142 = vmatprep.mubr.bf16.mxu0 %v7167_v30  ;;  %v7216_v30 = vld [vmem:[%s10099_s0 + $0x7ac] ss:$28 sps:$4 sm:$0xff]  }
 0x114   :  { %v8265_v32 = vpop.f32.mrb[0].mxu1 }
 0x115   :  { %v3385_v33 = vpop.f32.mrb[1].mxu1 }
 0x116   :  { %v8271_v35 = vpop.f32.mrb[2].mxu1  ;;  %v7218_v33 = vld [vmem:[%s10099_s0 + $0x7b4] ss:$28 sps:$4 sm:$0xff]  }
 0x117   :  { %v3388_v38 = vpop.f32.mrb[3].mxu1 }
 0x119   :  { %3598 = vmatmul.mubr.bf16.gmra.mrb[108].mxu1 %v7169_v34 }
 0x11a   :  { %4143 = vmatmul.mubr.bf16.gmra.mrb[108].mxu0 %v7170_v36  ;;  %3605 = vmatprep.mubr.bf16.mxu1 %v7172_v37  ;;  %v7220_v37 = vld [vmem:[%s10099_s0 + $0x7a8] ss:$28 sps:$4 sm:$0xff]  }
 0x11b   :  { %4150 = vmatprep.mubr.bf16.mxu0 %v7174_v39  ;;  %v7221_v39 = vld [vmem:[%s10099_s0 + $0x7b0] ss:$28 sps:$4 sm:$0xff]  }
 0x11c   :  { %v8282_v0 = vpop.f32.mrb[4].mxu1 }
 0x11d   :  { %v3393_v40 = vpop.f32.mrb[5].mxu1 }
 0x11e   :  { %v8287_v42 = vpop.f32.mrb[6].mxu1  ;;  %v7222_v40 = vld [vmem:[%s10099_s0 + $0x7e4] ss:$28 sps:$4 sm:$0xff]  }
 0x11f   :  { %v3396_v45 = vpop.f32.mrb[7].mxu1 }
 0x121   :  { %3606 = vmatmul.mubr.bf16.gmra.mrb[112].mxu1 %v7176_v41 }
 0x122   :  { %4151 = vmatmul.mubr.bf16.gmra.mrb[112].mxu0 %v7177_v43  ;;  %3613 = vmatprep.mubr.bf16.mxu1 %v7178_v44  ;;  %v7224_v43 = vld [vmem:[%s10099_s0 + $0x7ec] ss:$28 sps:$4 sm:$0xff]  }
 0x123   :  { %4158 = vmatprep.mubr.bf16.mxu0 %v7180_v46  ;;  %v7226_v46 = vld [vmem:[%s10099_s0 + $0x7e0] ss:$28 sps:$4 sm:$0xff]  }
 0x124   :  { %v8298_v47 = vpop.f32.mrb[8].mxu1 }
 0x125   :  { %v3401_v48 = vpop.f32.mrb[9].mxu1 }
 0x126   :  { %v8303_v50 = vpop.f32.mrb[10].mxu1 }
 0x127   :  { %v3404_v53 = vpop.f32.mrb[11].mxu1 }
 0x128   :  { %v7231_v53 = vld [vmem:[%s10099_s0 + $0x824] ss:$28 sps:$4 sm:$0xff]  }
 0x129   :  { %3614 = vmatmul.mubr.bf16.gmra.mrb[116].mxu1 %v7182_v49  ;;  %v7227_v49 = vld [vmem:[%s10099_s0 + $0x7e8] ss:$28 sps:$4 sm:$0xff]  }
 0x12a   :  { %4159 = vmatmul.mubr.bf16.gmra.mrb[116].mxu0 %v7183_v51  ;;  %3621 = vmatprep.mubr.bf16.mxu1 %v7184_v52  ;;  %v7229_v51 = vld [vmem:[%s10099_s0 + $0x81c] ss:$28 sps:$4 sm:$0xff]  }
 0x12b   :  { %4166 = vmatprep.mubr.bf16.mxu0 %v7186_v54 }
 0x12c   :  { %v8317_v56 = vpop.f32.mrb[12].mxu1 }
 0x12d   :  { %v3409_v57 = vpop.f32.mrb[13].mxu1 }
 0x12e   :  { %v8322_v59 = vpop.f32.mrb[14].mxu1  ;;  %v7233_v57 = vld [vmem:[%s10099_s0 + $0x818] ss:$28 sps:$4 sm:$0xff]  }
 0x12f   :  { %v3412_v62 = vpop.f32.mrb[15].mxu1 }
 0x131   :  { %3622 = vmatmul.mubr.bf16.gmra.mrb[120].mxu1 %v7188_v58 }
 0x132   :  { %4167 = vmatmul.mubr.bf16.gmra.mrb[120].mxu0 %v7189_v60  ;;  %3629 = vmatprep.mubr.bf16.mxu1 %v7191_v61  ;;  %v7234_v60 = vld [vmem:[%s10099_s0 + $0x820] ss:$28 sps:$4 sm:$0xff]   ;;  %v7235_v61 = vld [vmem:[%s10099_s0 + $0x854] ss:$28 sps:$4 sm:$0xff]  }
 0x133   :  { %4174 = vmatprep.mubr.bf16.mxu0 %v7193_v63  ;;  %v7237_v63 = vld [vmem:[%s10099_s0 + $0x85c] ss:$28 sps:$4 sm:$0xff]  }
 0x134   :  { %v8333_v1 = vpop.f32.mrb[16].mxu1 }
 0x135   :  { %v3417_v2 = vpop.f32.mrb[17].mxu1 }
 0x136   :  { %v8338_v4 = vpop.f32.mrb[18].mxu1 }
 0x137   :  { %v3420_v7 = vpop.f32.mrb[19].mxu1 }
 0x138   :  { %v7240_v7 = vld [vmem:[%s10099_s0 + $0x858] ss:$28 sps:$4 sm:$0xff]  }
 0x139   :  { %3630 = vmatmul.mubr.bf16.gmra.mrb[124].mxu1 %v7195_v3 }
 0x13a   :  { %4175 = vmatmul.mubr.bf16.gmra.mrb[124].mxu0 %v7196_v5  ;;  %3637 = vmatprep.mubr.bf16.mxu1 %v7197_v6  ;;  %v7239_v5 = vld [vmem:[%s10099_s0 + $0x850] ss:$28 sps:$4 sm:$0xff]  }
 0x13b   :  { %4182 = vmatprep.mubr.bf16.mxu0 %v7199_v8  ;;  %v7241_v8 = vld [vmem:[%s10099_s0 + $0x88c] ss:$28 sps:$4 sm:$0xff]  }
 0x13c   :  { %v8349_v9 = vpop.f32.mrb[20].mxu1 }
 0x13d   :  { %v3425_v10 = vpop.f32.mrb[21].mxu1 }
 0x13e   :  { %v8354_v12 = vpop.f32.mrb[22].mxu1 }
 0x13f   :  { %v3428_v15 = vpop.f32.mrb[23].mxu1 }
 0x140   :  { %v7245_v15 = vld [vmem:[%s10099_s0 + $0x888] ss:$28 sps:$4 sm:$0xff]  }
 0x141   :  { %3638 = vmatmul.mubr.bf16.gmra.mrb[128].mxu1 %v7201_v11  ;;  %v7243_v11 = vld [vmem:[%s10099_s0 + $0x894] ss:$28 sps:$4 sm:$0xff]  }
 0x142   :  { %4183 = vmatmul.mubr.bf16.gmra.mrb[128].mxu0 %v7202_v13  ;;  %3645 = vmatprep.mubr.bf16.mxu1 %v7203_v14 }
 0x143   :  { %4190 = vmatprep.mubr.bf16.mxu0 %v7205_v16 }
 0x144   :  { %v8365_v17 = vpop.f32.mrb[24].mxu1 }
 0x145   :  { %v3433_v18 = vpop.f32.mrb[25].mxu1 }
 0x146   :  { %v8370_v20 = vpop.f32.mrb[26].mxu1  ;;  %v7246_v18 = vld [vmem:[%s10099_s0 + $0x890] ss:$28 sps:$4 sm:$0xff]  }
 0x147   :  { %v3436_v23 = vpop.f32.mrb[27].mxu1 }
 0x149   :  { %3646 = vmatmul.mubr.bf16.gmra.mrb[132].mxu1 %v7207_v19  ;;  %v7248_v19 = vld [vmem:[%s10099_s0 + $0x8c4] ss:$28 sps:$4 sm:$0xff]  }
 0x14a   :  { %4191 = vmatmul.mubr.bf16.gmra.mrb[132].mxu0 %v7208_v21  ;;  %3653 = vmatprep.mubr.bf16.mxu1 %v7210_v22  ;;  %v7250_v22 = vld [vmem:[%s10099_s0 + $0x8cc] ss:$28 sps:$4 sm:$0xff]  }
 0x14b   :  { %4198 = vmatprep.mubr.bf16.mxu0 %v7212_v24 }
 0x14c   :  { %v8381_v25 = vpop.f32.mrb[28].mxu1 }
 0x14d   :  { %v3441_v26 = vpop.f32.mrb[29].mxu1 }
 0x14e   :  { %v8386_v28 = vpop.f32.mrb[30].mxu1  ;;  %v7252_v26 = vld [vmem:[%s10099_s0 + $0x8c0] ss:$28 sps:$4 sm:$0xff]  }
 0x14f   :  { %v3444_v31 = vpop.f32.mrb[31].mxu1 }
 0x151   :  { %3654 = vmatmul.mubr.bf16.gmra.mrb[136].mxu1 %v7214_v27 }
 0x152   :  { %4199 = vmatmul.mubr.bf16.gmra.mrb[136].mxu0 %v7215_v29  ;;  %3661 = vmatprep.mubr.bf16.mxu1 %v7216_v30  ;;  %v7253_v29 = vld [vmem:[%s10099_s0 + $0x8c8] ss:$28 sps:$4 sm:$0xff]   ;;  %v7254_v30 = vld [vmem:[%s10099_s0 + $0x8fc] ss:$28 sps:$4 sm:$0xff]  }
 0x153   :  { %4206 = vmatprep.mubr.bf16.mxu0 %v7218_v33  ;;  %v7256_v33 = vld [vmem:[%s10099_s0 + $0x904] ss:$28 sps:$4 sm:$0xff]  }
 0x154   :  { %v8397_v34 = vpop.f32.mrb[32].mxu1 }
 0x155   :  { %v3449_v36 = vpop.f32.mrb[33].mxu1 }
 0x156   :  { %v8402_v38 = vpop.f32.mrb[34].mxu1 }
 0x157   :  { %v3452_v41 = vpop.f32.mrb[35].mxu1 }
 0x158   :  { %v7259_v41 = vld [vmem:[%s10099_s0 + $0x900] ss:$28 sps:$4 sm:$0xff]  }
 0x159   :  { %3662 = vmatmul.mubr.bf16.gmra.mrb[140].mxu1 %v7220_v37 }
 0x15a   :  { %4207 = vmatmul.mubr.bf16.gmra.mrb[140].mxu0 %v7221_v39  ;;  %3669 = vmatprep.mubr.bf16.mxu1 %v7222_v40  ;;  %v7258_v39 = vld [vmem:[%s10099_s0 + $0x8f8] ss:$28 sps:$4 sm:$0xff]  }
 0x15b   :  { %4214 = vmatprep.mubr.bf16.mxu0 %v7224_v43  ;;  %v7260_v43 = vld [vmem:[%s10099_s0 + $0x934] ss:$28 sps:$4 sm:$0xff]  }
 0x15c   :  { %v8413_v44 = vpop.f32.mrb[36].mxu1 }
 0x15d   :  { %v3457_v45 = vpop.f32.mrb[37].mxu1 }
 0x15e   :  { %v8418_v48 = vpop.f32.mrb[38].mxu1 }
 0x15f   :  { %v3460_v52 = vpop.f32.mrb[39].mxu1 }
 0x160   :  { %v7264_v52 = vld [vmem:[%s10099_s0 + $0x930] ss:$28 sps:$4 sm:$0xff]  }
 0x161   :  { %3670 = vmatmul.mubr.bf16.gmra.mrb[144].mxu1 %v7226_v46  ;;  %v7262_v46 = vld [vmem:[%s10099_s0 + $0x93c] ss:$28 sps:$4 sm:$0xff]  }
 0x162   :  { %4215 = vmatmul.mubr.bf16.gmra.mrb[144].mxu0 %v7227_v49  ;;  %3677 = vmatprep.mubr.bf16.mxu1 %v7229_v51 }
 0x163   :  { %4222 = vmatprep.mubr.bf16.mxu0 %v7231_v53 }
 0x164   :  { %v8429_v54 = vpop.f32.mrb[40].mxu1 }
 0x165   :  { %v3465_v55 = vpop.f32.mrb[41].mxu1 }
 0x166   :  { %v8434_v58 = vpop.f32.mrb[42].mxu1  ;;  %v7265_v55 = vld [vmem:[%s10099_s0 + $0x938] ss:$28 sps:$4 sm:$0xff]  }
 0x167   :  { %v3468_v62 = vpop.f32.mrb[43].mxu1 }
 0x169   :  { %3678 = vmatmul.mubr.bf16.gmra.mrb[148].mxu1 %v7233_v57  ;;  %v7267_v57 = vld [vmem:[%s10099_s0 + $0x96c] ss:$28 sps:$4 sm:$0xff]  }
 0x16a   :  { %4223 = vmatmul.mubr.bf16.gmra.mrb[148].mxu0 %v7234_v60  ;;  %3685 = vmatprep.mubr.bf16.mxu1 %v7235_v61  ;;  %v7269_v61 = vld [vmem:[%s10099_s0 + $0x974] ss:$28 sps:$4 sm:$0xff]  }
 0x16b   :  { %4230 = vmatprep.mubr.bf16.mxu0 %v7237_v63 }
 0x16c   :  { %v8445_v2 = vpop.f32.mrb[44].mxu1 }
 0x16d   :  { %v3473_v3 = vpop.f32.mrb[45].mxu1 }
 0x16e   :  { %v8450_v6 = vpop.f32.mrb[46].mxu1  ;;  %v7271_v3 = vld [vmem:[%s10099_s0 + $0x968] ss:$28 sps:$4 sm:$0xff]  }
 0x16f   :  { %v3476_v10 = vpop.f32.mrb[47].mxu1 }
 0x171   :  { %3686 = vmatmul.mubr.bf16.gmra.mrb[152].mxu1 %v7239_v5 }
 0x172   :  { %4231 = vmatmul.mubr.bf16.gmra.mrb[152].mxu0 %v7240_v7  ;;  %3693 = vmatprep.mubr.bf16.mxu1 %v7241_v8  ;;  %v7272_v7 = vld [vmem:[%s10099_s0 + $0x970] ss:$28 sps:$4 sm:$0xff]   ;;  %v7273_v8 = vld [vmem:[%s10099_s0 + $0x9a4] ss:$28 sps:$4 sm:$0xff]  }
 0x173   :  { %4238 = vmatprep.mubr.bf16.mxu0 %v7243_v11  ;;  %v7275_v11 = vld [vmem:[%s10099_s0 + $0x9ac] ss:$28 sps:$4 sm:$0xff]  }
 0x174   :  { %v8461_v13 = vpop.f32.mrb[48].mxu1 }
 0x175   :  { %v3481_v14 = vpop.f32.mrb[49].mxu1 }
 0x176   :  { %v8466_v16 = vpop.f32.mrb[50].mxu1 }
 0x177   :  { %v3484_v21 = vpop.f32.mrb[51].mxu1 }
 0x178   :  { %v7278_v21 = vld [vmem:[%s10099_s0 + $0x9a8] ss:$28 sps:$4 sm:$0xff]  }
 0x179   :  { %3694 = vmatmul.mubr.bf16.gmra.mrb[156].mxu1 %v7245_v15 }
 0x17a   :  { %4239 = vmatmul.mubr.bf16.gmra.mrb[156].mxu0 %v7246_v18  ;;  %3701 = vmatprep.mubr.bf16.mxu1 %v7248_v19  ;;  %v7277_v18 = vld [vmem:[%s10099_s0 + $0x9a0] ss:$28 sps:$4 sm:$0xff]  }
 0x17b   :  { %4246 = vmatprep.mubr.bf16.mxu0 %v7250_v22  ;;  %v7279_v22 = vld [vmem:[%s10099_s0 + $0x9dc] ss:$28 sps:$4 sm:$0xff]  }
 0x17c   :  { %v8477_v23 = vpop.f32.mrb[52].mxu1 }
 0x17d   :  { %v3489_v24 = vpop.f32.mrb[53].mxu1 }
 0x17e   :  { %v8482_v27 = vpop.f32.mrb[54].mxu1 }
 0x17f   :  { %v3492_v31 = vpop.f32.mrb[55].mxu1 }
 0x180   :  { %v7283_v31 = vld [vmem:[%s10099_s0 + $0x9d8] ss:$28 sps:$4 sm:$0xff]  }
 0x181   :  { %3702 = vmatmul.mubr.bf16.gmra.mrb[160].mxu1 %v7252_v26  ;;  %v7281_v26 = vld [vmem:[%s10099_s0 + $0x9e4] ss:$28 sps:$4 sm:$0xff]  }
 0x182   :  { %4247 = vmatmul.mubr.bf16.gmra.mrb[160].mxu0 %v7253_v29  ;;  %3709 = vmatprep.mubr.bf16.mxu1 %v7254_v30 }
 0x183   :  { %4254 = vmatprep.mubr.bf16.mxu0 %v7256_v33 }
 0x184   :  { %v8493_v36 = vpop.f32.mrb[56].mxu1 }
 0x185   :  { %v3497_v37 = vpop.f32.mrb[57].mxu1 }
 0x186   :  { %v8498_v40 = vpop.f32.mrb[58].mxu1  ;;  %v7284_v37 = vld [vmem:[%s10099_s0 + $0x9e0] ss:$28 sps:$4 sm:$0xff]  }
 0x187   :  { %v3500_v45 = vpop.f32.mrb[59].mxu1 }
 0x189   :  { %3710 = vmatmul.mubr.bf16.gmra.mrb[164].mxu1 %v7258_v39  ;;  %v7286_v39 = vld [vmem:[%s10099_s0 + $0xa14] ss:$28 sps:$4 sm:$0xff]  }
 0x18a   :  { %4255 = vmatmul.mubr.bf16.gmra.mrb[164].mxu0 %v7259_v41  ;;  %3717 = vmatprep.mubr.bf16.mxu1 %v7260_v43  ;;  %v7288_v43 = vld [vmem:[%s10099_s0 + $0xa1c] ss:$28 sps:$4 sm:$0xff]  }
 0x18b   :  { %4262 = vmatprep.mubr.bf16.mxu0 %v7262_v46 }
 0x18c   :  { %v8509_v49 = vpop.f32.mrb[60].mxu1 }
 0x18d   :  { %v3505_v51 = vpop.f32.mrb[61].mxu1 }
 0x18e   :  { %v8514_v53 = vpop.f32.mrb[62].mxu1  ;;  %v7290_v51 = vld [vmem:[%s10099_s0 + $0xa10] ss:$28 sps:$4 sm:$0xff]  }
 0x18f   :  { %v3508_v60 = vpop.f32.mrb[63].mxu1 }
 0x191   :  { %3718 = vmatmul.mubr.bf16.gmra.mrb[168].mxu1 %v7264_v52 }
 0x192   :  { %4263 = vmatmul.mubr.bf16.gmra.mrb[168].mxu0 %v7265_v55  ;;  %3725 = vmatprep.mubr.bf16.mxu1 %v7267_v57  ;;  %v7291_v55 = vld [vmem:[%s10099_s0 + $0xa18] ss:$28 sps:$4 sm:$0xff]   ;;  %v7292_v57 = vld [vmem:[%s10099_s0 + $0xa4c] ss:$28 sps:$4 sm:$0xff]  }
 0x193   :  { %4270 = vmatprep.mubr.bf16.mxu0 %v7269_v61  ;;  %v7294_v61 = vld [vmem:[%s10099_s0 + $0xa54] ss:$28 sps:$4 sm:$0xff]  }
 0x194   :  { %v8525_v62 = vpop.f32.mrb[64].mxu1 }
 0x195   :  { %v3513_v63 = vpop.f32.mrb[65].mxu1 }
 0x196   :  { %v8530_v5 = vpop.f32.mrb[66].mxu1 }
 0x197   :  { %v3516_v10 = vpop.f32.mrb[67].mxu1 }
 0x198   :  { %v7297_v10 = vld [vmem:[%s10099_s0 + $0xa50] ss:$28 sps:$4 sm:$0xff]  }
 0x199   :  { %3726 = vmatmul.mubr.bf16.gmra.mrb[172].mxu1 %v7271_v3 }
 0x19a   :  { %4271 = vmatmul.mubr.bf16.gmra.mrb[172].mxu0 %v7272_v7  ;;  %3733 = vmatprep.mubr.bf16.mxu1 %v7273_v8  ;;  %v7296_v7 = vld [vmem:[%s10099_s0 + $0xa48] ss:$28 sps:$4 sm:$0xff]  }
 0x19b   :  { %4278 = vmatprep.mubr.bf16.mxu0 %v7275_v11  ;;  %v7298_v11 = vld [vmem:[%s10099_s0 + $0xa84] ss:$28 sps:$4 sm:$0xff]  }
 0x19c   :  { %v8541_v14 = vpop.f32.mrb[68].mxu1 }
 0x19d   :  { %v3521_v15 = vpop.f32.mrb[69].mxu1 }
 0x19e   :  { %v8546_v19 = vpop.f32.mrb[70].mxu1 }
 0x19f   :  { %v3524_v24 = vpop.f32.mrb[71].mxu1 }
 0x1a0   :  { %v7303_v24 = vld [vmem:[%s10099_s0 + $0xa80] ss:$28 sps:$4 sm:$0xff]  }
 0x1a1   :  { %3734 = vmatmul.mubr.bf16.gmra.mrb[176].mxu1 %v7277_v18  ;;  %v7302_v18 = vld [vmem:[%s10099_s0 + $0x14] ss:$28 sps:$4 sm:$0xff]  }
 0x1a2   :  { %4279 = vmatmul.mubr.bf16.gmra.mrb[176].mxu0 %v7278_v21  ;;  %3741 = vmatprep.mubr.bf16.mxu1 %v7279_v22 }
 0x1a3   :  { %4286 = vmatprep.mubr.bf16.mxu0 %v7281_v26 }
 0x1a4   :  { %v8557_v29 = vpop.f32.mrb[72].mxu1 }
 0x1a5   :  { %v3529_v30 = vpop.f32.mrb[73].mxu1 }
 0x1a6   :  { %v8562_v33 = vpop.f32.mrb[74].mxu1  ;;  %v7300_v30 = vld [vmem:[%s10099_s0 + $0x10] ss:$28 sps:$4 sm:$0xff]  }
 0x1a7   :  { %v3532_v41 = vpop.f32.mrb[75].mxu1 }
 0x1a8   :  { %v8624_v41 = vld [vmem:[%s10098_s1 + $0x180] sm:$0xff]  }
 0x1a9   :  { %3742 = vmatmul.mubr.bf16.gmra.mrb[180].mxu1 %v7283_v31  ;;  %v7304_v31 = vld [vmem:[%s10099_s0 + $0xabc] ss:$28 sps:$4 sm:$0xff]   ;;  %6415 = vmatprep.subr.bf16.mxu1 %v8624_v41 }
 0x1aa   :  { %4287 = vmatmul.mubr.bf16.gmra.mrb[180].mxu0 %v7284_v37  ;;  %3749 = vmatprep.mubr.bf16.mxu1 %v7286_v39  ;;  %v7306_v39 = vld [vmem:[%s10099_s0 + $0x4c] ss:$28 sps:$4 sm:$0xff]  }
 0x1ab   :  { %4294 = vmatprep.mubr.bf16.mxu0 %v7288_v43 }
 0x1ac   :  { %v8573_v45 = vpop.f32.mrb[76].mxu1 }
 0x1ad   :  { %v3537_v46 = vpop.f32.mrb[77].mxu1 }
 0x1ae   :  { %v8578_v52 = vpop.f32.mrb[78].mxu1 }
 0x1af   :  { %v3540_v60 = vpop.f32.mrb[79].mxu1 }
 0x1b0   :  { %v7310_v60 = vld [vmem:[%s10099_s0 + $0xaf4] ss:$28 sps:$4 sm:$0xff]  }
 0x1b1   :  { %3750 = vmatmul.mubr.bf16.gmra.mrb[184].mxu1 %v7290_v51  ;;  %v7308_v51 = vld [vmem:[%s10099_s0 + $0xab8] ss:$28 sps:$4 sm:$0xff]  }
 0x1b2   :  { %4295 = vmatmul.mubr.bf16.gmra.mrb[184].mxu0 %v7291_v55  ;;  %3757 = vmatprep.mubr.bf16.mxu1 %v7292_v57  ;;  %v7309_v57 = vld [vmem:[%s10099_s0 + $0x48] ss:$28 sps:$4 sm:$0xff]  }
 0x1b3   :  { %4302 = vmatprep.mubr.bf16.mxu0 %v7294_v61 }
 0x1b4   :  { %v8589_v63 = vpop.f32.mrb[80].mxu1 }
 0x1b5   :  { %v3545_v3 = vpop.f32.mrb[81].mxu1 }
 0x1b6   :  { %v8594_v8 = vpop.f32.mrb[82].mxu1  ;;  %v7312_v3 = vld [vmem:[%s10099_s0 + $0x84] ss:$28 sps:$4 sm:$0xff]  }
 0x1b7   :  { %v3548_v15 = vpop.f32.mrb[83].mxu1 }
 0x1b9   :  { %3758 = vmatmul.mubr.bf16.gmra.mrb[188].mxu1 %v7296_v7 }
 0x1ba   :  { %4303 = vmatmul.mubr.bf16.gmra.mrb[188].mxu0 %v7297_v10  ;;  %3765 = vmatprep.mubr.bf16.mxu1 %v7298_v11  ;;  %v7314_v11 = vld [vmem:[%s10099_s0 + $0xaf0] ss:$28 sps:$4 sm:$0xff]  }
 0x1bb   :  { %4471 = vmatprep.mubr.bf16.mxu0 %v7302_v18  ;;  %v7315_v18 = vld [vmem:[%s10099_s0 + $0x80] ss:$28 sps:$4 sm:$0xff]  }
 0x1bc   :  { %v8605_v21 = vpop.f32.mrb[84].mxu1 }
 0x1bd   :  { %v3553_v22 = vpop.f32.mrb[85].mxu1 }
 0x1be   :  { %v8610_v26 = vpop.f32.mrb[86].mxu1  ;;  %v7316_v22 = vld [vmem:[%s10099_s0 + $0xb2c] ss:$28 sps:$4 sm:$0xff]  }
 0x1bf   :  { %v3556_v37 = vpop.f32.mrb[87].mxu1 }
 0x1c1   :  { %3766 = vmatmul.mubr.bf16.gmra.mrb[192].mxu1 %v7303_v24 }
 0x1c2   :  { %4472 = vmatmul.mubr.bf16.vlgmr.msra.gmra.mrb[0].mxu0 %v7300_v30  ;;  %3773 = vmatprep.mubr.bf16.mxu1 %v7304_v31  ;;  %v7318_v30 = vld [vmem:[%s10099_s0 + $0xbc] ss:$28 sps:$4 sm:$0xff]  }
 0x1c3   :  { %4479 = vmatprep.mubr.bf16.mxu0 %v7306_v39  ;;  %v7320_v39 = vld [vmem:[%s10099_s0 + $0xb28] ss:$28 sps:$4 sm:$0xff]  }
 0x1c4   :  { %v8626_v43 = vpop.f32.mrb[88].mxu1 }
 0x1c5   :  { %v3561_v46 = vpop.f32.mrb[89].mxu1 }
 0x1c6   :  { %v8632_v55 = vpop.f32.mrb[90].mxu1 }
 0x1c7   :  { %v3564_v61 = vpop.f32.mrb[91].mxu1 }
 0x1c8   :  { %v7324_v61 = vld [vmem:[%s10099_s0 + $0xf4] ss:$28 sps:$4 sm:$0xff]  }
 0x1c9   :  { %3774 = vmatmul.mubr.bf16.gmra.mrb[196].mxu1 %v7308_v51  ;;  %v7321_v51 = vld [vmem:[%s10099_s0 + $0xb8] ss:$28 sps:$4 sm:$0xff]  }
 0x1ca   :  { %4480 = vmatmul.mubr.bf16.gmra.mrb[4].mxu0 %v7309_v57  ;;  %3781 = vmatprep.mubr.bf16.mxu1 %v7310_v60  ;;  %v7322_v57 = vld [vmem:[%s10099_s0 + $0xb64] ss:$28 sps:$4 sm:$0xff]  }
 0x1cb   :  { %4487 = vmatprep.mubr.bf16.mxu0 %v7312_v3 }
 0x1cc   :  { %v8643_v7 = vpop.f32.mrb[92].mxu1 }
 0x1cd   :  { %v3569_v10 = vpop.f32.mrb[93].mxu1 }
 0x1ce   :  { %v8648_v15 = vpop.f32.mrb[94].mxu1 }
 0x1cf   :  { %v3572_v24 = vpop.f32.mrb[95].mxu1 }
 0x1d0   :  { %v7328_v24 = vld [vmem:[%s10099_s0 + $0xb9c] ss:$28 sps:$4 sm:$0xff]  }
 0x1d1   :  { %3782 = vmatmul.mubr.bf16.gmra.mrb[200].mxu1 %v7314_v11  ;;  %v7326_v11 = vld [vmem:[%s10099_s0 + $0xb60] ss:$28 sps:$4 sm:$0xff]  }
 0x1d2   :  { %4488 = vmatmul.mubr.bf16.gmra.mrb[8].mxu0 %v7315_v18  ;;  %3789 = vmatprep.mubr.bf16.mxu1 %v7316_v22  ;;  %v7327_v22 = vld [vmem:[%s10099_s0 + $0xf0] ss:$28 sps:$4 sm:$0xff]  }
 0x1d3   :  { %4495 = vmatprep.mubr.bf16.mxu0 %v7318_v30 }
 0x1d4   :  { %v8659_v31 = vpop.f32.mrb[96].mxu1 }
 0x1d5   :  { %v3577_v37 = vpop.f32.mrb[97].mxu1 }
 0x1d6   :  { %v8664_v46 = vpop.f32.mrb[98].mxu1  ;;  %v7330_v37 = vld [vmem:[%s10099_s0 + $0x12c] ss:$28 sps:$4 sm:$0xff]  }
 0x1d7   :  { %v3580_v60 = vpop.f32.mrb[99].mxu1 }
 0x1d9   :  { %3790 = vmatmul.mubr.bf16.gmra.mrb[204].mxu1 %v7320_v39 }
 0x1da   :  { %4496 = vmatmul.mubr.bf16.gmra.mrb[12].mxu0 %v7321_v51  ;;  %3797 = vmatprep.mubr.bf16.mxu1 %v7322_v57  ;;  %v7332_v57 = vld [vmem:[%s10099_s0 + $0xb98] ss:$28 sps:$4 sm:$0xff]  }
 0x1db   :  { %4503 = vmatprep.mubr.bf16.mxu0 %v7324_v61  ;;  %v7333_v61 = vld [vmem:[%s10099_s0 + $0x128] ss:$28 sps:$4 sm:$0xff]  }
 0x1dc   :  { %v8675_v3 = vpop.f32.mrb[100].mxu1 }
 0x1dd   :  { %v3585_v10 = vpop.f32.mrb[101].mxu1 }
 0x1de   :  { %v8680_v18 = vpop.f32.mrb[102].mxu1  ;;  %v7334_v10 = vld [vmem:[%s10099_s0 + $0xbd4] ss:$28 sps:$4 sm:$0xff]  }
 0x1df   :  { %v3588_v30 = vpop.f32.mrb[103].mxu1 }
 0x1e1   :  { %3798 = vmatmul.mubr.bf16.gmra.mrb[208].mxu1 %v7326_v11 }
 0x1e2   :  { %4504 = vmatmul.mubr.bf16.gmra.mrb[16].mxu0 %v7327_v22  ;;  %3805 = vmatprep.mubr.bf16.mxu1 %v7328_v24  ;;  %v7336_v22 = vld [vmem:[%s10099_s0 + $0x164] ss:$28 sps:$4 sm:$0xff]  }
 0x1e3   :  { %4511 = vmatprep.mubr.bf16.mxu0 %v7330_v37  ;;  %v7338_v37 = vld [vmem:[%s10099_s0 + $0xbd0] ss:$28 sps:$4 sm:$0xff]  }
 0x1e4   :  { %v8691_v39 = vpop.f32.mrb[104].mxu1 }
 0x1e5   :  { %v3593_v51 = vpop.f32.mrb[105].mxu1 }
 0x1e6   :  { %v8696_v60 = vpop.f32.mrb[106].mxu1 }
 0x1e7   :  { %10101 = vst [vmem:[#allocation2_spill] sm:$0xff] %v8696_v60  ;;  %v3596_v11 = vpop.f32.mrb[107].mxu1 }
 0x1e8   :  { %v7339_v11 = vld [vmem:[%s10099_s0 + $0x160] ss:$28 sps:$4 sm:$0xff]  }
 0x1e9   :  { %3806 = vmatmul.mubr.bf16.gmra.mrb[212].mxu1 %v7332_v57  ;;  %v7340_v57 = vld [vmem:[%s10099_s0 + $0xc0c] ss:$28 sps:$4 sm:$0xff]  }
 0x1ea   :  { %4512 = vmatmul.mubr.bf16.gmra.mrb[20].mxu0 %v7333_v61  ;;  %3813 = vmatprep.mubr.bf16.mxu1 %v7334_v10  ;;  %v7342_v10 = vld [vmem:[%s10099_s0 + $0x19c] ss:$28 sps:$4 sm:$0xff]  }
 0x1eb   :  { %4519 = vmatprep.mubr.bf16.mxu0 %v7336_v22 }
 0x1ec   :  { %v8707_v24 = vpop.f32.mrb[108].mxu1 }
 0x1ed   :  { %10102 = vst [vmem:[#allocation3_spill] sm:$0xff] %v8707_v24  ;;  %v3601_v30 = vpop.f32.mrb[109].mxu1 }
 0x1ee   :  { %v8712_v51 = vpop.f32.mrb[110].mxu1 }
 0x1ef   :  { %10103 = vst [vmem:[#allocation4_spill] sm:$0xff] %v8712_v51  ;;  %v3604_v61 = vpop.f32.mrb[111].mxu1  ;;  %v7344_v51 = vld [vmem:[%s10099_s0 + $0xc08] ss:$28 sps:$4 sm:$0xff]  }
 0x1f0   :  { %v7345_v61 = vld [vmem:[%s10099_s0 + $0x198] ss:$28 sps:$4 sm:$0xff]  }
 0x1f1   :  { %3814 = vmatmul.mubr.bf16.gmra.mrb[216].mxu1 %v7338_v37  ;;  %v7346_v37 = vld [vmem:[%s10099_s0 + $0xc44] ss:$28 sps:$4 sm:$0xff]  }
 0x1f2   :  { %4520 = vmatmul.mubr.bf16.gmra.mrb[24].mxu0 %v7339_v11  ;;  %3821 = vmatprep.mubr.bf16.mxu1 %v7340_v57  ;;  %v7348_v57 = vld [vmem:[%s10099_s0 + $0x1d4] ss:$28 sps:$4 sm:$0xff]  }
 0x1f3   :  { %4527 = vmatprep.mubr.bf16.mxu0 %v7342_v10 }
 0x1f4   :  { %v8723_v22 = vpop.f32.mrb[112].mxu1 }
 0x1f5   :  { %10104 = vst [vmem:[#allocation5_spill] sm:$0xff] %v8723_v22  ;;  %v3609_v30 = vpop.f32.mrb[113].mxu1 }
 0x1f6   :  { %v8728_v24 = vpop.f32.mrb[114].mxu1 }
 0x1f7   :  { %10105 = vst [vmem:[#allocation6_spill] sm:$0xff] %v8728_v24  ;;  %v3612_v11 = vpop.f32.mrb[115].mxu1  ;;  %v7350_v24 = vld [vmem:[%s10099_s0 + $0xc40] ss:$28 sps:$4 sm:$0xff]  }
 0x1f8   :  { %v7351_v11 = vld [vmem:[%s10099_s0 + $0x1d0] ss:$28 sps:$4 sm:$0xff]  }
 0x1f9   :  { %3822 = vmatmul.mubr.bf16.gmra.mrb[220].mxu1 %v7344_v51  ;;  %v7352_v51 = vld [vmem:[%s10099_s0 + $0xc7c] ss:$28 sps:$4 sm:$0xff]  }
 0x1fa   :  { %4528 = vmatmul.mubr.bf16.gmra.mrb[28].mxu0 %v7345_v61  ;;  %3829 = vmatprep.mubr.bf16.mxu1 %v7346_v37  ;;  %v7354_v37 = vld [vmem:[%s10099_s0 + $0x20c] ss:$28 sps:$4 sm:$0xff]  }
 0x1fb   :  { %4535 = vmatprep.mubr.bf16.mxu0 %v7348_v57 }
 0x1fc   :  { %v8739_v10 = vpop.f32.mrb[116].mxu1 }
 0x1fd   :  { %10106 = vst [vmem:[#allocation7_spill] sm:$0xff] %v8739_v10  ;;  %v3617_v30 = vpop.f32.mrb[117].mxu1 }
 0x1fe   :  { %v8744_v22 = vpop.f32.mrb[118].mxu1 }
 0x1ff   :  { %10107 = vst [vmem:[#allocation8_spill] sm:$0xff] %v8744_v22  ;;  %v3620_v61 = vpop.f32.mrb[119].mxu1  ;;  %v7356_v22 = vld [vmem:[%s10099_s0 + $0xc78] ss:$28 sps:$4 sm:$0xff]  }
 0x200   :  { %v7357_v61 = vld [vmem:[%s10099_s0 + $0x208] ss:$28 sps:$4 sm:$0xff]  }
 0x201   :  { %3830 = vmatmul.mubr.bf16.gmra.mrb[224].mxu1 %v7350_v24  ;;  %v7358_v24 = vld [vmem:[%s10099_s0 + $0xcb4] ss:$28 sps:$4 sm:$0xff]  }
 0x202   :  { %4536 = vmatmul.mubr.bf16.gmra.mrb[32].mxu0 %v7351_v11  ;;  %3837 = vmatprep.mubr.bf16.mxu1 %v7352_v51  ;;  %v7360_v51 = vld [vmem:[%s10099_s0 + $0x244] ss:$28 sps:$4 sm:$0xff]  }
 0x203   :  { %4543 = vmatprep.mubr.bf16.mxu0 %v7354_v37 }
 0x204   :  { %v8755_v57 = vpop.f32.mrb[120].mxu1 }
 0x205   :  { %10108 = vst [vmem:[#allocation9_spill] sm:$0xff] %v8755_v57  ;;  %v3625_v30 = vpop.f32.mrb[121].mxu1 }
 0x206   :  { %v8760_v10 = vpop.f32.mrb[122].mxu1 }
 0x207   :  { %10109 = vst [vmem:[#allocation10_spill] sm:$0xff] %v8760_v10  ;;  %v3628_v11 = vpop.f32.mrb[123].mxu1  ;;  %v7362_v10 = vld [vmem:[%s10099_s0 + $0xcb0] ss:$28 sps:$4 sm:$0xff]  }
 0x208   :  { %v7363_v11 = vld [vmem:[%s10099_s0 + $0x240] ss:$28 sps:$4 sm:$0xff]  }
 0x209   :  { %3838 = vmatmul.mubr.bf16.gmra.mrb[228].mxu1 %v7356_v22  ;;  %v7364_v22 = vld [vmem:[%s10099_s0 + $0xcec] ss:$28 sps:$4 sm:$0xff]  }
 0x20a   :  { %4544 = vmatmul.mubr.bf16.gmra.mrb[36].mxu0 %v7357_v61  ;;  %3845 = vmatprep.mubr.bf16.mxu1 %v7358_v24  ;;  %v7366_v24 = vld [vmem:[%s10099_s0 + $0x27c] ss:$28 sps:$4 sm:$0xff]  }
 0x20b   :  { %4551 = vmatprep.mubr.bf16.mxu0 %v7360_v51 }
 0x20c   :  { %v8771_v37 = vpop.f32.mrb[124].mxu1 }
 0x20d   :  { %10110 = vst [vmem:[#allocation11_spill] sm:$0xff] %v8771_v37  ;;  %v3633_v30 = vpop.f32.mrb[125].mxu1 }
 0x20e   :  { %v8776_v57 = vpop.f32.mrb[126].mxu1 }
 0x20f   :  { %10111 = vst [vmem:[#allocation12_spill] sm:$0xff] %v8776_v57  ;;  %v3636_v61 = vpop.f32.mrb[127].mxu1  ;;  %v7368_v57 = vld [vmem:[%s10099_s0 + $0xce8] ss:$28 sps:$4 sm:$0xff]  }
 0x210   :  { %v7369_v61 = vld [vmem:[%s10099_s0 + $0x278] ss:$28 sps:$4 sm:$0xff]  }
 0x211   :  { %3846 = vmatmul.mubr.bf16.gmra.mrb[232].mxu1 %v7362_v10  ;;  %v7370_v10 = vld [vmem:[%s10099_s0 + $0xd24] ss:$28 sps:$4 sm:$0xff]  }
 0x212   :  { %4552 = vmatmul.mubr.bf16.gmra.mrb[40].mxu0 %v7363_v11  ;;  %3853 = vmatprep.mubr.bf16.mxu1 %v7364_v22  ;;  %v7372_v22 = vld [vmem:[%s10099_s0 + $0x2b4] ss:$28 sps:$4 sm:$0xff]  }
 0x213   :  { %4559 = vmatprep.mubr.bf16.mxu0 %v7366_v24 }
 0x214   :  { %v8787_v51 = vpop.f32.mrb[128].mxu1 }
 0x215   :  { %10112 = vst [vmem:[#allocation13_spill] sm:$0xff] %v8787_v51  ;;  %v3641_v30 = vpop.f32.mrb[129].mxu1 }
 0x216   :  { %v8792_v37 = vpop.f32.mrb[130].mxu1 }
 0x217   :  { %10113 = vst [vmem:[#allocation14_spill] sm:$0xff] %v8792_v37  ;;  %v3644_v11 = vpop.f32.mrb[131].mxu1  ;;  %v7374_v37 = vld [vmem:[%s10099_s0 + $0xd20] ss:$28 sps:$4 sm:$0xff]  }
 0x218   :  { %v7375_v11 = vld [vmem:[%s10099_s0 + $0x2b0] ss:$28 sps:$4 sm:$0xff]  }
 0x219   :  { %3854 = vmatmul.mubr.bf16.gmra.mrb[236].mxu1 %v7368_v57  ;;  %v7376_v57 = vld [vmem:[%s10099_s0 + $0xd5c] ss:$28 sps:$4 sm:$0xff]  }
 0x21a   :  { %4560 = vmatmul.mubr.bf16.gmra.mrb[44].mxu0 %v7369_v61  ;;  %3861 = vmatprep.mubr.bf16.mxu1 %v7370_v10  ;;  %v7378_v10 = vld [vmem:[%s10099_s0 + $0x2ec] ss:$28 sps:$4 sm:$0xff]  }
 0x21b   :  { %4567 = vmatprep.mubr.bf16.mxu0 %v7372_v22 }
 0x21c   :  { %v8803_v24 = vpop.f32.mrb[132].mxu1 }
 0x21d   :  { %10114 = vst [vmem:[#allocation15_spill] sm:$0xff] %v8803_v24  ;;  %v3649_v30 = vpop.f32.mrb[133].mxu1 }
 0x21e   :  { %v8808_v51 = vpop.f32.mrb[134].mxu1 }
 0x21f   :  { %10115 = vst [vmem:[#allocation16_spill] sm:$0xff] %v8808_v51  ;;  %v3652_v61 = vpop.f32.mrb[135].mxu1  ;;  %v7380_v51 = vld [vmem:[%s10099_s0 + $0xd58] ss:$28 sps:$4 sm:$0xff]  }
 0x220   :  { %v7381_v61 = vld [vmem:[%s10099_s0 + $0x2e8] ss:$28 sps:$4 sm:$0xff]  }
 0x221   :  { %3862 = vmatmul.mubr.bf16.gmra.mrb[240].mxu1 %v7374_v37  ;;  %v7382_v37 = vld [vmem:[%s10099_s0 + $0xd94] ss:$28 sps:$4 sm:$0xff]  }
 0x222   :  { %4568 = vmatmul.mubr.bf16.gmra.mrb[48].mxu0 %v7375_v11  ;;  %3869 = vmatprep.mubr.bf16.mxu1 %v7376_v57  ;;  %v7384_v57 = vld [vmem:[%s10099_s0 + $0x324] ss:$28 sps:$4 sm:$0xff]  }
 0x223   :  { %4575 = vmatprep.mubr.bf16.mxu0 %v7378_v10 }
 0x224   :  { %v8819_v22 = vpop.f32.mrb[136].mxu1 }
 0x225   :  { %10116 = vst [vmem:[#allocation17_spill] sm:$0xff] %v8819_v22  ;;  %v3657_v30 = vpop.f32.mrb[137].mxu1 }
 0x226   :  { %v8824_v24 = vpop.f32.mrb[138].mxu1 }
 0x227   :  { %10117 = vst [vmem:[#allocation18_spill] sm:$0xff] %v8824_v24  ;;  %v3660_v11 = vpop.f32.mrb[139].mxu1  ;;  %v7386_v24 = vld [vmem:[%s10099_s0 + $0xd90] ss:$28 sps:$4 sm:$0xff]  }
 0x228   :  { %v7387_v11 = vld [vmem:[%s10099_s0 + $0x320] ss:$28 sps:$4 sm:$0xff]  }
 0x229   :  { %3870 = vmatmul.mubr.bf16.gmra.mrb[244].mxu1 %v7380_v51  ;;  %v7388_v51 = vld [vmem:[%s10099_s0 + $0xdcc] ss:$28 sps:$4 sm:$0xff]  }
 0x22a   :  { %4576 = vmatmul.mubr.bf16.gmra.mrb[52].mxu0 %v7381_v61  ;;  %3877 = vmatprep.mubr.bf16.mxu1 %v7382_v37  ;;  %v7390_v37 = vld [vmem:[%s10099_s0 + $0x35c] ss:$28 sps:$4 sm:$0xff]  }
 0x22b   :  { %4583 = vmatprep.mubr.bf16.mxu0 %v7384_v57 }
 0x22c   :  { %v8835_v10 = vpop.f32.mrb[140].mxu1 }
 0x22d   :  { %10118 = vst [vmem:[#allocation19_spill] sm:$0xff] %v8835_v10  ;;  %v3665_v30 = vpop.f32.mrb[141].mxu1 }
 0x22e   :  { %v8840_v22 = vpop.f32.mrb[142].mxu1 }
 0x22f   :  { %10119 = vst [vmem:[#allocation20_spill] sm:$0xff] %v8840_v22  ;;  %v3668_v61 = vpop.f32.mrb[143].mxu1  ;;  %v7392_v22 = vld [vmem:[%s10099_s0 + $0xdc8] ss:$28 sps:$4 sm:$0xff]  }
 0x230   :  { %v7393_v61 = vld [vmem:[%s10099_s0 + $0x358] ss:$28 sps:$4 sm:$0xff]  }
 0x231   :  { %3878 = vmatmul.mubr.bf16.gmra.mrb[248].mxu1 %v7386_v24  ;;  %v7396_v24 = vld [vmem:[%s10099_s0 + $0xa8c] ss:$28 sps:$4 sm:$0xff]  }
 0x232   :  { %4584 = vmatmul.mubr.bf16.gmra.mrb[56].mxu0 %v7387_v11  ;;  %3885 = vmatprep.mubr.bf16.mxu1 %v7388_v51  ;;  %v7397_v51 = vld [vmem:[%s10099_s0 + $0x394] ss:$28 sps:$4 sm:$0xff]  }
 0x233   :  { %4591 = vmatprep.mubr.bf16.mxu0 %v7390_v37 }
 0x234   :  { %v8851_v57 = vpop.f32.mrb[144].mxu1 }
 0x235   :  { %10120 = vst [vmem:[#allocation21_spill] sm:$0xff] %v8851_v57  ;;  %v3673_v30 = vpop.f32.mrb[145].mxu1 }
 0x236   :  { %v8856_v10 = vpop.f32.mrb[146].mxu1 }
 0x237   :  { %10121 = vst [vmem:[#allocation22_spill] sm:$0xff] %v8856_v10  ;;  %v3676_v11 = vpop.f32.mrb[147].mxu1  ;;  %v7394_v10 = vld [vmem:[%s10099_s0 + $0xa88] ss:$28 sps:$4 sm:$0xff]  }
 0x238   :  { %v7399_v11 = vld [vmem:[%s10099_s0 + $0x390] ss:$28 sps:$4 sm:$0xff]  }
 0x239   :  { %3886 = vmatmul.mubr.bf16.gmra.mrb[252].mxu1 %v7392_v22  ;;  %v7401_v22 = vld [vmem:[%s10099_s0 + $0xac4] ss:$28 sps:$4 sm:$0xff]  }
 0x23a   :  { %4592 = vmatmul.mubr.bf16.gmra.mrb[60].mxu0 %v7393_v61  ;;  %4310 = vmatprep.mubr.bf16.mxu1 %v7396_v24  ;;  %v7403_v61 = vld [vmem:[%s10099_s0 + $0x3cc] ss:$28 sps:$4 sm:$0xff]  }
 0x23b   :  { %4599 = vmatprep.mubr.bf16.mxu0 %v7397_v51 }
 0x23c   :  { %v8867_v37 = vpop.f32.mrb[148].mxu1 }
 0x23d   :  { %10122 = vst [vmem:[#allocation23_spill] sm:$0xff] %v8867_v37  ;;  %v3681_v30 = vpop.f32.mrb[149].mxu1 }
 0x23e   :  { %v8872_v57 = vpop.f32.mrb[150].mxu1 }
 0x23f   :  { %10123 = vst [vmem:[#allocation24_spill] sm:$0xff] %v8872_v57  ;;  %v3684_v60 = vpop.f32.mrb[151].mxu1  ;;  %v7406_v57 = vld [vmem:[%s10099_s0 + $0x3c8] ss:$28 sps:$4 sm:$0xff]  }
 0x240   :  { %v7405_v60 = vld [vmem:[%s10099_s0 + $0xac0] ss:$28 sps:$4 sm:$0xff]  }
 0x241   :  { %4311 = vmatmul.mubr.bf16.vlgmr.msra.gmra.mrb[192].mxu1 %v7394_v10  ;;  %v7407_v10 = vld [vmem:[%s10099_s0 + $0xafc] ss:$28 sps:$4 sm:$0xff]  }
 0x242   :  { %4600 = vmatmul.mubr.bf16.gmra.mrb[64].mxu0 %v7399_v11  ;;  %6416 = vmatpush3.bf16.msra.mxu1 %v8624_v41  ;;  %v7409_v11 = vld [vmem:[%s10099_s0 + $0x404] ss:$28 sps:$4 sm:$0xff]  }
 0x243   :  { %4318 = vmatprep.mubr.bf16.mxu1 %v7401_v22  ;;  %4607 = vmatprep.mubr.bf16.mxu0 %v7403_v61 }
 0x244   :  { %v8884_v24 = vpop.f32.mrb[152].mxu1 }
 0x245   :  { %10124 = vst [vmem:[#allocation25_spill] sm:$0xff] %v8884_v24  ;;  %v3689_v51 = vpop.f32.mrb[153].mxu1 }
 0x246   :  { %v8889_v30 = vpop.f32.mrb[154].mxu1  ;;  %v7411_v51 = vld [vmem:[%s10099_s0 + $0xaf8] ss:$28 sps:$4 sm:$0xff]  }
 0x247   :  { %10125 = vst [vmem:[#allocation26_spill] sm:$0xff] %v8889_v30  ;;  %v3692_v41 = vpop.f32.mrb[155].mxu1 }
 0x248   :  { %v7412_v41 = vld [vmem:[%s10099_s0 + $0x400] ss:$28 sps:$4 sm:$0xff]  }
 0x249   :  { %4319 = vmatmul.mubr.bf16.gmra.mrb[196].mxu1 %v7405_v60  ;;  %v7413_v60 = vld [vmem:[%s10099_s0 + $0xb34] ss:$28 sps:$4 sm:$0xff]  }
 0x24a   :  { %4608 = vmatmul.mubr.bf16.gmra.mrb[68].mxu0 %v7406_v57  ;;  %4326 = vmatprep.mubr.bf16.mxu1 %v7407_v10  ;;  %v7415_v10 = vld [vmem:[%s10099_s0 + $0x43c] ss:$28 sps:$4 sm:$0xff]  }
 0x24b   :  { %4615 = vmatprep.mubr.bf16.mxu0 %v7409_v11 }
 0x24c   :  { %v8900_v22 = vpop.f32.mrb[156].mxu1 }
 0x24d   :  { %10126 = vst [vmem:[#allocation27_spill] sm:$0xff] %v8900_v22  ;;  %v3697_v61 = vpop.f32.mrb[157].mxu1 }
 0x24e   :  { %v8905_v30 = vpop.f32.mrb[158].mxu1 }
 0x24f   :  { %10127 = vst [vmem:[#allocation28_spill] sm:$0xff] %v8905_v30  ;;  %v3700_v57 = vpop.f32.mrb[159].mxu1  ;;  %v7417_v30 = vld [vmem:[%s10099_s0 + $0xb30] ss:$28 sps:$4 sm:$0xff]  }
 0x250   :  { %v7418_v57 = vld [vmem:[%s10099_s0 + $0x438] ss:$28 sps:$4 sm:$0xff]  }
 0x251   :  { %4327 = vmatmul.mubr.bf16.gmra.mrb[200].mxu1 %v7411_v51  ;;  %v7419_v51 = vld [vmem:[%s10099_s0 + $0xb6c] ss:$28 sps:$4 sm:$0xff]  }
 0x252   :  { %4616 = vmatmul.mubr.bf16.gmra.mrb[72].mxu0 %v7412_v41  ;;  %4334 = vmatprep.mubr.bf16.mxu1 %v7413_v60  ;;  %v7421_v60 = vld [vmem:[%s10099_s0 + $0x474] ss:$28 sps:$4 sm:$0xff]  }
 0x253   :  { %4623 = vmatprep.mubr.bf16.mxu0 %v7415_v10 }
 0x254   :  { %v8916_v11 = vpop.f32.mrb[160].mxu1 }
 0x255   :  { %10128 = vst [vmem:[#allocation29_spill] sm:$0xff] %v8916_v11  ;;  %v3705_v61 = vpop.f32.mrb[161].mxu1 }
 0x256   :  { %v8921_v22 = vpop.f32.mrb[162].mxu1 }
 0x257   :  { %10129 = vst [vmem:[#allocation30_spill] sm:$0xff] %v8921_v22  ;;  %v3708_v41 = vpop.f32.mrb[163].mxu1  ;;  %v7423_v22 = vld [vmem:[%s10099_s0 + $0xb68] ss:$28 sps:$4 sm:$0xff]  }
 0x258   :  { %v7424_v41 = vld [vmem:[%s10099_s0 + $0x470] ss:$28 sps:$4 sm:$0xff]  }
 0x259   :  { %4335 = vmatmul.mubr.bf16.gmra.mrb[204].mxu1 %v7417_v30  ;;  %v7425_v30 = vld [vmem:[%s10099_s0 + $0xba4] ss:$28 sps:$4 sm:$0xff]  }
 0x25a   :  { %4624 = vmatmul.mubr.bf16.gmra.mrb[76].mxu0 %v7418_v57  ;;  %4342 = vmatprep.mubr.bf16.mxu1 %v7419_v51  ;;  %v7427_v51 = vld [vmem:[%s10099_s0 + $0x4ac] ss:$28 sps:$4 sm:$0xff]  }
 0x25b   :  { %4631 = vmatprep.mubr.bf16.mxu0 %v7421_v60 }
 0x25c   :  { %v8932_v10 = vpop.f32.mrb[164].mxu1 }
 0x25d   :  { %10130 = vst [vmem:[#allocation31_spill] sm:$0xff] %v8932_v10  ;;  %v3713_v61 = vpop.f32.mrb[165].mxu1 }
 0x25e   :  { %v8937_v11 = vpop.f32.mrb[166].mxu1 }
 0x25f   :  { %10131 = vst [vmem:[#allocation32_spill] sm:$0xff] %v8937_v11  ;;  %v3716_v57 = vpop.f32.mrb[167].mxu1  ;;  %v7429_v11 = vld [vmem:[%s10099_s0 + $0xba0] ss:$28 sps:$4 sm:$0xff]  }
 0x260   :  { %v7430_v57 = vld [vmem:[%s10099_s0 + $0x4a8] ss:$28 sps:$4 sm:$0xff]  }
 0x261   :  { %4343 = vmatmul.mubr.bf16.gmra.mrb[208].mxu1 %v7423_v22  ;;  %v7431_v22 = vld [vmem:[%s10099_s0 + $0xbdc] ss:$28 sps:$4 sm:$0xff]  }
 0x262   :  { %4632 = vmatmul.mubr.bf16.gmra.mrb[80].mxu0 %v7424_v41  ;;  %4350 = vmatprep.mubr.bf16.mxu1 %v7425_v30  ;;  %v7433_v30 = vld [vmem:[%s10099_s0 + $0x4e4] ss:$28 sps:$4 sm:$0xff]  }
 0x263   :  { %4639 = vmatprep.mubr.bf16.mxu0 %v7427_v51 }
 0x264   :  { %v8948_v60 = vpop.f32.mrb[168].mxu1 }
 0x265   :  { %10132 = vst [vmem:[#allocation33_spill] sm:$0xff] %v8948_v60  ;;  %v3721_v61 = vpop.f32.mrb[169].mxu1 }
 0x266   :  { %v8953_v10 = vpop.f32.mrb[170].mxu1 }
 0x267   :  { %10133 = vst [vmem:[#allocation34_spill] sm:$0xff] %v8953_v10  ;;  %v3724_v41 = vpop.f32.mrb[171].mxu1  ;;  %v7435_v10 = vld [vmem:[%s10099_s0 + $0xbd8] ss:$28 sps:$4 sm:$0xff]  }
 0x268   :  { %v7436_v41 = vld [vmem:[%s10099_s0 + $0x4e0] ss:$28 sps:$4 sm:$0xff]  }
 0x269   :  { %4351 = vmatmul.mubr.bf16.gmra.mrb[212].mxu1 %v7429_v11  ;;  %v7437_v11 = vld [vmem:[%s10099_s0 + $0xc14] ss:$28 sps:$4 sm:$0xff]  }
 0x26a   :  { %4640 = vmatmul.mubr.bf16.gmra.mrb[84].mxu0 %v7430_v57  ;;  %4358 = vmatprep.mubr.bf16.mxu1 %v7431_v22  ;;  %v7439_v22 = vld [vmem:[%s10099_s0 + $0x51c] ss:$28 sps:$4 sm:$0xff]  }
 0x26b   :  { %4647 = vmatprep.mubr.bf16.mxu0 %v7433_v30 }
 0x26c   :  { %v8964_v51 = vpop.f32.mrb[172].mxu1 }
 0x26d   :  { %10134 = vst [vmem:[#allocation35_spill] sm:$0xff] %v8964_v51  ;;  %v3729_v61 = vpop.f32.mrb[173].mxu1 }
 0x26e   :  { %v8969_v60 = vpop.f32.mrb[174].mxu1 }
 0x26f   :  { %10135 = vst [vmem:[#allocation36_spill] sm:$0xff] %v8969_v60  ;;  %v3732_v57 = vpop.f32.mrb[175].mxu1  ;;  %v7441_v60 = vld [vmem:[%s10099_s0 + $0xc10] ss:$28 sps:$4 sm:$0xff]  }
 0x270   :  { %v7442_v57 = vld [vmem:[%s10099_s0 + $0x518] ss:$28 sps:$4 sm:$0xff]  }
 0x271   :  { %4359 = vmatmul.mubr.bf16.gmra.mrb[216].mxu1 %v7435_v10  ;;  %v7443_v10 = vld [vmem:[%s10099_s0 + $0xc4c] ss:$28 sps:$4 sm:$0xff]  }
 0x272   :  { %4648 = vmatmul.mubr.bf16.gmra.mrb[88].mxu0 %v7436_v41  ;;  %4366 = vmatprep.mubr.bf16.mxu1 %v7437_v11  ;;  %v7445_v11 = vld [vmem:[%s10099_s0 + $0x554] ss:$28 sps:$4 sm:$0xff]  }
 0x273   :  { %4655 = vmatprep.mubr.bf16.mxu0 %v7439_v22 }
 0x274   :  { %v8980_v30 = vpop.f32.mrb[176].mxu1 }
 0x275   :  { %10136 = vst [vmem:[#allocation37_spill] sm:$0xff] %v8980_v30  ;;  %v3737_v61 = vpop.f32.mrb[177].mxu1 }
 0x276   :  { %v8985_v51 = vpop.f32.mrb[178].mxu1 }
 0x277   :  { %10137 = vst [vmem:[#allocation38_spill] sm:$0xff] %v8985_v51  ;;  %v3740_v41 = vpop.f32.mrb[179].mxu1  ;;  %v7447_v51 = vld [vmem:[%s10099_s0 + $0xc48] ss:$28 sps:$4 sm:$0xff]  }
 0x278   :  { %v7448_v41 = vld [vmem:[%s10099_s0 + $0x550] ss:$28 sps:$4 sm:$0xff]  }
 0x279   :  { %4367 = vmatmul.mubr.bf16.gmra.mrb[220].mxu1 %v7441_v60  ;;  %v7449_v60 = vld [vmem:[%s10099_s0 + $0xc84] ss:$28 sps:$4 sm:$0xff]  }
 0x27a   :  { %4656 = vmatmul.mubr.bf16.gmra.mrb[92].mxu0 %v7442_v57  ;;  %4374 = vmatprep.mubr.bf16.mxu1 %v7443_v10  ;;  %v7451_v10 = vld [vmem:[%s10099_s0 + $0x58c] ss:$28 sps:$4 sm:$0xff]  }
 0x27b   :  { %4663 = vmatprep.mubr.bf16.mxu0 %v7445_v11 }
 0x27c   :  { %v8996_v22 = vpop.f32.mrb[180].mxu1 }
 0x27d   :  { %10138 = vst [vmem:[#allocation39_spill] sm:$0xff] %v8996_v22  ;;  %v3745_v61 = vpop.f32.mrb[181].mxu1 }
 0x27e   :  { %v9001_v30 = vpop.f32.mrb[182].mxu1 }
 0x27f   :  { %10139 = vst [vmem:[#allocation40_spill] sm:$0xff] %v9001_v30  ;;  %v3748_v57 = vpop.f32.mrb[183].mxu1  ;;  %v7453_v30 = vld [vmem:[%s10099_s0 + $0xc80] ss:$28 sps:$4 sm:$0xff]  }
 0x280   :  { %v7454_v57 = vld [vmem:[%s10099_s0 + $0x588] ss:$28 sps:$4 sm:$0xff]  }
 0x281   :  { %4375 = vmatmul.mubr.bf16.gmra.mrb[224].mxu1 %v7447_v51  ;;  %v7455_v51 = vld [vmem:[%s10099_s0 + $0xcbc] ss:$28 sps:$4 sm:$0xff]  }
 0x282   :  { %4664 = vmatmul.mubr.bf16.gmra.mrb[96].mxu0 %v7448_v41  ;;  %4382 = vmatprep.mubr.bf16.mxu1 %v7449_v60  ;;  %v7457_v60 = vld [vmem:[%s10099_s0 + $0x5c4] ss:$28 sps:$4 sm:$0xff]  }
 0x283   :  { %4671 = vmatprep.mubr.bf16.mxu0 %v7451_v10 }
 0x284   :  { %v9012_v11 = vpop.f32.mrb[184].mxu1 }
 0x285   :  { %10140 = vst [vmem:[#allocation41_spill] sm:$0xff] %v9012_v11  ;;  %v3753_v61 = vpop.f32.mrb[185].mxu1 }
 0x286   :  { %v9017_v22 = vpop.f32.mrb[186].mxu1 }
 0x287   :  { %10141 = vst [vmem:[#allocation42_spill] sm:$0xff] %v9017_v22  ;;  %v3756_v41 = vpop.f32.mrb[187].mxu1  ;;  %v7459_v22 = vld [vmem:[%s10099_s0 + $0xcb8] ss:$28 sps:$4 sm:$0xff]  }
 0x288   :  { %v7460_v41 = vld [vmem:[%s10099_s0 + $0x5c0] ss:$28 sps:$4 sm:$0xff]  }
 0x289   :  { %4383 = vmatmul.mubr.bf16.gmra.mrb[228].mxu1 %v7453_v30  ;;  %v7461_v30 = vld [vmem:[%s10099_s0 + $0xcf4] ss:$28 sps:$4 sm:$0xff]  }
 0x28a   :  { %4672 = vmatmul.mubr.bf16.gmra.mrb[100].mxu0 %v7454_v57  ;;  %4390 = vmatprep.mubr.bf16.mxu1 %v7455_v51  ;;  %v7463_v51 = vld [vmem:[%s10099_s0 + $0x5fc] ss:$28 sps:$4 sm:$0xff]  }
 0x28b   :  { %4679 = vmatprep.mubr.bf16.mxu0 %v7457_v60 }
 0x28c   :  { %v9028_v10 = vpop.f32.mrb[188].mxu1 }
 0x28d   :  { %10142 = vst [vmem:[#allocation43_spill] sm:$0xff] %v9028_v10  ;;  %v3761_v61 = vpop.f32.mrb[189].mxu1 }
 0x28e   :  { %v9033_v11 = vpop.f32.mrb[190].mxu1  ;;  %v7465_v61 = vld [vmem:[%s10099_s0 + $0xcf0] ss:$28 sps:$4 sm:$0xff]  }
 0x28f   :  { %10143 = vst [vmem:[#allocation44_spill] sm:$0xff] %v9033_v11  ;;  %v3764_v57 = vpop.f32.mrb[191].mxu1 }
 0x290   :  { %v7466_v57 = vld [vmem:[%s10099_s0 + $0x5f8] ss:$28 sps:$4 sm:$0xff]  }
 0x291   :  { %4391 = vmatmul.mubr.bf16.gmra.mrb[232].mxu1 %v7459_v22  ;;  %v7467_v22 = vld [vmem:[%s10099_s0 + $0xd2c] ss:$28 sps:$4 sm:$0xff]  }
 0x292   :  { %4680 = vmatmul.mubr.bf16.gmra.mrb[104].mxu0 %v7460_v41  ;;  %4398 = vmatprep.mubr.bf16.mxu1 %v7461_v30  ;;  %v7469_v30 = vld [vmem:[%s10099_s0 + $0x634] ss:$28 sps:$4 sm:$0xff]  }
 0x293   :  { %4687 = vmatprep.mubr.bf16.mxu0 %v7463_v51 }
 0x295   :  { %v4473_v60 = vpop.f32.mrb[0].mxu0 }
 0x296   :  { %v9048_v11 = vadd.f32 %v4473_v60, %v8265_v32  ;;  %v4475_v10 = vpop.f32.mrb[1].mxu0 }
 0x297   :  { %v4476_v41 = vpop.f32.mrb[2].mxu0  ;;  %v7471_v10 = vld [vmem:[%s10099_s0 + $0xd28] ss:$28 sps:$4 sm:$0xff]  }
 0x298   :  { %10144 = vst [vmem:[#allocation45_spill] sm:$0xff] %v9048_v11  ;;  %v9060_v51 = vadd.f32 %v4476_v41, %v8271_v35  ;;  %v4478_v24 = vpop.f32.mrb[3].mxu0  ;;  %v7472_v11 = vld [vmem:[%s10099_s0 + $0x630] ss:$28 sps:$4 sm:$0xff]   ;;  %v7473_v35 = vld [vmem:[%s10099_s0 + $0xd64] ss:$28 sps:$4 sm:$0xff]  }
 0x299   :  { %4399 = vmatmul.mubr.bf16.gmra.mrb[236].mxu1 %v7465_v61  ;;  %v7475_v61 = vld [vmem:[%s10099_s0 + $0x66c] ss:$28 sps:$4 sm:$0xff]  }
 0x29a   :  { %4688 = vmatmul.mubr.bf16.gmra.mrb[108].mxu0 %v7466_v57  ;;  %4406 = vmatprep.mubr.bf16.mxu1 %v7467_v22 }
 0x29b   :  { %4695 = vmatprep.mubr.bf16.mxu0 %v7469_v30 }
 0x29d   :  { %v4481_v32 = vpop.f32.mrb[4].mxu0 }
 0x29e   :  { %v9066_v60 = vadd.f32 %v4481_v32, %v8282_v0  ;;  %v4483_v37 = vpop.f32.mrb[5].mxu0  ;;  %v7478_v32 = vld [vmem:[%s10099_s0 + $0x668] ss:$28 sps:$4 sm:$0xff]  }
 0x29f   :  { %v4484_v24 = vpop.f32.mrb[6].mxu0  ;;  %v7477_v37 = vld [vmem:[%s10099_s0 + $0xd60] ss:$28 sps:$4 sm:$0xff]  }
 0x2a0   :  { %v9078_v57 = vadd.f32 %v4484_v24, %v8287_v42  ;;  %v4486_v22 = vpop.f32.mrb[7].mxu0  ;;  %v7479_v42 = vld [vmem:[%s10099_s0 + $0xd9c] ss:$28 sps:$4 sm:$0xff]  }
 0x2a1   :  { %4407 = vmatmul.mubr.bf16.gmra.mrb[240].mxu1 %v7471_v10  ;;  %v7481_v10 = vld [vmem:[%s10099_s0 + $0x6a4] ss:$28 sps:$4 sm:$0xff]  }
 0x2a2   :  { %4696 = vmatmul.mubr.bf16.gmra.mrb[112].mxu0 %v7472_v11  ;;  %4414 = vmatprep.mubr.bf16.mxu1 %v7473_v35 }
 0x2a3   :  { %4703 = vmatprep.mubr.bf16.mxu0 %v7475_v61  ;;  %v7483_v61 = vld [vmem:[%s10099_s0 + $0xd98] ss:$28 sps:$4 sm:$0xff]  }
 0x2a5   :  { %v4489_v0 = vpop.f32.mrb[8].mxu0 }
 0x2a6   :  { %v9084_v41 = vadd.f32 %v4489_v0, %v8298_v47  ;;  %v4491_v30 = vpop.f32.mrb[9].mxu0 }
 0x2a7   :  { %v4492_v11 = vpop.f32.mrb[10].mxu0  ;;  %v7484_v30 = vld [vmem:[%s10099_s0 + $0x6a0] ss:$28 sps:$4 sm:$0xff]  }
 0x2a8   :  { %v9096_v35 = vadd.f32 %v4492_v11, %v8303_v50  ;;  %v4494_v24 = vpop.f32.mrb[11].mxu0  ;;  %v7485_v50 = vld [vmem:[%s10099_s0 + $0xdd4] ss:$28 sps:$4 sm:$0xff]  }
 0x2a9   :  { %4415 = vmatmul.mubr.bf16.gmra.mrb[244].mxu1 %v7477_v37 }
 0x2aa   :  { %4704 = vmatmul.mubr.bf16.gmra.mrb[116].mxu0 %v7478_v32  ;;  %4422 = vmatprep.mubr.bf16.mxu1 %v7479_v42  ;;  %v7487_v32 = vld [vmem:[%s10099_s0 + $0x6dc] ss:$28 sps:$4 sm:$0xff]  }
 0x2ab   :  { %4711 = vmatprep.mubr.bf16.mxu0 %v7481_v10  ;;  %v7489_v10 = vld [vmem:[%s10099_s0 + $0xdd0] ss:$28 sps:$4 sm:$0xff]  }
 0x2ad   :  { %v4497_v47 = vpop.f32.mrb[12].mxu0 }
 0x2ae   :  { %v9102_v22 = vadd.f32 %v4497_v47, %v8317_v56  ;;  %v4499_v0 = vpop.f32.mrb[13].mxu0 }
 0x2af   :  { %v4500_v37 = vpop.f32.mrb[14].mxu0  ;;  %v7490_v0 = vld [vmem:[%s10099_s0 + $0x6d8] ss:$28 sps:$4 sm:$0xff]  }
 0x2b0   :  { %v9114_v42 = vadd.f32 %v4500_v37, %v8322_v59  ;;  %v4502_v11 = vpop.f32.mrb[15].mxu0  ;;  %v7493_v59 = vld [vmem:[%s10099_s0 + $0x18] ss:$28 sps:$4 sm:$0xff]  }
 0x2b1   :  { %4423 = vmatmul.mubr.bf16.gmra.mrb[248].mxu1 %v7483_v61 }
 0x2b2   :  { %4712 = vmatmul.mubr.bf16.gmra.mrb[120].mxu0 %v7484_v30  ;;  %4430 = vmatprep.mubr.bf16.mxu1 %v7485_v50  ;;  %v7491_v30 = vld [vmem:[%s10099_s0 + $0x714] ss:$28 sps:$4 sm:$0xff]  }
 0x2b3   :  { %4719 = vmatprep.mubr.bf16.mxu0 %v7487_v32  ;;  %v7495_v32 = vld [vmem:[%s10099_s0 + $0x50] ss:$28 sps:$4 sm:$0xff]  }
 0x2b5   :  { %v4505_v56 = vpop.f32.mrb[16].mxu0 }
 0x2b6   :  { %v9120_v24 = vadd.f32 %v4505_v56, %v8333_v1  ;;  %v4507_v47 = vpop.f32.mrb[17].mxu0 }
 0x2b7   :  { %v4508_v61 = vpop.f32.mrb[18].mxu0 }
 0x2b8   :  { %v9132_v50 = vadd.f32 %v4508_v61, %v8338_v4  ;;  %v4510_v1 = vpop.f32.mrb[19].mxu0  ;;  %v7494_v4 = vld [vmem:[%s10099_s0 + $0x710] ss:$28 sps:$4 sm:$0xff]  }
 0x2b9   :  { %4431 = vmatmul.mubr.bf16.gmra.mrb[252].mxu1 %v7489_v10  ;;  %v7498_v10 = vld [vmem:[%s10099_s0 + $0x88] ss:$28 sps:$4 sm:$0xff]  }
 0x2ba   :  { %4720 = vmatmul.mubr.bf16.gmra.mrb[124].mxu0 %v7490_v0  ;;  %6417 = vmatprep.mubr.msk.bf16.mxu1 %vm3156_vm0, %v7493_v59  ;;  %v7496_v0 = vld [vmem:[%s10099_s0 + $0x74c] ss:$28 sps:$4 sm:$0xff]  }
 0x2bb   :  { %4727 = vmatprep.mubr.bf16.mxu0 %v7491_v30  ;;  %v7500_v30 = vld [vmem:[%s10099_s0 + $0xc0] ss:$28 sps:$4 sm:$0xff]  }
 0x2bd   :  { %v4513_v37 = vpop.f32.mrb[20].mxu0 }
 0x2be   :  { %v9139_v11 = vadd.f32 %v4513_v37, %v8349_v9  ;;  %v4515_v56 = vpop.f32.mrb[21].mxu0 }
 0x2bf   :  { %v4516_v47 = vpop.f32.mrb[22].mxu0 }
 0x2c0   :  { %v9151_v59 = vadd.f32 %v4516_v47, %v8354_v12  ;;  %v4518_v61 = vpop.f32.mrb[23].mxu0  ;;  %v7499_v12 = vld [vmem:[%s10099_s0 + $0x748] ss:$28 sps:$4 sm:$0xff]  }
 0x2c1   :  { %6418 = vmatmul.mubr.msk.bf16.vlgmr.msra.gmra.mrb[0].mxu1 %vm3156_vm0, %v7495_v32  ;;  %v7503_v32 = vld [vmem:[%s10099_s0 + $0xf8] ss:$28 sps:$4 sm:$0xff]  }
 0x2c2   :  { %4728 = vmatmul.mubr.bf16.gmra.mrb[128].mxu0 %v7494_v4  ;;  %6421 = vmatprep.mubr.msk.bf16.mxu1 %vm3156_vm0, %v7498_v10  ;;  %v7501_v4 = vld [vmem:[%s10099_s0 + $0x784] ss:$28 sps:$4 sm:$0xff]  }
 0x2c3   :  { %4735 = vmatprep.mubr.bf16.mxu0 %v7496_v0  ;;  %v7505_v0 = vld [vmem:[%s10099_s0 + $0x130] ss:$28 sps:$4 sm:$0xff]  }
 0x2c5   :  { %v4521_v9 = vpop.f32.mrb[24].mxu0 }
 0x2c6   :  { %v9159_v1 = vadd.f32 %v4521_v9, %v8365_v17  ;;  %v4523_v37 = vpop.f32.mrb[25].mxu0 }
 0x2c7   :  { %v4524_v56 = vpop.f32.mrb[26].mxu0 }
 0x2c8   :  { %v9171_v10 = vadd.f32 %v4524_v56, %v8370_v20  ;;  %v4526_v47 = vpop.f32.mrb[27].mxu0  ;;  %v7504_v20 = vld [vmem:[%s10099_s0 + $0x780] ss:$28 sps:$4 sm:$0xff]  }
 0x2c9   :  { %6422 = vmatmul.mubr.msk.bf16.gmra.mrb[4].mxu1 %vm3156_vm0, %v7500_v30  ;;  %v7508_v30 = vld [vmem:[%s10099_s0 + $0x168] ss:$28 sps:$4 sm:$0xff]  }
 0x2ca   :  { %4736 = vmatmul.mubr.bf16.gmra.mrb[132].mxu0 %v7499_v12  ;;  %6425 = vmatprep.mubr.msk.bf16.mxu1 %vm3156_vm0, %v7503_v32  ;;  %v7506_v12 = vld [vmem:[%s10099_s0 + $0x7bc] ss:$28 sps:$4 sm:$0xff]  }
 0x2cb   :  { %4743 = vmatprep.mubr.bf16.mxu0 %v7501_v4  ;;  %v7510_v4 = vld [vmem:[%s10099_s0 + $0x1a0] ss:$28 sps:$4 sm:$0xff]  }
 0x2cd   :  { %v4529_v17 = vpop.f32.mrb[28].mxu0 }
 0x2ce   :  { %v9179_v61 = vadd.f32 %v4529_v17, %v8381_v25  ;;  %v4531_v9 = vpop.f32.mrb[29].mxu0 }
 0x2cf   :  { %v4532_v37 = vpop.f32.mrb[30].mxu0 }
 0x2d0   :  { %v9191_v32 = vadd.f32 %v4532_v37, %v8386_v28  ;;  %v4534_v56 = vpop.f32.mrb[31].mxu0  ;;  %v7509_v28 = vld [vmem:[%s10099_s0 + $0x7b8] ss:$28 sps:$4 sm:$0xff]  }
 0x2d1   :  { %6426 = vmatmul.mubr.msk.bf16.gmra.mrb[8].mxu1 %vm3156_vm0, %v7505_v0  ;;  %v7513_v0 = vld [vmem:[%s10099_s0 + $0x1d8] ss:$28 sps:$4 sm:$0xff]  }
 0x2d2   :  { %4744 = vmatmul.mubr.bf16.gmra.mrb[136].mxu0 %v7504_v20  ;;  %6429 = vmatprep.mubr.msk.bf16.mxu1 %vm3156_vm0, %v7508_v30  ;;  %v7511_v20 = vld [vmem:[%s10099_s0 + $0x7f4] ss:$28 sps:$4 sm:$0xff]  }
 0x2d3   :  { %4751 = vmatprep.mubr.bf16.mxu0 %v7506_v12  ;;  %v7515_v12 = vld [vmem:[%s10099_s0 + $0x210] ss:$28 sps:$4 sm:$0xff]  }
 0x2d5   :  { %v4537_v25 = vpop.f32.mrb[32].mxu0 }
 0x2d6   :  { %v9199_v47 = vadd.f32 %v4537_v25, %v8397_v34  ;;  %v4539_v17 = vpop.f32.mrb[33].mxu0 }
 0x2d7   :  { %v4540_v9 = vpop.f32.mrb[34].mxu0 }
 0x2d8   :  { %v9211_v30 = vadd.f32 %v4540_v9, %v8402_v38  ;;  %v4542_v37 = vpop.f32.mrb[35].mxu0  ;;  %v7514_v38 = vld [vmem:[%s10099_s0 + $0x7f0] ss:$28 sps:$4 sm:$0xff]  }
 0x2d9   :  { %6430 = vmatmul.mubr.msk.bf16.gmra.mrb[12].mxu1 %vm3156_vm0, %v7510_v4  ;;  %v7518_v4 = vld [vmem:[%s10099_s0 + $0x248] ss:$28 sps:$4 sm:$0xff]  }
 0x2da   :  { %4752 = vmatmul.mubr.bf16.gmra.mrb[140].mxu0 %v7509_v28  ;;  %6433 = vmatprep.mubr.msk.bf16.mxu1 %vm3156_vm0, %v7513_v0  ;;  %v7516_v28 = vld [vmem:[%s10099_s0 + $0x82c] ss:$28 sps:$4 sm:$0xff]  }
 0x2db   :  { %4759 = vmatprep.mubr.bf16.mxu0 %v7511_v20  ;;  %v7520_v20 = vld [vmem:[%s10099_s0 + $0x280] ss:$28 sps:$4 sm:$0xff]  }
 0x2dd   :  { %v4545_v34 = vpop.f32.mrb[36].mxu0 }
 0x2de   :  { %v9219_v56 = vadd.f32 %v4545_v34, %v8413_v44  ;;  %v4547_v25 = vpop.f32.mrb[37].mxu0 }
 0x2df   :  { %v4548_v17 = vpop.f32.mrb[38].mxu0 }
 0x2e0   :  { %v9231_v0 = vadd.f32 %v4548_v17, %v8418_v48  ;;  %v4550_v9 = vpop.f32.mrb[39].mxu0  ;;  %v7519_v48 = vld [vmem:[%s10099_s0 + $0x828] ss:$28 sps:$4 sm:$0xff]  }
 0x2e1   :  { %6434 = vmatmul.mubr.msk.bf16.gmra.mrb[16].mxu1 %vm3156_vm0, %v7515_v12  ;;  %v7523_v12 = vld [vmem:[%s10099_s0 + $0x2b8] ss:$28 sps:$4 sm:$0xff]  }
 0x2e2   :  { %4760 = vmatmul.mubr.bf16.gmra.mrb[144].mxu0 %v7514_v38  ;;  %6437 = vmatprep.mubr.msk.bf16.mxu1 %vm3156_vm0, %v7518_v4  ;;  %v7521_v38 = vld [vmem:[%s10099_s0 + $0x864] ss:$28 sps:$4 sm:$0xff]  }
 0x2e3   :  { %4767 = vmatprep.mubr.bf16.mxu0 %v7516_v28  ;;  %v7525_v28 = vld [vmem:[%s10099_s0 + $0x2f0] ss:$28 sps:$4 sm:$0xff]  }
 0x2e5   :  { %v4553_v44 = vpop.f32.mrb[40].mxu0 }
 0x2e6   :  { %v9239_v37 = vadd.f32 %v4553_v44, %v8429_v54  ;;  %v4555_v34 = vpop.f32.mrb[41].mxu0 }
 0x2e7   :  { %v4556_v25 = vpop.f32.mrb[42].mxu0 }
 0x2e8   :  { %v9251_v4 = vadd.f32 %v4556_v25, %v8434_v58  ;;  %v4558_v17 = vpop.f32.mrb[43].mxu0  ;;  %v7524_v58 = vld [vmem:[%s10099_s0 + $0x860] ss:$28 sps:$4 sm:$0xff]  }
 0x2e9   :  { %6438 = vmatmul.mubr.msk.bf16.gmra.mrb[20].mxu1 %vm3156_vm0, %v7520_v20  ;;  %v7528_v20 = vld [vmem:[%s10099_s0 + $0x328] ss:$28 sps:$4 sm:$0xff]  }
 0x2ea   :  { %4768 = vmatmul.mubr.bf16.gmra.mrb[148].mxu0 %v7519_v48  ;;  %6441 = vmatprep.mubr.msk.bf16.mxu1 %vm3156_vm0, %v7523_v12  ;;  %v7526_v48 = vld [vmem:[%s10099_s0 + $0x89c] ss:$28 sps:$4 sm:$0xff]  }
 0x2eb   :  { %4775 = vmatprep.mubr.bf16.mxu0 %v7521_v38  ;;  %v7530_v38 = vld [vmem:[%s10099_s0 + $0x360] ss:$28 sps:$4 sm:$0xff]  }
 0x2ed   :  { %v4561_v54 = vpop.f32.mrb[44].mxu0 }
 0x2ee   :  { %v9259_v9 = vadd.f32 %v4561_v54, %v8445_v2  ;;  %v4563_v44 = vpop.f32.mrb[45].mxu0 }
 0x2ef   :  { %v4564_v34 = vpop.f32.mrb[46].mxu0 }
 0x2f0   :  { %v9271_v12 = vadd.f32 %v4564_v34, %v8450_v6  ;;  %v4566_v25 = vpop.f32.mrb[47].mxu0  ;;  %v7529_v6 = vld [vmem:[%s10099_s0 + $0x898] ss:$28 sps:$4 sm:$0xff]  }
 0x2f1   :  { %6442 = vmatmul.mubr.msk.bf16.gmra.mrb[24].mxu1 %vm3156_vm0, %v7525_v28  ;;  %v7533_v28 = vld [vmem:[%s10099_s0 + $0x398] ss:$28 sps:$4 sm:$0xff]  }
 0x2f2   :  { %4776 = vmatmul.mubr.bf16.gmra.mrb[152].mxu0 %v7524_v58  ;;  %6445 = vmatprep.mubr.msk.bf16.mxu1 %vm3156_vm0, %v7528_v20  ;;  %v7531_v58 = vld [vmem:[%s10099_s0 + $0x8d4] ss:$28 sps:$4 sm:$0xff]  }
 0x2f3   :  { %4783 = vmatprep.mubr.bf16.mxu0 %v7526_v48  ;;  %v7535_v48 = vld [vmem:[%s10099_s0 + $0x3d0] ss:$28 sps:$4 sm:$0xff]  }
 0x2f5   :  { %v4569_v2 = vpop.f32.mrb[48].mxu0 }
 0x2f6   :  { %v9279_v17 = vadd.f32 %v4569_v2, %v8461_v13  ;;  %v4571_v54 = vpop.f32.mrb[49].mxu0 }
 0x2f7   :  { %v4572_v44 = vpop.f32.mrb[50].mxu0 }
 0x2f8   :  { %v9291_v20 = vadd.f32 %v4572_v44, %v8466_v16  ;;  %v4574_v34 = vpop.f32.mrb[51].mxu0  ;;  %v7534_v16 = vld [vmem:[%s10099_s0 + $0x8d0] ss:$28 sps:$4 sm:$0xff]  }
 0x2f9   :  { %6446 = vmatmul.mubr.msk.bf16.gmra.mrb[28].mxu1 %vm3156_vm0, %v7530_v38  ;;  %v7538_v38 = vld [vmem:[%s10099_s0 + $0x408] ss:$28 sps:$4 sm:$0xff]  }
 0x2fa   :  { %4784 = vmatmul.mubr.bf16.gmra.mrb[156].mxu0 %v7529_v6  ;;  %6449 = vmatprep.mubr.msk.bf16.mxu1 %vm3156_vm0, %v7533_v28  ;;  %v7536_v6 = vld [vmem:[%s10099_s0 + $0x90c] ss:$28 sps:$4 sm:$0xff]  }
 0x2fb   :  { %4791 = vmatprep.mubr.bf16.mxu0 %v7531_v58  ;;  %v7540_v58 = vld [vmem:[%s10099_s0 + $0x440] ss:$28 sps:$4 sm:$0xff]  }
 0x2fd   :  { %v4577_v13 = vpop.f32.mrb[52].mxu0 }
 0x2fe   :  { %v9299_v25 = vadd.f32 %v4577_v13, %v8477_v23  ;;  %v4579_v2 = vpop.f32.mrb[53].mxu0 }
 0x2ff   :  { %v4580_v54 = vpop.f32.mrb[54].mxu0 }
 0x300   :  { %v9311_v28 = vadd.f32 %v4580_v54, %v8482_v27  ;;  %v4582_v44 = vpop.f32.mrb[55].mxu0  ;;  %v7539_v27 = vld [vmem:[%s10099_s0 + $0x908] ss:$28 sps:$4 sm:$0xff]  }
 0x301   :  { %6450 = vmatmul.mubr.msk.bf16.gmra.mrb[32].mxu1 %vm3156_vm0, %v7535_v48  ;;  %v7543_v48 = vld [vmem:[%s10099_s0 + $0x478] ss:$28 sps:$4 sm:$0xff]  }
 0x302   :  { %4792 = vmatmul.mubr.bf16.gmra.mrb[160].mxu0 %v7534_v16  ;;  %6453 = vmatprep.mubr.msk.bf16.mxu1 %vm3156_vm0, %v7538_v38  ;;  %v7541_v16 = vld [vmem:[%s10099_s0 + $0x944] ss:$28 sps:$4 sm:$0xff]  }
 0x303   :  { %4799 = vmatprep.mubr.bf16.mxu0 %v7536_v6  ;;  %v7545_v6 = vld [vmem:[%s10099_s0 + $0x4b0] ss:$28 sps:$4 sm:$0xff]  }
 0x305   :  { %v4585_v23 = vpop.f32.mrb[56].mxu0 }
 0x306   :  { %v9319_v34 = vadd.f32 %v4585_v23, %v8493_v36  ;;  %v4587_v13 = vpop.f32.mrb[57].mxu0 }
 0x307   :  { %v4588_v2 = vpop.f32.mrb[58].mxu0 }
 0x308   :  { %v9331_v38 = vadd.f32 %v4588_v2, %v8498_v40  ;;  %v4590_v54 = vpop.f32.mrb[59].mxu0  ;;  %v7544_v40 = vld [vmem:[%s10099_s0 + $0x940] ss:$28 sps:$4 sm:$0xff]  }
 0x309   :  { %6454 = vmatmul.mubr.msk.bf16.gmra.mrb[36].mxu1 %vm3156_vm0, %v7540_v58  ;;  %v7548_v58 = vld [vmem:[%s10099_s0 + $0x4e8] ss:$28 sps:$4 sm:$0xff]  }
 0x30a   :  { %4800 = vmatmul.mubr.bf16.gmra.mrb[164].mxu0 %v7539_v27  ;;  %6457 = vmatprep.mubr.msk.bf16.mxu1 %vm3156_vm0, %v7543_v48  ;;  %v7546_v27 = vld [vmem:[%s10099_s0 + $0x97c] ss:$28 sps:$4 sm:$0xff]  }
 0x30b   :  { %4807 = vmatprep.mubr.bf16.mxu0 %v7541_v16 }
 0x30d   :  { %v4593_v36 = vpop.f32.mrb[60].mxu0 }
 0x30e   :  { %v9339_v44 = vadd.f32 %v4593_v36, %v8509_v49  ;;  %v4595_v23 = vpop.f32.mrb[61].mxu0  ;;  %v7550_v36 = vld [vmem:[%s10099_s0 + $0x520] ss:$28 sps:$4 sm:$0xff]  }
 0x30f   :  { %v4596_v13 = vpop.f32.mrb[62].mxu0 }
 0x310   :  { %v9351_v48 = vadd.f32 %v4596_v13, %v8514_v53  ;;  %v4598_v2 = vpop.f32.mrb[63].mxu0 }
 0x311   :  { %6458 = vmatmul.mubr.msk.bf16.gmra.mrb[40].mxu1 %vm3156_vm0, %v7545_v6  ;;  %v7549_v6 = vld [vmem:[%s10099_s0 + $0x978] ss:$28 sps:$4 sm:$0xff]  }
 0x312   :  { %4808 = vmatmul.mubr.bf16.gmra.mrb[168].mxu0 %v7544_v40  ;;  %6461 = vmatprep.mubr.msk.bf16.mxu1 %vm3156_vm0, %v7548_v58  ;;  %v7553_v40 = vld [vmem:[%s10099_s0 + $0x558] ss:$28 sps:$4 sm:$0xff]  }
 0x313   :  { %4815 = vmatprep.mubr.bf16.mxu0 %v7546_v27  ;;  %v7551_v2 = vld [vmem:[%s10099_s0 + $0x9b4] ss:$28 sps:$4 sm:$0xff]  }
 0x314   :  { %v9355_v49 = vpop.f32.mrb[192].mxu1 }
 0x315   :  { %10145 = vst [vmem:[#allocation46_spill] sm:$0xff] %v9355_v49  ;;  %v4601_v16 = vpop.f32.mrb[64].mxu0  ;;  %v4314_v54 = vpop.f32.mrb[193].mxu1 }
 0x316   :  { %v9361_v23 = vadd.f32 %v4601_v16, %v8525_v62  ;;  %v4603_v53 = vpop.f32.mrb[65].mxu0  ;;  %v9363_v13 = vpop.f32.mrb[194].mxu1 }
 0x317   :  { %10146 = vst [vmem:[#allocation47_spill] sm:$0xff] %v9363_v13  ;;  %v4604_v58 = vpop.f32.mrb[66].mxu0  ;;  %v4317_v27 = vpop.f32.mrb[195].mxu1 }
 0x318   :  { %v9375_v62 = vadd.f32 %v4604_v58, %v8530_v5  ;;  %v4606_v16 = vpop.f32.mrb[67].mxu0  ;;  %v7555_v27 = vld [vmem:[%s10099_s0 + $0x590] ss:$28 sps:$4 sm:$0xff]  }
 0x319   :  { %6462 = vmatmul.mubr.msk.bf16.gmra.mrb[44].mxu1 %vm3156_vm0, %v7550_v36  ;;  %v7554_v36 = vld [vmem:[%s10099_s0 + $0x9b0] ss:$28 sps:$4 sm:$0xff]  }
 0x31a   :  { %4816 = vmatmul.mubr.bf16.gmra.mrb[172].mxu0 %v7549_v6  ;;  %6465 = vmatprep.mubr.msk.bf16.mxu1 %vm3156_vm0, %v7553_v40  ;;  %v7558_v6 = vld [vmem:[%s10099_s0 + $0x5c8] ss:$28 sps:$4 sm:$0xff]  }
 0x31b   :  { %4823 = vmatprep.mubr.bf16.mxu0 %v7551_v2  ;;  %v7556_v2 = vld [vmem:[%s10099_s0 + $0x9ec] ss:$28 sps:$4 sm:$0xff]  }
 0x31c   :  { %v9379_v54 = vpop.f32.mrb[196].mxu1 }
 0x31d   :  { %10147 = vst [vmem:[#allocation48_spill] sm:$0xff] %v9379_v54  ;;  %v4609_v53 = vpop.f32.mrb[68].mxu0  ;;  %v4322_v13 = vpop.f32.mrb[197].mxu1 }
 0x31e   :  { %v9385_v49 = vadd.f32 %v4609_v53, %v8541_v14  ;;  %v4611_v5 = vpop.f32.mrb[69].mxu0  ;;  %v9387_v58 = vpop.f32.mrb[198].mxu1 }
 0x31f   :  { %10148 = vst [vmem:[#allocation49_spill] sm:$0xff] %v9387_v58  ;;  %v4612_v40 = vpop.f32.mrb[70].mxu0  ;;  %v4325_v13 = vpop.f32.mrb[199].mxu1 }
 0x320   :  { %v9399_v14 = vadd.f32 %v4612_v40, %v8546_v19  ;;  %v4614_v16 = vpop.f32.mrb[71].mxu0  ;;  %v7560_v13 = vld [vmem:[%s10099_s0 + $0x600] ss:$28 sps:$4 sm:$0xff]  }
 0x321   :  { %6466 = vmatmul.mubr.msk.bf16.gmra.mrb[48].mxu1 %vm3156_vm0, %v7555_v27  ;;  %v7559_v27 = vld [vmem:[%s10099_s0 + $0x9e8] ss:$28 sps:$4 sm:$0xff]  }
 0x322   :  { %4824 = vmatmul.mubr.bf16.gmra.mrb[176].mxu0 %v7554_v36  ;;  %6469 = vmatprep.mubr.msk.bf16.mxu1 %vm3156_vm0, %v7558_v6  ;;  %v7563_v36 = vld [vmem:[%s10099_s0 + $0x638] ss:$28 sps:$4 sm:$0xff]  }
 0x323   :  { %4831 = vmatprep.mubr.bf16.mxu0 %v7556_v2  ;;  %v7561_v2 = vld [vmem:[%s10099_s0 + $0xa24] ss:$28 sps:$4 sm:$0xff]  }
 0x324   :  { %v9403_v53 = vpop.f32.mrb[200].mxu1 }
 0x325   :  { %10149 = vst [vmem:[#allocation50_spill] sm:$0xff] %v9403_v53  ;;  %v4617_v5 = vpop.f32.mrb[72].mxu0  ;;  %v4330_v58 = vpop.f32.mrb[201].mxu1 }
 0x326   :  { %v9409_v54 = vadd.f32 %v4617_v5, %v8557_v29  ;;  %v4619_v19 = vpop.f32.mrb[73].mxu0  ;;  %v9411_v40 = vpop.f32.mrb[202].mxu1 }
 0x327   :  { %10150 = vst [vmem:[#allocation51_spill] sm:$0xff] %v9411_v40  ;;  %v4620_v6 = vpop.f32.mrb[74].mxu0  ;;  %v4333_v58 = vpop.f32.mrb[203].mxu1 }
 0x328   :  { %v9423_v29 = vadd.f32 %v4620_v6, %v8562_v33  ;;  %v4622_v16 = vpop.f32.mrb[75].mxu0  ;;  %v7565_v58 = vld [vmem:[%s10099_s0 + $0x670] ss:$28 sps:$4 sm:$0xff]  }
 0x329   :  { %6470 = vmatmul.mubr.msk.bf16.gmra.mrb[52].mxu1 %vm3156_vm0, %v7560_v13  ;;  %v7564_v13 = vld [vmem:[%s10099_s0 + $0xa20] ss:$28 sps:$4 sm:$0xff]  }
 0x32a   :  { %4832 = vmatmul.mubr.bf16.gmra.mrb[180].mxu0 %v7559_v27  ;;  %6473 = vmatprep.mubr.msk.bf16.mxu1 %vm3156_vm0, %v7563_v36  ;;  %v7568_v27 = vld [vmem:[%s10099_s0 + $0x6a8] ss:$28 sps:$4 sm:$0xff]  }
 0x32b   :  { %4839 = vmatprep.mubr.bf16.mxu0 %v7561_v2  ;;  %v7566_v2 = vld [vmem:[%s10099_s0 + $0xa5c] ss:$28 sps:$4 sm:$0xff]  }
 0x32c   :  { %v9427_v5 = vpop.f32.mrb[204].mxu1 }
 0x32d   :  { %10151 = vst [vmem:[#allocation52_spill] sm:$0xff] %v9427_v5  ;;  %v4625_v19 = vpop.f32.mrb[76].mxu0  ;;  %v4338_v40 = vpop.f32.mrb[205].mxu1 }
 0x32e   :  { %v9433_v53 = vadd.f32 %v4625_v19, %v8573_v45  ;;  %v4627_v33 = vpop.f32.mrb[77].mxu0  ;;  %v9435_v6 = vpop.f32.mrb[206].mxu1 }
 0x32f   :  { %10152 = vst [vmem:[#allocation53_spill] sm:$0xff] %v9435_v6  ;;  %v4628_v36 = vpop.f32.mrb[78].mxu0  ;;  %v4341_v40 = vpop.f32.mrb[207].mxu1 }
 0x330   :  { %v9447_v45 = vadd.f32 %v4628_v36, %v8578_v52  ;;  %v4630_v16 = vpop.f32.mrb[79].mxu0  ;;  %v7570_v40 = vld [vmem:[%s10099_s0 + $0x6e0] ss:$28 sps:$4 sm:$0xff]  }
 0x331   :  { %6474 = vmatmul.mubr.msk.bf16.gmra.mrb[56].mxu1 %vm3156_vm0, %v7565_v58  ;;  %v7569_v58 = vld [vmem:[%s10099_s0 + $0xa58] ss:$28 sps:$4 sm:$0xff]  }
 0x332   :  { %4840 = vmatmul.mubr.bf16.gmra.mrb[184].mxu0 %v7564_v13  ;;  %6477 = vmatprep.mubr.msk.bf16.mxu1 %vm3156_vm0, %v7568_v27  ;;  %v7573_v13 = vld [vmem:[%s10099_s0 + $0x718] ss:$28 sps:$4 sm:$0xff]  }
 0x333   :  { %4847 = vmatprep.mubr.bf16.mxu0 %v7566_v2  ;;  %v7571_v2 = vld [vmem:[%s10099_s0 + $0xa94] ss:$28 sps:$4 sm:$0xff]  }
 0x334   :  { %v9451_v19 = vpop.f32.mrb[208].mxu1 }
 0x335   :  { %10153 = vst [vmem:[#allocation54_spill] sm:$0xff] %v9451_v19  ;;  %v4633_v33 = vpop.f32.mrb[80].mxu0  ;;  %v4346_v6 = vpop.f32.mrb[209].mxu1 }
 0x336   :  { %v9457_v5 = vadd.f32 %v4633_v33, %v8589_v63  ;;  %v4635_v52 = vpop.f32.mrb[81].mxu0  ;;  %v9459_v36 = vpop.f32.mrb[210].mxu1 }
 0x337   :  { %10154 = vst [vmem:[#allocation55_spill] sm:$0xff] %v9459_v36  ;;  %v4636_v27 = vpop.f32.mrb[82].mxu0  ;;  %v4349_v6 = vpop.f32.mrb[211].mxu1 }
 0x338   :  { %v9471_v63 = vadd.f32 %v4636_v27, %v8594_v8  ;;  %v4638_v16 = vpop.f32.mrb[83].mxu0  ;;  %v7575_v6 = vld [vmem:[%s10099_s0 + $0x750] ss:$28 sps:$4 sm:$0xff]  }
 0x339   :  { %6478 = vmatmul.mubr.msk.bf16.gmra.mrb[60].mxu1 %vm3156_vm0, %v7570_v40  ;;  %v7574_v40 = vld [vmem:[%s10099_s0 + $0xa90] ss:$28 sps:$4 sm:$0xff]  }
 0x33a   :  { %4848 = vmatmul.mubr.bf16.gmra.mrb[188].mxu0 %v7569_v58  ;;  %6481 = vmatprep.mubr.msk.bf16.mxu1 %vm3156_vm0, %v7573_v13  ;;  %v7578_v58 = vld [vmem:[%s10099_s0 + $0x788] ss:$28 sps:$4 sm:$0xff]  }
 0x33b   :  { %4855 = vmatprep.mubr.bf16.mxu0 %v7571_v2  ;;  %v7576_v2 = vld [vmem:[%s10099_s0 + $0xacc] ss:$28 sps:$4 sm:$0xff]  }
 0x33c   :  { %v9475_v33 = vpop.f32.mrb[212].mxu1 }
 0x33d   :  { %10155 = vst [vmem:[#allocation56_spill] sm:$0xff] %v9475_v33  ;;  %v4641_v52 = vpop.f32.mrb[84].mxu0  ;;  %v4354_v36 = vpop.f32.mrb[213].mxu1 }
 0x33e   :  { %v9481_v19 = vadd.f32 %v4641_v52, %v8605_v21  ;;  %v4643_v8 = vpop.f32.mrb[85].mxu0  ;;  %v9483_v27 = vpop.f32.mrb[214].mxu1 }
 0x33f   :  { %10156 = vst [vmem:[#allocation57_spill] sm:$0xff] %v9483_v27  ;;  %v4644_v13 = vpop.f32.mrb[86].mxu0  ;;  %v4357_v36 = vpop.f32.mrb[215].mxu1 }
 0x340   :  { %v9495_v21 = vadd.f32 %v4644_v13, %v8610_v26  ;;  %v4646_v16 = vpop.f32.mrb[87].mxu0  ;;  %v7580_v36 = vld [vmem:[%s10099_s0 + $0x7c0] ss:$28 sps:$4 sm:$0xff]  }
 0x341   :  { %6482 = vmatmul.mubr.msk.bf16.gmra.mrb[64].mxu1 %vm3156_vm0, %v7575_v6  ;;  %v7579_v6 = vld [vmem:[%s10099_s0 + $0xac8] ss:$28 sps:$4 sm:$0xff]  }
 0x342   :  { %4856 = vmatmul.mubr.bf16.gmra.mrb[192].mxu0 %v7574_v40  ;;  %6485 = vmatprep.mubr.msk.bf16.mxu1 %vm3156_vm0, %v7578_v58  ;;  %v7583_v40 = vld [vmem:[%s10099_s0 + $0x7f8] ss:$28 sps:$4 sm:$0xff]  }
 0x343   :  { %4863 = vmatprep.mubr.bf16.mxu0 %v7576_v2  ;;  %v7581_v2 = vld [vmem:[%s10099_s0 + $0xb04] ss:$28 sps:$4 sm:$0xff]  }
 0x344   :  { %v9499_v52 = vpop.f32.mrb[216].mxu1 }
 0x345   :  { %10157 = vst [vmem:[#allocation58_spill] sm:$0xff] %v9499_v52  ;;  %v4649_v8 = vpop.f32.mrb[88].mxu0  ;;  %v4362_v27 = vpop.f32.mrb[217].mxu1 }
 0x346   :  { %v9505_v33 = vadd.f32 %v4649_v8, %v8626_v43  ;;  %v4651_v26 = vpop.f32.mrb[89].mxu0  ;;  %v9507_v13 = vpop.f32.mrb[218].mxu1 }
 0x347   :  { %10158 = vst [vmem:[#allocation59_spill] sm:$0xff] %v9507_v13  ;;  %v4652_v58 = vpop.f32.mrb[90].mxu0  ;;  %v4365_v27 = vpop.f32.mrb[219].mxu1 }
 0x348   :  { %v9519_v43 = vadd.f32 %v4652_v58, %v8632_v55  ;;  %v4654_v16 = vpop.f32.mrb[91].mxu0  ;;  %v7585_v27 = vld [vmem:[%s10099_s0 + $0x830] ss:$28 sps:$4 sm:$0xff]  }
 0x349   :  { %6486 = vmatmul.mubr.msk.bf16.gmra.mrb[68].mxu1 %vm3156_vm0, %v7580_v36  ;;  %v7584_v36 = vld [vmem:[%s10099_s0 + $0xb00] ss:$28 sps:$4 sm:$0xff]  }
 0x34a   :  { %10159 = vst [vmem:[#allocation60_spill] sm:$0xff] %v9519_v43  ;;  %4864 = vmatmul.mubr.bf16.gmra.mrb[196].mxu0 %v7579_v6  ;;  %6489 = vmatprep.mubr.msk.bf16.mxu1 %vm3156_vm0, %v7583_v40  ;;  %v7588_v6 = vld [vmem:[%s10099_s0 + $0x868] ss:$28 sps:$4 sm:$0xff]  }
 0x34b   :  { %4871 = vmatprep.mubr.bf16.mxu0 %v7581_v2  ;;  %v7586_v2 = vld [vmem:[%s10099_s0 + $0xb3c] ss:$28 sps:$4 sm:$0xff]  }
 0x34c   :  { %v9523_v8 = vpop.f32.mrb[220].mxu1 }
 0x34d   :  { %10160 = vst [vmem:[#allocation61_spill] sm:$0xff] %v9523_v8  ;;  %v4657_v26 = vpop.f32.mrb[92].mxu0  ;;  %v4370_v13 = vpop.f32.mrb[221].mxu1 }
 0x34e   :  { %v9529_v52 = vadd.f32 %v4657_v26, %v8643_v7  ;;  %v4659_v55 = vpop.f32.mrb[93].mxu0  ;;  %v9531_v58 = vpop.f32.mrb[222].mxu1 }
 0x34f   :  { %10161 = vst [vmem:[#allocation62_spill] sm:$0xff] %v9531_v58  ;;  %v4660_v40 = vpop.f32.mrb[94].mxu0  ;;  %v4373_v13 = vpop.f32.mrb[223].mxu1 }
 0x350   :  { %v9543_v7 = vadd.f32 %v4660_v40, %v8648_v15  ;;  %v4662_v16 = vpop.f32.mrb[95].mxu0  ;;  %v7590_v13 = vld [vmem:[%s10099_s0 + $0x8a0] ss:$28 sps:$4 sm:$0xff]  }
 0x351   :  { %6490 = vmatmul.mubr.msk.bf16.gmra.mrb[72].mxu1 %vm3156_vm0, %v7585_v27  ;;  %v7589_v27 = vld [vmem:[%s10099_s0 + $0xb38] ss:$28 sps:$4 sm:$0xff]  }
 0x352   :  { %10162 = vst [vmem:[#allocation63_spill] sm:$0xff] %v9543_v7  ;;  %4872 = vmatmul.mubr.bf16.gmra.mrb[200].mxu0 %v7584_v36  ;;  %6493 = vmatprep.mubr.msk.bf16.mxu1 %vm3156_vm0, %v7588_v6  ;;  %v7593_v36 = vld [vmem:[%s10099_s0 + $0x8d8] ss:$28 sps:$4 sm:$0xff]  }
 0x353   :  { %4879 = vmatprep.mubr.bf16.mxu0 %v7586_v2  ;;  %v7591_v2 = vld [vmem:[%s10099_s0 + $0xb74] ss:$28 sps:$4 sm:$0xff]  }
 0x354   :  { %v9547_v26 = vpop.f32.mrb[224].mxu1 }
 0x355   :  { %10163 = vst [vmem:[#allocation64_spill] sm:$0xff] %v9547_v26  ;;  %v4665_v55 = vpop.f32.mrb[96].mxu0  ;;  %v4378_v58 = vpop.f32.mrb[225].mxu1 }
 0x356   :  { %v9553_v8 = vadd.f32 %v4665_v55, %v8659_v31  ;;  %v4667_v15 = vpop.f32.mrb[97].mxu0  ;;  %v9555_v40 = vpop.f32.mrb[226].mxu1 }
 0x357   :  { %10165 = vst [vmem:[#allocation66_spill] sm:$0xff] %v9555_v40  ;;  %v4668_v6 = vpop.f32.mrb[98].mxu0  ;;  %v4381_v58 = vpop.f32.mrb[227].mxu1 }
 0x358   :  { %10164 = vst [vmem:[#allocation65_spill] sm:$0xff] %v9553_v8  ;;  %v9567_v31 = vadd.f32 %v4668_v6, %v8664_v46  ;;  %v4670_v16 = vpop.f32.mrb[99].mxu0  ;;  %v7595_v58 = vld [vmem:[%s10099_s0 + $0x910] ss:$28 sps:$4 sm:$0xff]  }
 0x359   :  { %6494 = vmatmul.mubr.msk.bf16.gmra.mrb[76].mxu1 %vm3156_vm0, %v7590_v13  ;;  %v7594_v13 = vld [vmem:[%s10099_s0 + $0xb70] ss:$28 sps:$4 sm:$0xff]  }
 0x35a   :  { %10166 = vst [vmem:[#allocation67_spill] sm:$0xff] %v9567_v31  ;;  %4880 = vmatmul.mubr.bf16.gmra.mrb[204].mxu0 %v7589_v27  ;;  %6497 = vmatprep.mubr.msk.bf16.mxu1 %vm3156_vm0, %v7593_v36  ;;  %v7598_v27 = vld [vmem:[%s10099_s0 + $0x948] ss:$28 sps:$4 sm:$0xff]  }
 0x35b   :  { %4887 = vmatprep.mubr.bf16.mxu0 %v7591_v2  ;;  %v7596_v2 = vld [vmem:[%s10099_s0 + $0xbac] ss:$28 sps:$4 sm:$0xff]  }
 0x35c   :  { %v9571_v55 = vpop.f32.mrb[228].mxu1 }
 0x35d   :  { %10167 = vst [vmem:[#allocation68_spill] sm:$0xff] %v9571_v55  ;;  %v4673_v15 = vpop.f32.mrb[100].mxu0  ;;  %v4386_v40 = vpop.f32.mrb[229].mxu1 }
 0x35e   :  { %v9577_v26 = vadd.f32 %v4673_v15, %v8675_v3  ;;  %v4675_v46 = vpop.f32.mrb[101].mxu0  ;;  %v9579_v6 = vpop.f32.mrb[230].mxu1 }
 0x35f   :  { %10169 = vst [vmem:[#allocation70_spill] sm:$0xff] %v9579_v6  ;;  %v4676_v36 = vpop.f32.mrb[102].mxu0  ;;  %v4389_v40 = vpop.f32.mrb[231].mxu1 }
 0x360   :  { %10168 = vst [vmem:[#allocation69_spill] sm:$0xff] %v9577_v26  ;;  %v9591_v3 = vadd.f32 %v4676_v36, %v8680_v18  ;;  %v4678_v16 = vpop.f32.mrb[103].mxu0  ;;  %v7600_v40 = vld [vmem:[%s10099_s0 + $0x980] ss:$28 sps:$4 sm:$0xff]  }
 0x361   :  { %6498 = vmatmul.mubr.msk.bf16.gmra.mrb[80].mxu1 %vm3156_vm0, %v7595_v58  ;;  %v7599_v58 = vld [vmem:[%s10099_s0 + $0xba8] ss:$28 sps:$4 sm:$0xff]  }
 0x362   :  { %10170 = vst [vmem:[#allocation71_spill] sm:$0xff] %v9591_v3  ;;  %4888 = vmatmul.mubr.bf16.gmra.mrb[208].mxu0 %v7594_v13  ;;  %6501 = vmatprep.mubr.msk.bf16.mxu1 %vm3156_vm0, %v7598_v27  ;;  %v7603_v13 = vld [vmem:[%s10099_s0 + $0x9b8] ss:$28 sps:$4 sm:$0xff]   ;;  %v10174_v16 = vld [vmem:[#allocation2_spill] sm:$0xff] }
 0x363   :  { %4895 = vmatprep.mubr.bf16.mxu0 %v7596_v2  ;;  %v7601_v2 = vld [vmem:[%s10099_s0 + $0xbe4] ss:$28 sps:$4 sm:$0xff]  }
 0x364   :  { %v9595_v15 = vpop.f32.mrb[232].mxu1 }
 0x365   :  { %10171 = vst [vmem:[#allocation72_spill] sm:$0xff] %v9595_v15  ;;  %v4681_v46 = vpop.f32.mrb[104].mxu0  ;;  %v4394_v6 = vpop.f32.mrb[233].mxu1 }
 0x366   :  { %v9601_v55 = vadd.f32 %v4681_v46, %v8691_v39  ;;  %v4683_v18 = vpop.f32.mrb[105].mxu0  ;;  %v9603_v36 = vpop.f32.mrb[234].mxu1 }
 0x367   :  { %10173 = vst [vmem:[#allocation74_spill] sm:$0xff] %v9603_v36  ;;  %v4684_v27 = vpop.f32.mrb[106].mxu0  ;;  %v4397_v6 = vpop.f32.mrb[235].mxu1 }
 0x368   :  { %10172 = vst [vmem:[#allocation73_spill] sm:$0xff] %v9601_v55  ;;  %v9615_v39 = vadd.f32 %v4684_v27, %v10174_v16  ;;  %v4686_v46 = vpop.f32.mrb[107].mxu0  ;;  %v7605_v6 = vld [vmem:[%s10099_s0 + $0x9f0] ss:$28 sps:$4 sm:$0xff]  }
 0x369   :  { %6502 = vmatmul.mubr.msk.bf16.gmra.mrb[84].mxu1 %vm3156_vm0, %v7600_v40  ;;  %v10177_v55 = vld [vmem:[#allocation3_spill] sm:$0xff]  ;;  %v7604_v40 = vld [vmem:[%s10099_s0 + $0xbe0] ss:$28 sps:$4 sm:$0xff]   ;;  %v10180_v46 = vld [vmem:[#allocation4_spill] sm:$0xff] }
 0x36a   :  { %10175 = vst [vmem:[#allocation2_spill] sm:$0xff] %v9615_v39  ;;  %4896 = vmatmul.mubr.bf16.gmra.mrb[212].mxu0 %v7599_v58  ;;  %6505 = vmatprep.mubr.msk.bf16.mxu1 %vm3156_vm0, %v7603_v13  ;;  %v7608_v58 = vld [vmem:[%s10099_s0 + $0xa28] ss:$28 sps:$4 sm:$0xff]   ;;  %v10183_v39 = vld [vmem:[#allocation5_spill] sm:$0xff] }
 0x36b   :  { %4903 = vmatprep.mubr.bf16.mxu0 %v7601_v2  ;;  %v7606_v2 = vld [vmem:[%s10099_s0 + $0xc1c] ss:$28 sps:$4 sm:$0xff]  }
 0x36c   :  { %v9619_v18 = vpop.f32.mrb[236].mxu1 }
 0x36d   :  { %10176 = vst [vmem:[#allocation75_spill] sm:$0xff] %v9619_v18  ;;  %v4689_v36 = vpop.f32.mrb[108].mxu0  ;;  %v4402_v15 = vpop.f32.mrb[237].mxu1 }
 0x36e   :  { %v9625_v31 = vadd.f32 %v4689_v36, %v10177_v55  ;;  %v4691_v27 = vpop.f32.mrb[109].mxu0  ;;  %v9627_v16 = vpop.f32.mrb[238].mxu1 }
 0x36f   :  { %10179 = vst [vmem:[#allocation76_spill] sm:$0xff] %v9627_v16  ;;  %v4692_v13 = vpop.f32.mrb[110].mxu0  ;;  %v4405_v15 = vpop.f32.mrb[239].mxu1 }
 0x370   :  { %10178 = vst [vmem:[#allocation3_spill] sm:$0xff] %v9625_v31  ;;  %v9639_v55 = vadd.f32 %v4692_v13, %v10180_v46  ;;  %v4694_v36 = vpop.f32.mrb[111].mxu0  ;;  %v7610_v15 = vld [vmem:[%s10099_s0 + $0xa60] ss:$28 sps:$4 sm:$0xff]  }
 0x371   :  { %6506 = vmatmul.mubr.msk.bf16.gmra.mrb[88].mxu1 %vm3156_vm0, %v7605_v6  ;;  %v7609_v6 = vld [vmem:[%s10099_s0 + $0xc18] ss:$28 sps:$4 sm:$0xff]   ;;  %v10186_v36 = vld [vmem:[#allocation6_spill] sm:$0xff] }
 0x372   :  { %10181 = vst [vmem:[#allocation4_spill] sm:$0xff] %v9639_v55  ;;  %4904 = vmatmul.mubr.bf16.gmra.mrb[216].mxu0 %v7604_v40  ;;  %6509 = vmatprep.mubr.msk.bf16.mxu1 %vm3156_vm0, %v7608_v58  ;;  %v7613_v40 = vld [vmem:[%s10099_s0 + $0xa98] ss:$28 sps:$4 sm:$0xff]  }
 0x373   :  { %4911 = vmatprep.mubr.bf16.mxu0 %v7606_v2  ;;  %v7611_v2 = vld [vmem:[%s10099_s0 + $0xc54] ss:$28 sps:$4 sm:$0xff]  }
 0x374   :  { %v9643_v27 = vpop.f32.mrb[240].mxu1 }
 0x375   :  { %10182 = vst [vmem:[#allocation77_spill] sm:$0xff] %v9643_v27  ;;  %v4697_v16 = vpop.f32.mrb[112].mxu0  ;;  %v4410_v18 = vpop.f32.mrb[241].mxu1 }
 0x376   :  { %v9649_v31 = vadd.f32 %v4697_v16, %v10183_v39  ;;  %v4699_v13 = vpop.f32.mrb[113].mxu0  ;;  %v9651_v46 = vpop.f32.mrb[242].mxu1 }
 0x377   :  { %10185 = vst [vmem:[#allocation78_spill] sm:$0xff] %v9651_v46  ;;  %v4700_v58 = vpop.f32.mrb[114].mxu0  ;;  %v4413_v18 = vpop.f32.mrb[243].mxu1 }
 0x378   :  { %10184 = vst [vmem:[#allocation5_spill] sm:$0xff] %v9649_v31  ;;  %v9663_v39 = vadd.f32 %v4700_v58, %v10186_v36  ;;  %v4702_v16 = vpop.f32.mrb[115].mxu0  ;;  %v7615_v18 = vld [vmem:[%s10099_s0 + $0xad0] ss:$28 sps:$4 sm:$0xff]  }
 0x379   :  { %6510 = vmatmul.mubr.msk.bf16.gmra.mrb[92].mxu1 %vm3156_vm0, %v7610_v15  ;;  %v10189_v31 = vld [vmem:[#allocation7_spill] sm:$0xff]  ;;  %v10192_v16 = vld [vmem:[#allocation8_spill] sm:$0xff] }
 0x37a   :  { %10187 = vst [vmem:[#allocation6_spill] sm:$0xff] %v9663_v39  ;;  %4912 = vmatmul.mubr.bf16.gmra.mrb[220].mxu0 %v7609_v6  ;;  %6513 = vmatprep.mubr.msk.bf16.mxu1 %vm3156_vm0, %v7613_v40  ;;  %v7614_v15 = vld [vmem:[%s10099_s0 + $0xc50] ss:$28 sps:$4 sm:$0xff]   ;;  %v7618_v6 = vld [vmem:[%s10099_s0 + $0xb08] ss:$28 sps:$4 sm:$0xff]   ;;  %v10195_v39 = vld [vmem:[#allocation9_spill] sm:$0xff] }
 0x37b   :  { %4919 = vmatprep.mubr.bf16.mxu0 %v7611_v2  ;;  %v7616_v2 = vld [vmem:[%s10099_s0 + $0xc8c] ss:$28 sps:$4 sm:$0xff]  }
 0x37c   :  { %v9667_v13 = vpop.f32.mrb[244].mxu1 }
 0x37d   :  { %10188 = vst [vmem:[#allocation79_spill] sm:$0xff] %v9667_v13  ;;  %v4705_v46 = vpop.f32.mrb[116].mxu0  ;;  %v4418_v27 = vpop.f32.mrb[245].mxu1 }
 0x37e   :  { %v9673_v55 = vadd.f32 %v4705_v46, %v10189_v31  ;;  %v4707_v58 = vpop.f32.mrb[117].mxu0  ;;  %v9675_v36 = vpop.f32.mrb[246].mxu1 }
 0x37f   :  { %10191 = vst [vmem:[#allocation80_spill] sm:$0xff] %v9675_v36  ;;  %v4708_v40 = vpop.f32.mrb[118].mxu0  ;;  %v4421_v27 = vpop.f32.mrb[247].mxu1 }
 0x380   :  { %10190 = vst [vmem:[#allocation7_spill] sm:$0xff] %v9673_v55  ;;  %v9687_v31 = vadd.f32 %v4708_v40, %v10192_v16  ;;  %v4710_v46 = vpop.f32.mrb[119].mxu0  ;;  %v7620_v27 = vld [vmem:[%s10099_s0 + $0xb40] ss:$28 sps:$4 sm:$0xff]  }
 0x381   :  { %6514 = vmatmul.mubr.msk.bf16.gmra.mrb[96].mxu1 %vm3156_vm0, %v7615_v18  ;;  %v7619_v18 = vld [vmem:[%s10099_s0 + $0xc88] ss:$28 sps:$4 sm:$0xff]  }
 0x382   :  { %10193 = vst [vmem:[#allocation8_spill] sm:$0xff] %v9687_v31  ;;  %4920 = vmatmul.mubr.bf16.gmra.mrb[224].mxu0 %v7614_v15  ;;  %6517 = vmatprep.mubr.msk.bf16.mxu1 %vm3156_vm0, %v7618_v6  ;;  %v7623_v15 = vld [vmem:[%s10099_s0 + $0xb78] ss:$28 sps:$4 sm:$0xff]   ;;  %v10198_v46 = vld [vmem:[#allocation10_spill] sm:$0xff] }
 0x383   :  { %4927 = vmatprep.mubr.bf16.mxu0 %v7616_v2  ;;  %v7621_v2 = vld [vmem:[%s10099_s0 + $0xcc4] ss:$28 sps:$4 sm:$0xff]  }
 0x384   :  { %v9691_v58 = vpop.f32.mrb[248].mxu1 }
 0x385   :  { %10194 = vst [vmem:[#allocation81_spill] sm:$0xff] %v9691_v58  ;;  %v4713_v36 = vpop.f32.mrb[120].mxu0  ;;  %v4426_v13 = vpop.f32.mrb[249].mxu1 }
 0x386   :  { %v9697_v55 = vadd.f32 %v4713_v36, %v10195_v39  ;;  %v4715_v40 = vpop.f32.mrb[121].mxu0  ;;  %v9699_v16 = vpop.f32.mrb[250].mxu1 }
 0x387   :  { %10197 = vst [vmem:[#allocation82_spill] sm:$0xff] %v9699_v16  ;;  %v4716_v6 = vpop.f32.mrb[122].mxu0  ;;  %v4429_v13 = vpop.f32.mrb[251].mxu1 }
 0x388   :  { %10196 = vst [vmem:[#allocation9_spill] sm:$0xff] %v9697_v55  ;;  %v9711_v39 = vadd.f32 %v4716_v6, %v10198_v46  ;;  %v4718_v36 = vpop.f32.mrb[123].mxu0  ;;  %v7625_v13 = vld [vmem:[%s10099_s0 + $0xbb0] ss:$28 sps:$4 sm:$0xff]  }
 0x389   :  { %6518 = vmatmul.mubr.msk.bf16.gmra.mrb[100].mxu1 %vm3156_vm0, %v7620_v27  ;;  %v10201_v55 = vld [vmem:[#allocation11_spill] sm:$0xff]  ;;  %v7624_v27 = vld [vmem:[%s10099_s0 + $0xcc0] ss:$28 sps:$4 sm:$0xff]   ;;  %v10204_v36 = vld [vmem:[#allocation12_spill] sm:$0xff] }
 0x38a   :  { %10199 = vst [vmem:[#allocation10_spill] sm:$0xff] %v9711_v39  ;;  %4928 = vmatmul.mubr.bf16.gmra.mrb[228].mxu0 %v7619_v18  ;;  %6521 = vmatprep.mubr.msk.bf16.mxu1 %vm3156_vm0, %v7623_v15  ;;  %v7628_v18 = vld [vmem:[%s10099_s0 + $0xbe8] ss:$28 sps:$4 sm:$0xff]  }
 0x38b   :  { %4935 = vmatprep.mubr.bf16.mxu0 %v7621_v2  ;;  %v7626_v2 = vld [vmem:[%s10099_s0 + $0xcfc] ss:$28 sps:$4 sm:$0xff]  }
 0x38c   :  { %v9715_v40 = vpop.f32.mrb[252].mxu1 }
 0x38d   :  { %10200 = vst [vmem:[#allocation83_spill] sm:$0xff] %v9715_v40  ;;  %v4721_v16 = vpop.f32.mrb[124].mxu0  ;;  %v4434_v58 = vpop.f32.mrb[253].mxu1 }
 0x38e   :  { %v9721_v31 = vadd.f32 %v4721_v16, %v10201_v55  ;;  %v4723_v6 = vpop.f32.mrb[125].mxu0  ;;  %v9723_v46 = vpop.f32.mrb[254].mxu1 }
 0x38f   :  { %10203 = vst [vmem:[#allocation84_spill] sm:$0xff] %v9723_v46  ;;  %v4724_v15 = vpop.f32.mrb[126].mxu0  ;;  %v4437_v58 = vpop.f32.mrb[255].mxu1 }
 0x390   :  { %10202 = vst [vmem:[#allocation11_spill] sm:$0xff] %v9721_v31  ;;  %v9735_v55 = vadd.f32 %v4724_v15, %v10204_v36  ;;  %v4726_v16 = vpop.f32.mrb[127].mxu0  ;;  %v7630_v58 = vld [vmem:[%s10099_s0 + $0xc20] ss:$28 sps:$4 sm:$0xff]  }
 0x391   :  { %6522 = vmatmul.mubr.msk.bf16.gmra.mrb[104].mxu1 %vm3156_vm0, %v7625_v13  ;;  %v10206_v31 = vld [vmem:[#allocation13_spill] sm:$0xff] }
 0x392   :  { %10205 = vst [vmem:[#allocation12_spill] sm:$0xff] %v9735_v55  ;;  %4936 = vmatmul.mubr.bf16.gmra.mrb[232].mxu0 %v7624_v27  ;;  %6525 = vmatprep.mubr.msk.bf16.mxu1 %vm3156_vm0, %v7628_v18  ;;  %v10208_v36 = vld [vmem:[#allocation45_spill] sm:$0xff] }
 0x393   :  { %4943 = vmatprep.mubr.bf16.mxu0 %v7626_v2  ;;  %v7629_v27 = vld [vmem:[%s10099_s0 + $0xcf8] ss:$28 sps:$4 sm:$0xff]  }
 0x394   :  { %v6419_v6 = vpop.f32.mrb[0].mxu1 }
 0x395   :  { %v4729_v46 = vpop.f32.mrb[128].mxu0  ;;  %v5027_v40 = vadd.f32 %v9066_v60, %v6419_v6  ;;  %v5018_v39 = vpop.f32.mrb[1].mxu1  ;;  %v7633_v60 = vld [vmem:[%s10099_s0 + $0xc58] ss:$28 sps:$4 sm:$0xff]  }
 0x396   :  { %v9744_v3 = vadd.f32 %v4729_v46, %v10206_v31  ;;  %v4731_v15 = vpop.f32.mrb[129].mxu0  ;;  %v5019_v16 = vadd.f32 %v10208_v36, %v5018_v39  ;;  %v6420_v13 = vpop.f32.mrb[2].mxu1  ;;  %v7631_v31 = vld [vmem:[%s10099_s0 + $0xd34] ss:$28 sps:$4 sm:$0xff]   ;;  %v10209_v39 = vld [vmem:[#allocation14_spill] sm:$0xff] }
 0x397   :  { %v5531_v18 = vmax.f32 %v5027_v40, 0.0  ;;  %v4732_v2 = vpop.f32.mrb[130].mxu0  ;;  %v5030_v6 = vadd.f32 %v9078_v57, %v6420_v13  ;;  %v5021_v55 = vpop.f32.mrb[3].mxu1 }
 0x398   :  { %10207 = vst [vmem:[#allocation13_spill] sm:$0xff] %v9744_v3  ;;  %v5529_v46 = vmax.f32 %v5019_v16, 0.0  ;;  %v9758_v15 = vadd.f32 %v4732_v2, %v10209_v39  ;;  %v4734_v36 = vpop.f32.mrb[131].mxu0  ;;  %v5022_v3 = vadd.f32 %v9060_v51, %v5021_v55  ;;  %v7635_v2 = vld [vmem:[%s10099_s0 + $0xc90] ss:$28 sps:$4 sm:$0xff]  }
 0x399   :  { %v5532_v8 = vmax.f32 %v5030_v6, 0.0  ;;  %6526 = vmatmul.mubr.msk.bf16.gmra.mrb[108].mxu1 %vm3156_vm0, %v7630_v58  ;;  %v10210_v51 = vld [vmem:[#allocation15_spill] sm:$0xff] }
 0x39a   :  { %v5657_v26 = vmax.f32 %v5529_v46, %v5531_v18  ;;  %v5530_v40 = vmax.f32 %v5022_v3, 0.0  ;;  %4944 = vmatmul.mubr.bf16.gmra.mrb[236].mxu0 %v7629_v27  ;;  %6529 = vmatprep.mubr.msk.bf16.mxu1 %vm3156_vm0, %v7633_v60  ;;  %v10211_v46 = vld [vmem:[#allocation16_spill] sm:$0xff] }
 0x39b   :  { %4951 = vmatprep.mubr.bf16.mxu0 %v7631_v31 }
 0x39c   :  { %v5658_v57 = vmax.f32 %v5530_v40, %v5532_v8  ;;  %v6423_v13 = vpop.f32.mrb[4].mxu1  ;;  %v7634_v8 = vld [vmem:[%s10099_s0 + $0xd30] ss:$28 sps:$4 sm:$0xff]  }
 0x39d   :  { %v4737_v43 = vpop.f32.mrb[132].mxu0  ;;  %v5043_v16 = vadd.f32 %v9102_v22, %v6423_v13  ;;  %v5034_v7 = vpop.f32.mrb[5].mxu1  ;;  %v7638_v22 = vld [vmem:[%s10099_s0 + $0xcc8] ss:$28 sps:$4 sm:$0xff]  }
 0x39e   :  { %v9768_v55 = vadd.f32 %v4737_v43, %v10210_v51  ;;  %v4739_v58 = vpop.f32.mrb[133].mxu0  ;;  %v5035_v3 = vadd.f32 %v9084_v41, %v5034_v7  ;;  %v6424_v27 = vpop.f32.mrb[6].mxu1  ;;  %v7636_v43 = vld [vmem:[%s10099_s0 + $0xd6c] ss:$28 sps:$4 sm:$0xff]  }
 0x39f   :  { %v4740_v60 = vpop.f32.mrb[134].mxu0  ;;  %v5046_v18 = vadd.f32 %v9114_v42, %v6424_v27  ;;  %v5037_v6 = vpop.f32.mrb[7].mxu1  ;;  %v5535_v36 = vmax.f32 %v5043_v16, 0.0 }
 0x3a0   :  { %v5533_v31 = vmax.f32 %v5035_v3, 0.0  ;;  %v9782_v41 = vadd.f32 %v4740_v60, %v10211_v46  ;;  %v4742_v7 = vpop.f32.mrb[135].mxu0  ;;  %v5038_v39 = vadd.f32 %v9096_v35, %v5037_v6  ;;  %v7640_v35 = vld [vmem:[%s10099_s0 + $0xd00] ss:$28 sps:$4 sm:$0xff]  }
 0x3a1   :  { %6530 = vmatmul.mubr.msk.bf16.gmra.mrb[112].mxu1 %vm3156_vm0, %v7635_v2  ;;  %v5536_v42 = vmax.f32 %v5046_v18, 0.0  ;;  %v10212_v2 = vld [vmem:[#allocation17_spill] sm:$0xff]  ;;  %v7641_v7 = vld [vmem:[%s10099_s0 + $0xda4] ss:$28 sps:$4 sm:$0xff]  }
 0x3a2   :  { %v5659_v40 = vmax.f32 %v5657_v26, %v5533_v31  ;;  %v5534_v13 = vmax.f32 %v5038_v39, 0.0  ;;  %4952 = vmatmul.mubr.bf16.gmra.mrb[240].mxu0 %v7634_v8  ;;  %6533 = vmatprep.mubr.msk.bf16.mxu1 %vm3156_vm0, %v7638_v22 }
 0x3a3   :  { %4959 = vmatprep.mubr.bf16.mxu0 %v7636_v43 }
 0x3a4   :  { %v5660_v51 = vmax.f32 %v5658_v57, %v5534_v13  ;;  %v6427_v58 = vpop.f32.mrb[8].mxu1  ;;  %v5661_v27 = vmax.f32 %v5659_v40, %v5535_v36  ;;  %v7639_v57 = vld [vmem:[%s10099_s0 + $0xd68] ss:$28 sps:$4 sm:$0xff]  }
 0x3a5   :  { %v4745_v3 = vpop.f32.mrb[136].mxu0  ;;  %v5059_v60 = vadd.f32 %v9139_v11, %v6427_v58  ;;  %v5050_v46 = vpop.f32.mrb[9].mxu1  ;;  %v7643_v11 = vld [vmem:[%s10099_s0 + $0xd38] ss:$28 sps:$4 sm:$0xff]  }
 0x3a6   :  { %v9792_v16 = vadd.f32 %v4745_v3, %v10212_v2  ;;  %v4747_v26 = vpop.f32.mrb[137].mxu0  ;;  %v5051_v8 = vadd.f32 %v9120_v24, %v5050_v46  ;;  %v6428_v22 = vpop.f32.mrb[10].mxu1  ;;  %v5662_v6 = vmax.f32 %v5660_v51, %v5536_v42  ;;  %v10213_v24 = vld [vmem:[#allocation18_spill] sm:$0xff] }
 0x3a7   :  { %v4748_v18 = vpop.f32.mrb[138].mxu0  ;;  %v5062_v43 = vadd.f32 %v9151_v59, %v6428_v22  ;;  %v5053_v31 = vpop.f32.mrb[11].mxu1  ;;  %v5539_v42 = vmax.f32 %v5059_v60, 0.0 }
 0x3a8   :  { %v5537_v39 = vmax.f32 %v5051_v8, 0.0  ;;  %v9806_v36 = vadd.f32 %v4748_v18, %v10213_v24  ;;  %v4750_v40 = vpop.f32.mrb[139].mxu0  ;;  %v5054_v13 = vadd.f32 %v9132_v50, %v5053_v31  ;;  %v7645_v50 = vld [vmem:[%s10099_s0 + $0xd70] ss:$28 sps:$4 sm:$0xff]  }
 0x3a9   :  { %6534 = vmatmul.mubr.msk.bf16.gmra.mrb[116].mxu1 %vm3156_vm0, %v7640_v35  ;;  %v5540_v59 = vmax.f32 %v5062_v43, 0.0  ;;  %v10214_v35 = vld [vmem:[#allocation19_spill] sm:$0xff] }
 0x3aa   :  { %v5663_v51 = vmax.f32 %v5661_v27, %v5537_v39  ;;  %v5538_v58 = vmax.f32 %v5054_v13, 0.0  ;;  %4960 = vmatmul.mubr.bf16.gmra.mrb[244].mxu0 %v7639_v57  ;;  %6537 = vmatprep.mubr.msk.bf16.mxu1 %vm3156_vm0, %v7643_v11  ;;  %v7646_v39 = vld [vmem:[%s10099_s0 + $0xddc] ss:$28 sps:$4 sm:$0xff]  }
 0x3ab   :  { %4967 = vmatprep.mubr.bf16.mxu0 %v7641_v7 }
 0x3ac   :  { %v5664_v3 = vmax.f32 %v5662_v6, %v5538_v58  ;;  %v6431_v46 = vpop.f32.mrb[12].mxu1  ;;  %v5665_v2 = vmax.f32 %v5663_v51, %v5539_v42  ;;  %v7644_v6 = vld [vmem:[%s10099_s0 + $0xda0] ss:$28 sps:$4 sm:$0xff]  }
 0x3ad   :  { %v4753_v26 = vpop.f32.mrb[140].mxu0  ;;  %v5075_v8 = vadd.f32 %v9179_v61, %v6431_v46  ;;  %v5066_v22 = vpop.f32.mrb[13].mxu1  ;;  %v7648_v61 = vld [vmem:[%s10099_s0 + $0xda8] ss:$28 sps:$4 sm:$0xff]  }
 0x3ae   :  { %v9816_v60 = vadd.f32 %v4753_v26, %v10214_v35  ;;  %v4755_v27 = vpop.f32.mrb[141].mxu0  ;;  %v5067_v57 = vadd.f32 %v9159_v1, %v5066_v22  ;;  %v6432_v11 = vpop.f32.mrb[14].mxu1  ;;  %v5666_v18 = vmax.f32 %v5664_v3, %v5540_v59  ;;  %v10215_v1 = vld [vmem:[#allocation20_spill] sm:$0xff] }
 0x3af   :  { %v4756_v43 = vpop.f32.mrb[142].mxu0  ;;  %v5078_v31 = vadd.f32 %v9191_v32, %v6432_v11  ;;  %v5069_v7 = vpop.f32.mrb[15].mxu1  ;;  %v5543_v51 = vmax.f32 %v5075_v8, 0.0 }
 0x3b0   :  { %v5541_v24 = vmax.f32 %v5067_v57, 0.0  ;;  %v9830_v40 = vadd.f32 %v4756_v43, %v10215_v1  ;;  %v4758_v13 = vpop.f32.mrb[143].mxu0  ;;  %v5070_v42 = vadd.f32 %v9171_v10, %v5069_v7  ;;  %v7650_v10 = vld [vmem:[%s10099_s0 + $0xde0] ss:$28 sps:$4 sm:$0xff]  }
 0x3b1   :  { %6538 = vmatmul.mubr.msk.bf16.gmra.mrb[120].mxu1 %vm3156_vm0, %v7645_v50  ;;  %v5544_v32 = vmax.f32 %v5078_v31, 0.0  ;;  %v10216_v50 = vld [vmem:[#allocation21_spill] sm:$0xff]  ;;  %v10217_v7 = vld [vmem:[#allocation22_spill] sm:$0xff] }
 0x3b2   :  { %v5667_v58 = vmax.f32 %v5665_v2, %v5541_v24  ;;  %v5542_v59 = vmax.f32 %v5070_v42, 0.0  ;;  %4968 = vmatmul.mubr.bf16.gmra.mrb[248].mxu0 %v7644_v6  ;;  %6541 = vmatprep.mubr.msk.bf16.mxu1 %vm3156_vm0, %v7648_v61 }
 0x3b3   :  { %4975 = vmatprep.mubr.bf16.mxu0 %v7646_v39 }
 0x3b4   :  { %v5668_v3 = vmax.f32 %v5666_v18, %v5542_v59  ;;  %v6435_v46 = vpop.f32.mrb[16].mxu1  ;;  %v5669_v26 = vmax.f32 %v5667_v58, %v5543_v51  ;;  %v7649_v18 = vld [vmem:[%s10099_s0 + $0xdd8] ss:$28 sps:$4 sm:$0xff]  }
 0x3b5   :  { %v4761_v22 = vpop.f32.mrb[144].mxu0  ;;  %v5091_v35 = vadd.f32 %v9219_v56, %v6435_v46  ;;  %v5082_v27 = vpop.f32.mrb[17].mxu1 }
 0x3b6   :  { %v9840_v8 = vadd.f32 %v4761_v22, %v10216_v50  ;;  %v4763_v2 = vpop.f32.mrb[145].mxu0  ;;  %v5083_v57 = vadd.f32 %v9199_v47, %v5082_v27  ;;  %v6436_v11 = vpop.f32.mrb[18].mxu1  ;;  %v5670_v6 = vmax.f32 %v5668_v3, %v5544_v32  ;;  %v10218_v22 = vld [vmem:[#allocation23_spill] sm:$0xff] }
 0x3b7   :  { %v4764_v61 = vpop.f32.mrb[146].mxu0  ;;  %v5094_v56 = vadd.f32 %v9231_v0, %v6436_v11  ;;  %v5085_v43 = vpop.f32.mrb[19].mxu1  ;;  %v5547_v47 = vmax.f32 %v5091_v35, 0.0 }
 0x3b8   :  { %v5545_v31 = vmax.f32 %v5083_v57, 0.0  ;;  %v9848_v39 = vadd.f32 %v4764_v61, %v10217_v7  ;;  %v4766_v24 = vpop.f32.mrb[147].mxu0  ;;  %v5086_v1 = vadd.f32 %v9211_v30, %v5085_v43 }
 0x3b9   :  { %6542 = vmatmul.mubr.msk.bf16.gmra.mrb[124].mxu1 %vm3156_vm0, %v7650_v10  ;;  %v5548_v51 = vmax.f32 %v5094_v56, 0.0 }
 0x3ba   :  { %v5671_v13 = vmax.f32 %v5669_v26, %v5545_v31  ;;  %v5546_v42 = vmax.f32 %v5086_v1, 0.0  ;;  %4976 = vmatmul.mubr.bf16.gmra.mrb[252].mxu0 %v7649_v18 }
 0x3bc   :  { %v5672_v58 = vmax.f32 %v5670_v6, %v5546_v42  ;;  %v6439_v59 = vpop.f32.mrb[20].mxu1  ;;  %v5673_v32 = vmax.f32 %v5671_v13, %v5547_v47  ;;  %v10219_v6 = vld [vmem:[#allocation24_spill] sm:$0xff] }
 0x3bd   :  { %v4769_v3 = vpop.f32.mrb[148].mxu0  ;;  %v5107_v0 = vadd.f32 %v9259_v9, %v6439_v59  ;;  %v5098_v46 = vpop.f32.mrb[21].mxu1 }
 0x3be   :  { %v9854_v27 = vadd.f32 %v4769_v3, %v10218_v22  ;;  %v4771_v50 = vpop.f32.mrb[149].mxu0  ;;  %v5099_v30 = vadd.f32 %v9239_v37, %v5098_v46  ;;  %v6440_v2 = vpop.f32.mrb[22].mxu1  ;;  %v5674_v10 = vmax.f32 %v5672_v58, %v5548_v51 }
 0x3bf   :  { %v4772_v35 = vpop.f32.mrb[150].mxu0  ;;  %v5110_v26 = vadd.f32 %v9271_v12, %v6440_v2  ;;  %v5101_v57 = vpop.f32.mrb[23].mxu1  ;;  %v5551_v56 = vmax.f32 %v5107_v0, 0.0  ;;  %v10220_v12 = vld [vmem:[#allocation25_spill] sm:$0xff]  ;;  %v10221_v50 = vld [vmem:[#allocation26_spill] sm:$0xff] }
 0x3c0   :  { %v5549_v11 = vmax.f32 %v5099_v30, 0.0  ;;  %v9859_v18 = vadd.f32 %v4772_v35, %v10219_v6  ;;  %v4774_v61 = vpop.f32.mrb[151].mxu0  ;;  %v5102_v9 = vadd.f32 %v9251_v4, %v5101_v57 }
 0x3c1   :  { %v5552_v7 = vmax.f32 %v5110_v26, 0.0 }
 0x3c2   :  { %v5675_v43 = vmax.f32 %v5673_v32, %v5549_v11  ;;  %v5550_v31 = vmax.f32 %v5102_v9, 0.0 }
 0x3c4   :  { %v5676_v24 = vmax.f32 %v5674_v10, %v5550_v31  ;;  %v6443_v1 = vpop.f32.mrb[24].mxu1  ;;  %v5677_v37 = vmax.f32 %v5675_v43, %v5551_v56 }
 0x3c5   :  { %v4777_v47 = vpop.f32.mrb[152].mxu0  ;;  %v5123_v13 = vadd.f32 %v9299_v25, %v6443_v1  ;;  %v5114_v42 = vpop.f32.mrb[25].mxu1 }
 0x3c6   :  { %v9864_v51 = vadd.f32 %v4777_v47, %v10220_v12  ;;  %v4779_v58 = vpop.f32.mrb[153].mxu0  ;;  %v5115_v59 = vadd.f32 %v9279_v17, %v5114_v42  ;;  %v6444_v3 = vpop.f32.mrb[26].mxu1  ;;  %v5678_v46 = vmax.f32 %v5676_v24, %v5552_v7  ;;  %v10223_v42 = vld [vmem:[#allocation28_spill] sm:$0xff] }
 0x3c7   :  { %v4780_v4 = vpop.f32.mrb[154].mxu0  ;;  %v5126_v32 = vadd.f32 %v9311_v28, %v6444_v3  ;;  %v5117_v0 = vpop.f32.mrb[27].mxu1  ;;  %v5555_v10 = vmax.f32 %v5123_v13, 0.0  ;;  %v10222_v28 = vld [vmem:[#allocation27_spill] sm:$0xff] }
 0x3c8   :  { %v5553_v22 = vmax.f32 %v5115_v59, 0.0  ;;  %v9869_v30 = vadd.f32 %v4780_v4, %v10221_v50  ;;  %v4782_v2 = vpop.f32.mrb[155].mxu0  ;;  %v5118_v25 = vadd.f32 %v9291_v20, %v5117_v0 }
 0x3c9   :  { %v5556_v57 = vmax.f32 %v5126_v32, 0.0 }
 0x3ca   :  { %v5679_v35 = vmax.f32 %v5677_v37, %v5553_v22  ;;  %v5554_v26 = vmax.f32 %v5118_v25, 0.0 }
 0x3cc   :  { %v5680_v11 = vmax.f32 %v5678_v46, %v5554_v26  ;;  %v6447_v6 = vpop.f32.mrb[28].mxu1  ;;  %v5681_v17 = vmax.f32 %v5679_v35, %v5555_v10 }
 0x3cd   :  { %v4785_v61 = vpop.f32.mrb[156].mxu0  ;;  %v5139_v9 = vadd.f32 %v9339_v44, %v6447_v6  ;;  %v5130_v56 = vpop.f32.mrb[29].mxu1 }
 0x3ce   :  { %v9874_v43 = vadd.f32 %v4785_v61, %v10222_v28  ;;  %v4787_v31 = vpop.f32.mrb[157].mxu0  ;;  %v5131_v7 = vadd.f32 %v9319_v34, %v5130_v56  ;;  %v6448_v24 = vpop.f32.mrb[30].mxu1  ;;  %v5682_v1 = vmax.f32 %v5680_v11, %v5556_v57  ;;  %v10225_v61 = vld [vmem:[#allocation30_spill] sm:$0xff] }
 0x3cf   :  { %v4788_v20 = vpop.f32.mrb[158].mxu0  ;;  %v5142_v37 = vadd.f32 %v9351_v48, %v6448_v24  ;;  %v5133_v47 = vpop.f32.mrb[31].mxu1  ;;  %v5559_v59 = vmax.f32 %v5139_v9, 0.0  ;;  %v10224_v48 = vld [vmem:[#allocation29_spill] sm:$0xff] }
 0x3d0   :  { %v5557_v13 = vmax.f32 %v5131_v7, 0.0  ;;  %v9879_v12 = vadd.f32 %v4788_v20, %v10223_v42  ;;  %v4790_v58 = vpop.f32.mrb[159].mxu0  ;;  %v5134_v44 = vadd.f32 %v9331_v38, %v5133_v47 }
 0x3d1   :  { %v5560_v4 = vmax.f32 %v5142_v37, 0.0 }
 0x3d2   :  { %v5683_v3 = vmax.f32 %v5681_v17, %v5557_v13  ;;  %v5558_v46 = vmax.f32 %v5134_v44, 0.0 }
 0x3d4   :  { %v5684_v32 = vmax.f32 %v5682_v1, %v5558_v46  ;;  %v6451_v0 = vpop.f32.mrb[32].mxu1  ;;  %v5685_v34 = vmax.f32 %v5683_v3, %v5559_v59 }
 0x3d5   :  { %v4793_v22 = vpop.f32.mrb[160].mxu0  ;;  %v5155_v50 = vadd.f32 %v9385_v49, %v6451_v0  ;;  %v5146_v2 = vpop.f32.mrb[33].mxu1  ;;  %v10227_v0 = vld [vmem:[#allocation32_spill] sm:$0xff] }
 0x3d6   :  { %v9884_v25 = vadd.f32 %v4793_v22, %v10224_v48  ;;  %v4795_v10 = vpop.f32.mrb[161].mxu0  ;;  %v5147_v35 = vadd.f32 %v9361_v23, %v5146_v2  ;;  %v6452_v26 = vpop.f32.mrb[34].mxu1  ;;  %v5686_v57 = vmax.f32 %v5684_v32, %v5560_v4 }
 0x3d7   :  { %v4796_v38 = vpop.f32.mrb[162].mxu0  ;;  %v5158_v11 = vadd.f32 %v9399_v14, %v6452_v26  ;;  %v5149_v6 = vpop.f32.mrb[35].mxu1  ;;  %v5563_v28 = vmax.f32 %v5155_v50, 0.0  ;;  %v10226_v14 = vld [vmem:[#allocation31_spill] sm:$0xff] }
 0x3d8   :  { %v5561_v17 = vmax.f32 %v5147_v35, 0.0  ;;  %v9889_v9 = vadd.f32 %v4796_v38, %v10225_v61  ;;  %v4798_v56 = vpop.f32.mrb[163].mxu0  ;;  %v5150_v49 = vadd.f32 %v9375_v62, %v5149_v6 }
 0x3d9   :  { %v5564_v24 = vmax.f32 %v5158_v11, 0.0 }
 0x3da   :  { %v5687_v31 = vmax.f32 %v5685_v34, %v5561_v17  ;;  %v5562_v7 = vmax.f32 %v5150_v49, 0.0 }
 0x3dc   :  { %v5688_v1 = vmax.f32 %v5686_v57, %v5562_v7  ;;  %v6455_v20 = vpop.f32.mrb[36].mxu1  ;;  %v5689_v23 = vmax.f32 %v5687_v31, %v5563_v28 }
 0x3dd   :  { %v4801_v37 = vpop.f32.mrb[164].mxu0  ;;  %v5171_v47 = vadd.f32 %v9433_v53, %v6455_v20  ;;  %v5162_v13 = vpop.f32.mrb[37].mxu1 }
 0x3de   :  { %v9894_v42 = vadd.f32 %v4801_v37, %v10226_v14  ;;  %v4803_v58 = vpop.f32.mrb[165].mxu0  ;;  %v5163_v44 = vadd.f32 %v9409_v54, %v5162_v13  ;;  %v6456_v59 = vpop.f32.mrb[38].mxu1  ;;  %v5690_v3 = vmax.f32 %v5688_v1, %v5564_v24  ;;  %v10229_v24 = vld [vmem:[#allocation34_spill] sm:$0xff] }
 0x3df   :  { %v4804_v62 = vpop.f32.mrb[166].mxu0  ;;  %v5174_v46 = vadd.f32 %v9447_v45, %v6456_v59  ;;  %v5165_v4 = vpop.f32.mrb[39].mxu1  ;;  %v5567_v50 = vmax.f32 %v5171_v47, 0.0  ;;  %v10228_v45 = vld [vmem:[#allocation33_spill] sm:$0xff] }
 0x3e0   :  { %v5565_v32 = vmax.f32 %v5163_v44, 0.0  ;;  %v9899_v34 = vadd.f32 %v4804_v62, %v10227_v0  ;;  %v4806_v22 = vpop.f32.mrb[167].mxu0  ;;  %v5166_v53 = vadd.f32 %v9423_v29, %v5165_v4 }
 0x3e1   :  { %v5568_v10 = vmax.f32 %v5174_v46, 0.0  ;;  %v10231_v22 = vld [vmem:[#allocation63_spill] sm:$0xff] }
 0x3e2   :  { %v5691_v2 = vmax.f32 %v5689_v23, %v5565_v32  ;;  %v5566_v48 = vmax.f32 %v5166_v53, 0.0 }
 0x3e4   :  { %v5692_v35 = vmax.f32 %v5690_v3, %v5566_v48  ;;  %v6459_v26 = vpop.f32.mrb[40].mxu1  ;;  %v5693_v54 = vmax.f32 %v5691_v2, %v5567_v50  ;;  %v10232_v48 = vld [vmem:[#allocation36_spill] sm:$0xff] }
 0x3e5   :  { %v4809_v57 = vpop.f32.mrb[168].mxu0  ;;  %v5187_v38 = vadd.f32 %v9481_v19, %v6459_v26  ;;  %v5178_v11 = vpop.f32.mrb[41].mxu1  ;;  %v10233_v26 = vld [vmem:[#allocation60_spill] sm:$0xff] }
 0x3e6   :  { %v9904_v6 = vadd.f32 %v4809_v57, %v10228_v45  ;;  %v4811_v17 = vpop.f32.mrb[169].mxu0  ;;  %v5179_v61 = vadd.f32 %v9457_v5, %v5178_v11  ;;  %v6460_v56 = vpop.f32.mrb[42].mxu1  ;;  %v5694_v49 = vmax.f32 %v5692_v35, %v5568_v10 }
 0x3e7   :  { %v4812_v29 = vpop.f32.mrb[170].mxu0  ;;  %v5190_v28 = vadd.f32 %v9495_v21, %v6460_v56  ;;  %v5181_v31 = vpop.f32.mrb[43].mxu1  ;;  %v5571_v23 = vmax.f32 %v5187_v38, 0.0  ;;  %v10230_v21 = vld [vmem:[#allocation35_spill] sm:$0xff]  ;;  %v10234_v56 = vld [vmem:[#allocation69_spill] sm:$0xff] }
 0x3e8   :  { %v5569_v7 = vmax.f32 %v5179_v61, 0.0  ;;  %v9909_v1 = vadd.f32 %v4812_v29, %v10229_v24  ;;  %v4814_v20 = vpop.f32.mrb[171].mxu0  ;;  %v5182_v19 = vadd.f32 %v9471_v63, %v5181_v31  ;;  %v10236_v24 = vld [vmem:[#allocation65_spill] sm:$0xff] }
 0x3e9   :  { %v5572_v13 = vmax.f32 %v5190_v28, 0.0  ;;  %v10235_v28 = vld [vmem:[#allocation37_spill] sm:$0xff] }
 0x3ea   :  { %v5695_v37 = vmax.f32 %v5693_v54, %v5569_v7  ;;  %v5570_v47 = vmax.f32 %v5182_v19, 0.0 }
 0x3ec   :  { %v5696_v14 = vmax.f32 %v5694_v49, %v5570_v47  ;;  %v6463_v58 = vpop.f32.mrb[44].mxu1  ;;  %v5697_v5 = vmax.f32 %v5695_v37, %v5571_v23  ;;  %v10237_v47 = vld [vmem:[#allocation71_spill] sm:$0xff] }
 0x3ed   :  { %v4817_v44 = vpop.f32.mrb[172].mxu0  ;;  %v5203_v59 = vadd.f32 %v9529_v52, %v6463_v58  ;;  %v5194_v3 = vpop.f32.mrb[45].mxu1 }
 0x3ee   :  { %v9914_v62 = vadd.f32 %v4817_v44, %v10230_v21  ;;  %v4819_v46 = vpop.f32.mrb[173].mxu0  ;;  %v5195_v4 = vadd.f32 %v9505_v33, %v5194_v3  ;;  %v6464_v32 = vpop.f32.mrb[46].mxu1  ;;  %v5698_v0 = vmax.f32 %v5696_v14, %v5572_v13  ;;  %v10239_v3 = vld [vmem:[#allocation67_spill] sm:$0xff] }
 0x3ef   :  { %v4820_v63 = vpop.f32.mrb[174].mxu0  ;;  %v5206_v53 = vadd.f32 %v10231_v22, %v6464_v32  ;;  %v5197_v50 = vpop.f32.mrb[47].mxu1  ;;  %v5575_v54 = vmax.f32 %v5203_v59, 0.0 }
 0x3f0   :  { %v5573_v2 = vmax.f32 %v5195_v4, 0.0  ;;  %v9919_v10 = vadd.f32 %v4820_v63, %v10232_v48  ;;  %v4822_v35 = vpop.f32.mrb[175].mxu0  ;;  %v5198_v52 = vadd.f32 %v10233_v26, %v5197_v50  ;;  %v10241_v26 = vld [vmem:[#allocation39_spill] sm:$0xff] }
 0x3f1   :  { %v5576_v11 = vmax.f32 %v5206_v53, 0.0 }
 0x3f2   :  { %v5699_v57 = vmax.f32 %v5697_v5, %v5573_v2  ;;  %v5574_v38 = vmax.f32 %v5198_v52, 0.0  ;;  %v10238_v5 = vld [vmem:[#allocation38_spill] sm:$0xff]  ;;  %v10240_v2 = vld [vmem:[#allocation3_spill] sm:$0xff] }
 0x3f4   :  { %v5700_v45 = vmax.f32 %v5698_v0, %v5574_v38  ;;  %v6467_v17 = vpop.f32.mrb[48].mxu1  ;;  %v5701_v33 = vmax.f32 %v5699_v57, %v5575_v54  ;;  %v10242_v57 = vld [vmem:[#allocation73_spill] sm:$0xff] }
 0x3f5   :  { %v4825_v61 = vpop.f32.mrb[176].mxu0  ;;  %v5219_v49 = vadd.f32 %v10234_v56, %v6467_v17  ;;  %v5210_v29 = vpop.f32.mrb[49].mxu1 }
 0x3f6   :  { %v9924_v31 = vadd.f32 %v4825_v61, %v10235_v28  ;;  %v4827_v7 = vpop.f32.mrb[177].mxu0  ;;  %v5211_v20 = vadd.f32 %v10236_v24, %v5210_v29  ;;  %v6468_v19 = vpop.f32.mrb[50].mxu1  ;;  %v5702_v23 = vmax.f32 %v5700_v45, %v5576_v11  ;;  %v10243_v61 = vld [vmem:[#allocation4_spill] sm:$0xff]  ;;  %v10245_v24 = vld [vmem:[#allocation2_spill] sm:$0xff] }
 0x3f7   :  { %v4828_v37 = vpop.f32.mrb[178].mxu0  ;;  %v5222_v13 = vadd.f32 %v10237_v47, %v6468_v19  ;;  %v5213_v14 = vpop.f32.mrb[51].mxu1  ;;  %v5579_v46 = vmax.f32 %v5219_v49, 0.0  ;;  %v10244_v29 = vld [vmem:[#allocation40_spill] sm:$0xff] }
 0x3f8   :  { %v5577_v58 = vmax.f32 %v5211_v20, 0.0  ;;  %v9929_v44 = vadd.f32 %v4828_v37, %v10238_v5  ;;  %v4830_v59 = vpop.f32.mrb[179].mxu0  ;;  %v5214_v21 = vadd.f32 %v10239_v3, %v5213_v14 }
 0x3f9   :  { %v5580_v0 = vmax.f32 %v5222_v13, 0.0  ;;  %v10246_v59 = vld [vmem:[#allocation7_spill] sm:$0xff] }
 0x3fa   :  { %v5703_v4 = vmax.f32 %v5701_v33, %v5577_v58  ;;  %v5578_v32 = vmax.f32 %v5214_v21, 0.0 }
 0x3fc   :  { %v5704_v63 = vmax.f32 %v5702_v23, %v5578_v32  ;;  %v6471_v22 = vpop.f32.mrb[52].mxu1  ;;  %v5705_v53 = vmax.f32 %v5703_v4, %v5579_v46  ;;  %v10247_v46 = vld [vmem:[#allocation41_spill] sm:$0xff] }
 0x3fd   :  { %v4833_v50 = vpop.f32.mrb[180].mxu0  ;;  %v5235_v48 = vadd.f32 %v10240_v2, %v6471_v22  ;;  %v5226_v35 = vpop.f32.mrb[53].mxu1 }
 0x3fe   :  { %v9934_v52 = vadd.f32 %v4833_v50, %v10241_v26  ;;  %v4835_v54 = vpop.f32.mrb[181].mxu0  ;;  %v5227_v38 = vadd.f32 %v10242_v57, %v5226_v35  ;;  %v6472_v11 = vpop.f32.mrb[54].mxu1  ;;  %v5706_v45 = vmax.f32 %v5704_v63, %v5580_v0  ;;  %v10248_v0 = vld [vmem:[#allocation5_spill] sm:$0xff] }
 0x3ff   :  { %v4836_v17 = vpop.f32.mrb[182].mxu0  ;;  %v5238_v33 = vadd.f32 %v10243_v61, %v6472_v11  ;;  %v5229_v56 = vpop.f32.mrb[55].mxu1  ;;  %v5583_v19 = vmax.f32 %v5235_v48, 0.0  ;;  %v10249_v48 = vld [vmem:[#allocation8_spill] sm:$0xff]  ;;  %v10250_v54 = vld [vmem:[#allocation42_spill] sm:$0xff] }
 0x400   :  { %v5581_v49 = vmax.f32 %v5227_v38, 0.0  ;;  %v9939_v28 = vadd.f32 %v4836_v17, %v10244_v29  ;;  %v4838_v7 = vpop.f32.mrb[183].mxu0  ;;  %v5230_v20 = vadd.f32 %v10245_v24, %v5229_v56  ;;  %v10251_v11 = vld [vmem:[#allocation6_spill] sm:$0xff] }
 0x401   :  { %v5584_v47 = vmax.f32 %v5238_v33, 0.0 }
 0x402   :  { %v5707_v23 = vmax.f32 %v5705_v53, %v5581_v49  ;;  %v5582_v37 = vmax.f32 %v5230_v20, 0.0  ;;  %v10252_v20 = vld [vmem:[#allocation11_spill] sm:$0xff] }
 0x404   :  { %v5708_v13 = vmax.f32 %v5706_v45, %v5582_v37  ;;  %v6475_v14 = vpop.f32.mrb[56].mxu1  ;;  %v5709_v58 = vmax.f32 %v5707_v23, %v5583_v19  ;;  %v10253_v37 = vld [vmem:[#allocation43_spill] sm:$0xff] }
 0x405   :  { %v4841_v5 = vpop.f32.mrb[184].mxu0  ;;  %v5251_v3 = vadd.f32 %v10246_v59, %v6475_v14  ;;  %v5242_v21 = vpop.f32.mrb[57].mxu1  ;;  %v10254_v14 = vld [vmem:[#allocation9_spill] sm:$0xff] }
 0x406   :  { %v9944_v4 = vadd.f32 %v4841_v5, %v10247_v46  ;;  %v4843_v32 = vpop.f32.mrb[185].mxu0  ;;  %v5243_v63 = vadd.f32 %v10248_v0, %v5242_v21  ;;  %v6476_v22 = vpop.f32.mrb[58].mxu1  ;;  %v5710_v50 = vmax.f32 %v5708_v13, %v5584_v47 }
 0x407   :  { %v4844_v2 = vpop.f32.mrb[186].mxu0  ;;  %v5254_v53 = vadd.f32 %v10249_v48, %v6476_v22  ;;  %v5245_v35 = vpop.f32.mrb[59].mxu1  ;;  %v5587_v17 = vmax.f32 %v5251_v3, 0.0  ;;  %v10255_v3 = vld [vmem:[#allocation12_spill] sm:$0xff] }
 0x408   :  { %v5585_v26 = vmax.f32 %v5243_v63, 0.0  ;;  %v9949_v57 = vadd.f32 %v4844_v2, %v10250_v54  ;;  %v4846_v38 = vpop.f32.mrb[187].mxu0  ;;  %v5246_v45 = vadd.f32 %v10251_v11, %v5245_v35  ;;  %v10256_v63 = vld [vmem:[#allocation44_spill] sm:$0xff]  ;;  %v10257_v2 = vld [vmem:[#allocation10_spill] sm:$0xff] }
 0x409   :  { %v5588_v56 = vmax.f32 %v5254_v53, 0.0 }
 0x40a   :  { %v5711_v61 = vmax.f32 %v5709_v58, %v5585_v26  ;;  %v5586_v33 = vmax.f32 %v5246_v45, 0.0 }
 0x40c   :  { %v5712_v49 = vmax.f32 %v5710_v50, %v5586_v33  ;;  %v6479_v29 = vpop.f32.mrb[60].mxu1  ;;  %v5713_v7 = vmax.f32 %v5711_v61, %v5587_v17 }
 0x40d   :  { %v4849_v24 = vpop.f32.mrb[188].mxu0  ;;  %v5267_v19 = vadd.f32 %v10252_v20, %v6479_v29  ;;  %v5258_v23 = vpop.f32.mrb[61].mxu1 }
 0x40e   :  { %v9954_v47 = vadd.f32 %v4849_v24, %v10253_v37  ;;  %v4851_v13 = vpop.f32.mrb[189].mxu0  ;;  %v5259_v5 = vadd.f32 %v10254_v14, %v5258_v23  ;;  %v6480_v59 = vpop.f32.mrb[62].mxu1  ;;  %v5714_v21 = vmax.f32 %v5712_v49, %v5588_v56  ;;  %v10258_v56 = vld [vmem:[#allocation46_spill] sm:$0xff]  ;;  %v10259_v24 = vld [vmem:[#allocation13_spill] sm:$0xff] }
 0x40f   :  { %v4852_v46 = vpop.f32.mrb[190].mxu0  ;;  %v5270_v58 = vadd.f32 %v10255_v3, %v6480_v59  ;;  %v5261_v32 = vpop.f32.mrb[63].mxu1  ;;  %v5591_v53 = vmax.f32 %v5267_v19, 0.0 }
 0x410   :  { %v5589_v0 = vmax.f32 %v5259_v5, 0.0  ;;  %v9959_v22 = vadd.f32 %v4852_v46, %v10256_v63  ;;  %v4854_v50 = vpop.f32.mrb[191].mxu0  ;;  %v5262_v48 = vadd.f32 %v10257_v2, %v5261_v32  ;;  %v10260_v5 = vld [vmem:[#allocation47_spill] sm:$0xff] }
 0x411   :  { %v5592_v54 = vmax.f32 %v5270_v58, 0.0 }
 0x412   :  { %v5715_v35 = vmax.f32 %v5713_v7, %v5589_v0  ;;  %v5590_v26 = vmax.f32 %v5262_v48, 0.0 }
 0x414   :  { %v5716_v38 = vmax.f32 %v5714_v21, %v5590_v26  ;;  %v6483_v11 = vpop.f32.mrb[64].mxu1  ;;  %v5717_v45 = vmax.f32 %v5715_v35, %v5591_v53 }
 0x415   :  { %v4857_v17 = vpop.f32.mrb[192].mxu0  ;;  %v5283_v61 = vadd.f32 %v9768_v55, %v6483_v11  ;;  %v5274_v33 = vpop.f32.mrb[65].mxu1 }
 0x416   :  { %v9964_v49 = vadd.f32 %v4857_v17, %v10258_v56  ;;  %v4859_v29 = vpop.f32.mrb[193].mxu0  ;;  %v5275_v20 = vadd.f32 %v10259_v24, %v5274_v33  ;;  %v6484_v23 = vpop.f32.mrb[66].mxu1  ;;  %v5718_v37 = vmax.f32 %v5716_v38, %v5592_v54  ;;  %v10262_v33 = vld [vmem:[#allocation49_spill] sm:$0xff] }
 0x417   :  { %v4860_v13 = vpop.f32.mrb[194].mxu0  ;;  %v5286_v7 = vadd.f32 %v9782_v41, %v6484_v23  ;;  %v5277_v19 = vpop.f32.mrb[67].mxu1  ;;  %v5595_v46 = vmax.f32 %v5283_v61, 0.0  ;;  %v10261_v41 = vld [vmem:[#allocation48_spill] sm:$0xff] }
 0x418   :  { %v5593_v14 = vmax.f32 %v5275_v20, 0.0  ;;  %v9969_v59 = vadd.f32 %v4860_v13, %v10260_v5  ;;  %v4862_v21 = vpop.f32.mrb[195].mxu0  ;;  %v5278_v55 = vadd.f32 %v9758_v15, %v5277_v19 }
 0x419   :  { %v5596_v32 = vmax.f32 %v5286_v7, 0.0 }
 0x41a   :  { %v5719_v3 = vmax.f32 %v5717_v45, %v5593_v14  ;;  %v5594_v58 = vmax.f32 %v5278_v55, 0.0 }
 0x41c   :  { %v5720_v0 = vmax.f32 %v5718_v37, %v5594_v58  ;;  %v6487_v63 = vpop.f32.mrb[68].mxu1  ;;  %v5721_v50 = vmax.f32 %v5719_v3, %v5595_v46 }
 0x41d   :  { %v4865_v2 = vpop.f32.mrb[196].mxu0  ;;  %v5299_v48 = vadd.f32 %v9816_v60, %v6487_v63  ;;  %v5290_v53 = vpop.f32.mrb[69].mxu1 }
 0x41e   :  { %v9974_v35 = vadd.f32 %v4865_v2, %v10261_v41  ;;  %v4867_v26 = vpop.f32.mrb[197].mxu0  ;;  %v5291_v54 = vadd.f32 %v9792_v16, %v5290_v53  ;;  %v6488_v38 = vpop.f32.mrb[70].mxu1  ;;  %v5722_v11 = vmax.f32 %v5720_v0, %v5596_v32 }
 0x41f   :  { %v4868_v15 = vpop.f32.mrb[198].mxu0  ;;  %v5302_v45 = vadd.f32 %v9830_v40, %v6488_v38  ;;  %v5293_v17 = vpop.f32.mrb[71].mxu1  ;;  %v5599_v24 = vmax.f32 %v5299_v48, 0.0  ;;  %v10263_v40 = vld [vmem:[#allocation50_spill] sm:$0xff] }
 0x420   :  { %v5597_v61 = vmax.f32 %v5291_v54, 0.0  ;;  %v9979_v56 = vadd.f32 %v4868_v15, %v10262_v33  ;;  %v4870_v29 = vpop.f32.mrb[199].mxu0  ;;  %v5294_v60 = vadd.f32 %v9806_v36, %v5293_v17 }
 0x421   :  { %v5600_v37 = vmax.f32 %v5302_v45, 0.0 }
 0x422   :  { %v5723_v20 = vmax.f32 %v5721_v50, %v5597_v61  ;;  %v5598_v23 = vmax.f32 %v5294_v60, 0.0  ;;  %v10264_v50 = vld [vmem:[#allocation51_spill] sm:$0xff] }
 0x424   :  { %v5724_v13 = vmax.f32 %v5722_v11, %v5598_v23  ;;  %v6491_v7 = vpop.f32.mrb[72].mxu1  ;;  %v5725_v16 = vmax.f32 %v5723_v20, %v5599_v24 }
 0x425   :  { %v4873_v19 = vpop.f32.mrb[200].mxu0  ;;  %v5315_v14 = vadd.f32 %v9854_v27, %v6491_v7  ;;  %v5306_v5 = vpop.f32.mrb[73].mxu1 }
 0x426   :  { %v9984_v21 = vadd.f32 %v4873_v19, %v10263_v40  ;;  %v4875_v55 = vpop.f32.mrb[201].mxu0  ;;  %v5307_v46 = vadd.f32 %v9840_v8, %v5306_v5  ;;  %v6492_v3 = vpop.f32.mrb[74].mxu1  ;;  %v5726_v58 = vmax.f32 %v5724_v13, %v5600_v37  ;;  %v10266_v13 = vld [vmem:[#allocation53_spill] sm:$0xff] }
 0x427   :  { %v4876_v36 = vpop.f32.mrb[202].mxu0  ;;  %v5318_v32 = vadd.f32 %v9859_v18, %v6492_v3  ;;  %v5309_v0 = vpop.f32.mrb[75].mxu1  ;;  %v5603_v53 = vmax.f32 %v5315_v14, 0.0  ;;  %v10265_v18 = vld [vmem:[#allocation52_spill] sm:$0xff] }
 0x428   :  { %v5601_v63 = vmax.f32 %v5307_v46, 0.0  ;;  %v9989_v2 = vadd.f32 %v4876_v36, %v10264_v50  ;;  %v4878_v48 = vpop.f32.mrb[203].mxu0  ;;  %v5310_v27 = vadd.f32 %v9848_v39, %v5309_v0 }
 0x429   :  { %v5604_v54 = vmax.f32 %v5318_v32, 0.0 }
 0x42a   :  { %v5727_v41 = vmax.f32 %v5725_v16, %v5601_v63  ;;  %v5602_v26 = vmax.f32 %v5310_v27, 0.0 }
 0x42c   :  { %v5728_v38 = vmax.f32 %v5726_v58, %v5602_v26  ;;  %v6495_v11 = vpop.f32.mrb[76].mxu1  ;;  %v5729_v8 = vmax.f32 %v5727_v41, %v5603_v53  ;;  %v10268_v26 = vld [vmem:[#allocation55_spill] sm:$0xff] }
 0x42d   :  { %v4881_v15 = vpop.f32.mrb[204].mxu0  ;;  %v5331_v45 = vadd.f32 %v9874_v43, %v6495_v11  ;;  %v5322_v17 = vpop.f32.mrb[77].mxu1 }
 0x42e   :  { %v9994_v61 = vadd.f32 %v4881_v15, %v10265_v18  ;;  %v4883_v33 = vpop.f32.mrb[205].mxu0  ;;  %v5323_v29 = vadd.f32 %v9864_v51, %v5322_v17  ;;  %v6496_v60 = vpop.f32.mrb[78].mxu1  ;;  %v5730_v24 = vmax.f32 %v5728_v38, %v5604_v54 }
 0x42f   :  { %v4884_v39 = vpop.f32.mrb[206].mxu0  ;;  %v5334_v20 = vadd.f32 %v9879_v12, %v6496_v60  ;;  %v5325_v23 = vpop.f32.mrb[79].mxu1  ;;  %v5607_v19 = vmax.f32 %v5331_v45, 0.0  ;;  %v10267_v12 = vld [vmem:[#allocation54_spill] sm:$0xff] }
 0x430   :  { %v5605_v37 = vmax.f32 %v5323_v29, 0.0  ;;  %v9999_v7 = vadd.f32 %v4884_v39, %v10266_v13  ;;  %v4886_v16 = vpop.f32.mrb[207].mxu0  ;;  %v5326_v43 = vadd.f32 %v9869_v30, %v5325_v23 }
 0x431   :  { %v5608_v40 = vmax.f32 %v5334_v20, 0.0 }
 0x432   :  { %v5731_v14 = vmax.f32 %v5729_v8, %v5605_v37  ;;  %v5606_v5 = vmax.f32 %v5326_v43, 0.0 }
 0x434   :  { %v5732_v55 = vmax.f32 %v5730_v24, %v5606_v5  ;;  %v6499_v46 = vpop.f32.mrb[80].mxu1  ;;  %v5733_v51 = vmax.f32 %v5731_v14, %v5607_v19  ;;  %v10270_v19 = vld [vmem:[#allocation57_spill] sm:$0xff] }
 0x435   :  { %v4889_v3 = vpop.f32.mrb[208].mxu0  ;;  %v5347_v58 = vadd.f32 %v9894_v42, %v6499_v46  ;;  %v5338_v36 = vpop.f32.mrb[81].mxu1 }
 0x436   :  { %v10004_v32 = vadd.f32 %v4889_v3, %v10267_v12  ;;  %v4891_v0 = vpop.f32.mrb[209].mxu0  ;;  %v5339_v63 = vadd.f32 %v9884_v25, %v5338_v36  ;;  %v6500_v50 = vpop.f32.mrb[82].mxu1  ;;  %v5734_v48 = vmax.f32 %v5732_v55, %v5608_v40 }
 0x437   :  { %v4892_v30 = vpop.f32.mrb[210].mxu0  ;;  %v5350_v27 = vadd.f32 %v9899_v34, %v6500_v50  ;;  %v5341_v53 = vpop.f32.mrb[83].mxu1  ;;  %v5611_v11 = vmax.f32 %v5347_v58, 0.0  ;;  %v10269_v34 = vld [vmem:[#allocation56_spill] sm:$0xff] }
 0x438   :  { %v5609_v41 = vmax.f32 %v5339_v63, 0.0  ;;  %v10009_v54 = vadd.f32 %v4892_v30, %v10268_v26  ;;  %v4894_v38 = vpop.f32.mrb[211].mxu0  ;;  %v5342_v42 = vadd.f32 %v9889_v9, %v5341_v53 }
 0x439   :  { %v5612_v45 = vmax.f32 %v5350_v27, 0.0  ;;  %v10272_v38 = vld [vmem:[#allocation59_spill] sm:$0xff] }
 0x43a   :  { %v5735_v8 = vmax.f32 %v5733_v51, %v5609_v41  ;;  %v5610_v15 = vmax.f32 %v5342_v42, 0.0 }
 0x43c   :  { %v5736_v17 = vmax.f32 %v5734_v48, %v5610_v15  ;;  %v6503_v18 = vpop.f32.mrb[84].mxu1  ;;  %v5737_v25 = vmax.f32 %v5735_v8, %v5611_v11 }
 0x43d   :  { %v4897_v33 = vpop.f32.mrb[212].mxu0  ;;  %v5363_v29 = vadd.f32 %v9914_v62, %v6503_v18  ;;  %v5354_v60 = vpop.f32.mrb[85].mxu1 }
 0x43e   :  { %v10014_v24 = vadd.f32 %v4897_v33, %v10269_v34  ;;  %v4899_v39 = vpop.f32.mrb[213].mxu0  ;;  %v5355_v20 = vadd.f32 %v9904_v6, %v5354_v60  ;;  %v6504_v23 = vpop.f32.mrb[86].mxu1  ;;  %v5738_v37 = vmax.f32 %v5736_v17, %v5612_v45 }
 0x43f   :  { %v4900_v9 = vpop.f32.mrb[214].mxu0  ;;  %v5366_v13 = vadd.f32 %v9919_v10, %v6504_v23  ;;  %v5357_v16 = vpop.f32.mrb[87].mxu1  ;;  %v5615_v40 = vmax.f32 %v5363_v29, 0.0  ;;  %v10271_v10 = vld [vmem:[#allocation58_spill] sm:$0xff] }
 0x440   :  { %v5613_v43 = vmax.f32 %v5355_v20, 0.0  ;;  %v10019_v14 = vadd.f32 %v4900_v9, %v10270_v19  ;;  %v4902_v5 = vpop.f32.mrb[215].mxu0  ;;  %v5358_v62 = vadd.f32 %v9909_v1, %v5357_v16 }
 0x441   :  { %v5616_v51 = vmax.f32 %v5366_v13, 0.0 }
 0x442   :  { %v5739_v55 = vmax.f32 %v5737_v25, %v5613_v43  ;;  %v5614_v46 = vmax.f32 %v5358_v62, 0.0  ;;  %v10274_v43 = vld [vmem:[#allocation62_spill] sm:$0xff] }
 0x444   :  { %v5740_v3 = vmax.f32 %v5738_v37, %v5614_v46  ;;  %v6507_v58 = vpop.f32.mrb[88].mxu1  ;;  %v5741_v6 = vmax.f32 %v5739_v55, %v5615_v40 }
 0x445   :  { %v4905_v36 = vpop.f32.mrb[216].mxu0  ;;  %v5379_v12 = vadd.f32 %v9934_v52, %v6507_v58  ;;  %v5370_v0 = vpop.f32.mrb[89].mxu1 }
 0x446   :  { %v10024_v63 = vadd.f32 %v4905_v36, %v10271_v10  ;;  %v4907_v50 = vpop.f32.mrb[217].mxu0  ;;  %v5371_v48 = vadd.f32 %v9924_v31, %v5370_v0  ;;  %v6508_v30 = vpop.f32.mrb[90].mxu1  ;;  %v5742_v27 = vmax.f32 %v5740_v3, %v5616_v51 }
 0x447   :  { %v4908_v1 = vpop.f32.mrb[218].mxu0  ;;  %v5382_v53 = vadd.f32 %v9939_v28, %v6508_v30  ;;  %v5373_v41 = vpop.f32.mrb[91].mxu1  ;;  %v5619_v8 = vmax.f32 %v5379_v12, 0.0  ;;  %v10273_v28 = vld [vmem:[#allocation61_spill] sm:$0xff] }
 0x448   :  { %v5617_v26 = vmax.f32 %v5371_v48, 0.0  ;;  %v10029_v42 = vadd.f32 %v4908_v1, %v10272_v38  ;;  %v4910_v11 = vpop.f32.mrb[219].mxu0  ;;  %v5374_v52 = vadd.f32 %v9929_v44, %v5373_v41 }
 0x449   :  { %v5620_v17 = vmax.f32 %v5382_v53, 0.0  ;;  %v10276_v53 = vld [vmem:[#allocation66_spill] sm:$0xff] }
 0x44a   :  { %v5743_v15 = vmax.f32 %v5741_v6, %v5617_v26  ;;  %v5618_v45 = vmax.f32 %v5374_v52, 0.0 }
 0x44c   :  { %v5744_v18 = vmax.f32 %v5742_v27, %v5618_v45  ;;  %v6511_v25 = vpop.f32.mrb[92].mxu1  ;;  %v5745_v31 = vmax.f32 %v5743_v15, %v5619_v8 }
 0x44d   :  { %v4913_v33 = vpop.f32.mrb[220].mxu0  ;;  %v5395_v29 = vadd.f32 %v9954_v47, %v6511_v25  ;;  %v5386_v60 = vpop.f32.mrb[93].mxu1 }
 0x44e   :  { %v10034_v34 = vadd.f32 %v4913_v33, %v10273_v28  ;;  %v4915_v39 = vpop.f32.mrb[221].mxu0  ;;  %v5387_v20 = vadd.f32 %v9944_v4, %v5386_v60  ;;  %v6512_v23 = vpop.f32.mrb[94].mxu1  ;;  %v5746_v37 = vmax.f32 %v5744_v18, %v5620_v17 }
 0x44f   :  { %v4916_v44 = vpop.f32.mrb[222].mxu0  ;;  %v5398_v9 = vadd.f32 %v9959_v22, %v6512_v23  ;;  %v5389_v13 = vpop.f32.mrb[95].mxu1  ;;  %v5623_v62 = vmax.f32 %v5395_v29, 0.0  ;;  %v10275_v22 = vld [vmem:[#allocation64_spill] sm:$0xff] }
 0x450   :  { %v5621_v16 = vmax.f32 %v5387_v20, 0.0  ;;  %v10039_v19 = vadd.f32 %v4916_v44, %v10274_v43  ;;  %v4918_v5 = vpop.f32.mrb[223].mxu0  ;;  %v5390_v47 = vadd.f32 %v9949_v57, %v5389_v13 }
 0x451   :  { %v5624_v46 = vmax.f32 %v5398_v9, 0.0 }
 0x452   :  { %v5747_v40 = vmax.f32 %v5745_v31, %v5621_v16  ;;  %v5622_v55 = vmax.f32 %v5390_v47, 0.0 }
 0x454   :  { %v5748_v51 = vmax.f32 %v5746_v37, %v5622_v55  ;;  %v6515_v3 = vpop.f32.mrb[96].mxu1  ;;  %v5749_v4 = vmax.f32 %v5747_v40, %v5623_v62  ;;  %v10278_v37 = vld [vmem:[#allocation70_spill] sm:$0xff] }
 0x455   :  { %v4921_v58 = vpop.f32.mrb[224].mxu0  ;;  %v5411_v6 = vadd.f32 %v9974_v35, %v6515_v3  ;;  %v5402_v36 = vpop.f32.mrb[97].mxu1 }
 0x456   :  { %v10044_v12 = vadd.f32 %v4921_v58, %v10275_v22  ;;  %v4923_v0 = vpop.f32.mrb[225].mxu0  ;;  %v5403_v10 = vadd.f32 %v9964_v49, %v5402_v36  ;;  %v6516_v50 = vpop.f32.mrb[98].mxu1  ;;  %v5750_v48 = vmax.f32 %v5748_v51, %v5624_v46 }
 0x457   :  { %v4924_v57 = vpop.f32.mrb[226].mxu0  ;;  %v5414_v30 = vadd.f32 %v9979_v56, %v6516_v50  ;;  %v5405_v27 = vpop.f32.mrb[99].mxu1  ;;  %v5627_v38 = vmax.f32 %v5411_v6, 0.0  ;;  %v10277_v56 = vld [vmem:[#allocation68_spill] sm:$0xff] }
 0x458   :  { %v5625_v1 = vmax.f32 %v5403_v10, 0.0  ;;  %v10049_v41 = vadd.f32 %v4924_v57, %v10276_v53  ;;  %v4926_v26 = vpop.f32.mrb[227].mxu0  ;;  %v5406_v35 = vadd.f32 %v9969_v59, %v5405_v27  ;;  %v10280_v10 = vld [vmem:[#allocation74_spill] sm:$0xff] }
 0x459   :  { %v5628_v8 = vmax.f32 %v5414_v30, 0.0 }
 0x45a   :  { %v5751_v11 = vmax.f32 %v5749_v4, %v5625_v1  ;;  %v5626_v52 = vmax.f32 %v5406_v35, 0.0 }
 0x45c   :  { %v5752_v15 = vmax.f32 %v5750_v48, %v5626_v52  ;;  %v6519_v45 = vpop.f32.mrb[100].mxu1  ;;  %v5753_v49 = vmax.f32 %v5751_v11, %v5627_v38 }
 0x45d   :  { %v4929_v17 = vpop.f32.mrb[228].mxu0  ;;  %v5427_v18 = vadd.f32 %v9994_v61, %v6519_v45  ;;  %v5418_v25 = vpop.f32.mrb[101].mxu1 }
 0x45e   :  { %v10054_v31 = vadd.f32 %v4929_v17, %v10277_v56  ;;  %v4931_v33 = vpop.f32.mrb[229].mxu0  ;;  %v5419_v29 = vadd.f32 %v9984_v21, %v5418_v25  ;;  %v6520_v60 = vpop.f32.mrb[102].mxu1  ;;  %v5754_v28 = vmax.f32 %v5752_v15, %v5628_v8  ;;  %v10282_v56 = vld [vmem:[#allocation76_spill] sm:$0xff] }
 0x45f   :  { %v4932_v59 = vpop.f32.mrb[230].mxu0  ;;  %v5430_v39 = vadd.f32 %v9999_v7, %v6520_v60  ;;  %v5421_v20 = vpop.f32.mrb[103].mxu1  ;;  %v5631_v13 = vmax.f32 %v5427_v18, 0.0  ;;  %v10279_v7 = vld [vmem:[#allocation72_spill] sm:$0xff] }
 0x460   :  { %v5629_v23 = vmax.f32 %v5419_v29, 0.0  ;;  %v10059_v44 = vadd.f32 %v4932_v59, %v10278_v37  ;;  %v4934_v9 = vpop.f32.mrb[231].mxu0  ;;  %v5422_v61 = vadd.f32 %v9989_v2, %v5421_v20 }
 0x461   :  { %v5632_v5 = vmax.f32 %v5430_v39, 0.0 }
 0x462   :  { %v5755_v16 = vmax.f32 %v5753_v49, %v5629_v23  ;;  %v5630_v43 = vmax.f32 %v5422_v61, 0.0 }
 0x464   :  { %v5756_v47 = vmax.f32 %v5754_v28, %v5630_v43  ;;  %v6523_v62 = vpop.f32.mrb[104].mxu1  ;;  %v5757_v21 = vmax.f32 %v5755_v16, %v5631_v13  ;;  %v10283_v13 = vld [vmem:[#allocation77_spill] sm:$0xff] }
 0x465   :  { %v4937_v40 = vpop.f32.mrb[232].mxu0  ;;  %v5443_v55 = vadd.f32 %v10014_v24, %v6523_v62  ;;  %v5434_v46 = vpop.f32.mrb[105].mxu1 }
 0x466   :  { %v10064_v51 = vadd.f32 %v4937_v40, %v10279_v7  ;;  %v4939_v3 = vpop.f32.mrb[233].mxu0  ;;  %v5435_v4 = vadd.f32 %v10004_v32, %v5434_v46  ;;  %v6524_v58 = vpop.f32.mrb[106].mxu1  ;;  %v5758_v6 = vmax.f32 %v5756_v47, %v5632_v5 }
 0x467   :  { %v4940_v2 = vpop.f32.mrb[234].mxu0  ;;  %v5446_v36 = vadd.f32 %v10019_v14, %v6524_v58  ;;  %v5437_v22 = vpop.f32.mrb[107].mxu1  ;;  %v5635_v57 = vmax.f32 %v5443_v55, 0.0  ;;  %v10281_v14 = vld [vmem:[#allocation75_spill] sm:$0xff]  ;;  %v10284_v55 = vld [vmem:[#allocation78_spill] sm:$0xff] }
 0x468   :  { %v5633_v0 = vmax.f32 %v5435_v4, 0.0  ;;  %v10069_v50 = vadd.f32 %v4940_v2, %v10280_v10  ;;  %v4942_v48 = vpop.f32.mrb[235].mxu0  ;;  %v5438_v24 = vadd.f32 %v10009_v54, %v5437_v22 }
 0x469   :  { %v5636_v1 = vmax.f32 %v5446_v36, 0.0  ;;  %v10285_v48 = vld [vmem:[#allocation79_spill] sm:$0xff] }
 0x46a   :  { %v5759_v30 = vmax.f32 %v5757_v21, %v5633_v0  ;;  %v5634_v27 = vmax.f32 %v5438_v24, 0.0 }
 0x46c   :  { %v5760_v53 = vmax.f32 %v5758_v6, %v5634_v27  ;;  %v6527_v26 = vpop.f32.mrb[108].mxu1  ;;  %v5761_v32 = vmax.f32 %v5759_v30, %v5635_v57 }
 0x46d   :  { %v4945_v35 = vpop.f32.mrb[236].mxu0  ;;  %v5459_v38 = vadd.f32 %v10034_v34, %v6527_v26  ;;  %v5450_v11 = vpop.f32.mrb[109].mxu1 }
 0x46e   :  { %v6695_v52 = vadd.f32 %v4945_v35, %v10281_v14  ;;  %v4947_v8 = vpop.f32.mrb[237].mxu0  ;;  %v5451_v15 = vadd.f32 %v10024_v63, %v5450_v11  ;;  %v6528_v45 = vpop.f32.mrb[110].mxu1  ;;  %v5762_v49 = vmax.f32 %v5760_v53, %v5636_v1 }
 0x46f   :  { %v4948_v17 = vpop.f32.mrb[238].mxu0  ;;  %v5462_v54 = vadd.f32 %v10039_v19, %v6528_v45  ;;  %v5453_v18 = vpop.f32.mrb[111].mxu1  ;;  %v5639_v28 = vmax.f32 %v5459_v38, 0.0 }
 0x470   :  { %v5637_v25 = vmax.f32 %v5451_v15, 0.0  ;;  %v6696_v33 = vadd.f32 %v4948_v17, %v10282_v56  ;;  %v4950_v29 = vpop.f32.mrb[239].mxu0  ;;  %v5454_v60 = vadd.f32 %v10029_v42, %v5453_v18 }
 0x471   :  { %v5640_v39 = vmax.f32 %v5462_v54, 0.0 }
 0x472   :  { %v5763_v34 = vmax.f32 %v5761_v32, %v5637_v25  ;;  %v5638_v59 = vmax.f32 %v5454_v60, 0.0  ;;  %v10286_v32 = vld [vmem:[#allocation80_spill] sm:$0xff]  ;;  %v10287_v25 = vld [vmem:[#allocation81_spill] sm:$0xff] }
 0x474   :  { %v5764_v20 = vmax.f32 %v5762_v49, %v5638_v59  ;;  %v6531_v23 = vpop.f32.mrb[112].mxu1  ;;  %v5765_v37 = vmax.f32 %v5763_v34, %v5639_v28 }
 0x475   :  { %v4953_v63 = vpop.f32.mrb[240].mxu0  ;;  %v5475_v9 = vadd.f32 %v10054_v31, %v6531_v23  ;;  %v5466_v61 = vpop.f32.mrb[113].mxu1 }
 0x476   :  { %v6697_v19 = vadd.f32 %v4953_v63, %v10283_v13  ;;  %v4955_v16 = vpop.f32.mrb[241].mxu0  ;;  %v5467_v43 = vadd.f32 %v10044_v12, %v5466_v61  ;;  %v6532_v5 = vpop.f32.mrb[114].mxu1  ;;  %v5766_v47 = vmax.f32 %v5764_v20, %v5640_v39  ;;  %v10288_v20 = vld [vmem:[#allocation82_spill] sm:$0xff] }
 0x477   :  { %v4956_v62 = vpop.f32.mrb[242].mxu0  ;;  %v5478_v42 = vadd.f32 %v10059_v44, %v6532_v5  ;;  %v5469_v21 = vpop.f32.mrb[115].mxu1  ;;  %v5643_v4 = vmax.f32 %v5475_v9, 0.0 }
 0x478   :  { %v5641_v40 = vmax.f32 %v5467_v43, 0.0  ;;  %v6698_v46 = vadd.f32 %v4956_v62, %v10284_v55  ;;  %v4958_v7 = vpop.f32.mrb[243].mxu0  ;;  %v5470_v3 = vadd.f32 %v10049_v41, %v5469_v21 }
 0x479   :  { %v5644_v6 = vmax.f32 %v5478_v42, 0.0 }
 0x47a   :  { %v5767_v31 = vmax.f32 %v5765_v37, %v5641_v40  ;;  %v5642_v58 = vmax.f32 %v5470_v3, 0.0 }
 0x47c   :  { %v5768_v2 = vmax.f32 %v5766_v47, %v5642_v58  ;;  %v6535_v36 = vpop.f32.mrb[116].mxu1  ;;  %v5769_v22 = vmax.f32 %v5767_v31, %v5643_v4 }
 0x47d   :  { %v4961_v12 = vpop.f32.mrb[244].mxu0  ;;  %v5491_v0 = vadd.f32 %v6695_v52, %v6535_v36  ;;  %v5482_v10 = vpop.f32.mrb[117].mxu1 }
 0x47e   :  { %v6699_v24 = vadd.f32 %v4961_v12, %v10285_v48  ;;  %v4963_v44 = vpop.f32.mrb[245].mxu0  ;;  %v5483_v57 = vadd.f32 %v10064_v51, %v5482_v10  ;;  %v6536_v30 = vpop.f32.mrb[118].mxu1  ;;  %v5770_v27 = vmax.f32 %v5768_v2, %v5644_v6 }
 0x47f   :  { %v4964_v1 = vpop.f32.mrb[246].mxu0  ;;  %v5494_v53 = vadd.f32 %v6696_v33, %v6536_v30  ;;  %v5485_v41 = vpop.f32.mrb[119].mxu1  ;;  %v5647_v14 = vmax.f32 %v5491_v0, 0.0 }
 0x480   :  { %v5645_v26 = vmax.f32 %v5483_v57, 0.0  ;;  %v6700_v35 = vadd.f32 %v4964_v1, %v10286_v32  ;;  %v4966_v38 = vpop.f32.mrb[247].mxu0  ;;  %v5486_v11 = vadd.f32 %v10069_v50, %v5485_v41 }
 0x481   :  { %v5648_v15 = vmax.f32 %v5494_v53, 0.0 }
 0x482   :  { %v5771_v8 = vmax.f32 %v5769_v22, %v5645_v26  ;;  %v5646_v52 = vmax.f32 %v5486_v11, 0.0 }
 0x484   :  { %v5772_v45 = vmax.f32 %v5770_v27, %v5646_v52  ;;  %v6539_v49 = vpop.f32.mrb[120].mxu1  ;;  %v5773_v17 = vmax.f32 %v5771_v8, %v5647_v14 }
 0x485   :  { %v4969_v54 = vpop.f32.mrb[248].mxu0  ;;  %v5507_v51 = vadd.f32 %v6699_v24, %v6539_v49  ;;  %v5498_v18 = vpop.f32.mrb[121].mxu1 }
 0x486   :  { %v6701_v56 = vadd.f32 %v4969_v54, %v10287_v25  ;;  %v4971_v33 = vpop.f32.mrb[249].mxu0  ;;  %v5499_v29 = vadd.f32 %v6697_v19, %v5498_v18  ;;  %v6540_v60 = vpop.f32.mrb[122].mxu1  ;;  %v5774_v28 = vmax.f32 %v5772_v45, %v5648_v15  ;;  %v10289_v19 = vld [vmem:[#allocation83_spill] sm:$0xff] }
 0x487   :  { %v4972_v34 = vpop.f32.mrb[250].mxu0  ;;  %v5510_v59 = vadd.f32 %v6700_v35, %v6540_v60  ;;  %v5501_v39 = vpop.f32.mrb[123].mxu1  ;;  %v5651_v9 = vmax.f32 %v5507_v51, 0.0 }
 0x488   :  { %v5649_v50 = vmax.f32 %v5499_v29, 0.0  ;;  %v6702_v23 = vadd.f32 %v4972_v34, %v10288_v20  ;;  %v4974_v37 = vpop.f32.mrb[251].mxu0  ;;  %v5502_v63 = vadd.f32 %v6698_v46, %v5501_v39  ;;  %v10290_v46 = vld [vmem:[#allocation84_spill] sm:$0xff] }
 0x489   :  { %v5652_v16 = vmax.f32 %v5510_v59, 0.0 }
 0x48a   :  { %v5775_v61 = vmax.f32 %v5773_v17, %v5649_v50  ;;  %v5650_v13 = vmax.f32 %v5502_v63, 0.0 }
 0x48c   :  { %v5776_v43 = vmax.f32 %v5774_v28, %v5650_v13  ;;  %v6543_v5 = vpop.f32.mrb[124].mxu1  ;;  %v5777_v47 = vmax.f32 %v5775_v61, %v5651_v9 }
 0x48d   :  { %v4977_v62 = vpop.f32.mrb[252].mxu0  ;;  %v5514_v42 = vpop.f32.mrb[125].mxu1 }
 0x48e   :  { %v6703_v21 = vadd.f32 %v4977_v62, %v10289_v19  ;;  %v4979_v40 = vpop.f32.mrb[253].mxu0  ;;  %v5515_v55 = vadd.f32 %v6701_v56, %v5514_v42  ;;  %v6544_v7 = vpop.f32.mrb[126].mxu1  ;;  %v5778_v3 = vmax.f32 %v5776_v43, %v5652_v16 }
 0x48f   :  { %v4980_v4 = vpop.f32.mrb[254].mxu0  ;;  %v5517_v31 = vpop.f32.mrb[127].mxu1 }
 0x490   :  { %v5523_v58 = vadd.f32 %v6703_v21, %v6543_v5  ;;  %v5653_v6 = vmax.f32 %v5515_v55, 0.0  ;;  %v6704_v2 = vadd.f32 %v4980_v4, %v10290_v46  ;;  %v4982_v36 = vpop.f32.mrb[255].mxu0  ;;  %v5518_v22 = vadd.f32 %v6702_v23, %v5517_v31 }
 0x492   :  { %v5655_v12 = vmax.f32 %v5523_v58, 0.0  ;;  %v5779_v0 = vmax.f32 %v5777_v47, %v5653_v6  ;;  %v5526_v10 = vadd.f32 %v6704_v2, %v6544_v7  ;;  %v5654_v48 = vmax.f32 %v5518_v22, 0.0 }
 0x494   :  { %v5781_v24 = vmax.f32 %v5779_v0, %v5655_v12  ;;  %v5656_v44 = vmax.f32 %v5526_v10, 0.0  ;;  %v5780_v57 = vmax.f32 %v5778_v3, %v5654_v48 }
 0x496   :  { %5783 = vst [vmem:[%s10100_s2] sm:$0xff] %v5781_v24  ;;  %v5782_v30 = vmax.f32 %v5780_v57, %v5656_v44 }
 0x498   :  { %5784 = vst [vmem:[%s10100_s2 + $0x8] sm:$0xff] %v5782_v30 }

// kernel: forward.3
= control target key start
LH: loop header
LB: loop body
LE: loop exit
PB: predicated region body
PF: predicated region fallthrough
CT: control target
= control target key end

     0   :  { %v5515_v0 = vmov 0   ;;  %vm1911_vm0 = vcmask 1043456   ;;  %vm1670_vm1 = vcmask 64512   ;;  %vm4122_vm2 = vcmask 1040384   ;;  %s7862_s1 = inlined_call_operand.vmem [shape: bf16[264,128], index: 1, kind: input, shape index: {}]   ;;  %s7863_s0 = inlined_call_operand.vmem [shape: bf16[1280,264], index: 0, kind: input, shape index: {}]   ;;  %s7864_s2 = inlined_call_operand.vmem [shape: bf16[12,80,128], index: 2, kind: input, shape index: {}]   ;;  %s7865_s3 = inlined_call_operand.vmem [shape: f32[12,1], index: 3, kind: input, shape index: {}]   ;;  %s7866_s4 = inlined_call_operand.vmem [shape: f32[12,1], index: 4, kind: output, shape index: {}]  }
   0x1   :  { %1915 = vmatprep.subr.bf16.mxu0 %v5515_v0  ;;  %5144 = vmatprep.subr.bf16.mxu1 %v5515_v0  ;;  %v5178_v1 = vld [vmem:[%s7862_s1] sm:$0xff]   ;;  %v5179_v2 = vld [vmem:[%s7862_s1 + $0x8] sm:$0xff]   ;;  %v5180_v3 = vld [vmem:[%s7862_s1 + $0x10] sm:$0xff]   ;;  %vm4124_vm3 = vcmask 1041408   ;;  %vm4126_vm4 = vcmask 1042432   ;;  %vm4129_vm5 = vcmask 1044480  }
   0x2   :  { %1916 = vmatpush1.bf16.msra.mxu0 %v5178_v1  ;;  %5160 = vmatpush1.bf16.msra.mxu1 %v5178_v1  ;;  %v5181_v4 = vld [vmem:[%s7862_s1 + $0x18] sm:$0xff]   ;;  %v5182_v5 = vld [vmem:[%s7862_s1 + $0x20] sm:$0xff]   ;;  %v5183_v7 = vld [vmem:[%s7862_s1 + $0x28] sm:$0xff]   ;;  %vm4131_vm6 = vcmask 1045504   ;;  %vm4133_vm7 = vcmask 1046528   ;;  %vm4147_vm8 = vcmask 7168  }
   0x3   :  { %1917 = vmatprep.subr.bf16.mxu0 %v5515_v0  ;;  %5145 = vmatprep.subr.bf16.mxu1 %v5515_v0  ;;  %v5196_v6 = vld [vmem:[%s7863_s0 + $0x4] ss:$12 sps:$4 sm:$0xff]   ;;  %v5185_v10 = vld [vmem:[%s7862_s1 + $0x38] sm:$0xff]   ;;  %v5187_v12 = vld [vmem:[%s7862_s1 + $0x48] sm:$0xff]   ;;  %vm4149_vm9 = vcmask 3072  }
   0x4   :  { %v5199_v8 = vld [vmem:[%s7863_s0 + $0x5a4] ss:$12 sps:$4 sm:$0xff]   ;;  %1947 = vmatprep.mubr.bf16.mxu0 %v5196_v6  ;;  %v5189_v14 = vld [vmem:[%s7862_s1 + $0x58] sm:$0xff]   ;;  %v5191_v16 = vld [vmem:[%s7862_s1 + $0x68] sm:$0xff]  }
   0x5   :  { %2427 = vmatprep.mubr.bf16.mxu1 %v5199_v8  ;;  %v5184_v9 = vld [vmem:[%s7862_s1 + $0x30] sm:$0xff]   ;;  %v5186_v11 = vld [vmem:[%s7862_s1 + $0x40] sm:$0xff]   ;;  %v5193_v18 = vld [vmem:[%s7862_s1 + $0x78] sm:$0xff]  }
   0x6   :  { %1918 = vmatpush1.bf16.msra.mxu0 %v5179_v2  ;;  %5161 = vmatpush1.bf16.msra.mxu1 %v5179_v2  ;;  %v5188_v13 = vld [vmem:[%s7862_s1 + $0x50] sm:$0xff]   ;;  %v5190_v15 = vld [vmem:[%s7862_s1 + $0x60] sm:$0xff]   ;;  %v5201_v22 = vld [vmem:[%s7863_s0 + $0x1c] ss:$12 sps:$4 sm:$0xff]  }
   0x7   :  { %1919 = vmatprep.subr.bf16.mxu0 %v5515_v0  ;;  %5146 = vmatprep.subr.bf16.mxu1 %v5515_v0  ;;  %v5192_v17 = vld [vmem:[%s7862_s1 + $0x70] sm:$0xff]   ;;  %v5200_v19 = vld [vmem:[%s7862_s1 + $0x80] ss:$0 sps:$4 sm:$0xff]   ;;  %v5203_v24 = vld [vmem:[%s7863_s0 + $0x5bc] ss:$12 sps:$4 sm:$0xff]  }
   0x8   :  { %v5194_v20 = vld [vmem:[%s7863_s0] ss:$12 sps:$4 sm:$0xff]   ;;  %v1913_v23 = vsel %vm1911_vm0, %v5200_v19, 0  ;;  %v5205_v25 = vld [vmem:[%s7863_s0 + $0x18] ss:$12 sps:$4 sm:$0xff]  }
   0x9   :  { %v5197_v21 = vld [vmem:[%s7863_s0 + $0x5a0] ss:$12 sps:$4 sm:$0xff]   ;;  %v5206_v26 = vld [vmem:[%s7863_s0 + $0x5b8] ss:$12 sps:$4 sm:$0xff]   ;;  %v5211_v29 = vld [vmem:[%s7863_s0 + $0x30] ss:$12 sps:$4 sm:$0xff]  }
   0xa   :  { %1920 = vmatpush1.bf16.msra.mxu0 %v5180_v3  ;;  %5162 = vmatpush1.bf16.msra.mxu1 %v5180_v3  ;;  %v5207_v27 = vld [vmem:[%s7863_s0 + $0x34] ss:$12 sps:$4 sm:$0xff]   ;;  %v5212_v30 = vld [vmem:[%s7863_s0 + $0x5d0] ss:$12 sps:$4 sm:$0xff]   ;;  %v5213_v31 = vld [vmem:[%s7863_s0 + $0x4c] ss:$12 sps:$4 sm:$0xff]  }
   0xb   :  { %1921 = vmatprep.subr.bf16.mxu0 %v5515_v0  ;;  %5147 = vmatprep.subr.bf16.mxu1 %v5515_v0  ;;  %v5209_v28 = vld [vmem:[%s7863_s0 + $0x5d4] ss:$12 sps:$4 sm:$0xff]   ;;  %v5215_v32 = vld [vmem:[%s7863_s0 + $0x5ec] ss:$12 sps:$4 sm:$0xff]   ;;  %v5219_v35 = vld [vmem:[%s7863_s0 + $0x64] ss:$12 sps:$4 sm:$0xff]  }
   0xc   :  { %v5217_v33 = vld [vmem:[%s7863_s0 + $0x48] ss:$12 sps:$4 sm:$0xff]   ;;  %v5221_v36 = vld [vmem:[%s7863_s0 + $0x604] ss:$12 sps:$4 sm:$0xff]   ;;  %v5223_v37 = vld [vmem:[%s7863_s0 + $0x60] ss:$12 sps:$4 sm:$0xff]  }
   0xd   :  { %v5218_v34 = vld [vmem:[%s7863_s0 + $0x5e8] ss:$12 sps:$4 sm:$0xff]   ;;  %v5224_v38 = vld [vmem:[%s7863_s0 + $0x600] ss:$12 sps:$4 sm:$0xff]   ;;  %v5229_v41 = vld [vmem:[%s7863_s0 + $0x78] ss:$12 sps:$4 sm:$0xff]  }
   0xe   :  { %1922 = vmatpush1.bf16.msra.mxu0 %v5181_v4  ;;  %5163 = vmatpush1.bf16.msra.mxu1 %v5181_v4  ;;  %v5225_v39 = vld [vmem:[%s7863_s0 + $0x7c] ss:$12 sps:$4 sm:$0xff]   ;;  %v5230_v42 = vld [vmem:[%s7863_s0 + $0x618] ss:$12 sps:$4 sm:$0xff]   ;;  %v5231_v43 = vld [vmem:[%s7863_s0 + $0x94] ss:$12 sps:$4 sm:$0xff]  }
   0xf   :  { %1923 = vmatprep.subr.bf16.mxu0 %v5515_v0  ;;  %5148 = vmatprep.subr.bf16.mxu1 %v5515_v0  ;;  %v5227_v40 = vld [vmem:[%s7863_s0 + $0x61c] ss:$12 sps:$4 sm:$0xff]   ;;  %v5233_v44 = vld [vmem:[%s7863_s0 + $0x634] ss:$12 sps:$4 sm:$0xff]   ;;  %v5237_v47 = vld [vmem:[%s7863_s0 + $0xac] ss:$12 sps:$4 sm:$0xff]  }
  0x10   :  { %v5235_v45 = vld [vmem:[%s7863_s0 + $0x90] ss:$12 sps:$4 sm:$0xff]   ;;  %v5239_v48 = vld [vmem:[%s7863_s0 + $0x64c] ss:$12 sps:$4 sm:$0xff]   ;;  %v5241_v49 = vld [vmem:[%s7863_s0 + $0xa8] ss:$12 sps:$4 sm:$0xff]  }
  0x11   :  { %v5236_v46 = vld [vmem:[%s7863_s0 + $0x630] ss:$12 sps:$4 sm:$0xff]   ;;  %v5242_v50 = vld [vmem:[%s7863_s0 + $0x648] ss:$12 sps:$4 sm:$0xff]   ;;  %v5247_v53 = vld [vmem:[%s7863_s0 + $0xc0] ss:$12 sps:$4 sm:$0xff]  }
  0x12   :  { %1924 = vmatpush1.bf16.msra.mxu0 %v5182_v5  ;;  %5164 = vmatpush1.bf16.msra.mxu1 %v5182_v5  ;;  %v5243_v51 = vld [vmem:[%s7863_s0 + $0xc4] ss:$12 sps:$4 sm:$0xff]   ;;  %v5248_v54 = vld [vmem:[%s7863_s0 + $0x660] ss:$12 sps:$4 sm:$0xff]   ;;  %v5249_v55 = vld [vmem:[%s7863_s0 + $0xdc] ss:$12 sps:$4 sm:$0xff]  }
  0x13   :  { %1925 = vmatprep.subr.bf16.mxu0 %v5515_v0  ;;  %5149 = vmatprep.subr.bf16.mxu1 %v5515_v0  ;;  %v5245_v52 = vld [vmem:[%s7863_s0 + $0x664] ss:$12 sps:$4 sm:$0xff]   ;;  %v5251_v56 = vld [vmem:[%s7863_s0 + $0x67c] ss:$12 sps:$4 sm:$0xff]   ;;  %v5255_v59 = vld [vmem:[%s7863_s0 + $0xf4] ss:$12 sps:$4 sm:$0xff]  }
  0x14   :  { %v5253_v57 = vld [vmem:[%s7863_s0 + $0xd8] ss:$12 sps:$4 sm:$0xff]   ;;  %v5257_v60 = vld [vmem:[%s7863_s0 + $0x694] ss:$12 sps:$4 sm:$0xff]   ;;  %v5259_v61 = vld [vmem:[%s7863_s0 + $0xf0] ss:$12 sps:$4 sm:$0xff]  }
  0x15   :  { %v5254_v58 = vld [vmem:[%s7863_s0 + $0x678] ss:$12 sps:$4 sm:$0xff]   ;;  %v5260_v62 = vld [vmem:[%s7863_s0 + $0x690] ss:$12 sps:$4 sm:$0xff]   ;;  %v5265_v1 = vld [vmem:[%s7863_s0 + $0x108] ss:$12 sps:$4 sm:$0xff]  }
  0x16   :  { %1926 = vmatpush1.bf16.msra.mxu0 %v5183_v7  ;;  %5165 = vmatpush1.bf16.msra.mxu1 %v5183_v7  ;;  %v5261_v63 = vld [vmem:[%s7863_s0 + $0x10c] ss:$12 sps:$4 sm:$0xff]   ;;  %v5266_v2 = vld [vmem:[%s7863_s0 + $0x6a8] ss:$12 sps:$4 sm:$0xff]   ;;  %v5267_v3 = vld [vmem:[%s7863_s0 + $0x124] ss:$12 sps:$4 sm:$0xff]  }
  0x17   :  { %1927 = vmatprep.subr.bf16.mxu0 %v5515_v0  ;;  %5150 = vmatprep.subr.bf16.mxu1 %v5515_v0  ;;  %v5269_v4 = vld [vmem:[%s7863_s0 + $0x6c4] ss:$12 sps:$4 sm:$0xff]   ;;  %v5271_v5 = vld [vmem:[%s7863_s0 + $0x120] ss:$12 sps:$4 sm:$0xff]   ;;  %v5273_v7 = vld [vmem:[%s7863_s0 + $0x13c] ss:$12 sps:$4 sm:$0xff]  }
  0x18   :  { %v5272_v6 = vld [vmem:[%s7863_s0 + $0x6c0] ss:$12 sps:$4 sm:$0xff]   ;;  %v5275_v8 = vld [vmem:[%s7863_s0 + $0x6dc] ss:$12 sps:$4 sm:$0xff]  }
  0x1a   :  { %1928 = vmatpush1.bf16.msra.mxu0 %v5184_v9  ;;  %5166 = vmatpush1.bf16.msra.mxu1 %v5184_v9  ;;  %v5277_v9 = vld [vmem:[%s7863_s0 + $0x138] ss:$12 sps:$4 sm:$0xff]  }
  0x1b   :  { %1929 = vmatprep.subr.bf16.mxu0 %v5515_v0  ;;  %5151 = vmatprep.subr.bf16.mxu1 %v5515_v0 }
  0x1e   :  { %1930 = vmatpush1.bf16.msra.mxu0 %v5185_v10  ;;  %5167 = vmatpush1.bf16.msra.mxu1 %v5185_v10  ;;  %v5278_v10 = vld [vmem:[%s7863_s0 + $0x6d8] ss:$12 sps:$4 sm:$0xff]  }
  0x1f   :  { %1931 = vmatprep.subr.bf16.mxu0 %v5515_v0  ;;  %5152 = vmatprep.subr.bf16.mxu1 %v5515_v0 }
  0x22   :  { %1932 = vmatpush1.bf16.msra.mxu0 %v5186_v11  ;;  %5168 = vmatpush1.bf16.msra.mxu1 %v5186_v11  ;;  %v5279_v11 = vld [vmem:[%s7863_s0 + $0x154] ss:$12 sps:$4 sm:$0xff]  }
  0x23   :  { %1933 = vmatprep.subr.bf16.mxu0 %v5515_v0  ;;  %5153 = vmatprep.subr.bf16.mxu1 %v5515_v0 }
  0x26   :  { %1934 = vmatpush1.bf16.msra.mxu0 %v5187_v12  ;;  %5169 = vmatpush1.bf16.msra.mxu1 %v5187_v12  ;;  %v5281_v12 = vld [vmem:[%s7863_s0 + $0x6f4] ss:$12 sps:$4 sm:$0xff]  }
  0x27   :  { %1935 = vmatprep.subr.bf16.mxu0 %v5515_v0  ;;  %5154 = vmatprep.subr.bf16.mxu1 %v5515_v0 }
  0x2a   :  { %1936 = vmatpush1.bf16.msra.mxu0 %v5188_v13  ;;  %5170 = vmatpush1.bf16.msra.mxu1 %v5188_v13  ;;  %v5283_v13 = vld [vmem:[%s7863_s0 + $0x150] ss:$12 sps:$4 sm:$0xff]  }
  0x2b   :  { %1937 = vmatprep.subr.bf16.mxu0 %v5515_v0  ;;  %5155 = vmatprep.subr.bf16.mxu1 %v5515_v0 }
  0x2e   :  { %1938 = vmatpush1.bf16.msra.mxu0 %v5189_v14  ;;  %5171 = vmatpush1.bf16.msra.mxu1 %v5189_v14  ;;  %v5284_v14 = vld [vmem:[%s7863_s0 + $0x6f0] ss:$12 sps:$4 sm:$0xff]  }
  0x2f   :  { %1939 = vmatprep.subr.bf16.mxu0 %v5515_v0  ;;  %5156 = vmatprep.subr.bf16.mxu1 %v5515_v0 }
  0x32   :  { %1940 = vmatpush1.bf16.msra.mxu0 %v5190_v15  ;;  %5172 = vmatpush1.bf16.msra.mxu1 %v5190_v15  ;;  %v5285_v15 = vld [vmem:[%s7863_s0 + $0x16c] ss:$12 sps:$4 sm:$0xff]  }
  0x33   :  { %1941 = vmatprep.subr.bf16.mxu0 %v5515_v0  ;;  %5157 = vmatprep.subr.bf16.mxu1 %v5515_v0 }
  0x36   :  { %1942 = vmatpush1.bf16.msra.mxu0 %v5191_v16  ;;  %5173 = vmatpush1.bf16.msra.mxu1 %v5191_v16  ;;  %v5287_v16 = vld [vmem:[%s7863_s0 + $0x70c] ss:$12 sps:$4 sm:$0xff]  }
  0x37   :  { %1943 = vmatprep.subr.bf16.mxu0 %v5515_v0  ;;  %5158 = vmatprep.subr.bf16.mxu1 %v5515_v0 }
  0x3a   :  { %1944 = vmatpush1.bf16.msra.mxu0 %v5192_v17  ;;  %5174 = vmatpush1.bf16.msra.mxu1 %v5192_v17  ;;  %v5289_v17 = vld [vmem:[%s7863_s0 + $0x168] ss:$12 sps:$4 sm:$0xff]  }
  0x3b   :  { %1945 = vmatprep.subr.bf16.mxu0 %v5515_v0  ;;  %5159 = vmatprep.subr.bf16.mxu1 %v5515_v0  ;;  %v5263_v0 = vld [vmem:[%s7863_s0 + $0x6ac] ss:$12 sps:$4 sm:$0xff]  }
  0x3e   :  { %1946 = vmatpush1.bf16.msra.mxu0 %v5193_v18  ;;  %5175 = vmatpush1.bf16.msra.mxu1 %v5193_v18  ;;  %v5290_v18 = vld [vmem:[%s7863_s0 + $0x708] ss:$12 sps:$4 sm:$0xff]  }
  0x3f   :  { %5176 = vmatprep.subr.msk.bf16.mxu1 %vm1911_vm0, %v5200_v19  ;;  %v5291_v19 = vld [vmem:[%s7863_s0 + $0x184] ss:$12 sps:$4 sm:$0xff]  }
  0x41   :  { %1948 = vmatmul.mubr.bf16.vlgmr.msra.gmra.mrb[0].mxu0 %v5194_v20  ;;  %2428 = vmatmul.mubr.bf16.vlgmr.msra.gmra.mrb[0].mxu1 %v5197_v21  ;;  %v5293_v20 = vld [vmem:[%s7863_s0 + $0x724] ss:$12 sps:$4 sm:$0xff]   ;;  %v5295_v21 = vld [vmem:[%s7863_s0 + $0x180] ss:$12 sps:$4 sm:$0xff]  }
  0x42   :  { %4983 = vmatpush3.bf16.msra.mxu1 %v1913_v23  ;;  %1955 = vmatprep.mubr.bf16.mxu0 %v5201_v22  ;;  %v5296_v22 = vld [vmem:[%s7863_s0 + $0x720] ss:$12 sps:$4 sm:$0xff]   ;;  %v5297_v23 = vld [vmem:[%s7863_s0 + $0x19c] ss:$12 sps:$4 sm:$0xff]  }
  0x43   :  { %2435 = vmatprep.mubr.bf16.mxu1 %v5203_v24  ;;  %v5299_v24 = vld [vmem:[%s7863_s0 + $0x73c] ss:$12 sps:$4 sm:$0xff]  }
  0x49   :  { %1956 = vmatmul.mubr.bf16.gmra.mrb[4].mxu0 %v5205_v25  ;;  %2436 = vmatmul.mubr.bf16.gmra.mrb[4].mxu1 %v5206_v26  ;;  %v5301_v25 = vld [vmem:[%s7863_s0 + $0x198] ss:$12 sps:$4 sm:$0xff]  }
  0x4a   :  { %1963 = vmatprep.mubr.bf16.mxu0 %v5207_v27  ;;  %2443 = vmatprep.mubr.bf16.mxu1 %v5209_v28  ;;  %v5302_v26 = vld [vmem:[%s7863_s0 + $0x738] ss:$12 sps:$4 sm:$0xff]   ;;  %v5303_v27 = vld [vmem:[%s7863_s0 + $0x1b4] ss:$12 sps:$4 sm:$0xff]  }
  0x4b   :  { %v5305_v28 = vld [vmem:[%s7863_s0 + $0x754] ss:$12 sps:$4 sm:$0xff]  }
  0x51   :  { %1964 = vmatmul.mubr.bf16.gmra.mrb[8].mxu0 %v5211_v29  ;;  %2444 = vmatmul.mubr.bf16.gmra.mrb[8].mxu1 %v5212_v30  ;;  %v5307_v29 = vld [vmem:[%s7863_s0 + $0x1b0] ss:$12 sps:$4 sm:$0xff]  }
  0x52   :  { %1971 = vmatprep.mubr.bf16.mxu0 %v5213_v31  ;;  %2451 = vmatprep.mubr.bf16.mxu1 %v5215_v32  ;;  %v5308_v30 = vld [vmem:[%s7863_s0 + $0x750] ss:$12 sps:$4 sm:$0xff]   ;;  %v5309_v31 = vld [vmem:[%s7863_s0 + $0x1cc] ss:$12 sps:$4 sm:$0xff]  }
  0x53   :  { %v5311_v32 = vld [vmem:[%s7863_s0 + $0x76c] ss:$12 sps:$4 sm:$0xff]  }
  0x59   :  { %1972 = vmatmul.mubr.bf16.gmra.mrb[12].mxu0 %v5217_v33  ;;  %2452 = vmatmul.mubr.bf16.gmra.mrb[12].mxu1 %v5218_v34  ;;  %v5313_v33 = vld [vmem:[%s7863_s0 + $0x1c8] ss:$12 sps:$4 sm:$0xff]  }
  0x5a   :  { %1979 = vmatprep.mubr.bf16.mxu0 %v5219_v35  ;;  %2459 = vmatprep.mubr.bf16.mxu1 %v5221_v36  ;;  %v5314_v34 = vld [vmem:[%s7863_s0 + $0x768] ss:$12 sps:$4 sm:$0xff]   ;;  %v5315_v35 = vld [vmem:[%s7863_s0 + $0x1e4] ss:$12 sps:$4 sm:$0xff]  }
  0x5b   :  { %v5317_v36 = vld [vmem:[%s7863_s0 + $0x8] ss:$12 sps:$4 sm:$0xff]  }
  0x61   :  { %1980 = vmatmul.mubr.bf16.gmra.mrb[16].mxu0 %v5223_v37  ;;  %2460 = vmatmul.mubr.bf16.gmra.mrb[16].mxu1 %v5224_v38  ;;  %v5318_v37 = vld [vmem:[%s7863_s0 + $0x1e0] ss:$12 sps:$4 sm:$0xff]  }
  0x62   :  { %1987 = vmatprep.mubr.bf16.mxu0 %v5225_v39  ;;  %2467 = vmatprep.mubr.bf16.mxu1 %v5227_v40  ;;  %v5319_v38 = vld [vmem:[%s7863_s0 + $0x20] ss:$12 sps:$4 sm:$0xff]   ;;  %v5320_v39 = vld [vmem:[%s7863_s0 + $0x1fc] ss:$12 sps:$4 sm:$0xff]   ;;  %v5322_v40 = vld [vmem:[%s7863_s0 + $0x38] ss:$12 sps:$4 sm:$0xff]  }
  0x69   :  { %1988 = vmatmul.mubr.bf16.gmra.mrb[20].mxu0 %v5229_v41  ;;  %2468 = vmatmul.mubr.bf16.gmra.mrb[20].mxu1 %v5230_v42  ;;  %v5323_v41 = vld [vmem:[%s7863_s0 + $0x1f8] ss:$12 sps:$4 sm:$0xff]   ;;  %v5324_v42 = vld [vmem:[%s7863_s0 + $0x50] ss:$12 sps:$4 sm:$0xff]  }
  0x6a   :  { %1995 = vmatprep.mubr.bf16.mxu0 %v5231_v43  ;;  %2475 = vmatprep.mubr.bf16.mxu1 %v5233_v44  ;;  %v5325_v43 = vld [vmem:[%s7863_s0 + $0x214] ss:$12 sps:$4 sm:$0xff]  }
  0x6b   :  { %v5327_v44 = vld [vmem:[%s7863_s0 + $0x68] ss:$12 sps:$4 sm:$0xff]  }
  0x71   :  { %1996 = vmatmul.mubr.bf16.gmra.mrb[24].mxu0 %v5235_v45  ;;  %2476 = vmatmul.mubr.bf16.gmra.mrb[24].mxu1 %v5236_v46  ;;  %v5328_v45 = vld [vmem:[%s7863_s0 + $0x210] ss:$12 sps:$4 sm:$0xff]   ;;  %v5329_v46 = vld [vmem:[%s7863_s0 + $0x80] ss:$12 sps:$4 sm:$0xff]  }
  0x72   :  { %2003 = vmatprep.mubr.bf16.mxu0 %v5237_v47  ;;  %2483 = vmatprep.mubr.bf16.mxu1 %v5239_v48  ;;  %v5330_v47 = vld [vmem:[%s7863_s0 + $0x22c] ss:$12 sps:$4 sm:$0xff]  }
  0x73   :  { %v5332_v48 = vld [vmem:[%s7863_s0 + $0x98] ss:$12 sps:$4 sm:$0xff]  }
  0x79   :  { %2004 = vmatmul.mubr.bf16.gmra.mrb[28].mxu0 %v5241_v49  ;;  %2484 = vmatmul.mubr.bf16.gmra.mrb[28].mxu1 %v5242_v50  ;;  %v5333_v49 = vld [vmem:[%s7863_s0 + $0x228] ss:$12 sps:$4 sm:$0xff]   ;;  %v5334_v50 = vld [vmem:[%s7863_s0 + $0xb0] ss:$12 sps:$4 sm:$0xff]  }
  0x7a   :  { %2011 = vmatprep.mubr.bf16.mxu0 %v5243_v51  ;;  %2491 = vmatprep.mubr.bf16.mxu1 %v5245_v52  ;;  %v5335_v51 = vld [vmem:[%s7863_s0 + $0x244] ss:$12 sps:$4 sm:$0xff]   ;;  %v5337_v52 = vld [vmem:[%s7863_s0 + $0xc8] ss:$12 sps:$4 sm:$0xff]  }
  0x81   :  { %2012 = vmatmul.mubr.bf16.gmra.mrb[32].mxu0 %v5247_v53  ;;  %2492 = vmatmul.mubr.bf16.gmra.mrb[32].mxu1 %v5248_v54  ;;  %v5338_v53 = vld [vmem:[%s7863_s0 + $0x240] ss:$12 sps:$4 sm:$0xff]  }
  0x82   :  { %2019 = vmatprep.mubr.bf16.mxu0 %v5249_v55  ;;  %2499 = vmatprep.mubr.bf16.mxu1 %v5251_v56  ;;  %v5339_v54 = vld [vmem:[%s7863_s0 + $0xe0] ss:$12 sps:$4 sm:$0xff]   ;;  %v5340_v55 = vld [vmem:[%s7863_s0 + $0x25c] ss:$12 sps:$4 sm:$0xff]   ;;  %v5342_v56 = vld [vmem:[%s7863_s0 + $0xf8] ss:$12 sps:$4 sm:$0xff]  }
  0x89   :  { %2020 = vmatmul.mubr.bf16.gmra.mrb[36].mxu0 %v5253_v57  ;;  %2500 = vmatmul.mubr.bf16.gmra.mrb[36].mxu1 %v5254_v58  ;;  %v5343_v57 = vld [vmem:[%s7863_s0 + $0x258] ss:$12 sps:$4 sm:$0xff]   ;;  %v5344_v58 = vld [vmem:[%s7863_s0 + $0x110] ss:$12 sps:$4 sm:$0xff]  }
  0x8a   :  { %2027 = vmatprep.mubr.bf16.mxu0 %v5255_v59  ;;  %2507 = vmatprep.mubr.bf16.mxu1 %v5257_v60  ;;  %v5345_v59 = vld [vmem:[%s7863_s0 + $0x274] ss:$12 sps:$4 sm:$0xff]  }
  0x8b   :  { %v5347_v60 = vld [vmem:[%s7863_s0 + $0x128] ss:$12 sps:$4 sm:$0xff]  }
  0x91   :  { %2028 = vmatmul.mubr.bf16.gmra.mrb[40].mxu0 %v5259_v61  ;;  %2508 = vmatmul.mubr.bf16.gmra.mrb[40].mxu1 %v5260_v62  ;;  %v5348_v61 = vld [vmem:[%s7863_s0 + $0x270] ss:$12 sps:$4 sm:$0xff]   ;;  %v5349_v62 = vld [vmem:[%s7863_s0 + $0x140] ss:$12 sps:$4 sm:$0xff]  }
  0x92   :  { %2035 = vmatprep.mubr.bf16.mxu0 %v5261_v63  ;;  %2515 = vmatprep.mubr.bf16.mxu1 %v5263_v0  ;;  %v5350_v63 = vld [vmem:[%s7863_s0 + $0x28c] ss:$12 sps:$4 sm:$0xff]  }
  0x93   :  { %v5352_v0 = vld [vmem:[%s7863_s0 + $0x158] ss:$12 sps:$4 sm:$0xff]  }
  0x99   :  { %2036 = vmatmul.mubr.bf16.gmra.mrb[44].mxu0 %v5265_v1  ;;  %2516 = vmatmul.mubr.bf16.gmra.mrb[44].mxu1 %v5266_v2 }
  0x9a   :  { %2043 = vmatprep.mubr.bf16.mxu0 %v5267_v3  ;;  %2523 = vmatprep.mubr.bf16.mxu1 %v5269_v4 }
  0xa1   :  { %2044 = vmatmul.mubr.bf16.gmra.mrb[48].mxu0 %v5271_v5  ;;  %2524 = vmatmul.mubr.bf16.gmra.mrb[48].mxu1 %v5272_v6  ;;  %v5353_v5 = vld [vmem:[%s7863_s0 + $0x288] ss:$12 sps:$4 sm:$0xff]   ;;  %v5354_v6 = vld [vmem:[%s7863_s0 + $0x170] ss:$12 sps:$4 sm:$0xff]  }
  0xa2   :  { %2051 = vmatprep.mubr.bf16.mxu0 %v5273_v7  ;;  %2531 = vmatprep.mubr.bf16.mxu1 %v5275_v8 }
  0xa9   :  { %2052 = vmatmul.mubr.bf16.gmra.mrb[52].mxu0 %v5277_v9  ;;  %2532 = vmatmul.mubr.bf16.gmra.mrb[52].mxu1 %v5278_v10  ;;  %v5355_v9 = vld [vmem:[%s7863_s0 + $0x2a4] ss:$12 sps:$4 sm:$0xff]   ;;  %v5357_v10 = vld [vmem:[%s7863_s0 + $0x188] ss:$12 sps:$4 sm:$0xff]  }
  0xaa   :  { %2059 = vmatprep.mubr.bf16.mxu0 %v5279_v11  ;;  %2539 = vmatprep.mubr.bf16.mxu1 %v5281_v12 }
  0xb1   :  { %2060 = vmatmul.mubr.bf16.gmra.mrb[56].mxu0 %v5283_v13  ;;  %2540 = vmatmul.mubr.bf16.gmra.mrb[56].mxu1 %v5284_v14 }
  0xb2   :  { %2067 = vmatprep.mubr.bf16.mxu0 %v5285_v15  ;;  %2547 = vmatprep.mubr.bf16.mxu1 %v5287_v16 }
  0xb9   :  { %2068 = vmatmul.mubr.bf16.gmra.mrb[60].mxu0 %v5289_v17  ;;  %2548 = vmatmul.mubr.bf16.gmra.mrb[60].mxu1 %v5290_v18  ;;  %v5358_v17 = vld [vmem:[%s7863_s0 + $0x2a0] ss:$12 sps:$4 sm:$0xff]  }
  0xba   :  { %2075 = vmatprep.mubr.bf16.mxu0 %v5291_v19  ;;  %2555 = vmatprep.mubr.bf16.mxu1 %v5293_v20  ;;  %v5359_v18 = vld [vmem:[%s7863_s0 + $0x1a0] ss:$12 sps:$4 sm:$0xff]  }
  0xc1   :  { %2076 = vmatmul.mubr.bf16.gmra.mrb[64].mxu0 %v5295_v21  ;;  %2556 = vmatmul.mubr.bf16.gmra.mrb[64].mxu1 %v5296_v22  ;;  %v5360_v21 = vld [vmem:[%s7863_s0 + $0x2bc] ss:$12 sps:$4 sm:$0xff]   ;;  %v5362_v22 = vld [vmem:[%s7863_s0 + $0x1b8] ss:$12 sps:$4 sm:$0xff]  }
  0xc2   :  { %2083 = vmatprep.mubr.bf16.mxu0 %v5297_v23  ;;  %2563 = vmatprep.mubr.bf16.mxu1 %v5299_v24 }
  0xc9   :  { %2084 = vmatmul.mubr.bf16.gmra.mrb[68].mxu0 %v5301_v25  ;;  %2564 = vmatmul.mubr.bf16.gmra.mrb[68].mxu1 %v5302_v26 }
  0xca   :  { %2091 = vmatprep.mubr.bf16.mxu0 %v5303_v27  ;;  %2571 = vmatprep.mubr.bf16.mxu1 %v5305_v28 }
  0xd1   :  { %2092 = vmatmul.mubr.bf16.gmra.mrb[72].mxu0 %v5307_v29  ;;  %2572 = vmatmul.mubr.bf16.gmra.mrb[72].mxu1 %v5308_v30  ;;  %v5363_v29 = vld [vmem:[%s7863_s0 + $0x2b8] ss:$12 sps:$4 sm:$0xff]   ;;  %v5364_v30 = vld [vmem:[%s7863_s0 + $0x1d0] ss:$12 sps:$4 sm:$0xff]  }
  0xd2   :  { %2099 = vmatprep.mubr.bf16.mxu0 %v5309_v31  ;;  %2579 = vmatprep.mubr.bf16.mxu1 %v5311_v32 }
  0xd9   :  { %2100 = vmatmul.mubr.bf16.gmra.mrb[76].mxu0 %v5313_v33  ;;  %2580 = vmatmul.mubr.bf16.gmra.mrb[76].mxu1 %v5314_v34  ;;  %v5365_v33 = vld [vmem:[%s7863_s0 + $0x2d4] ss:$12 sps:$4 sm:$0xff]  }
  0xda   :  { %2107 = vmatprep.mubr.bf16.mxu0 %v5315_v35  ;;  %4984 = vmatprep.mubr.msk.bf16.mxu1 %vm1670_vm1, %v5317_v36  ;;  %v5367_v34 = vld [vmem:[%s7863_s0 + $0x1e8] ss:$12 sps:$4 sm:$0xff]  }
  0xe1   :  { %2108 = vmatmul.mubr.bf16.gmra.mrb[80].mxu0 %v5318_v37  ;;  %4985 = vmatmul.mubr.msk.bf16.vlgmr.msra.gmra.mrb[80].mxu1 %vm1670_vm1, %v5319_v38 }
  0xe2   :  { %2115 = vmatprep.mubr.bf16.mxu0 %v5320_v39  ;;  %4988 = vmatprep.mubr.msk.bf16.mxu1 %vm1670_vm1, %v5322_v40 }
  0xe9   :  { %2116 = vmatmul.mubr.bf16.gmra.mrb[84].mxu0 %v5323_v41  ;;  %4989 = vmatmul.mubr.msk.bf16.gmra.mrb[84].mxu1 %vm1670_vm1, %v5324_v42  ;;  %v5368_v41 = vld [vmem:[%s7863_s0 + $0x2d0] ss:$12 sps:$4 sm:$0xff]   ;;  %v5369_v42 = vld [vmem:[%s7863_s0 + $0x200] ss:$12 sps:$4 sm:$0xff]  }
  0xea   :  { %2123 = vmatprep.mubr.bf16.mxu0 %v5325_v43  ;;  %4992 = vmatprep.mubr.msk.bf16.mxu1 %vm1670_vm1, %v5327_v44 }
  0xf1   :  { %2124 = vmatmul.mubr.bf16.gmra.mrb[88].mxu0 %v5328_v45  ;;  %4993 = vmatmul.mubr.msk.bf16.gmra.mrb[88].mxu1 %vm1670_vm1, %v5329_v46  ;;  %v5370_v45 = vld [vmem:[%s7863_s0 + $0x2ec] ss:$12 sps:$4 sm:$0xff]  }
  0xf2   :  { %2131 = vmatprep.mubr.bf16.mxu0 %v5330_v47  ;;  %4996 = vmatprep.mubr.msk.bf16.mxu1 %vm1670_vm1, %v5332_v48  ;;  %v5372_v46 = vld [vmem:[%s7863_s0 + $0x218] ss:$12 sps:$4 sm:$0xff]  }
  0xf9   :  { %2132 = vmatmul.mubr.bf16.gmra.mrb[92].mxu0 %v5333_v49  ;;  %4997 = vmatmul.mubr.msk.bf16.gmra.mrb[92].mxu1 %vm1670_vm1, %v5334_v50 }
  0xfa   :  { %2139 = vmatprep.mubr.bf16.mxu0 %v5335_v51  ;;  %5000 = vmatprep.mubr.msk.bf16.mxu1 %vm1670_vm1, %v5337_v52 }
 0x101   :  { %2140 = vmatmul.mubr.bf16.gmra.mrb[96].mxu0 %v5338_v53  ;;  %5001 = vmatmul.mubr.msk.bf16.gmra.mrb[96].mxu1 %vm1670_vm1, %v5339_v54  ;;  %v5373_v53 = vld [vmem:[%s7863_s0 + $0x2e8] ss:$12 sps:$4 sm:$0xff]   ;;  %v5374_v54 = vld [vmem:[%s7863_s0 + $0x230] ss:$12 sps:$4 sm:$0xff]  }
 0x102   :  { %2147 = vmatprep.mubr.bf16.mxu0 %v5340_v55  ;;  %5004 = vmatprep.mubr.msk.bf16.mxu1 %vm1670_vm1, %v5342_v56 }
 0x109   :  { %2148 = vmatmul.mubr.bf16.gmra.mrb[100].mxu0 %v5343_v57  ;;  %5005 = vmatmul.mubr.msk.bf16.gmra.mrb[100].mxu1 %vm1670_vm1, %v5344_v58  ;;  %v5375_v57 = vld [vmem:[%s7863_s0 + $0x304] ss:$12 sps:$4 sm:$0xff]   ;;  %v5377_v58 = vld [vmem:[%s7863_s0 + $0x248] ss:$12 sps:$4 sm:$0xff]  }
 0x10a   :  { %2155 = vmatprep.mubr.bf16.mxu0 %v5345_v59  ;;  %5008 = vmatprep.mubr.msk.bf16.mxu1 %vm1670_vm1, %v5347_v60 }
 0x111   :  { %2156 = vmatmul.mubr.bf16.gmra.mrb[104].mxu0 %v5348_v61  ;;  %5009 = vmatmul.mubr.msk.bf16.gmra.mrb[104].mxu1 %vm1670_vm1, %v5349_v62 }
 0x112   :  { %2163 = vmatprep.mubr.bf16.mxu0 %v5350_v63  ;;  %5012 = vmatprep.mubr.msk.bf16.mxu1 %vm1670_vm1, %v5352_v0 }
 0x114   :  { %v5971_v1 = vpop.f32.mrb[0].mxu0  ;;  %v5973_v2 = vpop.f32.mrb[0].mxu1 }
 0x115   :  { %7927 = vst [vmem:[#allocation2_spill] sm:$0xff] %v5973_v2  ;;  %v1951_v3 = vpop.f32.mrb[1].mxu0  ;;  %v2431_v4 = vpop.f32.mrb[1].mxu1 }
 0x116   :  { %v5981_v7 = vpop.f32.mrb[2].mxu0  ;;  %v5983_v8 = vpop.f32.mrb[2].mxu1  ;;  %v5378_v3 = vld [vmem:[%s7863_s0 + $0x300] ss:$12 sps:$4 sm:$0xff]  }
 0x117   :  { %7928 = vst [vmem:[#allocation3_spill] sm:$0xff] %v5983_v8  ;;  %v1954_v11 = vpop.f32.mrb[3].mxu0  ;;  %v2434_v12 = vpop.f32.mrb[3].mxu1  ;;  %v5379_v4 = vld [vmem:[%s7863_s0 + $0x260] ss:$12 sps:$4 sm:$0xff]  }
 0x119   :  { %2164 = vmatmul.mubr.bf16.gmra.mrb[108].mxu0 %v5353_v5  ;;  %5013 = vmatmul.mubr.msk.bf16.gmra.mrb[108].mxu1 %vm1670_vm1, %v5354_v6 }
 0x11a   :  { %2171 = vmatprep.mubr.bf16.mxu0 %v5355_v9  ;;  %5016 = vmatprep.mubr.msk.bf16.mxu1 %vm1670_vm1, %v5357_v10  ;;  %v5380_v9 = vld [vmem:[%s7863_s0 + $0x31c] ss:$12 sps:$4 sm:$0xff]   ;;  %v5382_v10 = vld [vmem:[%s7863_s0 + $0x278] ss:$12 sps:$4 sm:$0xff]  }
 0x11c   :  { %v5993_v13 = vpop.f32.mrb[4].mxu0  ;;  %v5995_v14 = vpop.f32.mrb[4].mxu1 }
 0x11d   :  { %v1959_v15 = vpop.f32.mrb[5].mxu0  ;;  %v2439_v16 = vpop.f32.mrb[5].mxu1 }
 0x11e   :  { %v6003_v19 = vpop.f32.mrb[6].mxu0  ;;  %v6005_v20 = vpop.f32.mrb[6].mxu1 }
 0x11f   :  { %7929 = vst [vmem:[#allocation4_spill] sm:$0xff] %v6005_v20  ;;  %v1962_v23 = vpop.f32.mrb[7].mxu0  ;;  %v2442_v24 = vpop.f32.mrb[7].mxu1 }
 0x121   :  { %2172 = vmatmul.mubr.bf16.gmra.mrb[112].mxu0 %v5358_v17  ;;  %5017 = vmatmul.mubr.msk.bf16.gmra.mrb[112].mxu1 %vm1670_vm1, %v5359_v18 }
 0x122   :  { %2179 = vmatprep.mubr.bf16.mxu0 %v5360_v21  ;;  %5020 = vmatprep.mubr.msk.bf16.mxu1 %vm1670_vm1, %v5362_v22  ;;  %v5383_v21 = vld [vmem:[%s7863_s0 + $0x318] ss:$12 sps:$4 sm:$0xff]   ;;  %v5384_v22 = vld [vmem:[%s7863_s0 + $0x290] ss:$12 sps:$4 sm:$0xff]  }
 0x124   :  { %v6015_v25 = vpop.f32.mrb[8].mxu0  ;;  %v6017_v26 = vpop.f32.mrb[8].mxu1 }
 0x125   :  { %7930 = vst [vmem:[#allocation5_spill] sm:$0xff] %v6017_v26  ;;  %v1967_v27 = vpop.f32.mrb[9].mxu0  ;;  %v2447_v28 = vpop.f32.mrb[9].mxu1 }
 0x126   :  { %v6025_v31 = vpop.f32.mrb[10].mxu0  ;;  %v6027_v32 = vpop.f32.mrb[10].mxu1  ;;  %v5385_v27 = vld [vmem:[%s7863_s0 + $0x334] ss:$12 sps:$4 sm:$0xff]  }
 0x127   :  { %7931 = vst [vmem:[#allocation6_spill] sm:$0xff] %v6027_v32  ;;  %v1970_v35 = vpop.f32.mrb[11].mxu0  ;;  %v2450_v36 = vpop.f32.mrb[11].mxu1  ;;  %v5387_v28 = vld [vmem:[%s7863_s0 + $0x2a8] ss:$12 sps:$4 sm:$0xff]  }
 0x129   :  { %2180 = vmatmul.mubr.bf16.gmra.mrb[116].mxu0 %v5363_v29  ;;  %5021 = vmatmul.mubr.msk.bf16.gmra.mrb[116].mxu1 %vm1670_vm1, %v5364_v30 }
 0x12a   :  { %2187 = vmatprep.mubr.bf16.mxu0 %v5365_v33  ;;  %5024 = vmatprep.mubr.msk.bf16.mxu1 %vm1670_vm1, %v5367_v34 }
 0x12c   :  { %v6037_v37 = vpop.f32.mrb[12].mxu0  ;;  %v6039_v38 = vpop.f32.mrb[12].mxu1 }
 0x12d   :  { %7932 = vst [vmem:[#allocation7_spill] sm:$0xff] %v6039_v38  ;;  %v1975_v39 = vpop.f32.mrb[13].mxu0  ;;  %v2455_v40 = vpop.f32.mrb[13].mxu1 }
 0x12e   :  { %v6047_v43 = vpop.f32.mrb[14].mxu0  ;;  %v6049_v44 = vpop.f32.mrb[14].mxu1  ;;  %v5388_v39 = vld [vmem:[%s7863_s0 + $0x330] ss:$12 sps:$4 sm:$0xff]   ;;  %v5389_v40 = vld [vmem:[%s7863_s0 + $0x2c0] ss:$12 sps:$4 sm:$0xff]  }
 0x12f   :  { %7933 = vst [vmem:[#allocation8_spill] sm:$0xff] %v6049_v44  ;;  %v1978_v47 = vpop.f32.mrb[15].mxu0  ;;  %v2458_v48 = vpop.f32.mrb[15].mxu1 }
 0x131   :  { %2188 = vmatmul.mubr.bf16.gmra.mrb[120].mxu0 %v5368_v41  ;;  %5025 = vmatmul.mubr.msk.bf16.gmra.mrb[120].mxu1 %vm1670_vm1, %v5369_v42 }
 0x132   :  { %2195 = vmatprep.mubr.bf16.mxu0 %v5370_v45  ;;  %5028 = vmatprep.mubr.msk.bf16.mxu1 %vm1670_vm1, %v5372_v46  ;;  %v5390_v45 = vld [vmem:[%s7863_s0 + $0x34c] ss:$12 sps:$4 sm:$0xff]  }
 0x133   :  { %v5392_v46 = vld [vmem:[%s7863_s0 + $0x2d8] ss:$12 sps:$4 sm:$0xff]  }
 0x134   :  { %v6059_v49 = vpop.f32.mrb[16].mxu0  ;;  %v6061_v50 = vpop.f32.mrb[16].mxu1 }
 0x135   :  { %7934 = vst [vmem:[#allocation9_spill] sm:$0xff] %v6061_v50  ;;  %v1983_v51 = vpop.f32.mrb[17].mxu0  ;;  %v2463_v52 = vpop.f32.mrb[17].mxu1 }
 0x136   :  { %v6069_v55 = vpop.f32.mrb[18].mxu0  ;;  %v6071_v56 = vpop.f32.mrb[18].mxu1 }
 0x137   :  { %7935 = vst [vmem:[#allocation10_spill] sm:$0xff] %v6071_v56  ;;  %v1986_v59 = vpop.f32.mrb[19].mxu0  ;;  %v2466_v60 = vpop.f32.mrb[19].mxu1 }
 0x139   :  { %2196 = vmatmul.mubr.bf16.gmra.mrb[124].mxu0 %v5373_v53  ;;  %5029 = vmatmul.mubr.msk.bf16.gmra.mrb[124].mxu1 %vm1670_vm1, %v5374_v54 }
 0x13a   :  { %2203 = vmatprep.mubr.bf16.mxu0 %v5375_v57  ;;  %5032 = vmatprep.mubr.msk.bf16.mxu1 %vm1670_vm1, %v5377_v58  ;;  %v5393_v57 = vld [vmem:[%s7863_s0 + $0x348] ss:$12 sps:$4 sm:$0xff]   ;;  %v5394_v58 = vld [vmem:[%s7863_s0 + $0x2f0] ss:$12 sps:$4 sm:$0xff]  }
 0x13c   :  { %v6081_v61 = vpop.f32.mrb[20].mxu0  ;;  %v6083_v62 = vpop.f32.mrb[20].mxu1 }
 0x13d   :  { %7936 = vst [vmem:[#allocation11_spill] sm:$0xff] %v6083_v62  ;;  %v1991_v63 = vpop.f32.mrb[21].mxu0  ;;  %v2471_v0 = vpop.f32.mrb[21].mxu1 }
 0x13e   :  { %v6091_v5 = vpop.f32.mrb[22].mxu0  ;;  %v6093_v6 = vpop.f32.mrb[22].mxu1  ;;  %v5395_v63 = vld [vmem:[%s7863_s0 + $0x364] ss:$12 sps:$4 sm:$0xff]   ;;  %v5397_v0 = vld [vmem:[%s7863_s0 + $0x308] ss:$12 sps:$4 sm:$0xff]  }
 0x13f   :  { %7937 = vst [vmem:[#allocation12_spill] sm:$0xff] %v6093_v6  ;;  %v1994_v11 = vpop.f32.mrb[23].mxu0  ;;  %v2474_v12 = vpop.f32.mrb[23].mxu1 }
 0x141   :  { %2204 = vmatmul.mubr.bf16.gmra.mrb[128].mxu0 %v5378_v3  ;;  %5033 = vmatmul.mubr.msk.bf16.gmra.mrb[128].mxu1 %vm1670_vm1, %v5379_v4 }
 0x142   :  { %2211 = vmatprep.mubr.bf16.mxu0 %v5380_v9  ;;  %5036 = vmatprep.mubr.msk.bf16.mxu1 %vm1670_vm1, %v5382_v10 }
 0x144   :  { %v6103_v15 = vpop.f32.mrb[24].mxu0  ;;  %v6105_v16 = vpop.f32.mrb[24].mxu1 }
 0x145   :  { %7938 = vst [vmem:[#allocation13_spill] sm:$0xff] %v6105_v16  ;;  %v1999_v17 = vpop.f32.mrb[25].mxu0  ;;  %v2479_v18 = vpop.f32.mrb[25].mxu1 }
 0x146   :  { %v6113_v23 = vpop.f32.mrb[26].mxu0  ;;  %v6115_v24 = vpop.f32.mrb[26].mxu1  ;;  %v5398_v17 = vld [vmem:[%s7863_s0 + $0x360] ss:$12 sps:$4 sm:$0xff]  }
 0x147   :  { %7939 = vst [vmem:[#allocation14_spill] sm:$0xff] %v6115_v24  ;;  %v2002_v29 = vpop.f32.mrb[27].mxu0  ;;  %v2482_v30 = vpop.f32.mrb[27].mxu1  ;;  %v5399_v18 = vld [vmem:[%s7863_s0 + $0x320] ss:$12 sps:$4 sm:$0xff]  }
 0x148   :  { %v5448_v24 = vld [vmem:[%s7863_s0 + $0x450] ss:$12 sps:$4 sm:$0xff]  }
 0x149   :  { %2212 = vmatmul.mubr.bf16.gmra.mrb[132].mxu0 %v5383_v21  ;;  %5037 = vmatmul.mubr.msk.bf16.gmra.mrb[132].mxu1 %vm1670_vm1, %v5384_v22 }
 0x14a   :  { %2219 = vmatprep.mubr.bf16.mxu0 %v5385_v27  ;;  %5040 = vmatprep.mubr.msk.bf16.mxu1 %vm1670_vm1, %v5387_v28  ;;  %v5400_v27 = vld [vmem:[%s7863_s0 + $0x37c] ss:$12 sps:$4 sm:$0xff]   ;;  %v5402_v28 = vld [vmem:[%s7863_s0 + $0x338] ss:$12 sps:$4 sm:$0xff]  }
 0x14c   :  { %v6125_v33 = vpop.f32.mrb[28].mxu0  ;;  %v6127_v34 = vpop.f32.mrb[28].mxu1 }
 0x14d   :  { %7940 = vst [vmem:[#allocation15_spill] sm:$0xff] %v6127_v34  ;;  %v2007_v35 = vpop.f32.mrb[29].mxu0  ;;  %v2487_v36 = vpop.f32.mrb[29].mxu1  ;;  %v5453_v34 = vld [vmem:[%s7863_s0 + $0x468] ss:$12 sps:$4 sm:$0xff]  }
 0x14e   :  { %v6135_v41 = vpop.f32.mrb[30].mxu0  ;;  %v6137_v42 = vpop.f32.mrb[30].mxu1 }
 0x14f   :  { %7941 = vst [vmem:[#allocation16_spill] sm:$0xff] %v6137_v42  ;;  %v2010_v47 = vpop.f32.mrb[31].mxu0  ;;  %v2490_v48 = vpop.f32.mrb[31].mxu1 }
 0x151   :  { %2220 = vmatmul.mubr.bf16.gmra.mrb[136].mxu0 %v5388_v39  ;;  %5041 = vmatmul.mubr.msk.bf16.gmra.mrb[136].mxu1 %vm1670_vm1, %v5389_v40 }
 0x152   :  { %2227 = vmatprep.mubr.bf16.mxu0 %v5390_v45  ;;  %5044 = vmatprep.mubr.msk.bf16.mxu1 %vm1670_vm1, %v5392_v46  ;;  %v5403_v45 = vld [vmem:[%s7863_s0 + $0x378] ss:$12 sps:$4 sm:$0xff]   ;;  %v5404_v46 = vld [vmem:[%s7863_s0 + $0x350] ss:$12 sps:$4 sm:$0xff]  }
 0x154   :  { %v6147_v51 = vpop.f32.mrb[32].mxu0  ;;  %v6149_v52 = vpop.f32.mrb[32].mxu1 }
 0x155   :  { %7942 = vst [vmem:[#allocation17_spill] sm:$0xff] %v6149_v52  ;;  %v2015_v53 = vpop.f32.mrb[33].mxu0  ;;  %v2495_v54 = vpop.f32.mrb[33].mxu1  ;;  %v5443_v52 = vld [vmem:[%s7863_s0 + $0x438] ss:$12 sps:$4 sm:$0xff]  }
 0x156   :  { %v6157_v59 = vpop.f32.mrb[34].mxu0  ;;  %v6159_v60 = vpop.f32.mrb[34].mxu1  ;;  %v5405_v53 = vld [vmem:[%s7863_s0 + $0x394] ss:$12 sps:$4 sm:$0xff]  }
 0x157   :  { %7943 = vst [vmem:[#allocation18_spill] sm:$0xff] %v6159_v60  ;;  %v2018_v3 = vpop.f32.mrb[35].mxu0  ;;  %v2498_v4 = vpop.f32.mrb[35].mxu1  ;;  %v5407_v54 = vld [vmem:[%s7863_s0 + $0x368] ss:$12 sps:$4 sm:$0xff]  }
 0x158   :  { %v5438_v60 = vld [vmem:[%s7863_s0 + $0x420] ss:$12 sps:$4 sm:$0xff]  }
 0x159   :  { %2228 = vmatmul.mubr.bf16.gmra.mrb[140].mxu0 %v5393_v57  ;;  %5045 = vmatmul.mubr.msk.bf16.gmra.mrb[140].mxu1 %vm1670_vm1, %v5394_v58 }
 0x15a   :  { %2235 = vmatprep.mubr.bf16.mxu0 %v5395_v63  ;;  %5048 = vmatprep.mubr.msk.bf16.mxu1 %vm1670_vm1, %v5397_v0 }
 0x15c   :  { %v6169_v9 = vpop.f32.mrb[36].mxu0  ;;  %v6171_v10 = vpop.f32.mrb[36].mxu1 }
 0x15d   :  { %7944 = vst [vmem:[#allocation19_spill] sm:$0xff] %v6171_v10  ;;  %v2023_v11 = vpop.f32.mrb[37].mxu0  ;;  %v2503_v12 = vpop.f32.mrb[37].mxu1 }
 0x15e   :  { %v6179_v21 = vpop.f32.mrb[38].mxu0  ;;  %v6181_v22 = vpop.f32.mrb[38].mxu1  ;;  %v5408_v11 = vld [vmem:[%s7863_s0 + $0x390] ss:$12 sps:$4 sm:$0xff]   ;;  %v5409_v12 = vld [vmem:[%s7863_s0 + $0x380] ss:$12 sps:$4 sm:$0xff]  }
 0x15f   :  { %7945 = vst [vmem:[#allocation20_spill] sm:$0xff] %v6181_v22  ;;  %v2026_v29 = vpop.f32.mrb[39].mxu0  ;;  %v2506_v30 = vpop.f32.mrb[39].mxu1 }
 0x161   :  { %2236 = vmatmul.mubr.bf16.gmra.mrb[144].mxu0 %v5398_v17  ;;  %5049 = vmatmul.mubr.msk.bf16.gmra.mrb[144].mxu1 %vm1670_vm1, %v5399_v18 }
 0x162   :  { %2243 = vmatprep.mubr.bf16.mxu0 %v5400_v27  ;;  %5052 = vmatprep.mubr.msk.bf16.mxu1 %vm1670_vm1, %v5402_v28  ;;  %v5410_v27 = vld [vmem:[%s7863_s0 + $0x3ac] ss:$12 sps:$4 sm:$0xff]  }
 0x163   :  { %v5412_v28 = vld [vmem:[%s7863_s0 + $0x398] ss:$12 sps:$4 sm:$0xff]  }
 0x164   :  { %v6191_v35 = vpop.f32.mrb[40].mxu0  ;;  %v6193_v36 = vpop.f32.mrb[40].mxu1 }
 0x165   :  { %7946 = vst [vmem:[#allocation21_spill] sm:$0xff] %v6193_v36  ;;  %v2031_v39 = vpop.f32.mrb[41].mxu0  ;;  %v2511_v40 = vpop.f32.mrb[41].mxu1  ;;  %v5433_v36 = vld [vmem:[%s7863_s0 + $0x408] ss:$12 sps:$4 sm:$0xff]  }
 0x166   :  { %v6201_v47 = vpop.f32.mrb[42].mxu0  ;;  %v6203_v48 = vpop.f32.mrb[42].mxu1 }
 0x167   :  { %7947 = vst [vmem:[#allocation22_spill] sm:$0xff] %v6203_v48  ;;  %v2034_v57 = vpop.f32.mrb[43].mxu0  ;;  %v2514_v58 = vpop.f32.mrb[43].mxu1  ;;  %v5428_v48 = vld [vmem:[%s7863_s0 + $0x3f0] ss:$12 sps:$4 sm:$0xff]  }
 0x169   :  { %2244 = vmatmul.mubr.bf16.gmra.mrb[148].mxu0 %v5403_v45  ;;  %5053 = vmatmul.mubr.msk.bf16.gmra.mrb[148].mxu1 %vm1670_vm1, %v5404_v46 }
 0x16a   :  { %2251 = vmatprep.mubr.bf16.mxu0 %v5405_v53  ;;  %5056 = vmatprep.mubr.msk.bf16.mxu1 %vm1670_vm1, %v5407_v54  ;;  %v5413_v53 = vld [vmem:[%s7863_s0 + $0x3a8] ss:$12 sps:$4 sm:$0xff]   ;;  %v5414_v54 = vld [vmem:[%s7863_s0 + $0x3b0] ss:$12 sps:$4 sm:$0xff]  }
 0x16c   :  { %v6213_v63 = vpop.f32.mrb[44].mxu0  ;;  %v6215_v0 = vpop.f32.mrb[44].mxu1 }
 0x16d   :  { %7948 = vst [vmem:[#allocation23_spill] sm:$0xff] %v6215_v0  ;;  %v2039_v3 = vpop.f32.mrb[45].mxu0  ;;  %v2519_v4 = vpop.f32.mrb[45].mxu1 }
 0x16e   :  { %v6223_v17 = vpop.f32.mrb[46].mxu0  ;;  %v6225_v18 = vpop.f32.mrb[46].mxu1  ;;  %v5415_v3 = vld [vmem:[%s7863_s0 + $0x3c4] ss:$12 sps:$4 sm:$0xff]   ;;  %v5417_v4 = vld [vmem:[%s7863_s0 + $0x3c8] ss:$12 sps:$4 sm:$0xff]  }
 0x16f   :  { %7949 = vst [vmem:[#allocation24_spill] sm:$0xff] %v6225_v18  ;;  %v2042_v29 = vpop.f32.mrb[47].mxu0  ;;  %v2522_v30 = vpop.f32.mrb[47].mxu1 }
 0x171   :  { %2252 = vmatmul.mubr.bf16.gmra.mrb[152].mxu0 %v5408_v11  ;;  %5057 = vmatmul.mubr.msk.bf16.gmra.mrb[152].mxu1 %vm1670_vm1, %v5409_v12 }
 0x172   :  { %2259 = vmatprep.mubr.bf16.mxu0 %v5410_v27  ;;  %5060 = vmatprep.mubr.msk.bf16.mxu1 %vm1670_vm1, %v5412_v28 }
 0x174   :  { %v6235_v39 = vpop.f32.mrb[48].mxu0  ;;  %v6237_v40 = vpop.f32.mrb[48].mxu1 }
 0x175   :  { %7950 = vst [vmem:[#allocation25_spill] sm:$0xff] %v6237_v40  ;;  %v2047_v45 = vpop.f32.mrb[49].mxu0  ;;  %v2527_v46 = vpop.f32.mrb[49].mxu1  ;;  %v5423_v40 = vld [vmem:[%s7863_s0 + $0x3d8] ss:$12 sps:$4 sm:$0xff]  }
 0x176   :  { %v6245_v57 = vpop.f32.mrb[50].mxu0  ;;  %v6247_v58 = vpop.f32.mrb[50].mxu1  ;;  %v5418_v45 = vld [vmem:[%s7863_s0 + $0x3c0] ss:$12 sps:$4 sm:$0xff]  }
 0x177   :  { %7951 = vst [vmem:[#allocation26_spill] sm:$0xff] %v6247_v58  ;;  %v2050_v11 = vpop.f32.mrb[51].mxu0  ;;  %v2530_v12 = vpop.f32.mrb[51].mxu1  ;;  %v5419_v46 = vld [vmem:[%s7863_s0 + $0x3e0] ss:$12 sps:$4 sm:$0xff]  }
 0x179   :  { %2260 = vmatmul.mubr.bf16.gmra.mrb[156].mxu0 %v5413_v53  ;;  %5061 = vmatmul.mubr.msk.bf16.gmra.mrb[156].mxu1 %vm1670_vm1, %v5414_v54 }
 0x17a   :  { %2267 = vmatprep.mubr.bf16.mxu0 %v5415_v3  ;;  %5064 = vmatprep.mubr.msk.bf16.mxu1 %vm1670_vm1, %v5417_v4  ;;  %v5420_v3 = vld [vmem:[%s7863_s0 + $0x3dc] ss:$12 sps:$4 sm:$0xff]   ;;  %v5422_v4 = vld [vmem:[%s7863_s0 + $0x3f8] ss:$12 sps:$4 sm:$0xff]  }
 0x17c   :  { %v6257_v27 = vpop.f32.mrb[52].mxu0  ;;  %v6259_v28 = vpop.f32.mrb[52].mxu1 }
 0x17d   :  { %7952 = vst [vmem:[#allocation27_spill] sm:$0xff] %v6259_v28  ;;  %v2055_v29 = vpop.f32.mrb[53].mxu0  ;;  %v2535_v30 = vpop.f32.mrb[53].mxu1 }
 0x17e   :  { %v6267_v53 = vpop.f32.mrb[54].mxu0  ;;  %v6269_v54 = vpop.f32.mrb[54].mxu1 }
 0x17f   :  { %7953 = vst [vmem:[#allocation28_spill] sm:$0xff] %v6269_v54  ;;  %v2058_v11 = vpop.f32.mrb[55].mxu0  ;;  %v2538_v12 = vpop.f32.mrb[55].mxu1 }
 0x180   :  { %v5424_v11 = vld [vmem:[%s7863_s0 + $0x410] ss:$12 sps:$4 sm:$0xff]  }
 0x181   :  { %2268 = vmatmul.mubr.bf16.gmra.mrb[160].mxu0 %v5418_v45  ;;  %5065 = vmatmul.mubr.msk.bf16.gmra.mrb[160].mxu1 %vm1670_vm1, %v5419_v46 }
 0x182   :  { %2275 = vmatprep.mubr.bf16.mxu0 %v5420_v3  ;;  %5068 = vmatprep.mubr.msk.bf16.mxu1 %vm1670_vm1, %v5422_v4  ;;  %v5425_v3 = vld [vmem:[%s7863_s0 + $0x3f4] ss:$12 sps:$4 sm:$0xff]  }
 0x184   :  { %v6279_v29 = vpop.f32.mrb[56].mxu0  ;;  %v6281_v30 = vpop.f32.mrb[56].mxu1 }
 0x185   :  { %7954 = vst [vmem:[#allocation29_spill] sm:$0xff] %v6281_v30  ;;  %v2063_v58 = vpop.f32.mrb[57].mxu0  ;;  %v2543_v54 = vpop.f32.mrb[57].mxu1 }
 0x186   :  { %v6289_v45 = vpop.f32.mrb[58].mxu0  ;;  %v6291_v46 = vpop.f32.mrb[58].mxu1  ;;  %v5427_v58 = vld [vmem:[%s7863_s0 + $0x428] ss:$12 sps:$4 sm:$0xff]  }
 0x187   :  { %7955 = vst [vmem:[#allocation30_spill] sm:$0xff] %v6291_v46  ;;  %v2066_v54 = vpop.f32.mrb[59].mxu0  ;;  %v2546_v4 = vpop.f32.mrb[59].mxu1 }
 0x188   :  { %v5429_v54 = vld [vmem:[%s7863_s0 + $0x440] ss:$12 sps:$4 sm:$0xff]  }
 0x189   :  { %2276 = vmatmul.mubr.bf16.gmra.mrb[164].mxu0 %v5423_v40  ;;  %5069 = vmatmul.mubr.msk.bf16.gmra.mrb[164].mxu1 %vm1670_vm1, %v5424_v11 }
 0x18a   :  { %2283 = vmatprep.mubr.bf16.mxu0 %v5425_v3  ;;  %5072 = vmatprep.mubr.msk.bf16.mxu1 %vm1670_vm1, %v5427_v58  ;;  %v5430_v3 = vld [vmem:[%s7863_s0 + $0x40c] ss:$12 sps:$4 sm:$0xff]  }
 0x18c   :  { %v6301_v12 = vpop.f32.mrb[60].mxu0  ;;  %v6303_v30 = vpop.f32.mrb[60].mxu1 }
 0x18d   :  { %7956 = vst [vmem:[#allocation31_spill] sm:$0xff] %v6303_v30  ;;  %v2071_v46 = vpop.f32.mrb[61].mxu0  ;;  %v2551_v28 = vpop.f32.mrb[61].mxu1 }
 0x18e   :  { %v6311_v40 = vpop.f32.mrb[62].mxu0  ;;  %v6313_v11 = vpop.f32.mrb[62].mxu1  ;;  %v5432_v28 = vld [vmem:[%s7863_s0 + $0x458] ss:$12 sps:$4 sm:$0xff]  }
 0x18f   :  { %7957 = vst [vmem:[#allocation32_spill] sm:$0xff] %v6313_v11  ;;  %v2074_v46 = vpop.f32.mrb[63].mxu0  ;;  %v2554_v58 = vpop.f32.mrb[63].mxu1 }
 0x190   :  { %v5434_v46 = vld [vmem:[%s7863_s0 + $0x470] ss:$12 sps:$4 sm:$0xff]  }
 0x191   :  { %2284 = vmatmul.mubr.bf16.gmra.mrb[168].mxu0 %v5428_v48  ;;  %5073 = vmatmul.mubr.msk.bf16.gmra.mrb[168].mxu1 %vm1670_vm1, %v5429_v54 }
 0x192   :  { %2291 = vmatprep.mubr.bf16.mxu0 %v5430_v3  ;;  %5076 = vmatprep.mubr.msk.bf16.mxu1 %vm1670_vm1, %v5432_v28  ;;  %v5435_v3 = vld [vmem:[%s7863_s0 + $0x424] ss:$12 sps:$4 sm:$0xff]  }
 0x194   :  { %v6323_v4 = vpop.f32.mrb[64].mxu0  ;;  %v6325_v30 = vpop.f32.mrb[64].mxu1 }
 0x195   :  { %7958 = vst [vmem:[#allocation33_spill] sm:$0xff] %v6325_v30  ;;  %v2079_v11 = vpop.f32.mrb[65].mxu0  ;;  %v2559_v18 = vpop.f32.mrb[65].mxu1 }
 0x196   :  { %v6333_v48 = vpop.f32.mrb[66].mxu0  ;;  %v6335_v54 = vpop.f32.mrb[66].mxu1  ;;  %v5437_v18 = vld [vmem:[%s7863_s0 + $0x488] ss:$12 sps:$4 sm:$0xff]  }
 0x197   :  { %7959 = vst [vmem:[#allocation34_spill] sm:$0xff] %v6335_v54  ;;  %v2082_v11 = vpop.f32.mrb[67].mxu0  ;;  %v2562_v28 = vpop.f32.mrb[67].mxu1 }
 0x198   :  { %v5439_v11 = vld [vmem:[%s7863_s0 + $0x4a0] ss:$12 sps:$4 sm:$0xff]  }
 0x199   :  { %2292 = vmatmul.mubr.bf16.gmra.mrb[172].mxu0 %v5433_v36  ;;  %5077 = vmatmul.mubr.msk.bf16.gmra.mrb[172].mxu1 %vm1670_vm1, %v5434_v46 }
 0x19a   :  { %2299 = vmatprep.mubr.bf16.mxu0 %v5435_v3  ;;  %5080 = vmatprep.mubr.msk.bf16.mxu1 %vm1670_vm1, %v5437_v18  ;;  %v5440_v3 = vld [vmem:[%s7863_s0 + $0x43c] ss:$12 sps:$4 sm:$0xff]  }
 0x19c   :  { %v6345_v58 = vpop.f32.mrb[68].mxu0  ;;  %v6347_v30 = vpop.f32.mrb[68].mxu1 }
 0x19d   :  { %7960 = vst [vmem:[#allocation35_spill] sm:$0xff] %v6347_v30  ;;  %v2087_v54 = vpop.f32.mrb[69].mxu0  ;;  %v2567_v0 = vpop.f32.mrb[69].mxu1 }
 0x19e   :  { %v6355_v36 = vpop.f32.mrb[70].mxu0  ;;  %v6357_v46 = vpop.f32.mrb[70].mxu1  ;;  %v5442_v0 = vld [vmem:[%s7863_s0 + $0x4b8] ss:$12 sps:$4 sm:$0xff]  }
 0x19f   :  { %7961 = vst [vmem:[#allocation36_spill] sm:$0xff] %v6357_v46  ;;  %v2090_v54 = vpop.f32.mrb[71].mxu0  ;;  %v2570_v18 = vpop.f32.mrb[71].mxu1 }
 0x1a0   :  { %v5444_v54 = vld [vmem:[%s7863_s0 + $0x4d0] ss:$12 sps:$4 sm:$0xff]  }
 0x1a1   :  { %2300 = vmatmul.mubr.bf16.gmra.mrb[176].mxu0 %v5438_v60  ;;  %5081 = vmatmul.mubr.msk.bf16.gmra.mrb[176].mxu1 %vm1670_vm1, %v5439_v11 }
 0x1a2   :  { %2307 = vmatprep.mubr.bf16.mxu0 %v5440_v3  ;;  %5084 = vmatprep.mubr.msk.bf16.mxu1 %vm1670_vm1, %v5442_v0  ;;  %v5445_v3 = vld [vmem:[%s7863_s0 + $0x454] ss:$12 sps:$4 sm:$0xff]  }
 0x1a4   :  { %v6367_v28 = vpop.f32.mrb[72].mxu0  ;;  %v6369_v30 = vpop.f32.mrb[72].mxu1 }
 0x1a5   :  { %7962 = vst [vmem:[#allocation37_spill] sm:$0xff] %v6369_v30  ;;  %v2095_v46 = vpop.f32.mrb[73].mxu0  ;;  %v2575_v22 = vpop.f32.mrb[73].mxu1 }
 0x1a6   :  { %v6377_v60 = vpop.f32.mrb[74].mxu0  ;;  %v6379_v11 = vpop.f32.mrb[74].mxu1  ;;  %v5447_v22 = vld [vmem:[%s7863_s0 + $0x4e8] ss:$12 sps:$4 sm:$0xff]  }
 0x1a7   :  { %7963 = vst [vmem:[#allocation38_spill] sm:$0xff] %v6379_v11  ;;  %v2098_v46 = vpop.f32.mrb[75].mxu0  ;;  %v2578_v0 = vpop.f32.mrb[75].mxu1 }
 0x1a8   :  { %v5449_v46 = vld [vmem:[%s7863_s0 + $0x500] ss:$12 sps:$4 sm:$0xff]  }
 0x1a9   :  { %2308 = vmatmul.mubr.bf16.gmra.mrb[180].mxu0 %v5443_v52  ;;  %5085 = vmatmul.mubr.msk.bf16.gmra.mrb[180].mxu1 %vm1670_vm1, %v5444_v54 }
 0x1aa   :  { %2315 = vmatprep.mubr.bf16.mxu0 %v5445_v3  ;;  %5088 = vmatprep.mubr.msk.bf16.mxu1 %vm1670_vm1, %v5447_v22  ;;  %v5450_v3 = vld [vmem:[%s7863_s0 + $0x46c] ss:$12 sps:$4 sm:$0xff]  }
 0x1ac   :  { %v6389_v18 = vpop.f32.mrb[76].mxu0  ;;  %v6391_v30 = vpop.f32.mrb[76].mxu1 }
 0x1ad   :  { %7964 = vst [vmem:[#allocation39_spill] sm:$0xff] %v6391_v30  ;;  %v2103_v11 = vpop.f32.mrb[77].mxu0  ;;  %v2583_v10 = vpop.f32.mrb[77].mxu1 }
 0x1ae   :  { %v6399_v52 = vpop.f32.mrb[78].mxu0  ;;  %v6401_v54 = vpop.f32.mrb[78].mxu1  ;;  %v5452_v10 = vld [vmem:[%s7863_s0 + $0x518] ss:$12 sps:$4 sm:$0xff]  }
 0x1af   :  { %7965 = vst [vmem:[#allocation40_spill] sm:$0xff] %v6401_v54  ;;  %v2106_v11 = vpop.f32.mrb[79].mxu0  ;;  %v2586_v22 = vpop.f32.mrb[79].mxu1 }
 0x1b1   :  { %2316 = vmatmul.mubr.bf16.gmra.mrb[184].mxu0 %v5448_v24  ;;  %5089 = vmatmul.mubr.msk.bf16.gmra.mrb[184].mxu1 %vm1670_vm1, %v5449_v46  ;;  %v5454_v24 = vld [vmem:[%s7863_s0 + $0x530] ss:$12 sps:$4 sm:$0xff]  }
 0x1b2   :  { %2323 = vmatprep.mubr.bf16.mxu0 %v5450_v3  ;;  %5092 = vmatprep.mubr.msk.bf16.mxu1 %vm1670_vm1, %v5452_v10 }
 0x1b4   :  { %v6411_v0 = vpop.f32.mrb[80].mxu0  ;;  %v4986_v30 = vpop.f32.mrb[80].mxu1 }
 0x1b5   :  { %v6414_v54 = vadd.f32 %v4986_v30, %v5993_v13  ;;  %v2111_v42 = vpop.f32.mrb[81].mxu0  ;;  %v2622_v16 = vpop.f32.mrb[81].mxu1  ;;  %v5455_v13 = vld [vmem:[%s7863_s0 + $0x484] ss:$12 sps:$4 sm:$0xff]  }
 0x1b6   :  { %v2623_v46 = vadd.f32 %v2622_v16, %v5971_v1  ;;  %v6423_v3 = vpop.f32.mrb[82].mxu0  ;;  %v4987_v10 = vpop.f32.mrb[82].mxu1  ;;  %v5457_v42 = vld [vmem:[%s7863_s0 + $0x548] ss:$12 sps:$4 sm:$0xff]  }
 0x1b7   :  { %v6432_v30 = vadd.f32 %v4987_v10, %v6003_v19  ;;  %v2114_v11 = vpop.f32.mrb[83].mxu0  ;;  %v2625_v22 = vpop.f32.mrb[83].mxu1  ;;  %v5458_v19 = vld [vmem:[%s7863_s0 + $0x480] ss:$12 sps:$4 sm:$0xff]  }
 0x1b8   :  { %v2626_v56 = vadd.f32 %v2625_v22, %v5981_v7  ;;  %v5459_v7 = vld [vmem:[%s7863_s0 + $0x560] ss:$12 sps:$4 sm:$0xff]  }
 0x1b9   :  { %2324 = vmatmul.mubr.bf16.gmra.mrb[188].mxu0 %v5453_v34  ;;  %5093 = vmatmul.mubr.msk.bf16.gmra.mrb[188].mxu1 %vm1670_vm1, %v5454_v24  ;;  %v3264_v2 = vmax.f32 %v6432_v30, 0.0  ;;  %v5474_v30 = vld [vmem:[%s7863_s0 + $0x5f0] ss:$12 sps:$4 sm:$0xff]  }
 0x1ba   :  { %2331 = vmatprep.mubr.bf16.mxu0 %v5455_v13  ;;  %5096 = vmatprep.mubr.msk.bf16.mxu1 %vm1670_vm1, %v5457_v42 }
 0x1bc   :  { %v6437_v1 = vpop.f32.mrb[84].mxu0  ;;  %v4990_v16 = vpop.f32.mrb[84].mxu1 }
 0x1bd   :  { %v6440_v6 = vadd.f32 %v4990_v16, %v6037_v37  ;;  %v2119_v50 = vpop.f32.mrb[85].mxu0  ;;  %v2638_v62 = vpop.f32.mrb[85].mxu1  ;;  %v5460_v37 = vld [vmem:[%s7863_s0 + $0x49c] ss:$12 sps:$4 sm:$0xff]  }
 0x1be   :  { %v2639_v34 = vadd.f32 %v2638_v62, %v6015_v25  ;;  %v6449_v24 = vpop.f32.mrb[86].mxu0  ;;  %v4991_v10 = vpop.f32.mrb[86].mxu1  ;;  %v5462_v50 = vld [vmem:[%s7863_s0 + $0x578] ss:$12 sps:$4 sm:$0xff]  }
 0x1bf   :  { %v6458_v13 = vadd.f32 %v4991_v10, %v6047_v43  ;;  %v2122_v42 = vpop.f32.mrb[87].mxu0  ;;  %v2641_v11 = vpop.f32.mrb[87].mxu1  ;;  %v5463_v43 = vld [vmem:[%s7863_s0 + $0x498] ss:$12 sps:$4 sm:$0xff]  }
 0x1c0   :  { %v2642_v22 = vadd.f32 %v2641_v11, %v6025_v31  ;;  %v5464_v31 = vld [vmem:[%s7863_s0 + $0x590] ss:$12 sps:$4 sm:$0xff]  }
 0x1c1   :  { %2332 = vmatmul.mubr.bf16.gmra.mrb[192].mxu0 %v5458_v19  ;;  %5097 = vmatmul.mubr.msk.bf16.gmra.mrb[192].mxu1 %vm1670_vm1, %v5459_v7 }
 0x1c2   :  { %2339 = vmatprep.mubr.bf16.mxu0 %v5460_v37  ;;  %5100 = vmatprep.mubr.msk.bf16.mxu1 %vm1670_vm1, %v5462_v50  ;;  %v3261_v37 = vmax.f32 %v2623_v46, 0.0 }
 0x1c4   :  { %v6463_v25 = vpop.f32.mrb[88].mxu0  ;;  %v4994_v62 = vpop.f32.mrb[88].mxu1 }
 0x1c5   :  { %v2663_v16 = vadd.f32 %v4994_v62, %v6081_v61  ;;  %v2127_v32 = vpop.f32.mrb[89].mxu0  ;;  %v2654_v44 = vpop.f32.mrb[89].mxu1  ;;  %v5465_v61 = vld [vmem:[%s7863_s0 + $0x4b4] ss:$12 sps:$4 sm:$0xff]  }
 0x1c6   :  { %v6473_v19 = vadd.f32 %v2654_v44, %v6059_v49  ;;  %v6475_v7 = vpop.f32.mrb[90].mxu0  ;;  %v4995_v10 = vpop.f32.mrb[90].mxu1  ;;  %v5467_v32 = vld [vmem:[%s7863_s0 + $0x5a8] ss:$12 sps:$4 sm:$0xff]   ;;  %v3262_v49 = vmax.f32 %v2626_v56, 0.0 }
 0x1c7   :  { %v3271_v50 = vmax.f32 %v2663_v16, 0.0  ;;  %v2666_v42 = vadd.f32 %v4995_v10, %v6091_v5  ;;  %v2130_v11 = vpop.f32.mrb[91].mxu0  ;;  %v2657_v62 = vpop.f32.mrb[91].mxu1  ;;  %v5468_v56 = vld [vmem:[%s7863_s0 + $0x4b0] ss:$12 sps:$4 sm:$0xff]  }
 0x1c8   :  { %v6485_v44 = vadd.f32 %v2657_v62, %v6069_v55 }
 0x1c9   :  { %v6487_v26 = vmax.f32 %v3261_v37, %v3271_v50  ;;  %v3272_v38 = vmax.f32 %v2666_v42, 0.0  ;;  %2340 = vmatmul.mubr.bf16.gmra.mrb[196].mxu0 %v5463_v43  ;;  %5101 = vmatmul.mubr.msk.bf16.gmra.mrb[196].mxu1 %vm1670_vm1, %v5464_v31  ;;  %v5469_v43 = vld [vmem:[%s7863_s0 + $0x5c0] ss:$12 sps:$4 sm:$0xff]   ;;  %v3265_v37 = vmax.f32 %v2639_v34, 0.0 }
 0x1ca   :  { %2347 = vmatprep.mubr.bf16.mxu0 %v5465_v61  ;;  %5104 = vmatprep.mubr.msk.bf16.mxu1 %vm1670_vm1, %v5467_v32  ;;  %v5470_v32 = vld [vmem:[%s7863_s0 + $0x4cc] ss:$12 sps:$4 sm:$0xff]  }
 0x1cb   :  { %v6491_v8 = vmax.f32 %v3262_v49, %v3272_v38  ;;  %v3263_v49 = vmax.f32 %v6414_v54, 0.0 }
 0x1cc   :  { %v6493_v46 = vpop.f32.mrb[92].mxu0  ;;  %v4998_v5 = vpop.f32.mrb[92].mxu1 }
 0x1cd   :  { %v2679_v16 = vadd.f32 %v4998_v5, %v6125_v33  ;;  %v2135_v10 = vpop.f32.mrb[93].mxu0  ;;  %v2670_v55 = vpop.f32.mrb[93].mxu1  ;;  %v5472_v33 = vld [vmem:[%s7863_s0 + $0x5d8] ss:$12 sps:$4 sm:$0xff]  }
 0x1ce   :  { %v2671_v31 = vadd.f32 %v2670_v55, %v6103_v15  ;;  %v6503_v61 = vpop.f32.mrb[94].mxu0  ;;  %v4999_v38 = vpop.f32.mrb[94].mxu1  ;;  %v3266_v10 = vmax.f32 %v2642_v22, 0.0 }
 0x1cf   :  { %v3275_v50 = vmax.f32 %v2679_v16, 0.0  ;;  %v2682_v42 = vadd.f32 %v4999_v38, %v6135_v41  ;;  %v2138_v11 = vpop.f32.mrb[95].mxu0  ;;  %v2673_v62 = vpop.f32.mrb[95].mxu1 }
 0x1d0   :  { %v3273_v15 = vmax.f32 %v2671_v31, 0.0  ;;  %v2674_v5 = vadd.f32 %v2673_v62, %v6113_v23 }
 0x1d1   :  { %v6514_v55 = vmax.f32 %v3265_v37, %v3275_v50  ;;  %v3276_v20 = vmax.f32 %v2682_v42, 0.0  ;;  %2348 = vmatmul.mubr.bf16.gmra.mrb[200].mxu0 %v5468_v56  ;;  %5105 = vmatmul.mubr.msk.bf16.gmra.mrb[200].mxu1 %vm1670_vm1, %v5469_v43  ;;  %v5473_v56 = vld [vmem:[%s7863_s0 + $0x4c8] ss:$12 sps:$4 sm:$0xff]  }
 0x1d2   :  { %v3423_v34 = vmax.f32 %v3263_v49, %v3273_v15  ;;  %v3274_v16 = vmax.f32 %v2674_v5, 0.0  ;;  %2355 = vmatprep.mubr.bf16.mxu0 %v5470_v32  ;;  %5108 = vmatprep.mubr.msk.bf16.mxu1 %vm1670_vm1, %v5472_v33  ;;  %v5475_v32 = vld [vmem:[%s7863_s0 + $0x4e4] ss:$12 sps:$4 sm:$0xff]   ;;  %v3269_v33 = vmax.f32 %v6473_v19, 0.0  ;;  %v3270_v5 = vmax.f32 %v6485_v44, 0.0 }
 0x1d3   :  { %v6519_v41 = vmax.f32 %v3266_v10, %v3276_v20  ;;  %v3268_v19 = vmax.f32 %v6458_v13, 0.0  ;;  %v5479_v13 = vld [vmem:[%s7863_s0 + $0x620] ss:$12 sps:$4 sm:$0xff]  }
 0x1d4   :  { %v3424_v54 = vmax.f32 %v3264_v2, %v3274_v16  ;;  %v6521_v31 = vpop.f32.mrb[96].mxu0  ;;  %v5002_v23 = vpop.f32.mrb[96].mxu1 }
 0x1d5   :  { %v2695_v22 = vadd.f32 %v5002_v23, %v6169_v9  ;;  %v2143_v38 = vpop.f32.mrb[97].mxu0  ;;  %v2686_v37 = vpop.f32.mrb[97].mxu1  ;;  %v5477_v9 = vld [vmem:[%s7863_s0 + $0x608] ss:$12 sps:$4 sm:$0xff]  }
 0x1d6   :  { %v2687_v43 = vadd.f32 %v2686_v37, %v6147_v51  ;;  %v6531_v20 = vpop.f32.mrb[98].mxu0  ;;  %v5003_v2 = vpop.f32.mrb[98].mxu1  ;;  %v3267_v51 = vmax.f32 %v6440_v6, 0.0 }
 0x1d7   :  { %v3279_v50 = vmax.f32 %v2695_v22, 0.0  ;;  %v2698_v42 = vadd.f32 %v5003_v2, %v6179_v21  ;;  %v2146_v11 = vpop.f32.mrb[99].mxu0  ;;  %v2689_v62 = vpop.f32.mrb[99].mxu1 }
 0x1d8   :  { %v3277_v49 = vmax.f32 %v2687_v43, 0.0  ;;  %v2690_v15 = vadd.f32 %v2689_v62, %v6157_v59 }
 0x1d9   :  { %v6544_v10 = vmax.f32 %v3269_v33, %v3279_v50  ;;  %v3280_v16 = vmax.f32 %v2698_v42, 0.0  ;;  %2356 = vmatmul.mubr.bf16.gmra.mrb[204].mxu0 %v5473_v56  ;;  %5109 = vmatmul.mubr.msk.bf16.gmra.mrb[204].mxu1 %vm1670_vm1, %v5474_v30  ;;  %v5478_v56 = vld [vmem:[%s7863_s0 + $0x4e0] ss:$12 sps:$4 sm:$0xff]  }
 0x1da   :  { %v3427_v23 = vmax.f32 %v3267_v51, %v3277_v49  ;;  %v3278_v22 = vmax.f32 %v2690_v15, 0.0  ;;  %2363 = vmatprep.mubr.bf16.mxu0 %v5475_v32  ;;  %5112 = vmatprep.mubr.msk.bf16.mxu1 %vm1670_vm1, %v5477_v9  ;;  %v5480_v9 = vld [vmem:[%s7863_s0 + $0x4fc] ss:$12 sps:$4 sm:$0xff]  }
 0x1db   :  { %v6549_v21 = vmax.f32 %v3270_v5, %v3280_v16 }
 0x1dc   :  { %v3428_v6 = vmax.f32 %v3268_v19, %v3278_v22  ;;  %v6551_v38 = vpop.f32.mrb[100].mxu0  ;;  %v5006_v59 = vpop.f32.mrb[100].mxu1 }
 0x1dd   :  { %v2711_v44 = vadd.f32 %v5006_v59, %v6213_v63  ;;  %v2151_v37 = vpop.f32.mrb[101].mxu0  ;;  %v2702_v43 = vpop.f32.mrb[101].mxu1  ;;  %v5482_v63 = vld [vmem:[%s7863_s0 + $0x638] ss:$12 sps:$4 sm:$0xff]  }
 0x1de   :  { %v2703_v30 = vadd.f32 %v2702_v43, %v6191_v35  ;;  %v6561_v2 = vpop.f32.mrb[102].mxu0  ;;  %v5007_v32 = vpop.f32.mrb[102].mxu1  ;;  %v5485_v43 = vld [vmem:[%s7863_s0 + $0x514] ss:$12 sps:$4 sm:$0xff]  }
 0x1df   :  { %v3283_v33 = vmax.f32 %v2711_v44, 0.0  ;;  %v2714_v50 = vadd.f32 %v5007_v32, %v6223_v17  ;;  %v2154_v42 = vpop.f32.mrb[103].mxu0  ;;  %v2705_v11 = vpop.f32.mrb[103].mxu1  ;;  %v5483_v44 = vld [vmem:[%s7863_s0 + $0x4f8] ss:$12 sps:$4 sm:$0xff]  }
 0x1e0   :  { %v3281_v62 = vmax.f32 %v2703_v30, 0.0  ;;  %v2706_v51 = vadd.f32 %v2705_v11, %v6201_v47 }
 0x1e1   :  { %v6571_v35 = vmax.f32 %v3423_v34, %v3283_v33  ;;  %v3284_v49 = vmax.f32 %v2714_v50, 0.0  ;;  %2364 = vmatmul.mubr.bf16.gmra.mrb[208].mxu0 %v5478_v56  ;;  %5113 = vmatmul.mubr.msk.bf16.gmra.mrb[208].mxu1 %vm1670_vm1, %v5479_v13 }
 0x1e2   :  { %v3431_v15 = vmax.f32 %v6487_v26, %v3281_v62  ;;  %v3282_v5 = vmax.f32 %v2706_v51, 0.0  ;;  %2371 = vmatprep.mubr.bf16.mxu0 %v5480_v9  ;;  %5116 = vmatprep.mubr.msk.bf16.mxu1 %vm1670_vm1, %v5482_v63  ;;  %v5484_v26 = vld [vmem:[%s7863_s0 + $0x650] ss:$12 sps:$4 sm:$0xff]  }
 0x1e3   :  { %v6576_v16 = vmax.f32 %v3424_v54, %v3284_v49 }
 0x1e4   :  { %v3432_v17 = vmax.f32 %v6491_v8, %v3282_v5  ;;  %v6579_v19 = vpop.f32.mrb[104].mxu0  ;;  %v5010_v22 = vpop.f32.mrb[104].mxu1  ;;  %v5488_v5 = vld [vmem:[%s7863_s0 + $0x510] ss:$12 sps:$4 sm:$0xff]  }
 0x1e5   :  { %v2727_v47 = vadd.f32 %v5010_v22, %v6257_v27  ;;  %v2159_v34 = vpop.f32.mrb[105].mxu0  ;;  %v2718_v59 = vpop.f32.mrb[105].mxu1  ;;  %v5487_v27 = vld [vmem:[%s7863_s0 + $0x668] ss:$12 sps:$4 sm:$0xff]  }
 0x1e6   :  { %v2719_v54 = vadd.f32 %v2718_v59, %v6235_v39  ;;  %v6589_v37 = vpop.f32.mrb[106].mxu0  ;;  %v5011_v8 = vpop.f32.mrb[106].mxu1 }
 0x1e7   :  { %v3287_v56 = vmax.f32 %v2727_v47, 0.0  ;;  %v2730_v13 = vadd.f32 %v5011_v8, %v6267_v53  ;;  %v2162_v30 = vpop.f32.mrb[107].mxu0  ;;  %v2721_v32 = vpop.f32.mrb[107].mxu1  ;;  %v5490_v47 = vld [vmem:[%s7863_s0 + $0x52c] ss:$12 sps:$4 sm:$0xff]  }
 0x1e8   :  { %v3285_v9 = vmax.f32 %v2719_v54, 0.0  ;;  %v2722_v63 = vadd.f32 %v2721_v32, %v6245_v57 }
 0x1e9   :  { %v6599_v39 = vmax.f32 %v3427_v23, %v3287_v56  ;;  %v3288_v33 = vmax.f32 %v2730_v13, 0.0  ;;  %2372 = vmatmul.mubr.bf16.gmra.mrb[212].mxu0 %v5483_v44  ;;  %5117 = vmatmul.mubr.msk.bf16.gmra.mrb[212].mxu1 %vm1670_vm1, %v5484_v26 }
 0x1ea   :  { %v3435_v50 = vmax.f32 %v6514_v55, %v3285_v9  ;;  %v3286_v42 = vmax.f32 %v2722_v63, 0.0  ;;  %2379 = vmatprep.mubr.bf16.mxu0 %v5485_v43  ;;  %5120 = vmatprep.mubr.msk.bf16.mxu1 %vm1670_vm1, %v5487_v27  ;;  %v5489_v55 = vld [vmem:[%s7863_s0 + $0x680] ss:$12 sps:$4 sm:$0xff]   ;;  %v5493_v63 = vld [vmem:[%s7863_s0 + $0x528] ss:$12 sps:$4 sm:$0xff]  }
 0x1eb   :  { %v6604_v11 = vmax.f32 %v3428_v6, %v3288_v33 }
 0x1ec   :  { %v3436_v53 = vmax.f32 %v6519_v41, %v3286_v42  ;;  %v6607_v62 = vpop.f32.mrb[108].mxu0  ;;  %v5014_v51 = vpop.f32.mrb[108].mxu1  ;;  %v5495_v42 = vld [vmem:[%s7863_s0 + $0x544] ss:$12 sps:$4 sm:$0xff]  }
 0x1ed   :  { %v2743_v57 = vadd.f32 %v5014_v51, %v6301_v12  ;;  %v2167_v23 = vpop.f32.mrb[109].mxu0  ;;  %v2734_v49 = vpop.f32.mrb[109].mxu1  ;;  %v5492_v12 = vld [vmem:[%s7863_s0 + $0x698] ss:$12 sps:$4 sm:$0xff]  }
 0x1ee   :  { %v2735_v6 = vadd.f32 %v2734_v49, %v6279_v29  ;;  %v6617_v22 = vpop.f32.mrb[110].mxu0  ;;  %v5015_v41 = vpop.f32.mrb[110].mxu1 }
 0x1ef   :  { %v3291_v34 = vmax.f32 %v2743_v57, 0.0  ;;  %v2746_v59 = vadd.f32 %v5015_v41, %v6311_v40  ;;  %v2170_v44 = vpop.f32.mrb[111].mxu0  ;;  %v2737_v26 = vpop.f32.mrb[111].mxu1 }
 0x1f0   :  { %v3289_v54 = vmax.f32 %v2735_v6, 0.0  ;;  %v2738_v8 = vadd.f32 %v2737_v26, %v6289_v45  ;;  %v5498_v26 = vld [vmem:[%s7863_s0 + $0x540] ss:$12 sps:$4 sm:$0xff]  }
 0x1f1   :  { %v6627_v29 = vmax.f32 %v3431_v15, %v3291_v34  ;;  %v3292_v43 = vmax.f32 %v2746_v59, 0.0  ;;  %2380 = vmatmul.mubr.bf16.gmra.mrb[216].mxu0 %v5488_v5  ;;  %5121 = vmatmul.mubr.msk.bf16.gmra.mrb[216].mxu1 %vm1670_vm1, %v5489_v55 }
 0x1f2   :  { %v3439_v27 = vmax.f32 %v6544_v10, %v3289_v54  ;;  %v3290_v56 = vmax.f32 %v2738_v8, 0.0  ;;  %2387 = vmatprep.mubr.bf16.mxu0 %v5490_v47  ;;  %5124 = vmatprep.mubr.msk.bf16.mxu1 %vm1670_vm1, %v5492_v12  ;;  %v5494_v10 = vld [vmem:[%s7863_s0 + $0x6b0] ss:$12 sps:$4 sm:$0xff]  }
 0x1f3   :  { %v6632_v13 = vmax.f32 %v3432_v17, %v3292_v43  ;;  %v5500_v8 = vld [vmem:[%s7863_s0 + $0x55c] ss:$12 sps:$4 sm:$0xff]  }
 0x1f4   :  { %v3440_v40 = vmax.f32 %v6549_v21, %v3290_v56  ;;  %v6635_v30 = vpop.f32.mrb[112].mxu0  ;;  %v5018_v32 = vpop.f32.mrb[112].mxu1 }
 0x1f5   :  { %v2759_v45 = vadd.f32 %v5018_v32, %v6345_v58  ;;  %v2175_v15 = vpop.f32.mrb[113].mxu0  ;;  %v2750_v9 = vpop.f32.mrb[113].mxu1  ;;  %v5497_v58 = vld [vmem:[%s7863_s0 + $0x6c8] ss:$12 sps:$4 sm:$0xff]  }
 0x1f6   :  { %v2751_v17 = vadd.f32 %v2750_v9, %v6323_v4  ;;  %v6645_v33 = vpop.f32.mrb[114].mxu0  ;;  %v5019_v21 = vpop.f32.mrb[114].mxu1 }
 0x1f7   :  { %v3295_v51 = vmax.f32 %v2759_v45, 0.0  ;;  %v2762_v57 = vadd.f32 %v5019_v21, %v6355_v36  ;;  %v2178_v23 = vpop.f32.mrb[115].mxu0  ;;  %v2753_v49 = vpop.f32.mrb[115].mxu1 }
 0x1f8   :  { %v3293_v5 = vmax.f32 %v2751_v17, 0.0  ;;  %v2754_v55 = vadd.f32 %v2753_v49, %v6333_v48  ;;  %v5505_v49 = vld [vmem:[%s7863_s0 + $0x574] ss:$12 sps:$4 sm:$0xff]  }
 0x1f9   :  { %v6655_v4 = vmax.f32 %v3435_v50, %v3295_v51  ;;  %v3296_v6 = vmax.f32 %v2762_v57, 0.0  ;;  %2388 = vmatmul.mubr.bf16.gmra.mrb[220].mxu0 %v5493_v63  ;;  %5125 = vmatmul.mubr.msk.bf16.gmra.mrb[220].mxu1 %vm1670_vm1, %v5494_v10  ;;  %v5503_v57 = vld [vmem:[%s7863_s0 + $0x558] ss:$12 sps:$4 sm:$0xff]  }
 0x1fa   :  { %v3443_v41 = vmax.f32 %v6571_v35, %v3293_v5  ;;  %v3294_v47 = vmax.f32 %v2754_v55, 0.0  ;;  %2395 = vmatprep.mubr.bf16.mxu0 %v5495_v42  ;;  %5128 = vmatprep.mubr.msk.bf16.mxu1 %vm1670_vm1, %v5497_v58  ;;  %v5499_v35 = vld [vmem:[%s7863_s0 + $0x6e0] ss:$12 sps:$4 sm:$0xff]  }
 0x1fb   :  { %v6660_v12 = vmax.f32 %v3436_v53, %v3296_v6 }
 0x1fc   :  { %v3444_v36 = vmax.f32 %v6576_v16, %v3294_v47  ;;  %v6663_v34 = vpop.f32.mrb[116].mxu0  ;;  %v5022_v59 = vpop.f32.mrb[116].mxu1 }
 0x1fd   :  { %v2775_v48 = vadd.f32 %v5022_v59, %v6389_v18  ;;  %v2183_v50 = vpop.f32.mrb[117].mxu0  ;;  %v2766_v44 = vpop.f32.mrb[117].mxu1  ;;  %v5502_v18 = vld [vmem:[%s7863_s0 + $0x6f8] ss:$12 sps:$4 sm:$0xff]  }
 0x1fe   :  { %v2767_v53 = vadd.f32 %v2766_v44, %v6367_v28  ;;  %v6673_v54 = vpop.f32.mrb[118].mxu0  ;;  %v5023_v16 = vpop.f32.mrb[118].mxu1 }
 0x1ff   :  { %v3299_v43 = vmax.f32 %v2775_v48, 0.0  ;;  %v2778_v56 = vadd.f32 %v5023_v16, %v6399_v52  ;;  %v2186_v32 = vpop.f32.mrb[119].mxu0  ;;  %v2769_v45 = vpop.f32.mrb[119].mxu1 }
 0x200   :  { %v3297_v15 = vmax.f32 %v2767_v53, 0.0  ;;  %v2770_v9 = vadd.f32 %v2769_v45, %v6377_v60 }
 0x201   :  { %v6683_v28 = vmax.f32 %v3439_v27, %v3299_v43  ;;  %v3300_v63 = vmax.f32 %v2778_v56, 0.0  ;;  %2396 = vmatmul.mubr.bf16.gmra.mrb[224].mxu0 %v5498_v26  ;;  %5129 = vmatmul.mubr.msk.bf16.gmra.mrb[224].mxu1 %vm1670_vm1, %v5499_v35  ;;  %v5510_v56 = vld [vmem:[%s7863_s0 + $0x58c] ss:$12 sps:$4 sm:$0xff]  }
 0x202   :  { %v3447_v10 = vmax.f32 %v6599_v39, %v3297_v15  ;;  %v3298_v17 = vmax.f32 %v2770_v9, 0.0  ;;  %2403 = vmatprep.mubr.bf16.mxu0 %v5500_v8  ;;  %5132 = vmatprep.mubr.msk.bf16.mxu1 %vm1670_vm1, %v5502_v18  ;;  %v5504_v39 = vld [vmem:[%s7863_s0 + $0x710] ss:$12 sps:$4 sm:$0xff]  }
 0x203   :  { %v6688_v21 = vmax.f32 %v3440_v40, %v3300_v63  ;;  %v5508_v18 = vld [vmem:[%s7863_s0 + $0x570] ss:$12 sps:$4 sm:$0xff]  }
 0x204   :  { %v3448_v52 = vmax.f32 %v6604_v11, %v3298_v17  ;;  %v6691_v42 = vpop.f32.mrb[120].mxu0  ;;  %v5026_v58 = vpop.f32.mrb[120].mxu1 }
 0x205   :  { %v2791_v60 = vadd.f32 %v5026_v58, %v6437_v1  ;;  %v2191_v27 = vpop.f32.mrb[121].mxu0  ;;  %v2782_v51 = vpop.f32.mrb[121].mxu1  ;;  %v5507_v1 = vld [vmem:[%s7863_s0 + $0x728] ss:$12 sps:$4 sm:$0xff]  }
 0x206   :  { %v2783_v40 = vadd.f32 %v2782_v51, %v6411_v0  ;;  %v6701_v23 = vpop.f32.mrb[122].mxu0  ;;  %v5027_v11 = vpop.f32.mrb[122].mxu1 }
 0x207   :  { %v3303_v5 = vmax.f32 %v2791_v60, 0.0  ;;  %v2794_v55 = vadd.f32 %v5027_v11, %v6449_v24  ;;  %v2194_v6 = vpop.f32.mrb[123].mxu0  ;;  %v2785_v47 = vpop.f32.mrb[123].mxu1  ;;  %v5513_v11 = vld [vmem:[%s7863_s0 + $0x588] ss:$12 sps:$4 sm:$0xff]  }
 0x208   :  { %v3301_v59 = vmax.f32 %v2783_v40, 0.0  ;;  %v2786_v48 = vadd.f32 %v2785_v47, %v6423_v3 }
 0x209   :  { %v6711_v0 = vmax.f32 %v3443_v41, %v3303_v5  ;;  %v3304_v50 = vmax.f32 %v2794_v55, 0.0  ;;  %2404 = vmatmul.mubr.bf16.gmra.mrb[228].mxu0 %v5503_v57  ;;  %5133 = vmatmul.mubr.msk.bf16.gmra.mrb[228].mxu1 %vm1670_vm1, %v5504_v39 }
 0x20a   :  { %v3451_v44 = vmax.f32 %v6627_v29, %v3301_v59  ;;  %v3302_v26 = vmax.f32 %v2786_v48, 0.0  ;;  %2411 = vmatprep.mubr.bf16.mxu0 %v5505_v49  ;;  %5136 = vmatprep.mubr.msk.bf16.mxu1 %vm1670_vm1, %v5507_v1  ;;  %v5509_v29 = vld [vmem:[%s7863_s0 + $0x740] ss:$12 sps:$4 sm:$0xff]  }
 0x20b   :  { %v6716_v35 = vmax.f32 %v3444_v36, %v3304_v50 }
 0x20c   :  { %v3452_v24 = vmax.f32 %v6632_v13, %v3302_v26  ;;  %v6719_v53 = vpop.f32.mrb[124].mxu0  ;;  %v5030_v16 = vpop.f32.mrb[124].mxu1 }
 0x20d   :  { %v2807_v3 = vadd.f32 %v5030_v16, %v6493_v46  ;;  %v2199_v41 = vpop.f32.mrb[125].mxu0  ;;  %v2798_v8 = vpop.f32.mrb[125].mxu1  ;;  %v5512_v46 = vld [vmem:[%s7863_s0 + $0x758] ss:$12 sps:$4 sm:$0xff]  }
 0x20e   :  { %v2799_v36 = vadd.f32 %v2798_v8, %v6463_v25  ;;  %v6729_v43 = vpop.f32.mrb[126].mxu0  ;;  %v5031_v13 = vpop.f32.mrb[126].mxu1 }
 0x20f   :  { %v3307_v32 = vmax.f32 %v2807_v3, 0.0  ;;  %v2810_v45 = vadd.f32 %v5031_v13, %v6503_v61  ;;  %v2202_v15 = vpop.f32.mrb[127].mxu0  ;;  %v2801_v9 = vpop.f32.mrb[127].mxu1 }
 0x210   :  { %v3305_v63 = vmax.f32 %v2799_v36, 0.0  ;;  %v2802_v17 = vadd.f32 %v2801_v9, %v6475_v7 }
 0x211   :  { %v6739_v25 = vmax.f32 %v3447_v10, %v3307_v32  ;;  %v3308_v58 = vmax.f32 %v2810_v45, 0.0  ;;  %2412 = vmatmul.mubr.bf16.gmra.mrb[232].mxu0 %v5508_v18  ;;  %5137 = vmatmul.mubr.msk.bf16.gmra.mrb[232].mxu1 %vm1670_vm1, %v5509_v29 }
 0x212   :  { %v3455_v60 = vmax.f32 %v6655_v4, %v3305_v63  ;;  %v3306_v27 = vmax.f32 %v2802_v17, 0.0  ;;  %2419 = vmatprep.mubr.bf16.mxu0 %v5510_v56  ;;  %5140 = vmatprep.mubr.msk.bf16.mxu1 %vm1670_vm1, %v5512_v46  ;;  %v5514_v4 = vld [vmem:[%s7863_s0 + $0x770] ss:$12 sps:$4 sm:$0xff]  }
 0x213   :  { %v6744_v51 = vmax.f32 %v3448_v52, %v3308_v58 }
 0x214   :  { %v3456_v61 = vmax.f32 %v6660_v12, %v3306_v27  ;;  %v6747_v57 = vpop.f32.mrb[128].mxu0  ;;  %v5034_v39 = vpop.f32.mrb[128].mxu1 }
 0x215   :  { %v2823_v7 = vadd.f32 %v5034_v39, %v6551_v38  ;;  %v2207_v10 = vpop.f32.mrb[129].mxu0  ;;  %v2814_v40 = vpop.f32.mrb[129].mxu1 }
 0x216   :  { %v2815_v52 = vadd.f32 %v2814_v40, %v6521_v31  ;;  %v6757_v49 = vpop.f32.mrb[130].mxu0  ;;  %v5035_v12 = vpop.f32.mrb[130].mxu1 }
 0x217   :  { %v3311_v1 = vmax.f32 %v2823_v7, 0.0  ;;  %v2826_v5 = vadd.f32 %v5035_v12, %v6561_v2  ;;  %v2210_v55 = vpop.f32.mrb[131].mxu0  ;;  %v2817_v38 = vpop.f32.mrb[131].mxu1 }
 0x218   :  { %v3309_v6 = vmax.f32 %v2815_v52, 0.0  ;;  %v2818_v47 = vadd.f32 %v2817_v38, %v6531_v20 }
 0x219   :  { %v6761_v59 = vmax.f32 %v3451_v44, %v3311_v1  ;;  %v3312_v48 = vmax.f32 %v2826_v5, 0.0  ;;  %2420 = vmatmul.mubr.bf16.gmra.mrb[236].mxu0 %v5513_v11  ;;  %5141 = vmatmul.mubr.msk.bf16.gmra.mrb[236].mxu1 %vm1670_vm1, %v5514_v4 }
 0x21a   :  { %v3459_v50 = vmax.f32 %v6683_v28, %v3309_v6  ;;  %v3310_v31 = vmax.f32 %v2818_v47, 0.0 }
 0x21b   :  { %v3462_v26 = vmax.f32 %v3452_v24, %v3312_v48 }
 0x21c   :  { %v3460_v16 = vmax.f32 %v6688_v21, %v3310_v31  ;;  %v2213_v3 = vpop.f32.mrb[132].mxu0  ;;  %v5038_v41 = vpop.f32.mrb[132].mxu1 }
 0x21d   :  { %v2839_v2 = vadd.f32 %v5038_v41, %v6607_v62  ;;  %v2215_v8 = vpop.f32.mrb[133].mxu0  ;;  %v2830_v18 = vpop.f32.mrb[133].mxu1 }
 0x21e   :  { %v2831_v20 = vadd.f32 %v2830_v18, %v6579_v19  ;;  %v6768_v44 = vpop.f32.mrb[134].mxu0  ;;  %v5039_v29 = vpop.f32.mrb[134].mxu1 }
 0x21f   :  { %v3315_v36 = vmax.f32 %v2839_v2, 0.0  ;;  %v2842_v13 = vadd.f32 %v5039_v29, %v6617_v22  ;;  %v2218_v56 = vpop.f32.mrb[135].mxu0  ;;  %v2833_v28 = vpop.f32.mrb[135].mxu1 }
 0x220   :  { %v3313_v46 = vmax.f32 %v2831_v20, 0.0  ;;  %v2834_v24 = vadd.f32 %v2833_v28, %v6589_v37 }
 0x221   :  { %v3465_v21 = vmax.f32 %v3455_v60, %v3315_v36  ;;  %v3316_v32 = vmax.f32 %v2842_v13, 0.0 }
 0x222   :  { %v3463_v45 = vmax.f32 %v6711_v0, %v3313_v46  ;;  %v3314_v62 = vmax.f32 %v2834_v24, 0.0 }
 0x223   :  { %v3466_v15 = vmax.f32 %v3456_v61, %v3316_v32 }
 0x224   :  { %v3464_v9 = vmax.f32 %v6716_v35, %v3314_v62  ;;  %v6774_v19 = vpop.f32.mrb[136].mxu0  ;;  %v5042_v63 = vpop.f32.mrb[136].mxu1 }
 0x225   :  { %v2855_v17 = vadd.f32 %v5042_v63, %v6663_v34  ;;  %v2223_v58 = vpop.f32.mrb[137].mxu0  ;;  %v2846_v22 = vpop.f32.mrb[137].mxu1 }
 0x226   :  { %v2847_v27 = vadd.f32 %v2846_v22, %v6635_v30  ;;  %v6778_v39 = vpop.f32.mrb[138].mxu0  ;;  %v5043_v37 = vpop.f32.mrb[138].mxu1 }
 0x227   :  { %v3319_v60 = vmax.f32 %v2855_v17, 0.0  ;;  %v2858_v7 = vadd.f32 %v5043_v37, %v6673_v54  ;;  %v2226_v0 = vpop.f32.mrb[139].mxu0  ;;  %v2849_v10 = vpop.f32.mrb[139].mxu1 }
 0x228   :  { %v3317_v61 = vmax.f32 %v2847_v27, 0.0  ;;  %v2850_v35 = vadd.f32 %v2849_v10, %v6645_v33 }
 0x229   :  { %v3469_v40 = vmax.f32 %v3459_v50, %v3319_v60  ;;  %v3320_v11 = vmax.f32 %v2858_v7, 0.0 }
 0x22a   :  { %v3467_v4 = vmax.f32 %v6739_v25, %v3317_v61  ;;  %v3318_v34 = vmax.f32 %v2850_v35, 0.0 }
 0x22b   :  { %v3470_v52 = vmax.f32 %v3460_v16, %v3320_v11 }
 0x22c   :  { %v3468_v12 = vmax.f32 %v6744_v51, %v3318_v34  ;;  %v2229_v30 = vpop.f32.mrb[140].mxu0  ;;  %v5046_v1 = vpop.f32.mrb[140].mxu1 }
 0x22d   :  { %v2871_v5 = vadd.f32 %v5046_v1, %v6719_v53  ;;  %v2231_v55 = vpop.f32.mrb[141].mxu0  ;;  %v2862_v38 = vpop.f32.mrb[141].mxu1 }
 0x22e   :  { %v2863_v54 = vadd.f32 %v2862_v38, %v6691_v42  ;;  %v2232_v6 = vpop.f32.mrb[142].mxu0  ;;  %v5047_v47 = vpop.f32.mrb[142].mxu1 }
 0x22f   :  { %v3323_v48 = vmax.f32 %v2871_v5, 0.0  ;;  %v2874_v33 = vadd.f32 %v5047_v47, %v6729_v43  ;;  %v2234_v50 = vpop.f32.mrb[143].mxu0  ;;  %v2865_v31 = vpop.f32.mrb[143].mxu1 }
 0x230   :  { %v3321_v25 = vmax.f32 %v2863_v54, 0.0  ;;  %v2866_v16 = vadd.f32 %v2865_v31, %v6701_v23 }
 0x231   :  { %v3473_v41 = vmax.f32 %v3463_v45, %v3323_v48  ;;  %v3324_v51 = vmax.f32 %v2874_v33, 0.0 }
 0x232   :  { %v3471_v2 = vmax.f32 %v6761_v59, %v3321_v25  ;;  %v3322_v8 = vmax.f32 %v2866_v16, 0.0 }
 0x233   :  { %v3474_v53 = vmax.f32 %v3464_v9, %v3324_v51 }
 0x234   :  { %v3472_v18 = vmax.f32 %v3462_v26, %v3322_v8  ;;  %v2237_v20 = vpop.f32.mrb[144].mxu0  ;;  %v5050_v29 = vpop.f32.mrb[144].mxu1 }
 0x235   :  { %v2887_v42 = vadd.f32 %v5050_v29, %v2213_v3  ;;  %v2239_v36 = vpop.f32.mrb[145].mxu0  ;;  %v2878_v13 = vpop.f32.mrb[145].mxu1 }
 0x236   :  { %v2879_v56 = vadd.f32 %v2878_v13, %v6747_v57  ;;  %v2240_v43 = vpop.f32.mrb[146].mxu0  ;;  %v5051_v28 = vpop.f32.mrb[146].mxu1 }
 0x237   :  { %v3327_v46 = vmax.f32 %v2887_v42, 0.0  ;;  %v2890_v24 = vadd.f32 %v5051_v28, %v6768_v44  ;;  %v2242_v23 = vpop.f32.mrb[147].mxu0  ;;  %v2881_v32 = vpop.f32.mrb[147].mxu1 }
 0x238   :  { %v3325_v45 = vmax.f32 %v2879_v56, 0.0  ;;  %v2882_v59 = vadd.f32 %v2881_v32, %v6757_v49 }
 0x239   :  { %v3477_v62 = vmax.f32 %v3467_v4, %v3327_v46  ;;  %v3328_v9 = vmax.f32 %v2890_v24, 0.0 }
 0x23a   :  { %v3475_v26 = vmax.f32 %v3465_v21, %v3325_v45  ;;  %v3326_v63 = vmax.f32 %v2882_v59, 0.0 }
 0x23b   :  { %v3478_v17 = vmax.f32 %v3468_v12, %v3328_v9 }
 0x23c   :  { %v3476_v3 = vmax.f32 %v3466_v15, %v3326_v63  ;;  %v2245_v58 = vpop.f32.mrb[148].mxu0  ;;  %v5054_v22 = vpop.f32.mrb[148].mxu1 }
 0x23d   :  { %v2903_v27 = vadd.f32 %v5054_v22, %v2229_v30  ;;  %v2247_v57 = vpop.f32.mrb[149].mxu0  ;;  %v2894_v37 = vpop.f32.mrb[149].mxu1 }
 0x23e   :  { %v2895_v60 = vadd.f32 %v2894_v37, %v6774_v19  ;;  %v2248_v7 = vpop.f32.mrb[150].mxu0  ;;  %v5055_v44 = vpop.f32.mrb[150].mxu1 }
 0x23f   :  { %v3331_v0 = vmax.f32 %v2903_v27, 0.0  ;;  %v2906_v10 = vadd.f32 %v5055_v44, %v2232_v6  ;;  %v2250_v61 = vpop.f32.mrb[151].mxu0  ;;  %v2897_v35 = vpop.f32.mrb[151].mxu1 }
 0x240   :  { %v3329_v49 = vmax.f32 %v2895_v60, 0.0  ;;  %v2898_v11 = vadd.f32 %v2897_v35, %v6778_v39 }
 0x241   :  { %v3481_v21 = vmax.f32 %v3471_v2, %v3331_v0  ;;  %v3332_v4 = vmax.f32 %v2906_v10, 0.0 }
 0x242   :  { %v3479_v34 = vmax.f32 %v3469_v40, %v3329_v49  ;;  %v3330_v15 = vmax.f32 %v2898_v11, 0.0 }
 0x243   :  { %v3482_v12 = vmax.f32 %v3472_v18, %v3332_v4 }
 0x244   :  { %v3480_v1 = vmax.f32 %v3470_v52, %v3330_v15  ;;  %v2253_v30 = vpop.f32.mrb[152].mxu0  ;;  %v5058_v5 = vpop.f32.mrb[152].mxu1 }
 0x245   :  { %v2919_v55 = vadd.f32 %v5058_v5, %v2245_v58  ;;  %v2255_v38 = vpop.f32.mrb[153].mxu0  ;;  %v2910_v19 = vpop.f32.mrb[153].mxu1 }
 0x246   :  { %v2911_v54 = vadd.f32 %v2910_v19, %v2237_v20  ;;  %v2256_v47 = vpop.f32.mrb[154].mxu0  ;;  %v5059_v48 = vpop.f32.mrb[154].mxu1 }
 0x247   :  { %v3335_v6 = vmax.f32 %v2919_v55, 0.0  ;;  %v2922_v33 = vadd.f32 %v5059_v48, %v2248_v7  ;;  %v2258_v50 = vpop.f32.mrb[155].mxu0  ;;  %v2913_v31 = vpop.f32.mrb[155].mxu1 }
 0x248   :  { %v3333_v25 = vmax.f32 %v2911_v54, 0.0  ;;  %v2914_v39 = vadd.f32 %v2913_v31, %v2240_v43 }
 0x249   :  { %v6794_v16 = vmax.f32 %v3475_v26, %v3335_v6  ;;  %v3336_v40 = vmax.f32 %v2922_v33, 0.0 }
 0x24a   :  { %v3483_v51 = vmax.f32 %v3473_v41, %v3333_v25  ;;  %v3334_v2 = vmax.f32 %v2914_v39, 0.0 }
 0x24b   :  { %v6796_v52 = vmax.f32 %v3476_v3, %v3336_v40 }
 0x24c   :  { %v3484_v8 = vmax.f32 %v3474_v53, %v3334_v2  ;;  %v2261_v18 = vpop.f32.mrb[156].mxu0  ;;  %v5062_v29 = vpop.f32.mrb[156].mxu1 }
 0x24d   :  { %v2935_v42 = vadd.f32 %v5062_v29, %v2261_v18  ;;  %v2263_v20 = vpop.f32.mrb[157].mxu0  ;;  %v2926_v36 = vpop.f32.mrb[157].mxu1 }
 0x24e   :  { %v2927_v13 = vadd.f32 %v2926_v36, %v2253_v30  ;;  %v2264_v56 = vpop.f32.mrb[158].mxu0  ;;  %v5063_v28 = vpop.f32.mrb[158].mxu1 }
 0x24f   :  { %v3339_v46 = vmax.f32 %v2935_v42, 0.0  ;;  %v2938_v24 = vadd.f32 %v5063_v28, %v2264_v56  ;;  %v2266_v23 = vpop.f32.mrb[159].mxu0  ;;  %v2929_v43 = vpop.f32.mrb[159].mxu1 }
 0x250   :  { %v3337_v32 = vmax.f32 %v2927_v13, 0.0  ;;  %v2930_v45 = vadd.f32 %v2929_v43, %v2256_v47 }
 0x251   :  { %v6798_v59 = vmax.f32 %v3479_v34, %v3339_v46  ;;  %v3340_v41 = vmax.f32 %v2938_v24, 0.0 }
 0x252   :  { %v3487_v9 = vmax.f32 %v3477_v62, %v3337_v32  ;;  %v3338_v26 = vmax.f32 %v2930_v45, 0.0 }
 0x253   :  { %v6800_v53 = vmax.f32 %v3480_v1, %v3340_v41 }
 0x254   :  { %v3488_v63 = vmax.f32 %v3478_v17, %v3338_v26  ;;  %v2269_v3 = vpop.f32.mrb[160].mxu0  ;;  %v5066_v58 = vpop.f32.mrb[160].mxu1 }
 0x255   :  { %v2271_v22 = vpop.f32.mrb[161].mxu0  ;;  %v2942_v27 = vpop.f32.mrb[161].mxu1 }
 0x256   :  { %v2943_v57 = vadd.f32 %v2942_v27, %v2269_v3  ;;  %v2272_v37 = vpop.f32.mrb[162].mxu0  ;;  %v5067_v60 = vpop.f32.mrb[162].mxu1 }
 0x257   :  { %v2274_v7 = vpop.f32.mrb[163].mxu0  ;;  %v2945_v44 = vpop.f32.mrb[163].mxu1 }
 0x258   :  { %v3341_v0 = vmax.f32 %v2943_v57, 0.0  ;;  %v2946_v10 = vadd.f32 %v2945_v44, %v2272_v37 }
 0x25a   :  { %v6802_v61 = vmax.f32 %v3481_v21, %v3341_v0  ;;  %v3342_v35 = vmax.f32 %v2946_v10, 0.0 }
 0x25c   :  { %v6804_v49 = vmax.f32 %v3482_v12, %v3342_v35  ;;  %v2277_v62 = vpop.f32.mrb[164].mxu0  ;;  %v5070_v11 = vpop.f32.mrb[164].mxu1 }
 0x25d   :  { %v2951_v4 = vadd.f32 %v5066_v58, %v2277_v62  ;;  %v2279_v17 = vpop.f32.mrb[165].mxu0  ;;  %v2958_v34 = vpop.f32.mrb[165].mxu1 }
 0x25e   :  { %v2280_v15 = vpop.f32.mrb[166].mxu0  ;;  %v5071_v1 = vpop.f32.mrb[166].mxu1 }
 0x25f   :  { %v3343_v30 = vmax.f32 %v2951_v4, 0.0  ;;  %v2954_v5 = vadd.f32 %v5067_v60, %v2280_v15  ;;  %v2282_v55 = vpop.f32.mrb[167].mxu0  ;;  %v2961_v38 = vpop.f32.mrb[167].mxu1 }
 0x261   :  { %v6806_v19 = vmax.f32 %v3483_v51, %v3343_v30  ;;  %v3344_v54 = vmax.f32 %v2954_v5, 0.0 }
 0x263   :  { %v6808_v47 = vmax.f32 %v3484_v8, %v3344_v54 }
 0x264   :  { %v2285_v21 = vpop.f32.mrb[168].mxu0  ;;  %v5074_v48 = vpop.f32.mrb[168].mxu1 }
 0x265   :  { %v2959_v12 = vadd.f32 %v2958_v34, %v2285_v21  ;;  %v2287_v6 = vpop.f32.mrb[169].mxu0  ;;  %v2974_v33 = vpop.f32.mrb[169].mxu1 }
 0x266   :  { %v2288_v50 = vpop.f32.mrb[170].mxu0  ;;  %v5075_v31 = vpop.f32.mrb[170].mxu1 }
 0x267   :  { %v3345_v25 = vmax.f32 %v2959_v12, 0.0  ;;  %v2962_v39 = vadd.f32 %v2961_v38, %v2288_v50  ;;  %v2290_v40 = vpop.f32.mrb[171].mxu0  ;;  %v2977_v2 = vpop.f32.mrb[171].mxu1 }
 0x269   :  { %v6811_v18 = vmax.f32 %v6794_v16, %v3345_v25  ;;  %v3346_v29 = vmax.f32 %v2962_v39, 0.0 }
 0x26b   :  { %v6814_v51 = vmax.f32 %v6796_v52, %v3346_v29 }
 0x26c   :  { %v2293_v8 = vpop.f32.mrb[172].mxu0  ;;  %v5078_v42 = vpop.f32.mrb[172].mxu1 }
 0x26d   :  { %v2967_v20 = vadd.f32 %v5070_v11, %v2293_v8  ;;  %v2295_v36 = vpop.f32.mrb[173].mxu0  ;;  %v2990_v13 = vpop.f32.mrb[173].mxu1 }
 0x26e   :  { %v2296_v56 = vpop.f32.mrb[174].mxu0  ;;  %v5079_v28 = vpop.f32.mrb[174].mxu1 }
 0x26f   :  { %v3347_v46 = vmax.f32 %v2967_v20, 0.0  ;;  %v2970_v24 = vadd.f32 %v5071_v1, %v2296_v56  ;;  %v2298_v23 = vpop.f32.mrb[175].mxu0  ;;  %v2993_v43 = vpop.f32.mrb[175].mxu1 }
 0x271   :  { %v6816_v32 = vmax.f32 %v3487_v9, %v3347_v46  ;;  %v3348_v45 = vmax.f32 %v2970_v24, 0.0 }
 0x273   :  { %v6818_v16 = vmax.f32 %v3488_v63, %v3348_v45 }
 0x274   :  { %v2301_v41 = vpop.f32.mrb[176].mxu0  ;;  %v6820_v26 = vpop.f32.mrb[176].mxu1 }
 0x275   :  { %v2975_v52 = vadd.f32 %v2974_v33, %v2301_v41  ;;  %v2303_v3 = vpop.f32.mrb[177].mxu0  ;;  %v3006_v58 = vpop.f32.mrb[177].mxu1 }
 0x276   :  { %v2304_v22 = vpop.f32.mrb[178].mxu0  ;;  %v6822_v27 = vpop.f32.mrb[178].mxu1 }
 0x277   :  { %v3349_v57 = vmax.f32 %v2975_v52, 0.0  ;;  %v2978_v37 = vadd.f32 %v2977_v2, %v2304_v22  ;;  %v2306_v60 = vpop.f32.mrb[179].mxu0  ;;  %v3009_v7 = vpop.f32.mrb[179].mxu1 }
 0x279   :  { %v6825_v44 = vmax.f32 %v6798_v59, %v3349_v57  ;;  %v3350_v9 = vmax.f32 %v2978_v37, 0.0 }
 0x27b   :  { %v6828_v63 = vmax.f32 %v6800_v53, %v3350_v9 }
 0x27c   :  { %v2309_v0 = vpop.f32.mrb[180].mxu0  ;;  %v6830_v10 = vpop.f32.mrb[180].mxu1 }
 0x27d   :  { %v2983_v35 = vadd.f32 %v5074_v48, %v2309_v0  ;;  %v2311_v62 = vpop.f32.mrb[181].mxu0  ;;  %v6832_v11 = vpop.f32.mrb[181].mxu1 }
 0x27e   :  { %v2312_v4 = vpop.f32.mrb[182].mxu0  ;;  %v6834_v17 = vpop.f32.mrb[182].mxu1 }
 0x27f   :  { %v3351_v34 = vmax.f32 %v2983_v35, 0.0  ;;  %v2986_v15 = vadd.f32 %v5075_v31, %v2312_v4  ;;  %v2314_v1 = vpop.f32.mrb[183].mxu0  ;;  %v6836_v30 = vpop.f32.mrb[183].mxu1 }
 0x281   :  { %v6839_v59 = vmax.f32 %v6802_v61, %v3351_v34  ;;  %v3352_v53 = vmax.f32 %v2986_v15, 0.0 }
 0x283   :  { %v6842_v5 = vmax.f32 %v6804_v49, %v3352_v53 }
 0x284   :  { %v2317_v55 = vpop.f32.mrb[184].mxu0  ;;  %v6844_v38 = vpop.f32.mrb[184].mxu1 }
 0x285   :  { %v2991_v54 = vadd.f32 %v2990_v13, %v2317_v55  ;;  %v2319_v21 = vpop.f32.mrb[185].mxu0  ;;  %v6846_v48 = vpop.f32.mrb[185].mxu1 }
 0x286   :  { %v2320_v12 = vpop.f32.mrb[186].mxu0  ;;  %v6848_v6 = vpop.f32.mrb[186].mxu1 }
 0x287   :  { %v3353_v33 = vmax.f32 %v2991_v54, 0.0  ;;  %v2994_v50 = vadd.f32 %v2993_v43, %v2320_v12  ;;  %v2322_v31 = vpop.f32.mrb[187].mxu0  ;;  %v6850_v25 = vpop.f32.mrb[187].mxu1 }
 0x289   :  { %v6853_v61 = vmax.f32 %v6806_v19, %v3353_v33  ;;  %v3354_v49 = vmax.f32 %v2994_v50, 0.0 }
 0x28b   :  { %v6856_v39 = vmax.f32 %v6808_v47, %v3354_v49 }
 0x28c   :  { %v2325_v40 = vpop.f32.mrb[188].mxu0  ;;  %v6858_v2 = vpop.f32.mrb[188].mxu1 }
 0x28d   :  { %v2999_v29 = vadd.f32 %v5078_v42, %v2325_v40  ;;  %v2327_v8 = vpop.f32.mrb[189].mxu0  ;;  %v6860_v20 = vpop.f32.mrb[189].mxu1 }
 0x28e   :  { %v2328_v36 = vpop.f32.mrb[190].mxu0  ;;  %v6862_v13 = vpop.f32.mrb[190].mxu1 }
 0x28f   :  { %v3355_v56 = vmax.f32 %v2999_v29, 0.0  ;;  %v3002_v46 = vadd.f32 %v5079_v28, %v2328_v36  ;;  %v2330_v24 = vpop.f32.mrb[191].mxu0  ;;  %v6864_v23 = vpop.f32.mrb[191].mxu1 }
 0x290   :  { %v7967_v24 = vld [vmem:[#allocation4_spill] sm:$0xff] }
 0x291   :  { %v6867_v19 = vmax.f32 %v6811_v18, %v3355_v56  ;;  %v3356_v47 = vmax.f32 %v3002_v46, 0.0 }
 0x293   :  { %v6870_v43 = vmax.f32 %v6814_v51, %v3356_v47 }
 0x294   :  { %v2333_v45 = vpop.f32.mrb[192].mxu0  ;;  %v6872_v42 = vpop.f32.mrb[192].mxu1 }
 0x295   :  { %v3007_v41 = vadd.f32 %v3006_v58, %v2333_v45  ;;  %v2335_v52 = vpop.f32.mrb[193].mxu0  ;;  %v6874_v3 = vpop.f32.mrb[193].mxu1 }
 0x296   :  { %v2336_v22 = vpop.f32.mrb[194].mxu0  ;;  %v6876_v57 = vpop.f32.mrb[194].mxu1  ;;  %v6928_v52 = vld [vmem:[%s7864_s2 + $0x50] sm:$0xff]  }
 0x297   :  { %v3357_v28 = vmax.f32 %v3007_v41, 0.0  ;;  %v3010_v37 = vadd.f32 %v3009_v7, %v2336_v22  ;;  %v2338_v60 = vpop.f32.mrb[195].mxu0  ;;  %v6878_v9 = vpop.f32.mrb[195].mxu1  ;;  %v6923_v41 = vld [vmem:[%s7864_s2 + $0x10] sm:$0xff]   ;;  %v7968_v22 = vld [vmem:[#allocation3_spill] sm:$0xff] }
 0x299   :  { %v6881_v18 = vmax.f32 %v6816_v32, %v3357_v28  ;;  %v3358_v51 = vmax.f32 %v3010_v37, 0.0 }
 0x29b   :  { %v6884_v0 = vmax.f32 %v6818_v16, %v3358_v51 }
 0x29c   :  { %v2341_v35 = vpop.f32.mrb[196].mxu0  ;;  %v6886_v58 = vpop.f32.mrb[196].mxu1 }
 0x29d   :  { %v3015_v62 = vadd.f32 %v6820_v26, %v2341_v35  ;;  %v2343_v4 = vpop.f32.mrb[197].mxu0  ;;  %v6889_v34 = vpop.f32.mrb[197].mxu1  ;;  %v6905_v26 = vld [vmem:[%s7864_s2] sm:$0xff]   ;;  %v6942_v35 = vld [vmem:[%s7864_s2 + $0x38] sm:$0xff]  }
 0x29e   :  { %v2344_v15 = vpop.f32.mrb[198].mxu0  ;;  %v6891_v7 = vpop.f32.mrb[198].mxu1 }
 0x29f   :  { %v3359_v1 = vmax.f32 %v3015_v62, 0.0  ;;  %v3018_v53 = vadd.f32 %v6822_v27, %v2344_v15  ;;  %v2346_v32 = vpop.f32.mrb[199].mxu0  ;;  %v6894_v55 = vpop.f32.mrb[199].mxu1 }
 0x2a0   :  { %v6956_v32 = vld [vmem:[%s7864_s2 + $0x78] sm:$0xff]  }
 0x2a1   :  { %v6897_v16 = vmax.f32 %v6825_v44, %v3359_v1  ;;  %v3360_v54 = vmax.f32 %v3018_v53, 0.0  ;;  %v6912_v44 = vld [vmem:[%s7864_s2 + $0x28] sm:$0xff]   ;;  %v6951_v53 = vld [vmem:[%s7864_s2 + $0x30] sm:$0xff]  }
 0x2a3   :  { %v6900_v21 = vmax.f32 %v6828_v63, %v3360_v54  ;;  %v7966_v63 = vld [vmem:[#allocation2_spill] sm:$0xff] }
 0x2a4   :  { %v2349_v12 = vpop.f32.mrb[200].mxu0  ;;  %v5106_v33 = vpop.f32.mrb[200].mxu1 }
 0x2a5   :  { %v3023_v50 = vadd.f32 %v6832_v11, %v2349_v12  ;;  %v3111_v27 = vadd.f32 %v5106_v33, %v5995_v14  ;;  %v2351_v31 = vpop.f32.mrb[201].mxu0  ;;  %v3102_v49 = vpop.f32.mrb[201].mxu1 }
 0x2a6   :  { %v6915_v40 = vadd.f32 %v3102_v49, %v7966_v63  ;;  %v2352_v29 = vpop.f32.mrb[202].mxu0  ;;  %v5107_v8 = vpop.f32.mrb[202].mxu1  ;;  %v6968_v49 = vld [vmem:[%s7864_s2 + $0x60] sm:$0xff]  }
 0x2a7   :  { %v3361_v56 = vmax.f32 %v3023_v50, 0.0  ;;  %v3383_v46 = vmax.f32 %v3111_v27, 0.0  ;;  %v3026_v11 = vadd.f32 %v6836_v30, %v2352_v29  ;;  %v3114_v14 = vadd.f32 %v5107_v8, %v7967_v24  ;;  %v2354_v47 = vpop.f32.mrb[203].mxu0  ;;  %v3105_v45 = vpop.f32.mrb[203].mxu1  ;;  %v6935_v30 = vld [vmem:[%s7864_s2 + $0x8] sm:$0xff]   ;;  %v7976_v27 = vld [vmem:[#allocation9_spill] sm:$0xff] }
 0x2a8   :  { %v3106_v28 = vadd.f32 %v3105_v45, %v7968_v22  ;;  %v7969_v24 = vld [vmem:[#allocation7_spill] sm:$0xff] }
 0x2a9   :  { %v6945_v62 = vmax.f32 %v6839_v59, %v3361_v56  ;;  %v3513_v4 = vmax.f32 %v6853_v61, %v3383_v46  ;;  %v3362_v15 = vmax.f32 %v3026_v11, 0.0  ;;  %v3384_v1 = vmax.f32 %v3114_v14, 0.0  ;;  %v7044_v56 = vld [vmem:[%s7864_s2 + $0xa0] sm:$0xff]  }
 0x2aa   :  { %v3382_v54 = vmax.f32 %v3106_v28, 0.0  ;;  %v6982_v28 = vld [vmem:[%s7864_s2 + $0x58] sm:$0xff]  }
 0x2ab   :  { %v3512_v61 = vmax.f32 %v6842_v5, %v3362_v15  ;;  %v3514_v50 = vmax.f32 %v6856_v39, %v3384_v1  ;;  %v7970_v15 = vld [vmem:[#allocation5_spill] sm:$0xff] }
 0x2ac   :  { %v2357_v63 = vpop.f32.mrb[204].mxu0  ;;  %v5110_v29 = vpop.f32.mrb[204].mxu1 }
 0x2ad   :  { %v6974_v39 = vmax.f32 %v3512_v61, %v3382_v54  ;;  %v3031_v11 = vadd.f32 %v6830_v10, %v2357_v63  ;;  %v3127_v14 = vadd.f32 %v5110_v29, %v7969_v24  ;;  %v2359_v47 = vpop.f32.mrb[205].mxu0  ;;  %v3118_v45 = vpop.f32.mrb[205].mxu1  ;;  %v7972_v10 = vld [vmem:[#allocation6_spill] sm:$0xff]  ;;  %v7974_v54 = vld [vmem:[#allocation11_spill] sm:$0xff] }
 0x2ae   :  { %v3119_v1 = vadd.f32 %v3118_v45, %v7970_v15  ;;  %v2360_v46 = vpop.f32.mrb[206].mxu0  ;;  %v5111_v31 = vpop.f32.mrb[206].mxu1  ;;  %v7971_v47 = vld [vmem:[#allocation8_spill] sm:$0xff]  ;;  %v6993_v45 = vld [vmem:[%s7864_s2 + $0x18] sm:$0xff]   ;;  %v6998_v15 = vld [vmem:[%s7864_s2 + $0x40] sm:$0xff]  }
 0x2af   :  { %v3363_v63 = vmax.f32 %v3031_v11, 0.0  ;;  %v3387_v29 = vmax.f32 %v3127_v14, 0.0  ;;  %v3034_v24 = vadd.f32 %v6834_v17, %v2360_v46  ;;  %v3130_v5 = vadd.f32 %v5111_v31, %v7971_v47  ;;  %v2362_v8 = vpop.f32.mrb[207].mxu0  ;;  %v3121_v12 = vpop.f32.mrb[207].mxu1  ;;  %v7006_v17 = vld [vmem:[%s7864_s2 + $0x20] sm:$0xff]   ;;  %v7013_v46 = vld [vmem:[%s7864_s2 + $0x88] sm:$0xff]  }
 0x2b0   :  { %v3385_v61 = vmax.f32 %v3119_v1, 0.0  ;;  %v7001_v11 = vadd.f32 %v3121_v12, %v7972_v10  ;;  %7973 = vst [vmem:[#allocation2_spill] sm:$0xff] %v7013_v46  ;;  %v7023_v47 = vld [vmem:[%s7864_s2 + $0x48] sm:$0xff]   ;;  %v7028_v8 = vld [vmem:[%s7864_s2 + $0x80] sm:$0xff]  }
 0x2b1   :  { %v7015_v14 = vmax.f32 %v3513_v4, %v3363_v63  ;;  %v7018_v1 = vmax.f32 %v6881_v18, %v3387_v29  ;;  %v3364_v12 = vmax.f32 %v3034_v24, 0.0  ;;  %v3388_v10 = vmax.f32 %v3130_v5, 0.0  ;;  %v7977_v63 = vld [vmem:[#allocation12_spill] sm:$0xff] }
 0x2b2   :  { %v3515_v31 = vmax.f32 %v6867_v19, %v3385_v61 }
 0x2b3   :  { %v7034_v29 = vmax.f32 %v3514_v50, %v3364_v12  ;;  %v7037_v5 = vmax.f32 %v6884_v0, %v3388_v10  ;;  %v7052_v0 = vld [vmem:[%s7864_s2 + $0x68] sm:$0xff]   ;;  %v7064_v50 = vld [vmem:[%s7864_s2 + $0x70] sm:$0xff]  }
 0x2b4   :  { %v2365_v19 = vpop.f32.mrb[208].mxu0  ;;  %v5114_v61 = vpop.f32.mrb[208].mxu1  ;;  %7975 = vst [vmem:[#allocation4_spill] sm:$0xff] %v7064_v50  ;;  %v7989_v50 = vld [vmem:[#allocation16_spill] sm:$0xff] }
 0x2b5   :  { %v3039_v10 = vadd.f32 %v6846_v48, %v2365_v19  ;;  %v7057_v24 = vadd.f32 %v5114_v61, %v7974_v54  ;;  %v2367_v4 = vpop.f32.mrb[209].mxu0  ;;  %v3134_v22 = vpop.f32.mrb[209].mxu1  ;;  %v7979_v48 = vld [vmem:[#allocation10_spill] sm:$0xff] }
 0x2b6   :  { %v3135_v59 = vadd.f32 %v3134_v22, %v7976_v27  ;;  %v2368_v33 = vpop.f32.mrb[210].mxu0  ;;  %v5115_v12 = vpop.f32.mrb[210].mxu1  ;;  %v7076_v27 = vld [vmem:[%s7864_s2 + $0xc8] sm:$0xff]  }
 0x2b7   :  { %v3365_v19 = vmax.f32 %v3039_v10, 0.0  ;;  %v3042_v61 = vadd.f32 %v6850_v25, %v2368_v33  ;;  %v3146_v18 = vadd.f32 %v5115_v12, %v7977_v63  ;;  %v2370_v51 = vpop.f32.mrb[211].mxu0  ;;  %v3137_v60 = vpop.f32.mrb[211].mxu1  ;;  %7978 = vst [vmem:[#allocation3_spill] sm:$0xff] %v7076_v27  ;;  %v7083_v25 = vld [vmem:[%s7864_s2 + $0x90] sm:$0xff]   ;;  %v7104_v33 = vld [vmem:[%s7864_s2 + $0xa8] sm:$0xff]  }
 0x2b8   :  { %v3389_v22 = vmax.f32 %v3135_v59, 0.0  ;;  %v3138_v36 = vadd.f32 %v3137_v60, %v7979_v48  ;;  %7980 = vst [vmem:[#allocation7_spill] sm:$0xff] %v7083_v25  ;;  %v7088_v51 = vld [vmem:[%s7864_s2 + $0x98] sm:$0xff]   ;;  %v7095_v60 = vld [vmem:[%s7864_s2 + $0xb0] sm:$0xff]   ;;  %7983 = vst [vmem:[#allocation6_spill] sm:$0xff] %v7104_v33 }
 0x2b9   :  { %7981 = vst [vmem:[#allocation5_spill] sm:$0xff] %v7088_v51  ;;  %v3525_v63 = vmax.f32 %v3515_v31, %v3365_v19  ;;  %v3366_v12 = vmax.f32 %v3042_v61, 0.0  ;;  %v3392_v10 = vmax.f32 %v3146_v18, 0.0  ;;  %7982 = vst [vmem:[#allocation8_spill] sm:$0xff] %v7095_v60  ;;  %v7985_v61 = vld [vmem:[#allocation15_spill] sm:$0xff] }
 0x2ba   :  { %v7098_v48 = vmax.f32 %v6897_v16, %v3389_v22  ;;  %v3390_v54 = vmax.f32 %v3138_v36, 0.0  ;;  %v7118_v36 = vld [vmem:[%s7864_s2 + $0xf0] sm:$0xff]  }
 0x2bb   :  { %v7108_v18 = vmax.f32 %v6870_v43, %v3366_v12  ;;  %v7111_v19 = vmax.f32 %v6974_v39, %v3392_v10  ;;  %7984 = vst [vmem:[#allocation11_spill] sm:$0xff] %v7118_v36  ;;  %v7990_v39 = vld [vmem:[#allocation14_spill] sm:$0xff] }
 0x2bc   :  { %v7121_v22 = vmax.f32 %v6900_v21, %v3390_v54  ;;  %v2373_v37 = vpop.f32.mrb[212].mxu0  ;;  %v5118_v31 = vpop.f32.mrb[212].mxu1  ;;  %v7133_v21 = vld [vmem:[%s7864_s2 + $0xd8] sm:$0xff]  }
 0x2bd   :  { %v3047_v10 = vadd.f32 %v6844_v38, %v2373_v37  ;;  %v3159_v16 = vadd.f32 %v5118_v31, %v7985_v61  ;;  %v2375_v59 = vpop.f32.mrb[213].mxu0  ;;  %v3150_v4 = vpop.f32.mrb[213].mxu1  ;;  %7986 = vst [vmem:[#allocation9_spill] sm:$0xff] %v7133_v21  ;;  %v7987_v54 = vld [vmem:[#allocation13_spill] sm:$0xff]  ;;  %v7141_v37 = vld [vmem:[%s7864_s2 + $0xd0] sm:$0xff]  }
 0x2be   :  { %v3151_v43 = vadd.f32 %v3150_v4, %v7987_v54  ;;  %v2376_v12 = vpop.f32.mrb[214].mxu0  ;;  %v5119_v25 = vpop.f32.mrb[214].mxu1  ;;  %7988 = vst [vmem:[#allocation12_spill] sm:$0xff] %v7141_v37  ;;  %v7152_v38 = vld [vmem:[%s7864_s2 + $0xb8] sm:$0xff]  }
 0x2bf   :  { %v3367_v31 = vmax.f32 %v3047_v10, 0.0  ;;  %v3395_v61 = vmax.f32 %v3159_v16, 0.0  ;;  %v3050_v46 = vadd.f32 %v6848_v6, %v2376_v12  ;;  %v7146_v27 = vadd.f32 %v5119_v25, %v7989_v50  ;;  %v2378_v4 = vpop.f32.mrb[215].mxu0  ;;  %v3153_v54 = vpop.f32.mrb[215].mxu1  ;;  %7991 = vst [vmem:[#allocation10_spill] sm:$0xff] %v7152_v38  ;;  %v7157_v10 = vld [vmem:[%s7864_s2 + $0xc0] sm:$0xff]  }
 0x2c0   :  { %v3393_v51 = vmax.f32 %v3151_v43, 0.0  ;;  %v3154_v33 = vadd.f32 %v3153_v54, %v7990_v39  ;;  %7992 = vst [vmem:[#allocation15_spill] sm:$0xff] %v7157_v10  ;;  %v7168_v39 = vld [vmem:[%s7864_s2 + $0xf8] sm:$0xff]   ;;  %v7173_v4 = vld [vmem:[%s7864_s2 + $0x100] sm:$0xff]   ;;  %v7996_v50 = vld [vmem:[#allocation19_spill] sm:$0xff] }
 0x2c1   :  { %v3527_v25 = vmax.f32 %v7018_v1, %v3367_v31  ;;  %v7162_v16 = vmax.f32 %v3525_v63, %v3395_v61  ;;  %v3368_v43 = vmax.f32 %v3050_v46, 0.0  ;;  %7993 = vst [vmem:[#allocation13_spill] sm:$0xff] %v7168_v39  ;;  %7994 = vst [vmem:[#allocation16_spill] sm:$0xff] %v7173_v4  ;;  %v7183_v63 = vld [vmem:[%s7864_s2 + $0x118] sm:$0xff]   ;;  %v7257_v4 = vld [vmem:[%s7864_s2 + $0x168] sm:$0xff]  }
 0x2c2   :  { %v7176_v54 = vmax.f32 %v7015_v14, %v3393_v51  ;;  %v3394_v59 = vmax.f32 %v3154_v33, 0.0  ;;  %7995 = vst [vmem:[#allocation14_spill] sm:$0xff] %v7183_v63  ;;  %v7192_v14 = vld [vmem:[%s7864_s2 + $0xe0] sm:$0xff]   ;;  %v7997_v1 = vld [vmem:[#allocation17_spill] sm:$0xff]  ;;  %8004 = vst [vmem:[#allocation41_spill] sm:$0xff] %v7257_v4 }
 0x2c3   :  { %v3528_v31 = vmax.f32 %v7037_v5, %v3368_v43  ;;  %v7201_v5 = vld [vmem:[%s7864_s2 + $0xe8] sm:$0xff]   ;;  %v8001_v43 = vld [vmem:[#allocation18_spill] sm:$0xff] }
 0x2c4   :  { %v7195_v51 = vmax.f32 %v7034_v29, %v3394_v59  ;;  %v2381_v33 = vpop.f32.mrb[216].mxu0  ;;  %v5122_v46 = vpop.f32.mrb[216].mxu1  ;;  %v7224_v59 = vld [vmem:[%s7864_s2 + $0x128] sm:$0xff]  }
 0x2c5   :  { %v3055_v12 = vadd.f32 %v6860_v20, %v2381_v33  ;;  %v3175_v61 = vadd.f32 %v5122_v46, %v7996_v50  ;;  %v2383_v36 = vpop.f32.mrb[217].mxu0  ;;  %v3166_v29 = vpop.f32.mrb[217].mxu1  ;;  %v7216_v20 = vld [vmem:[%s7864_s2 + $0x140] sm:$0xff]   ;;  %v7999_v46 = vld [vmem:[#allocation20_spill] sm:$0xff]  ;;  %8000 = vst [vmem:[#allocation17_spill] sm:$0xff] %v7224_v59 }
 0x2c6   :  { %v3167_v10 = vadd.f32 %v3166_v29, %v7997_v1  ;;  %v2384_v37 = vpop.f32.mrb[218].mxu0  ;;  %v5123_v38 = vpop.f32.mrb[218].mxu1  ;;  %7998 = vst [vmem:[#allocation19_spill] sm:$0xff] %v7216_v20 }
 0x2c7   :  { %v3369_v36 = vmax.f32 %v3055_v12, 0.0  ;;  %v3058_v50 = vadd.f32 %v6864_v23, %v2384_v37  ;;  %v3178_v33 = vadd.f32 %v5123_v38, %v7999_v46  ;;  %v2386_v21 = vpop.f32.mrb[219].mxu0  ;;  %v3169_v1 = vpop.f32.mrb[219].mxu1  ;;  %v7232_v23 = vld [vmem:[%s7864_s2 + $0x108] sm:$0xff]   ;;  %v3399_v38 = vmax.f32 %v3175_v61, 0.0  ;;  %v7238_v46 = vld [vmem:[%s7864_s2 + $0x110] sm:$0xff]  }
 0x2c8   :  { %v3397_v6 = vmax.f32 %v3167_v10, 0.0  ;;  %v3170_v60 = vadd.f32 %v3169_v1, %v8001_v43  ;;  %8002 = vst [vmem:[#allocation20_spill] sm:$0xff] %v7232_v23  ;;  %8003 = vst [vmem:[#allocation18_spill] sm:$0xff] %v7238_v46  ;;  %v7243_v10 = vld [vmem:[%s7864_s2 + $0x120] sm:$0xff]  }
 0x2c9   :  { %v3529_v21 = vmax.f32 %v7098_v48, %v3369_v36  ;;  %v3370_v37 = vmax.f32 %v3058_v50, 0.0  ;;  %v3400_v50 = vmax.f32 %v3178_v33, 0.0  ;;  %v8005_v33 = vld [vmem:[#allocation23_spill] sm:$0xff]  ;;  %v8008_v48 = vld [vmem:[#allocation24_spill] sm:$0xff] }
 0x2ca   :  { %v7246_v1 = vmax.f32 %v3527_v25, %v3397_v6  ;;  %v3398_v12 = vmax.f32 %v3170_v60, 0.0 }
 0x2cb   :  { %v7250_v61 = vmax.f32 %v3529_v21, %v3399_v38  ;;  %v3530_v36 = vmax.f32 %v7121_v22, %v3370_v37 }
 0x2cc   :  { %v7259_v43 = vmax.f32 %v3528_v31, %v3398_v12  ;;  %v2389_v6 = vpop.f32.mrb[220].mxu0  ;;  %v5126_v60 = vpop.f32.mrb[220].mxu1  ;;  %v7272_v31 = vld [vmem:[%s7864_s2 + $0x148] sm:$0xff]   ;;  %v7277_v12 = vld [vmem:[%s7864_s2 + $0x150] sm:$0xff]  }
 0x2cd   :  { %v7264_v38 = vmax.f32 %v3530_v36, %v3400_v50  ;;  %v3063_v22 = vadd.f32 %v6858_v2, %v2389_v6  ;;  %v3191_v37 = vadd.f32 %v5126_v60, %v8005_v33  ;;  %v2391_v29 = vpop.f32.mrb[221].mxu0  ;;  %v3182_v63 = vpop.f32.mrb[221].mxu1  ;;  %8006 = vst [vmem:[#allocation23_spill] sm:$0xff] %v7277_v12  ;;  %v8007_v36 = vld [vmem:[#allocation21_spill] sm:$0xff]  ;;  %v8009_v6 = vld [vmem:[#allocation22_spill] sm:$0xff]  ;;  %v3391_v60 = vmax.f32 %v7057_v24, 0.0 }
 0x2ce   :  { %v3183_v50 = vadd.f32 %v3182_v63, %v8007_v36  ;;  %v2392_v21 = vpop.f32.mrb[222].mxu0  ;;  %v5127_v2 = vpop.f32.mrb[222].mxu1  ;;  %v7288_v63 = vld [vmem:[%s7864_s2 + $0x130] sm:$0xff]   ;;  %v3381_v36 = vmax.f32 %v6915_v40, 0.0  ;;  %v8014_v40 = vld [vmem:[#allocation25_spill] sm:$0xff] }
 0x2cf   :  { %v3371_v33 = vmax.f32 %v3063_v22, 0.0  ;;  %v3403_v25 = vmax.f32 %v3191_v37, 0.0  ;;  %v3066_v20 = vadd.f32 %v6862_v13, %v2392_v21  ;;  %v3194_v59 = vadd.f32 %v5127_v2, %v8008_v48  ;;  %v2394_v23 = vpop.f32.mrb[223].mxu0  ;;  %v3185_v39 = vpop.f32.mrb[223].mxu1  ;;  %v7299_v21 = vld [vmem:[%s7864_s2 + $0x138] sm:$0xff]  }
 0x2d0   :  { %v3186_v46 = vadd.f32 %v3185_v39, %v8009_v6  ;;  %8010 = vst [vmem:[#allocation21_spill] sm:$0xff] %v7299_v21 }
 0x2d1   :  { %v3521_v37 = vmax.f32 %v6945_v62, %v3371_v33  ;;  %v3543_v13 = vmax.f32 %v7176_v54, %v3403_v25  ;;  %v3372_v48 = vmax.f32 %v3066_v20, 0.0  ;;  %v3404_v23 = vmax.f32 %v3194_v59, 0.0  ;;  %v7310_v59 = vld [vmem:[%s7864_s2 + $0x178] sm:$0xff]   ;;  %v7315_v20 = vld [vmem:[%s7864_s2 + $0x190] sm:$0xff]  }
 0x2d2   :  { %v3402_v2 = vmax.f32 %v3186_v46, 0.0  ;;  %8011 = vst [vmem:[#allocation24_spill] sm:$0xff] %v7310_v59  ;;  %8012 = vst [vmem:[#allocation22_spill] sm:$0xff] %v7315_v20  ;;  %v3401_v46 = vmax.f32 %v3183_v50, 0.0  ;;  %v7327_v50 = vld [vmem:[%s7864_s2 + $0x170] sm:$0xff]   ;;  %v8026_v59 = vld [vmem:[#allocation30_spill] sm:$0xff] }
 0x2d3   :  { %v3531_v22 = vmax.f32 %v3521_v37, %v3381_v36  ;;  %v3542_v62 = vmax.f32 %v7111_v19, %v3372_v48  ;;  %v3544_v54 = vmax.f32 %v7195_v51, %v3404_v23  ;;  %v8013_v23 = vld [vmem:[#allocation27_spill] sm:$0xff]  ;;  %v8017_v19 = vld [vmem:[#allocation26_spill] sm:$0xff] }
 0x2d4   :  { %v2397_v25 = vpop.f32.mrb[224].mxu0  ;;  %v5130_v33 = vpop.f32.mrb[224].mxu1 }
 0x2d5   :  { %v3541_v51 = vmax.f32 %v3531_v22, %v3391_v60  ;;  %v7320_v37 = vmax.f32 %v3542_v62, %v3402_v2  ;;  %v3071_v48 = vadd.f32 %v6874_v3, %v2397_v25  ;;  %v3207_v39 = vadd.f32 %v5130_v33, %v8013_v23  ;;  %v2399_v6 = vpop.f32.mrb[225].mxu0  ;;  %v3198_v29 = vpop.f32.mrb[225].mxu1  ;;  %v7337_v23 = vld [vmem:[%s7864_s2 + $0x158] sm:$0xff]  }
 0x2d6   :  { %v3199_v24 = vadd.f32 %v3198_v29, %v8014_v40  ;;  %v2400_v12 = vpop.f32.mrb[226].mxu0  ;;  %v5131_v36 = vpop.f32.mrb[226].mxu1  ;;  %8015 = vst [vmem:[#allocation27_spill] sm:$0xff] %v7337_v23  ;;  %v8016_v40 = vld [vmem:[#allocation28_spill] sm:$0xff] }
 0x2d7   :  { %v3551_v3 = vmax.f32 %v3541_v51, %v3401_v46  ;;  %v3373_v2 = vmax.f32 %v3071_v48, 0.0  ;;  %v3407_v62 = vmax.f32 %v3207_v39, 0.0  ;;  %v3074_v6 = vadd.f32 %v6878_v9, %v2400_v12  ;;  %v2402_v25 = vpop.f32.mrb[227].mxu0  ;;  %v3201_v33 = vpop.f32.mrb[227].mxu1  ;;  %v7346_v46 = vld [vmem:[%s7864_s2 + $0x160] sm:$0xff]  }
 0x2d8   :  { %v3405_v29 = vmax.f32 %v3199_v24, 0.0  ;;  %v3210_v4 = vadd.f32 %v5131_v36, %v8016_v40  ;;  %v7341_v21 = vadd.f32 %v3201_v33, %v8017_v19  ;;  %8018 = vst [vmem:[#allocation25_spill] sm:$0xff] %v7346_v46  ;;  %v7358_v36 = vld [vmem:[%s7864_s2 + $0x1a0] sm:$0xff]   ;;  %v7363_v19 = vld [vmem:[%s7864_s2 + $0x1b8] sm:$0xff]   ;;  %v8022_v24 = vld [vmem:[#allocation31_spill] sm:$0xff] }
 0x2d9   :  { %v7349_v12 = vmax.f32 %v3543_v13, %v3373_v2  ;;  %v7352_v39 = vmax.f32 %v7246_v1, %v3407_v62  ;;  %v3374_v51 = vmax.f32 %v3074_v6, 0.0  ;;  %8019 = vst [vmem:[#allocation28_spill] sm:$0xff] %v7358_v36  ;;  %8020 = vst [vmem:[#allocation26_spill] sm:$0xff] %v7363_v19  ;;  %v7371_v62 = vld [vmem:[%s7864_s2 + $0x198] sm:$0xff]   ;;  %v8035_v36 = vld [vmem:[#allocation34_spill] sm:$0xff] }
 0x2da   :  { %v3545_v48 = vmax.f32 %v7162_v16, %v3405_v29  ;;  %v3408_v13 = vmax.f32 %v3210_v4, 0.0  ;;  %v7381_v16 = vld [vmem:[%s7864_s2 + $0x180] sm:$0xff]   ;;  %v7386_v4 = vld [vmem:[%s7864_s2 + $0x188] sm:$0xff]  }
 0x2db   :  { %v7373_v6 = vmax.f32 %v3544_v54, %v3374_v51  ;;  %8021 = vst [vmem:[#allocation42_spill] sm:$0xff] %v7386_v4 }
 0x2dc   :  { %v7389_v29 = vmax.f32 %v7259_v43, %v3408_v13  ;;  %v2405_v54 = vpop.f32.mrb[228].mxu0  ;;  %v5134_v51 = vpop.f32.mrb[228].mxu1  ;;  %v8023_v43 = vld [vmem:[#allocation29_spill] sm:$0xff] }
 0x2dd   :  { %v3079_v33 = vadd.f32 %v6872_v42, %v2405_v54  ;;  %v3223_v25 = vadd.f32 %v5134_v51, %v8022_v24  ;;  %v2407_v40 = vpop.f32.mrb[229].mxu0  ;;  %v3214_v2 = vpop.f32.mrb[229].mxu1 }
 0x2de   :  { %v3215_v13 = vadd.f32 %v3214_v2, %v8023_v43  ;;  %v2408_v20 = vpop.f32.mrb[230].mxu0  ;;  %v5135_v23 = vpop.f32.mrb[230].mxu1  ;;  %v8024_v40 = vld [vmem:[#allocation32_spill] sm:$0xff]  ;;  %v7407_v2 = vld [vmem:[%s7864_s2 + $0x1c8] sm:$0xff]  }
 0x2df   :  { %v3375_v46 = vmax.f32 %v3079_v33, 0.0  ;;  %v3411_v42 = vmax.f32 %v3223_v25, 0.0  ;;  %v3082_v24 = vadd.f32 %v6876_v57, %v2408_v20  ;;  %v3226_v54 = vadd.f32 %v5135_v23, %v8024_v40  ;;  %v2410_v51 = vpop.f32.mrb[231].mxu0  ;;  %v3217_v9 = vpop.f32.mrb[231].mxu1  ;;  %8025 = vst [vmem:[#allocation31_spill] sm:$0xff] %v7407_v2  ;;  %v7415_v57 = vld [vmem:[%s7864_s2 + $0x1c0] sm:$0xff]  }
 0x2e0   :  { %v3409_v43 = vmax.f32 %v3215_v13, 0.0  ;;  %v3218_v1 = vadd.f32 %v3217_v9, %v8026_v59  ;;  %v3386_v51 = vmax.f32 %v7001_v11, 0.0  ;;  %v8030_v9 = vld [vmem:[#allocation33_spill] sm:$0xff]  ;;  %v8031_v59 = vunpack.c.l.bf16 %v6912_v44 }
 0x2e1   :  { %v3555_v20 = vmax.f32 %v3545_v48, %v3375_v46  ;;  %v7417_v23 = vmax.f32 %v3551_v3, %v3411_v42  ;;  %v3376_v25 = vmax.f32 %v3082_v24, 0.0  ;;  %v3412_v33 = vmax.f32 %v3226_v54, 0.0 }
 0x2e2   :  { %v7420_v40 = vmax.f32 %v7250_v61, %v3409_v43  ;;  %v3410_v13 = vmax.f32 %v3218_v1, 0.0  ;;  %v3396_v46 = vmax.f32 %v7146_v27, 0.0  ;;  %v3406_v48 = vmax.f32 %v7341_v21, 0.0 }
 0x2e3   :  { %v3526_v22 = vmax.f32 %v7108_v18, %v3376_v25  ;;  %v7427_v60 = vmax.f32 %v7320_v37, %v3412_v33  ;;  %v8027_v24 = vunpack.c.l.bf16 %v6905_v26  ;;  %v8028_v37 = vld [vmem:[#allocation35_spill] sm:$0xff]  ;;  %v8029_v27 = vunpack.c.h.bf16 %v6905_v26 }
 0x2e4   :  { %v7433_v61 = vmax.f32 %v7264_v38, %v3410_v13  ;;  %v2413_v1 = vpop.f32.mrb[232].mxu0  ;;  %v5138_v42 = vpop.f32.mrb[232].mxu1  ;;  %v3637_v2 = vmul.f32 %v8031_v59, %v7417_v23 }
 0x2e5   :  { %v3591_v11 = vmul.f32 %v8027_v24, %v7417_v23  ;;  %v3536_v54 = vmax.f32 %v3526_v22, %v3386_v51  ;;  %v3087_v18 = vadd.f32 %v6889_v34, %v2413_v1  ;;  %v3239_v43 = vadd.f32 %v5138_v42, %v8028_v37  ;;  %v2415_v25 = vpop.f32.mrb[233].mxu0  ;;  %v3230_v33 = vpop.f32.mrb[233].mxu1  ;;  %v8034_v37 = vld [vmem:[#allocation36_spill] sm:$0xff] }
 0x2e6   :  { %v3592_v21 = vmul.f32 %v8029_v27, %v7427_v60  ;;  %v3231_v38 = vadd.f32 %v3230_v33, %v8030_v9  ;;  %v2416_v13 = vpop.f32.mrb[234].mxu0  ;;  %v5139_v3 = vpop.f32.mrb[234].mxu1  ;;  %v8032_v22 = vunpack.c.h.bf16 %v6912_v44  ;;  %v8033_v51 = vunpack.c.h.bf16 %v6928_v52  ;;  %v7459_v44 = vld [vmem:[%s7864_s2 + $0x1a8] sm:$0xff]  }
 0x2e7   :  { %v3377_v42 = vmax.f32 %v3087_v18, 0.0  ;;  %v3415_v24 = vmax.f32 %v3239_v43, 0.0  ;;  %v3090_v26 = vadd.f32 %v6894_v55, %v2416_v13  ;;  %v3242_v9 = vadd.f32 %v5139_v3, %v8034_v37  ;;  %v2418_v25 = vpop.f32.mrb[235].mxu0  ;;  %v3233_v33 = vpop.f32.mrb[235].mxu1 }
 0x2e8   :  { %v3638_v34 = vmul.f32 %v8032_v22, %v7427_v60  ;;  %v3684_v1 = vmul.f32 %v8033_v51, %v7427_v60  ;;  %v3413_v27 = vmax.f32 %v3231_v38, 0.0  ;;  %v3546_v19 = vmax.f32 %v3536_v54, %v3396_v46 }
 0x2e9   :  { %v3234_v59 = vadd.f32 %v3233_v33, %v8035_v36  ;;  %v3601_v4 = vadd.f32 %v3592_v21, %v3591_v11  ;;  %v3557_v22 = vmax.f32 %v7352_v39, %v3377_v42  ;;  %v7462_v18 = vmax.f32 %v3555_v20, %v3415_v24  ;;  %v7470_v36 = vld [vmem:[%s7864_s2 + $0x1b0] sm:$0xff]   ;;  %v8038_v42 = vld [vmem:[#allocation39_spill] sm:$0xff]  ;;  %v8039_v33 = vld [vmem:[#allocation37_spill] sm:$0xff] }
 0x2ea   :  { %v3378_v43 = vmax.f32 %v3090_v26, 0.0  ;;  %v3416_v55 = vmax.f32 %v3242_v9, 0.0  ;;  %v7465_v3 = vmax.f32 %v7349_v12, %v3413_v27  ;;  %v3556_v13 = vmax.f32 %v3546_v19, %v3406_v48 }
 0x2eb   :  { %v3414_v38 = vmax.f32 %v3234_v59, 0.0  ;;  %v3647_v46 = vadd.f32 %v3638_v34, %v3637_v2  ;;  %v8036_v39 = vunpack.c.l.bf16 %v6928_v52  ;;  %v4816_v54 = vunpack.c.l.bf16 %v7459_v44 }
 0x2ec   :  { %v3558_v11 = vmax.f32 %v7389_v29, %v3378_v43  ;;  %v4829_v21 = vunpack.c.h.bf16 %v7415_v57  ;;  %v7478_v12 = vmax.f32 %v3556_v13, %v3416_v55  ;;  %v2421_v2 = vpop.f32.mrb[236].mxu0  ;;  %v5142_v48 = vpop.f32.mrb[236].mxu1  ;;  %v8037_v34 = vunpack.c.l.bf16 %v6935_v30 }
 0x2ed   :  { %v3683_v20 = vmul.f32 %v8036_v39, %v7417_v23  ;;  %v7481_v19 = vmax.f32 %v7373_v6, %v3414_v38  ;;  %v4817_v29 = vunpack.c.h.bf16 %v7459_v44  ;;  %v3095_v52 = vadd.f32 %v6886_v58, %v2421_v2  ;;  %v2423_v26 = vpop.f32.mrb[237].mxu0  ;;  %v3246_v37 = vpop.f32.mrb[237].mxu1 }
 0x2ee   :  { %v3593_v51 = vmul.f32 %v8037_v34, %v7465_v3  ;;  %v3255_v24 = vadd.f32 %v5142_v48, %v8038_v42  ;;  %v3247_v6 = vadd.f32 %v3246_v37, %v8039_v33  ;;  %v2424_v27 = vpop.f32.mrb[238].mxu0  ;;  %v5143_v59 = vpop.f32.mrb[238].mxu1  ;;  %v8040_v43 = vunpack.c.h.bf16 %v6935_v30  ;;  %v8042_v48 = vld [vmem:[#allocation40_spill] sm:$0xff]  ;;  %v8044_v33 = vld [vmem:[#allocation38_spill] sm:$0xff] }
 0x2ef   :  { %v3693_v9 = vadd.f32 %v3684_v1, %v3683_v20  ;;  %v8041_v38 = vunpack.c.l.bf16 %v6951_v53  ;;  %v3379_v39 = vmax.f32 %v3095_v52, 0.0  ;;  %v3098_v2 = vadd.f32 %v6891_v7, %v2424_v27  ;;  %v2426_v20 = vpop.f32.mrb[239].mxu0  ;;  %v3249_v34 = vpop.f32.mrb[239].mxu1 }
 0x2f0   :  { %v3594_v55 = vmul.f32 %v8040_v43, %v7481_v19  ;;  %v3602_v13 = vadd.f32 %v3601_v4, %v3593_v51  ;;  %v3258_v1 = vadd.f32 %v5143_v59, %v8042_v48  ;;  %v8043_v42 = vunpack.c.l.bf16 %v6923_v41 }
 0x2f1   :  { %v3639_v58 = vmul.f32 %v8041_v38, %v7465_v3  ;;  %v3417_v37 = vmax.f32 %v3247_v6, 0.0  ;;  %v3250_v30 = vadd.f32 %v3249_v34, %v8044_v33  ;;  %v8045_v4 = vunpack.c.h.bf16 %v6923_v41 }
 0x2f2   :  { %v3595_v26 = vmul.f32 %v8043_v42, %v7462_v18  ;;  %v3603_v43 = vadd.f32 %v3602_v13, %v3594_v55  ;;  %v3559_v52 = vmax.f32 %v7420_v40, %v3379_v39  ;;  %v3419_v38 = vmax.f32 %v3255_v24, 0.0 }
 0x2f3   :  { %v3596_v51 = vmul.f32 %v8045_v4, %v7478_v12  ;;  %v3380_v7 = vmax.f32 %v3098_v2, 0.0  ;;  %v8046_v27 = vunpack.c.h.bf16 %v6951_v53  ;;  %v7510_v48 = vmax.f32 %v3557_v22, %v3417_v37 }
 0x2f4   :  { %v3418_v20 = vmax.f32 %v3250_v30, 0.0  ;;  %v3604_v42 = vadd.f32 %v3603_v43, %v3595_v26  ;;  %v3648_v6 = vadd.f32 %v3647_v46, %v3639_v58  ;;  %v7512_v25 = vmax.f32 %v3559_v52, %v3419_v38 }
 0x2f5   :  { %v3640_v59 = vmul.f32 %v8046_v27, %v7481_v19  ;;  %v3560_v34 = vmax.f32 %v7433_v61, %v3380_v7  ;;  %v3420_v41 = vmax.f32 %v3258_v1, 0.0  ;;  %v8047_v55 = vunpack.c.l.bf16 %v6956_v32 }
 0x2f6   :  { %v7518_v24 = vmax.f32 %v3558_v11, %v3418_v20  ;;  %v8048_v53 = vunpack.c.l.bf16 %v6993_v45  ;;  %v3605_v22 = vadd.f32 %v3604_v42, %v3596_v51  ;;  %v8049_v39 = vunpack.c.l.bf16 %v6982_v28 }
 0x2f7   :  { %v3729_v40 = vmul.f32 %v8047_v55, %v7417_v23  ;;  %v7526_v58 = vmax.f32 %v3560_v34, %v3420_v41  ;;  %v8050_v61 = vunpack.c.l.bf16 %v6942_v35  ;;  %v3649_v1 = vadd.f32 %v3648_v6, %v3640_v59 }
 0x2f8   :  { %v3597_v13 = vmul.f32 %v8048_v53, %v7510_v48  ;;  %v3685_v46 = vmul.f32 %v8049_v39, %v7465_v3  ;;  %v8051_v11 = vunpack.c.l.bf16 %v7044_v56  ;;  %v8052_v37 = vunpack.c.h.bf16 %v6993_v45 }
 0x2f9   :  { %v3641_v2 = vmul.f32 %v8050_v61, %v7462_v18  ;;  %v8053_v4 = vunpack.c.h.bf16 %v6982_v28  ;;  %v8054_v43 = vunpack.c.h.bf16 %v6956_v32  ;;  %v8055_v38 = vunpack.c.h.bf16 %v6942_v35 }
 0x2fa   :  { %v3775_v26 = vmul.f32 %v8051_v11, %v7417_v23  ;;  %v3598_v33 = vmul.f32 %v8052_v37, %v7518_v24  ;;  %v3606_v30 = vadd.f32 %v3605_v22, %v3597_v13  ;;  %v8056_v27 = vunpack.c.l.bf16 %v6998_v15 }
 0x2fb   :  { %v3686_v51 = vmul.f32 %v8053_v4, %v7481_v19  ;;  %v3730_v52 = vmul.f32 %v8054_v43, %v7427_v60  ;;  %v3642_v7 = vmul.f32 %v8055_v38, %v7478_v12  ;;  %v3650_v20 = vadd.f32 %v3649_v1, %v3641_v2  ;;  %v8067_v38 = vld [vmem:[#allocation4_spill] sm:$0xff] }
 0x2fc   :  { %v3643_v59 = vmul.f32 %v8056_v27, %v7510_v48  ;;  %v8057_v45 = vunpack.c.l.bf16 %v6968_v49  ;;  %v8058_v28 = vunpack.c.l.bf16 %v7006_v17  ;;  %v3607_v34 = vadd.f32 %v3606_v30, %v3598_v33 }
 0x2fd   :  { %v8059_v32 = vunpack.c.h.bf16 %v6968_v49  ;;  %v3694_v35 = vadd.f32 %v3693_v9, %v3685_v46  ;;  %v8060_v55 = vunpack.c.h.bf16 %v6998_v15  ;;  %v8061_v13 = vunpack.c.l.bf16 %v7023_v47 }
 0x2fe   :  { %v3687_v42 = vmul.f32 %v8057_v45, %v7462_v18  ;;  %v3599_v6 = vmul.f32 %v8058_v28, %v7512_v25  ;;  %v3651_v39 = vadd.f32 %v3650_v20, %v3642_v7  ;;  %v8062_v61 = vunpack.c.l.bf16 %v7052_v0 }
 0x2ff   :  { %v3688_v41 = vmul.f32 %v8059_v32, %v7478_v12  ;;  %v3644_v53 = vmul.f32 %v8060_v55, %v7518_v24  ;;  %v3645_v22 = vmul.f32 %v8061_v13, %v7512_v25  ;;  %v8063_v1 = vunpack.c.h.bf16 %v7006_v17 }
 0x300   :  { %v3689_v2 = vmul.f32 %v8062_v61, %v7510_v48  ;;  %v3608_v49 = vadd.f32 %v3607_v34, %v3599_v6  ;;  %v3695_v37 = vadd.f32 %v3694_v35, %v3686_v51  ;;  %v8064_v9 = vunpack.c.l.bf16 %v7028_v8  ;;  %v8071_v34 = vld [vmem:[#allocation2_spill] sm:$0xff] }
 0x301   :  { %v3600_v11 = vmul.f32 %v8063_v1, %v7526_v58  ;;  %v8065_v46 = vunpack.c.h.bf16 %v7023_v47  ;;  %v3652_v30 = vadd.f32 %v3651_v39, %v3643_v59  ;;  %v8066_v4 = vunpack.c.h.bf16 %v7052_v0 }
 0x302   :  { %v3731_v15 = vmul.f32 %v8064_v9, %v7465_v3  ;;  %v8068_v7 = vunpack.c.l.bf16 %v8067_v38  ;;  %v3696_v20 = vadd.f32 %v3695_v37, %v3687_v42  ;;  %v8069_v51 = vunpack.c.h.bf16 %v7028_v8  ;;  %v8078_v37 = vld [vmem:[#allocation6_spill] sm:$0xff] }
 0x303   :  { %v3646_v33 = vmul.f32 %v8065_v46, %v7526_v58  ;;  %v3690_v43 = vmul.f32 %v8066_v4, %v7518_v24  ;;  %v3609_v27 = vadd.f32 %v3608_v49, %v3600_v11  ;;  %v3739_v28 = vadd.f32 %v3730_v52, %v3729_v40 }
 0x304   :  { %v3691_v17 = vmul.f32 %v8068_v7, %v7512_v25  ;;  %v3732_v45 = vmul.f32 %v8069_v51, %v7481_v19  ;;  %v3653_v6 = vadd.f32 %v3652_v30, %v3644_v53  ;;  %v8070_v47 = vunpack.c.h.bf16 %v8067_v38  ;;  %v8075_v53 = vld [vmem:[#allocation7_spill] sm:$0xff]  ;;  %v8080_v30 = vld [vmem:[#allocation5_spill] sm:$0xff] }
 0x305   :  { %v8072_v0 = vunpack.c.l.bf16 %v8071_v34  ;;  %v8073_v35 = vunpack.c.h.bf16 %v7044_v56  ;;  %v3610_v13 = vrot.slane %v3609_v27, 4  ;;  %v3697_v42 = vadd.f32 %v3696_v20, %v3688_v41 }
 0x306   :  { %v3692_v59 = vmul.f32 %v8070_v47, %v7526_v58  ;;  %v8074_v8 = vunpack.c.h.bf16 %v8071_v34  ;;  %v3740_v40 = vadd.f32 %v3739_v28, %v3731_v15  ;;  %v3654_v52 = vadd.f32 %v3653_v6, %v3645_v22 }
 0x307   :  { %v3733_v32 = vmul.f32 %v8072_v0, %v7462_v18  ;;  %v3776_v55 = vmul.f32 %v8073_v35, %v7427_v60  ;;  %v8076_v61 = vunpack.c.l.bf16 %v8075_v53  ;;  %v8077_v11 = vunpack.c.h.bf16 %v8075_v53 }
 0x308   :  { %v3734_v39 = vmul.f32 %v8074_v8, %v7478_v12  ;;  %v8079_v56 = vunpack.c.l.bf16 %v8078_v37  ;;  %v3611_v46 = vadd.f32 %v3610_v13, %v3609_v27  ;;  %v3698_v41 = vadd.f32 %v3697_v42, %v3689_v2  ;;  %v8084_v2 = vld [vmem:[#allocation8_spill] sm:$0xff]  ;;  %v8087_v8 = vld [vmem:[#allocation3_spill] sm:$0xff] }
 0x309   :  { %v3735_v1 = vmul.f32 %v8076_v61, %v7510_v48  ;;  %v3736_v49 = vmul.f32 %v8077_v11, %v7518_v24  ;;  %v8081_v4 = vunpack.c.l.bf16 %v8080_v30  ;;  %v3741_v15 = vadd.f32 %v3740_v40, %v3732_v45 }
 0x30a   :  { %v3777_v9 = vmul.f32 %v8079_v56, %v7465_v3  ;;  %v3655_v22 = vadd.f32 %v3654_v52, %v3646_v33  ;;  %v8082_v7 = vunpack.c.h.bf16 %v8080_v30  ;;  %v8083_v51 = vunpack.c.h.bf16 %v8078_v37  ;;  %v8093_v30 = vld [vmem:[#allocation12_spill] sm:$0xff] }
 0x30b   :  { %v3737_v38 = vmul.f32 %v8081_v4, %v7512_v25  ;;  %v3785_v6 = vadd.f32 %v3776_v55, %v3775_v26  ;;  %v3612_v47 = vrot.slane %v3611_v46, 2  ;;  %v3699_v34 = vadd.f32 %v3698_v41, %v3690_v43  ;;  %v8089_v26 = vld [vmem:[#allocation10_spill] sm:$0xff] }
 0x30c   :  { %v3738_v20 = vmul.f32 %v8082_v7, %v7526_v58  ;;  %v3778_v28 = vmul.f32 %v8083_v51, %v7481_v19  ;;  %v3742_v0 = vadd.f32 %v3741_v15, %v3733_v32  ;;  %v8085_v27 = vunpack.c.l.bf16 %v8084_v2  ;;  %v8095_v51 = vld [vmem:[#allocation15_spill] sm:$0xff] }
 0x30d   :  { %v3656_v13 = vrot.slane %v3655_v22, 4  ;;  %v8086_v33 = vunpack.c.h.bf16 %v8084_v2  ;;  %v3786_v42 = vadd.f32 %v3785_v6, %v3777_v9  ;;  %v8088_v40 = vunpack.c.h.bf16 %v8087_v8 }
 0x30e   :  { %v3779_v35 = vmul.f32 %v8085_v27, %v7462_v18  ;;  %v3700_v53 = vadd.f32 %v3699_v34, %v3691_v17  ;;  %v3743_v61 = vadd.f32 %v3742_v0, %v3734_v39  ;;  %v8090_v43 = vunpack.c.l.bf16 %v8089_v26 }
 0x30f   :  { %v3780_v45 = vmul.f32 %v8086_v33, %v7478_v12  ;;  %v3822_v52 = vmul.f32 %v8088_v40, %v7427_v60  ;;  %v8091_v55 = vunpack.c.h.bf16 %v8089_v26  ;;  %v3657_v37 = vadd.f32 %v3656_v13, %v3655_v22 }
 0x310   :  { %v3781_v32 = vmul.f32 %v8090_v43, %v7510_v48  ;;  %v3787_v56 = vadd.f32 %v3786_v42, %v3778_v28  ;;  %v8092_v41 = vunpack.c.l.bf16 %v8087_v8  ;;  %v8094_v4 = vunpack.c.l.bf16 %v8093_v30 }
 0x311   :  { %v3782_v11 = vmul.f32 %v8091_v55, %v7518_v24  ;;  %v3613_v17 = vadd.f32 %v3612_v47, %v3611_v46  ;;  %v3701_v39 = vadd.f32 %v3700_v53, %v3692_v59  ;;  %v3744_v7 = vadd.f32 %v3743_v61, %v3735_v1  ;;  %v8099_v59 = vld [vmem:[#allocation9_spill] sm:$0xff] }
 0x312   :  { %v3821_v9 = vmul.f32 %v8092_v41, %v7417_v23  ;;  %v3823_v15 = vmul.f32 %v8094_v4, %v7465_v3  ;;  %v8096_v6 = vunpack.c.l.bf16 %v8095_v51  ;;  %v3658_v0 = vrot.slane %v3657_v37, 2 }
 0x313   :  { %v3788_v2 = vadd.f32 %v3787_v56, %v3779_v35  ;;  %v8097_v22 = vunpack.c.h.bf16 %v8093_v30  ;;  %v3702_v13 = vrot.slane %v3701_v39, 4  ;;  %v3745_v33 = vadd.f32 %v3744_v7, %v3736_v49 }
 0x314   :  { %v3783_v34 = vmul.f32 %v8096_v6, %v7512_v25  ;;  %v3831_v27 = vadd.f32 %v3822_v52, %v3821_v9  ;;  %v8098_v42 = vunpack.c.h.bf16 %v8095_v51  ;;  %v8100_v1 = vunpack.c.l.bf16 %v8099_v59 }
 0x315   :  { %v3824_v28 = vmul.f32 %v8097_v22, %v7481_v19  ;;  %v3789_v47 = vadd.f32 %v3788_v2, %v3780_v45  ;;  %v8101_v40 = vunpack.c.h.bf16 %v8099_v59  ;;  %v8102_v53 = vunpack.c.l.bf16 %v7192_v14  ;;  %v8104_v45 = vld [vmem:[#allocation11_spill] sm:$0xff]  ;;  %v8109_v22 = vld [vmem:[#allocation13_spill] sm:$0xff] }
 0x316   :  { %v3784_v8 = vmul.f32 %v8098_v42, %v7526_v58  ;;  %v3825_v46 = vmul.f32 %v8100_v1, %v7462_v18  ;;  %v3832_v52 = vadd.f32 %v3831_v27, %v3823_v15  ;;  %v3614_v26 = vrot.slane %v3613_v17, 1 }
 0x317   :  { %v3826_v35 = vmul.f32 %v8101_v40, %v7478_v12  ;;  %v3827_v61 = vmul.f32 %v8102_v53, %v7510_v48  ;;  %v3659_v49 = vadd.f32 %v3658_v0, %v3657_v37  ;;  %v3703_v43 = vadd.f32 %v3702_v13, %v3701_v39  ;;  %v8112_v53 = vld [vmem:[#allocation16_spill] sm:$0xff] }
 0x318   :  { %v3746_v55 = vadd.f32 %v3745_v33, %v3737_v38  ;;  %v3790_v56 = vadd.f32 %v3789_v47, %v3781_v32  ;;  %v8103_v41 = vunpack.c.h.bf16 %v7192_v14  ;;  %v3833_v30 = vadd.f32 %v3832_v52, %v3824_v28 }
 0x319   :  { %v8105_v4 = vunpack.c.h.bf16 %v8104_v45  ;;  %v3704_v51 = vrot.slane %v3703_v43, 2  ;;  %v8106_v15 = vunpack.c.l.bf16 %v7201_v5  ;;  %v8107_v38 = vunpack.c.h.bf16 %v7201_v5 }
 0x31a   :  { %v3828_v9 = vmul.f32 %v8103_v41, %v7518_v24  ;;  %v3747_v6 = vadd.f32 %v3746_v55, %v3738_v20  ;;  %v3791_v37 = vadd.f32 %v3790_v56, %v3782_v11  ;;  %v3834_v39 = vadd.f32 %v3833_v30, %v3825_v46 }
 0x31b   :  { %v3868_v7 = vmul.f32 %v8105_v4, %v7427_v60  ;;  %v3829_v2 = vmul.f32 %v8106_v15, %v7512_v25  ;;  %v3830_v32 = vmul.f32 %v8107_v38, %v7526_v58  ;;  %v8108_v14 = vunpack.c.l.bf16 %v8104_v45 }
 0x31c   :  { %v8110_v28 = vunpack.c.l.bf16 %v8109_v22  ;;  %v3615_v20 = vadd.f32 %v3614_v26, %v3613_v17  ;;  %v3660_v13 = vrot.slane %v3659_v49, 1  ;;  %v3705_v33 = vadd.f32 %v3704_v51, %v3703_v43 }
 0x31d   :  { %v3867_v0 = vmul.f32 %v8108_v14, %v7417_v23  ;;  %v3748_v42 = vrot.slane %v3747_v6, 4  ;;  %v3792_v59 = vadd.f32 %v3791_v37, %v3783_v34  ;;  %v3835_v1 = vadd.f32 %v3834_v39, %v3826_v35  ;;  %v8115_v35 = vld [vmem:[#allocation14_spill] sm:$0xff] }
 0x31e   :  { %v3869_v27 = vmul.f32 %v8110_v28, %v7465_v3  ;;  %v8111_v5 = vunpack.c.h.bf16 %v8109_v22  ;;  %v3706_v47 = vrot.slane %v3705_v33, 1  ;;  %v8113_v52 = vunpack.c.l.bf16 %v8112_v53 }
 0x31f   :  { %v3877_v46 = vadd.f32 %v3868_v7, %v3867_v0  ;;  %v3749_v40 = vadd.f32 %v3748_v42, %v3747_v6  ;;  %v8114_v17 = vunpack.c.h.bf16 %v8112_v53  ;;  %v3793_v43 = vadd.f32 %v3792_v59, %v3784_v8  ;;  %v8117_v7 = vld [vmem:[#allocation20_spill] sm:$0xff] }
 0x320   :  { %v3870_v11 = vmul.f32 %v8111_v5, %v7481_v19  ;;  %v3871_v55 = vmul.f32 %v8113_v52, %v7462_v18  ;;  %v3836_v56 = vadd.f32 %v3835_v1, %v3827_v61  ;;  %v8116_v41 = vunpack.c.h.bf16 %v8115_v35 }
 0x321   :  { %v3872_v26 = vmul.f32 %v8114_v17, %v7478_v12  ;;  %v3878_v34 = vadd.f32 %v3877_v46, %v3869_v27  ;;  %v3661_v45 = vadd.f32 %v3660_v13, %v3659_v49  ;;  %v3750_v4 = vrot.slane %v3749_v40, 2 }
 0x322   :  { %v3914_v30 = vmul.f32 %v8116_v41, %v7427_v60  ;;  %v8118_v51 = vunpack.c.l.bf16 %v8117_v7  ;;  %v8119_v15 = vunpack.c.l.bf16 %v8115_v35  ;;  %v3794_v37 = vrot.slane %v3793_v43, 4  ;;  %v8128_v41 = vld [vmem:[#allocation19_spill] sm:$0xff] }
 0x323   :  { %v3837_v39 = vadd.f32 %v3836_v56, %v3828_v9  ;;  %v3879_v14 = vadd.f32 %v3878_v34, %v3870_v11  ;;  %v8120_v8 = vunpack.c.l.bf16 %v7243_v10  ;;  %v3707_v0 = vadd.f32 %v3706_v47, %v3705_v33  ;;  %v8123_v11 = vld [vmem:[#allocation18_spill] sm:$0xff]  ;;  %v8125_v33 = vld [vmem:[#allocation17_spill] sm:$0xff] }
 0x324   :  { %v3873_v6 = vmul.f32 %v8118_v51, %v7510_v48  ;;  %v3913_v38 = vmul.f32 %v8119_v15, %v7417_v23  ;;  %v3751_v22 = vadd.f32 %v3750_v4, %v3749_v40  ;;  %v8121_v49 = vunpack.c.h.bf16 %v8117_v7 }
 0x325   :  { %v3915_v61 = vmul.f32 %v8120_v8, %v7465_v3  ;;  %v8122_v27 = vunpack.c.h.bf16 %v7243_v10  ;;  %v3795_v42 = vadd.f32 %v3794_v37, %v3793_v43  ;;  %v3838_v59 = vadd.f32 %v3837_v39, %v3829_v2 }
 0x326   :  { %v3874_v28 = vmul.f32 %v8121_v49, %v7518_v24  ;;  %v3880_v1 = vadd.f32 %v3879_v14, %v3871_v55  ;;  %v3923_v5 = vadd.f32 %v3914_v30, %v3913_v38  ;;  %v3752_v9 = vrot.slane %v3751_v22, 1 }
 0x327   :  { %v3916_v13 = vmul.f32 %v8122_v27, %v7481_v19  ;;  %v8124_v46 = vunpack.c.l.bf16 %v8123_v11  ;;  %v8126_v47 = vunpack.c.l.bf16 %v8125_v33  ;;  %v4123_v52 = vsel %vm4122_vm2, %v3615_v20, %v3661_v45 }
 0x328   :  { %v3796_v17 = vrot.slane %v3795_v42, 2  ;;  %v3839_v56 = vadd.f32 %v3838_v59, %v3830_v32  ;;  %v3881_v34 = vadd.f32 %v3880_v1, %v3872_v26  ;;  %v3924_v10 = vadd.f32 %v3923_v5, %v3915_v61 }
 0x329   :  { %v3875_v53 = vmul.f32 %v8124_v46, %v7512_v25  ;;  %v3917_v40 = vmul.f32 %v8126_v47, %v7462_v18  ;;  %v3753_v35 = vadd.f32 %v3752_v9, %v3751_v22  ;;  %v8127_v2 = vunpack.c.h.bf16 %v8125_v33 }
 0x32a   :  { %v4125_v43 = vsel %vm4124_vm3, %v4123_v52, %v3707_v0  ;;  %v8129_v30 = vunpack.c.h.bf16 %v8128_v41  ;;  %v3797_v7 = vadd.f32 %v3796_v17, %v3795_v42  ;;  %v3840_v51 = vrot.slane %v3839_v56, 4  ;;  %v8138_v52 = vld [vmem:[#allocation41_spill] sm:$0xff] }
 0x32b   :  { %v3918_v55 = vmul.f32 %v8127_v2, %v7478_v12  ;;  %v3882_v15 = vadd.f32 %v3881_v34, %v3873_v6  ;;  %v3925_v38 = vadd.f32 %v3924_v10, %v3916_v13  ;;  %v8130_v32 = vunpack.c.l.bf16 %v7288_v63  ;;  %v8141_v2 = vld [vmem:[#allocation23_spill] sm:$0xff] }
 0x32c   :  { %v3960_v4 = vmul.f32 %v8129_v30, %v7427_v60  ;;  %v4127_v26 = vsel %vm4126_vm4, %v4125_v43, %v3753_v35  ;;  %v8131_v45 = vunpack.c.l.bf16 %v8128_v41  ;;  %v8132_v39 = vunpack.c.l.bf16 %v7272_v31 }
 0x32d   :  { %v3919_v20 = vmul.f32 %v8130_v32, %v7510_v48  ;;  %v3798_v8 = vrot.slane %v3797_v7, 1  ;;  %v3841_v61 = vadd.f32 %v3840_v51, %v3839_v56  ;;  %v3883_v0 = vadd.f32 %v3882_v15, %v3874_v28  ;;  %v8136_v28 = vld [vmem:[#allocation21_spill] sm:$0xff] }
 0x32e   :  { %v3959_v37 = vmul.f32 %v8131_v45, %v7417_v23  ;;  %v3961_v14 = vmul.f32 %v8132_v39, %v7465_v3  ;;  %v3926_v22 = vadd.f32 %v3925_v38, %v3917_v40  ;;  %v8133_v6 = vunpack.c.h.bf16 %v8123_v11  ;;  %v8146_v45 = vld [vmem:[#allocation27_spill] sm:$0xff] }
 0x32f   :  { %v8134_v27 = vunpack.c.h.bf16 %v7288_v63  ;;  %v8135_v42 = vunpack.c.h.bf16 %v7272_v31  ;;  %v3799_v5 = vadd.f32 %v3798_v8, %v3797_v7  ;;  %v3842_v9 = vrot.slane %v3841_v61, 2 }
 0x330   :  { %v3876_v49 = vmul.f32 %v8133_v6, %v7526_v58  ;;  %v3969_v1 = vadd.f32 %v3960_v4, %v3959_v37  ;;  %v3884_v46 = vadd.f32 %v3883_v0, %v3875_v53  ;;  %v3927_v33 = vadd.f32 %v3926_v22, %v3918_v55 }
 0x331   :  { %v3920_v13 = vmul.f32 %v8134_v27, %v7518_v24  ;;  %v3962_v59 = vmul.f32 %v8135_v42, %v7481_v19  ;;  %v8137_v47 = vunpack.c.l.bf16 %v8136_v28  ;;  %v8139_v17 = vunpack.c.h.bf16 %v8138_v52 }
 0x332   :  { %v3970_v11 = vadd.f32 %v3969_v1, %v3961_v14  ;;  %v3843_v56 = vadd.f32 %v3842_v9, %v3841_v61  ;;  %v3885_v34 = vadd.f32 %v3884_v46, %v3876_v49  ;;  %v3928_v10 = vadd.f32 %v3927_v33, %v3919_v20 }
 0x333   :  { %v3921_v40 = vmul.f32 %v8137_v47, %v7512_v25  ;;  %v4006_v63 = vmul.f32 %v8139_v17, %v7427_v60  ;;  %v4128_v31 = vsel %vm1911_vm0, %v4127_v26, %v3799_v5  ;;  %v8140_v35 = vunpack.c.h.bf16 %v8136_v28  ;;  %v8152_v28 = vld [vmem:[#allocation25_spill] sm:$0xff] }
 0x334   :  { %v8142_v55 = vunpack.c.l.bf16 %v8141_v2  ;;  %v3971_v41 = vadd.f32 %v3970_v11, %v3962_v59  ;;  %v8143_v30 = vunpack.c.l.bf16 %v8138_v52  ;;  %v3844_v7 = vrot.slane %v3843_v56, 1  ;;  %v8150_v59 = vld [vmem:[#allocation22_spill] sm:$0xff]  ;;  %v8154_v52 = vld [vmem:[#allocation24_spill] sm:$0xff] }
 0x335   :  { %v3922_v53 = vmul.f32 %v8140_v35, %v7526_v58  ;;  %v3886_v51 = vrot.slane %v3885_v34, 4  ;;  %v3929_v15 = vadd.f32 %v3928_v10, %v3920_v13  ;;  %v8144_v38 = vunpack.c.l.bf16 %v7327_v50 }
 0x336   :  { %v3963_v43 = vmul.f32 %v8142_v55, %v7462_v18  ;;  %v4005_v4 = vmul.f32 %v8143_v30, %v7417_v23  ;;  %v8145_v20 = vunpack.c.h.bf16 %v8141_v2  ;;  %v8147_v37 = vunpack.c.l.bf16 %v8146_v45 }
 0x337   :  { %v4007_v32 = vmul.f32 %v8144_v38, %v7465_v3  ;;  %v8148_v8 = vunpack.c.h.bf16 %v7327_v50  ;;  %v3845_v0 = vadd.f32 %v3844_v7, %v3843_v56  ;;  %v3887_v22 = vadd.f32 %v3886_v51, %v3885_v34 }
 0x338   :  { %v3964_v26 = vmul.f32 %v8145_v20, %v7478_v12  ;;  %v3965_v39 = vmul.f32 %v8147_v37, %v7510_v48  ;;  %v3972_v14 = vadd.f32 %v3971_v41, %v3963_v43  ;;  %v3930_v6 = vadd.f32 %v3929_v15, %v3921_v40 }
 0x339   :  { %v4008_v61 = vmul.f32 %v8148_v8, %v7481_v19  ;;  %v4015_v49 = vadd.f32 %v4006_v63, %v4005_v4  ;;  %v8149_v27 = vunpack.c.h.bf16 %v8146_v45  ;;  %v8151_v1 = vunpack.c.h.bf16 %v8150_v59 }
 0x33a   :  { %v3973_v42 = vadd.f32 %v3972_v14, %v3964_v26  ;;  %v3888_v9 = vrot.slane %v3887_v22, 2  ;;  %v3931_v46 = vadd.f32 %v3930_v6, %v3922_v53  ;;  %v4130_v33 = vsel %vm4129_vm5, %v4128_v31, %v3845_v0  ;;  %v8163_v6 = vld [vmem:[#allocation42_spill] sm:$0xff] }
 0x33b   :  { %v3966_v13 = vmul.f32 %v8149_v27, %v7518_v24  ;;  %v4052_v5 = vmul.f32 %v8151_v1, %v7427_v60  ;;  %v4016_v50 = vadd.f32 %v4015_v49, %v4007_v32  ;;  %v8153_v47 = vunpack.c.l.bf16 %v8152_v28  ;;  %v8167_v1 = vld [vmem:[#allocation26_spill] sm:$0xff] }
 0x33c   :  { %v3974_v11 = vadd.f32 %v3973_v42, %v3965_v39  ;;  %v8155_v17 = vunpack.c.l.bf16 %v8154_v52  ;;  %v8156_v56 = vunpack.c.l.bf16 %v8150_v59  ;;  %v3889_v10 = vadd.f32 %v3888_v9, %v3887_v22 }
 0x33d   :  { %v3967_v40 = vmul.f32 %v8153_v47, %v7512_v25  ;;  %v3932_v35 = vrot.slane %v3931_v46, 4  ;;  %v4017_v2 = vadd.f32 %v4016_v50, %v4008_v61  ;;  %v8157_v31 = vunpack.c.l.bf16 %v7371_v62 }
 0x33e   :  { %v4009_v63 = vmul.f32 %v8155_v17, %v7462_v18  ;;  %v4051_v34 = vmul.f32 %v8156_v56, %v7417_v23  ;;  %v3975_v55 = vadd.f32 %v3974_v11, %v3966_v13  ;;  %v8158_v43 = vunpack.c.h.bf16 %v8154_v52  ;;  %v8165_v13 = vld [vmem:[#allocation28_spill] sm:$0xff] }
 0x33f   :  { %v4053_v53 = vmul.f32 %v8157_v31, %v7465_v3  ;;  %v8159_v30 = vunpack.c.l.bf16 %v7381_v16  ;;  %v8160_v7 = vunpack.c.h.bf16 %v7371_v62  ;;  %v3890_v15 = vrot.slane %v3889_v10, 1 }
 0x340   :  { %v4010_v41 = vmul.f32 %v8158_v43, %v7478_v12  ;;  %v3933_v38 = vadd.f32 %v3932_v35, %v3931_v46  ;;  %v4018_v32 = vadd.f32 %v4017_v2, %v4009_v63  ;;  %v4061_v20 = vadd.f32 %v4052_v5, %v4051_v34  ;;  %v4899_v35 = vld [vmem:[%s7864_s2 + $0x1d0] sm:$0xff]  }
 0x341   :  { %v4011_v4 = vmul.f32 %v8159_v30, %v7510_v48  ;;  %v4054_v51 = vmul.f32 %v8160_v7, %v7481_v19  ;;  %v8161_v26 = vunpack.c.h.bf16 %v8152_v28  ;;  %v3976_v37 = vadd.f32 %v3975_v55, %v3967_v40 }
 0x342   :  { %v8162_v39 = vunpack.c.h.bf16 %v7381_v16  ;;  %v3891_v8 = vadd.f32 %v3890_v15, %v3889_v10  ;;  %v3934_v61 = vrot.slane %v3933_v38, 2  ;;  %v4019_v0 = vadd.f32 %v4018_v32, %v4010_v41 }
 0x343   :  { %v3968_v45 = vmul.f32 %v8161_v26, %v7526_v58  ;;  %v4062_v22 = vadd.f32 %v4061_v20, %v4053_v53  ;;  %v8164_v49 = vunpack.c.l.bf16 %v8163_v6  ;;  %v8166_v42 = vunpack.c.l.bf16 %v8165_v13 }
 0x344   :  { %v4012_v14 = vmul.f32 %v8162_v39, %v7518_v24  ;;  %v8168_v5 = vunpack.c.h.bf16 %v8167_v1  ;;  %v3935_v46 = vadd.f32 %v3934_v61, %v3933_v38  ;;  %v4132_v16 = vsel %vm4131_vm6, %v4130_v33, %v3891_v8  ;;  %v4900_v8 = vld [vmem:[%s7864_s2 + $0x1d8] sm:$0xff]  }
 0x345   :  { %v3977_v62 = vadd.f32 %v3976_v37, %v3968_v45  ;;  %v4013_v27 = vmul.f32 %v8164_v49, %v7512_v25  ;;  %v4055_v59 = vmul.f32 %v8166_v42, %v7462_v18  ;;  %v4020_v50 = vadd.f32 %v4019_v0, %v4011_v4  ;;  %v8173_v4 = vld [vmem:[#allocation31_spill] sm:$0xff] }
 0x346   :  { %v4098_v9 = vmul.f32 %v8168_v5, %v7427_v60  ;;  %v4063_v28 = vadd.f32 %v4062_v22, %v4054_v51  ;;  %v8169_v40 = vunpack.c.h.bf16 %v8165_v13  ;;  %v8170_v52 = vunpack.c.l.bf16 %v8167_v1 }
 0x347   :  { %v3978_v47 = vrot.slane %v3977_v62, 4  ;;  %v8171_v63 = vunpack.c.l.bf16 %v7415_v57  ;;  %v3936_v34 = vrot.slane %v3935_v46, 1  ;;  %v4021_v60 = vadd.f32 %v4020_v50, %v4012_v14 }
 0x348   :  { %v4056_v11 = vmul.f32 %v8169_v40, %v7478_v12  ;;  %v4097_v17 = vmul.f32 %v8170_v52, %v7417_v23  ;;  %v4057_v33 = vmul.f32 %v4816_v54, %v7510_v48  ;;  %v4064_v10 = vadd.f32 %v4063_v28, %v4055_v59 }
 0x349   :  { %v4099_v56 = vmul.f32 %v8171_v63, %v7465_v3  ;;  %v3979_v2 = vadd.f32 %v3978_v47, %v3977_v62  ;;  %v8172_v31 = vunpack.c.h.bf16 %v8163_v6  ;;  %v4100_v3 = vmul.f32 %v4829_v21, %v7481_v19 }
 0x34a   :  { %v4107_v53 = vadd.f32 %v4098_v9, %v4097_v17  ;;  %v3937_v55 = vadd.f32 %v3936_v34, %v3935_v46  ;;  %v4022_v43 = vadd.f32 %v4021_v60, %v4013_v27  ;;  %v4058_v54 = vmul.f32 %v4817_v29, %v7518_v24 }
 0x34b   :  { %v4014_v23 = vmul.f32 %v8172_v31, %v7526_v58  ;;  %v4065_v41 = vadd.f32 %v4064_v10, %v4056_v11  ;;  %v3980_v30 = vrot.slane %v3979_v2, 2  ;;  %v4833_v7 = vunpack.c.h.bf16 %v8173_v4 }
 0x34c   :  { %v4836_v51 = vunpack.c.l.bf16 %v4899_v35  ;;  %v4108_v15 = vadd.f32 %v4107_v53, %v4099_v56  ;;  %v4134_v38 = vsel %vm4133_vm7, %v4132_v16, %v3937_v55  ;;  %v4821_v20 = vunpack.c.h.bf16 %v7470_v36 }
 0x34d   :  { %v4023_v32 = vadd.f32 %v4022_v43, %v4014_v23  ;;  %v4066_v57 = vadd.f32 %v4065_v41, %v4057_v33  ;;  %4138 = vadd.xlane.f32.xlu0 %v4134_v38  ;;  %v4837_v21 = vunpack.c.h.bf16 %v4899_v35  ;;  %v8174_v19 = vunpack.c.l.bf16 %v8173_v4  ;;  %v4144_v43 = vld [vmem:[%s7865_s3 + $0x8] sm:$0xf] }
 0x34e   :  { %v4109_v44 = vadd.f32 %v4108_v15, %v4100_v3  ;;  %v3981_v29 = vadd.f32 %v3980_v30, %v3979_v2  ;;  %v8175_v37 = vunpack.c.l.bf16 %v7470_v36  ;;  %v4102_v61 = vmul.f32 %v4833_v7, %v7478_v12  ;;  %v4143_v3 = vld [vmem:[%s7865_s3] sm:$0xff] }
 0x34f   :  { %v4101_v26 = vmul.f32 %v8174_v19, %v7462_v18  ;;  %v4024_v45 = vrot.slane %v4023_v32, 4  ;;  %v4067_v14 = vadd.f32 %v4066_v57, %v4058_v54  ;;  %v4103_v0 = vmul.f32 %v4836_v51, %v7510_v48 }
 0x350   :  { %v4059_v39 = vmul.f32 %v8175_v37, %v7512_v25  ;;  %v4060_v18 = vmul.f32 %v4821_v20, %v7526_v58  ;;  %v4840_v49 = vunpack.c.l.bf16 %v4900_v8  ;;  %v4104_v27 = vmul.f32 %v4837_v21, %v7518_v24 }
 0x351   :  { %v4110_v22 = vadd.f32 %v4109_v44, %v4101_v26  ;;  %v4025_v62 = vadd.f32 %v4024_v45, %v4023_v32  ;;  %v3982_v36 = vrot.slane %v3981_v29, 1  ;;  %v4841_v1 = vunpack.c.h.bf16 %v4900_v8 }
 0x352   :  { %v4068_v6 = vadd.f32 %v4067_v14, %v4059_v39  ;;  %v4105_v12 = vmul.f32 %v4840_v49, %v7512_v25 }
 0x353   :  { %v4111_v13 = vadd.f32 %v4110_v22, %v4102_v61  ;;  %v4026_v42 = vrot.slane %v4025_v62, 2  ;;  %v3983_v48 = vadd.f32 %v3982_v36, %v3981_v29  ;;  %v4106_v47 = vmul.f32 %v4841_v1, %v7526_v58 }
 0x354   :  { %v4069_v59 = vadd.f32 %v4068_v6, %v4060_v18 }
 0x355   :  { %v4112_v5 = vadd.f32 %v4111_v13, %v4103_v0  ;;  %v4027_v9 = vadd.f32 %v4026_v42, %v4025_v62 }
 0x356   :  { %v4070_v46 = vrot.slane %v4069_v59, 4 }
 0x357   :  { %v4113_v16 = vadd.f32 %v4112_v5, %v4104_v27  ;;  %v4028_v50 = vrot.slane %v4027_v9, 1 }
 0x358   :  { %v4071_v28 = vadd.f32 %v4070_v46, %v4069_v59 }
 0x359   :  { %v4114_v40 = vadd.f32 %v4113_v16, %v4105_v12  ;;  %v4029_v11 = vadd.f32 %v4028_v50, %v4027_v9 }
 0x35a   :  { %v4072_v52 = vrot.slane %v4071_v28, 2 }
 0x35b   :  { %v4115_v24 = vadd.f32 %v4114_v40, %v4106_v47  ;;  %v4135_v63 = vsel %vm4122_vm2, %v3983_v48, %v4029_v11 }
 0x35c   :  { %v4073_v17 = vadd.f32 %v4072_v52, %v4071_v28 }
 0x35d   :  { %v4116_v56 = vrot.slane %v4115_v24, 4 }
 0x35e   :  { %v4074_v34 = vrot.slane %v4073_v17, 1 }
 0x35f   :  { %v4117_v60 = vadd.f32 %v4116_v56, %v4115_v24 }
 0x360   :  { %v4075_v33 = vadd.f32 %v4074_v34, %v4073_v17 }
 0x361   :  { %v4118_v10 = vrot.slane %v4117_v60, 2 }
 0x362   :  { %v4136_v25 = vsel %vm4124_vm3, %v4135_v63, %v4075_v33 }
 0x363   :  { %v4119_v35 = vadd.f32 %v4118_v10, %v4117_v60 }
 0x365   :  { %v4120_v2 = vrot.slane %v4119_v35, 1 }
 0x367   :  { %v4121_v31 = vadd.f32 %v4120_v2, %v4119_v35 }
 0x369   :  { %v4137_v23 = vsel %vm4126_vm4, %v4136_v25, %v4121_v31 }
 0x36a   :  { %v4140_v58 = vsel %vm1911_vm0, %v4137_v23, 0.0 }
 0x36b   :  { %4141 = vadd.xlane.f32.xlu0 %v4140_v58 }
 0x3da   :  { %v4139_v53 = vpop.xlane.xlu0 %4138 }
 0x3db   :  { %v4145_v55 = vadd.f32 %v4143_v3, %v4139_v53 }
 0x3dd   :  { %4148 = vst.msk [vmem:[%s7866_s4] sm:$0xff] %vm4147_vm8, %v4145_v55 }
 0x3f8   :  { %v4142_v54 = vpop.xlane.xlu0 %4141 }
 0x3f9   :  { %v4146_v41 = vadd.f32 %v4144_v43, %v4142_v54 }
 0x3fb   :  { %4150 = vst.msk [vmem:[%s7866_s4 + $0x8] sm:$0xf] %vm4149_vm9, %v4146_v41 }

</bundles_post_ra>
